<compile_context>
chip_gen: v7x
topology: tpu7x:2x2x1
jax: 0.10.0
libtpu: 0.0.40
codegen_flags: <defaults>
</compile_context>

<pallas_src>
import jax
import jax.numpy as jnp
from jax import lax
from jax.experimental import pallas as pl
from jax.experimental.pallas import tpu as pltpu

# ----------------------------- small synthetic config -----------------------------
B = 2      # batch_size
NB = 8     # num_boxes
F = 32     # image_feature_size
E = 32     # embedding_size   (!= 300/600 -> nn.Embedding path)
H = 32     # hidden_size
A = 32     # attention_projection_size
Z = 16     # z_space
V = 64     # vocab size
PAD_INDEX = 0        # '@@UNKNOWN@@'
BOUNDARY_INDEX = 1   # '@@BOUNDARY@@'
CAP_LEN = 6          # caption length before boundary tokens
SUBLANE = 8
LANE = 128

G = 4 * H                                   # LSTM gate width (= 128, lane aligned)
assert G % LANE == 0, "toy config assumes 4*H is a multiple of 128"


def _round_up(x, m):
    return ((x + m - 1) // m) * m


AP = _round_up(A, LANE)        # attention projection padded to a full vreg
Z2P = _round_up(2 * Z, LANE)   # [q_mean | q_log_var] padded to a full vreg
VP = _round_up(V, LANE)        # vocab padded to a full vreg (lane-dense logits store)


def _pad_cols(w, width):
    return jnp.pad(w, ((0, 0), (0, width - w.shape[1])))


# ----------------------------- Pallas kernel (whole decode in one invocation) ------
def updown_decode_kernel(
    img_ref,        # (Bp, NB, F)          image features (batch-padded)
    g1base_ref,     # (T, Bp, G)           precomputed: emb@W1x + img_mean@W1v + b1
    boxproj_ref,    # (Bp, NB, AP)         precomputed: img@Wia (lane-padded, pad cols = 0)
    eps_ref,        # (T, Bp, Z)           reparameterization noise
    mask_ref,       # (Bp, T)              target mask (single VMEM tile)
    wh2c_ref,       # (H, 2G)              [w1h2 | w2h2]                 (consumers of h2_prev)
    wh1n_ref,       # (H, 2G+AP+Z2P)       [w2h1 | w1h1 | wha_p | wqh_p] (consumers of h1_new)
    wattc_ref,      # (F, G+Z2P)           [w2a | wqa_p]                 (consumers of attended)
    w2z_ref,        # (Z, G)
    wa_ref,         # (1, AP)
    b2_ref,         # (1, G)
    bq_ref,         # (1, Z2P)
    wout_ref,       # (H, VP)
    bout_ref,       # (1, VP)
    logits_ref,     # out (T*Bp, VP)       lane-dense logits slab
    kld_ref,        # out (Bp, Z)          masked per-z KLD summed over time
    h2all_ref,      # scratch (T*Bp, H)    language-LSTM hidden states for the hoisted vocab matmul
    qstats_ref,     # scratch (T*Bp, Z2P)  per-step [q_mean | q_log_var | 0...] for post-loop KLD
):
    Bp = img_ref.shape[0]
    T = g1base_ref.shape[0]

    # -------- loop-invariant loads / broadcasts hoisted out of the (unrolled) recurrence -------
    img = img_ref[...]                    # (Bp, NB, F)
    boxproj = boxproj_ref[...]            # (Bp, NB, AP)
    wa3 = wa_ref[...][None, :, :]         # (1, 1, AP)
    b2 = b2_ref[...]                      # (1, G)
    bq = bq_ref[...]                      # (1, Z2P)
    lane = lax.broadcasted_iota(jnp.int32, (Bp, G), 1)
    is_g_lane = jnp.logical_and(lane >= 2 * H, lane < 3 * H)   # tanh gate ('g') lanes

    def lstm_gates(gates, c_prev):
        # PyTorch nn.LSTMCell gate order: i, f, g, o.  Two full-vreg EUP pushes (sigmoid + tanh)
        # selected by a lane mask instead of four quarter-vreg transcendentals.
        act = jnp.where(is_g_lane, jnp.tanh(gates), jax.nn.sigmoid(gates))
        i = act[:, 0 * H:1 * H]
        f = act[:, 1 * H:2 * H]
        g = act[:, 2 * H:3 * H]
        o = act[:, 3 * H:4 * H]
        c_new = f * c_prev + i * g
        h_new = o * jnp.tanh(c_new)
        return h_new, c_new

    def step(t, carry):
        # h1_prev itself is not needed: its only consumer (w1h1) was computed at the previous
        # step and carried forward as g1_h1.
        c1, g1_h1, h2, c2 = carry

        # ---- attention LSTM: input = [token_emb, mean_img, h2_prev], hidden = (h1, c1) ----
        g_h2 = jnp.dot(h2, wh2c_ref[...], preferred_element_type=jnp.float32)    # (Bp, 2G)
        gates1 = g1base_ref[t] + g_h2[:, :G] + g1_h1
        h1n, c1n = lstm_gates(gates1, c1)

        # fused push of h1_new through ALL of its consumers: w2h1 | w1h1 | wha | wqh
        # (every slice below starts on a 128-lane boundary)
        r1 = jnp.dot(h1n, wh1n_ref[...], preferred_element_type=jnp.float32)     # (Bp, 2G+AP+Z2P)
        g2_h1 = r1[:, 0:G]
        g1_h1_next = r1[:, G:2 * G]                       # h1n @ w1h1, carried to next step
        att_h = r1[:, 2 * G:2 * G + AP]
        q_h = r1[:, 2 * G + AP:2 * G + AP + Z2P]

        # ---- bottom-up / top-down attention over boxes (box projection hoisted, pad lanes 0) ----
        proj = jnp.tanh(boxproj + att_h[:, None, :])                              # (Bp, NB, AP)
        scores = jnp.sum(proj * wa3, axis=-1)                                     # (Bp, NB)
        scores = scores - jnp.max(scores, axis=1, keepdims=True)
        e = jnp.exp(scores)
        alpha = e / jnp.sum(e, axis=1, keepdims=True)                             # exact softmax
        attended = jnp.sum(alpha[:, :, None] * img, axis=1)                       # (Bp, F)

        # fused push of the attended features through w2a | wqa
        r2 = jnp.dot(attended, wattc_ref[...], preferred_element_type=jnp.float32)  # (Bp, G+Z2P)
        g2_a = r2[:, 0:G]
        q_a = r2[:, G:G + Z2P]

        # ---- VAE posterior over z ----
        q_stats = q_h + q_a + bq                                                  # (Bp, Z2P)
        q_mean = q_stats[:, :Z]
        q_log_var = q_stats[:, Z:2 * Z]
        z = q_mean + jnp.exp(0.5 * q_log_var) * eps_ref[t]                        # (Bp, Z)

        # ---- language LSTM: input = [attended, h1_new, z], hidden = (h2, c2) ----
        gates2 = (g2_a + g2_h1 + g_h2[:, G:2 * G]
                  + jnp.dot(z, w2z_ref[...], preferred_element_type=jnp.float32)
                  + b2)
        h2n, c2n = lstm_gates(gates2, c2)

        # stash per-step state for the hoisted (post-loop) vocab projection and KLD
        row0 = pl.multiple_of(t * Bp, Bp)
        h2all_ref[pl.ds(row0, Bp), :] = h2n
        qstats_ref[pl.ds(row0, Bp), :] = q_stats

        return c1n, g1_h1_next, h2n, c2n

    zeros_h = jnp.zeros((Bp, H), jnp.float32)
    init = (zeros_h, jnp.zeros((Bp, G), jnp.float32), zeros_h, zeros_h)
    lax.fori_loop(0, T, step, init, unroll=(True if T <= 8 else 4))

    # ---- hoisted vocab projection: one big MXU matmul + one lane-dense bulk store ----
    h2all = h2all_ref[...]                                                        # (T*Bp, H)
    logits_ref[...] = (jnp.dot(h2all, wout_ref[...], preferred_element_type=jnp.float32)
                       + bout_ref[...])

    # ---- masked KLD (sentiment_vae == 0 path), computed off the recurrence critical path ----
    q = qstats_ref[...]                                                           # (T*Bp, Z2P)
    qm = q[:, :Z]
    qlv = q[:, Z:2 * Z]
    kterms = -0.5 * (1.0 + qlv - qm * qm - jnp.exp(qlv))                          # (T*Bp, Z)
    kacc = jnp.zeros((Bp, Z), jnp.float32)
    for tt in range(T):                       # static, post-loop; tiny
        kacc = kacc + mask_ref[:, tt:tt + 1] * kterms[tt * Bp:(tt + 1) * Bp, :]
    kld_ref[...] = kacc


# ----------------------------- pallas_call wrapper ----------------------------------
def run_updown_decoder(img_p, g1_base, boxproj, eps_p, mask_bt, packed_weights):
    T, Bp, _ = g1_base.shape
    inputs = [img_p, g1_base, boxproj, eps_p, mask_bt] + list(packed_weights)

    def vspec():
        return pl.BlockSpec(memory_space=pltpu.MemorySpace.VMEM)

    logits_flat, kld_bz = pl.pallas_call(
        updown_decode_kernel,
        out_shape=(
            jax.ShapeDtypeStruct((T * Bp, VP), jnp.float32),
            jax.ShapeDtypeStruct((Bp, Z), jnp.float32),
        ),
        in_specs=[vspec() for _ in inputs],
        out_specs=(vspec(), vspec()),
        scratch_shapes=[
            pltpu.VMEM((T * Bp, H), jnp.float32),
            pltpu.VMEM((T * Bp, Z2P), jnp.float32),
        ],
    )(*inputs)
    return logits_flat, kld_bz


def updown_captioner_forward(image_features, caption_tokens, params, eps_seq):
    """Training (teacher forcing) forward: returns {'loss', 'kld'} like the PyTorch module."""
    Bsz = image_features.shape[0]
    inp_tokens = caption_tokens[:, :-1]                         # (B, T)
    targets = caption_tokens[:, 1:]                             # (B, T)
    T = inp_tokens.shape[1]
    mask = (targets != PAD_INDEX).astype(jnp.float32)           # tokens_mask[:, 1:]

    # ---- batch padding to a full sublane (padded rows masked out below) ----
    Bp = _round_up(Bsz, SUBLANE)
    padb = Bp - Bsz
    img_p = jnp.pad(image_features.astype(jnp.float32), ((0, padb), (0, 0), (0, 0)))
    emb = params["embedding"][inp_tokens].astype(jnp.float32)   # (B, T, E) embedding lookup (glue)
    emb_p = jnp.pad(emb, ((0, padb), (0, 0), (0, 0)))
    emb_tbe = jnp.transpose(emb_p, (1, 0, 2))                   # (T, Bp, E)
    eps_p = jnp.pad(eps_seq.astype(jnp.float32), ((0, 0), (0, padb), (0, 0)))   # (T, Bp, Z)
    mask_bt = jnp.pad(mask, ((0, padb), (0, 0)))                                # (Bp, T)

    # ---- hoisted time-invariant work (once per forward, outside the recurrence) ----
    img_mean = jnp.mean(img_p, axis=1)                                           # (Bp, F)
    g1_const = img_mean @ params["w1v"] + params["b1"]                           # (Bp, G)
    g1_base = jnp.einsum("tbe,eg->tbg", emb_tbe, params["w1x"]) + g1_const[None]  # (T, Bp, G)
    wia_p = _pad_cols(params["wia"], AP)
    boxproj = jnp.einsum("bnf,fa->bna", img_p, wia_p)                            # (Bp, NB, AP)

    # ---- weight fusion with 128-lane-aligned column blocks (pad columns are zero) ----
    wha_p = _pad_cols(params["wha"], AP)
    wqh_p = _pad_cols(params["wqh"], Z2P)
    wqa_p = _pad_cols(params["wqa"], Z2P)
    bq_p = _pad_cols(params["bq"], Z2P)
    wa_p = _pad_cols(params["wa"], AP)
    wout_p = _pad_cols(params["wout"], VP)
    bout_p = _pad_cols(params["bout"], VP)

    packed = [
        jnp.concatenate([params["w1h2"], params["w2h2"]], axis=1),                    # (H, 2G)
        jnp.concatenate([params["w2h1"], params["w1h1"], wha_p, wqh_p], axis=1),      # (H, 2G+AP+Z2P)
        jnp.concatenate([params["w2a"], wqa_p], axis=1),                              # (F, G+Z2P)
        params["w2z"],                                                                # (Z, G)
        wa_p,                                                                         # (1, AP)
        params["b2"],                                                                 # (1, G)
        bq_p,                                                                         # (1, Z2P)
        wout_p,                                                                       # (H, VP)
        bout_p,                                                                       # (1, VP)
    ]

    logits_flat, kld_bz = run_updown_decoder(img_p, g1_base, boxproj, eps_p, mask_bt, packed)

    logits = jnp.transpose(logits_flat.reshape(T, Bp, VP)[:, :Bsz, :V], (1, 0, 2))   # (B, T, V)
    kld = jnp.sum(kld_bz[:Bsz], axis=-1)                                             # (B,)

    # sequence_cross_entropy_with_logits(..., average=None) * target_lengths
    logp = jax.nn.log_softmax(logits, axis=-1)
    nll = -jnp.take_along_axis(logp, targets[..., None], axis=-1)[..., 0]
    nll = nll * mask
    target_lengths = jnp.sum(mask, axis=-1)
    per_batch_loss = jnp.sum(nll, axis=1) / (target_lengths + 1e-13)
    loss = target_lengths * per_batch_loss
    return {"loss": loss, "kld": kld}


# ----------------------------- pure-JAX reference (same math, unpacked weights) -----
def _lstm_ref(gates, c_prev):
    i = jax.nn.sigmoid(gates[:, 0 * H:1 * H])
    f = jax.nn.sigmoid(gates[:, 1 * H:2 * H])
    g = jnp.tanh(gates[:, 2 * H:3 * H])
    o = jax.nn.sigmoid(gates[:, 3 * H:4 * H])
    c = f * c_prev + i * g
    return o * jnp.tanh(c), c


def reference_forward(image_features, caption_tokens, params, eps_seq):
    with jax.default_matmul_precision("highest"):
        Bsz = image_features.shape[0]
        inp = caption_tokens[:, :-1]
        tgt = caption_tokens[:, 1:]
        T = inp.shape[1]
        mask = (tgt != PAD_INDEX).astype(jnp.float32)
        img = image_features.astype(jnp.float32)
        img_mean = jnp.mean(img, axis=1)
        h1 = c1 = h2 = c2 = jnp.zeros((Bsz, H), jnp.float32)
        logits_steps, kld_steps = [], []
        for t in range(T):
            emb = params["embedding"][inp[:, t]]
            gates1 = (emb @ params["w1x"] + img_mean @ params["w1v"]
                      + h2 @ params["w1h2"] + h1 @ params["w1h1"] + params["b1"])
            h1, c1 = _lstm_ref(gates1, c1)
            proj = jnp.tanh(jnp.einsum("bnf,fa->bna", img, params["wia"])
                            + (h1 @ params["wha"])[:, None, :])
            scores = jnp.sum(proj * params["wa"][None], axis=-1)
            alpha = jax.nn.softmax(scores, axis=1)
            attended = jnp.sum(alpha[:, :, None] * img, axis=1)
            qstats = h1 @ params["wqh"] + attended @ params["wqa"] + params["bq"]
            qm, qlv = qstats[:, :Z], qstats[:, Z:]
            zlat = qm + jnp.exp(0.5 * qlv) * eps_seq[t]
            gates2 = (attended @ params["w2a"] + h1 @ params["w2h1"] + h2 @ params["w2h2"]
                      + zlat @ params["w2z"] + params["b2"])
            h2, c2 = _lstm_ref(gates2, c2)
            logits_steps.append(h2 @ params["wout"] + params["bout"])
            kld_steps.append(-0.5 * jnp.sum(1.0 + qlv - qm * qm - jnp.exp(qlv), axis=1))
        logits = jnp.stack(logits_steps, axis=1)                    # (B, T, V)
        klds = jnp.stack(kld_steps, axis=1) * mask
        kld = jnp.sum(klds, axis=1)
        logp = jax.nn.log_softmax(logits, axis=-1)
        nll = -jnp.take_along_axis(logp, tgt[..., None], axis=-1)[..., 0] * mask
        tl = jnp.sum(mask, axis=-1)
        loss = tl * (jnp.sum(nll, axis=1) / (tl + 1e-13))
        return {"loss": loss, "kld": kld}


# ----------------------------- deterministic parameter init -------------------------
def init_params(key):
    ks = jax.random.split(key, 20)
    s = 0.1

    def w(k, shape):
        return jax.random.normal(k, shape, jnp.float32) * s

    embedding = w(ks[0], (V, E))
    embedding = embedding.at[PAD_INDEX].set(0.0)   # padding_idx row zeroed

    return {
        "embedding": embedding,
        # attention LSTM (gate order i, f, g, o as in nn.LSTMCell)
        "w1x": w(ks[1], (E, G)),
        "w1v": w(ks[2], (F, G)),
        "w1h2": w(ks[3], (H, G)),
        "w1h1": w(ks[4], (H, G)),
        "b1": jnp.zeros((1, G), jnp.float32),
        # bottom-up / top-down attention
        "wia": w(ks[5], (F, A)),
        "wha": w(ks[6], (H, A)),
        "wa": w(ks[7], (1, A)),
        # VAE posterior
        "wqh": w(ks[8], (H, 2 * Z)),
        "wqa": w(ks[9], (F, 2 * Z)),
        "bq": jnp.zeros((1, 2 * Z), jnp.float32),
        # language LSTM
        "w2a": w(ks[10], (F, G)),
        "w2h1": w(ks[11], (H, G)),
        "w2z": w(ks[12], (Z, G)),
        "w2h2": w(ks[13], (H, G)),
        "b2": jnp.zeros((1, G), jnp.float32),
        # output layer
        "wout": w(ks[14], (H, V)),
        "bout": jnp.zeros((1, V), jnp.float32),
    }


if __name__ == "__main__":
    key = jax.random.PRNGKey(0)
    k_img, k_tok, k_eps, k_par = jax.random.split(key, 4)

    params = init_params(k_par)

    image_features = jax.random.normal(k_img, (B, NB, F), jnp.float32)

    # caption tokens with boundary tokens added (add_sentence_boundary_token_ids)
    body = jax.random.randint(k_tok, (B, CAP_LEN), 2, V, dtype=jnp.int32)
    boundary = jnp.full((B, 1), BOUNDARY_INDEX, jnp.int32)
    caption_tokens = jnp.concatenate([boundary, body, boundary], axis=1)   # (B, CAP_LEN+2)
    T = caption_tokens.shape[1] - 1                                        # num_decoding_steps

    eps_seq = jax.random.normal(k_eps, (T, B, Z), jnp.float32)

    fwd = jax.jit(updown_captioner_forward)
    out = jax.block_until_ready(fwd(image_features, caption_tokens, params, eps_seq))

    assert out["loss"].shape == (B,)
    assert out["kld"].shape == (B,)
    assert bool(jnp.all(jnp.isfinite(out["loss"]))) and bool(jnp.all(jnp.isfinite(out["kld"])))

    # numeric parity against the pure-JAX reference (padded rows / padded weight columns are inert)
    ref = reference_forward(image_features, caption_tokens, params, eps_seq)
    assert bool(jnp.allclose(out["loss"], ref["loss"], rtol=5e-2, atol=5e-2)), (out["loss"], ref["loss"])
    assert bool(jnp.allclose(out["kld"], ref["kld"], rtol=5e-2, atol=5e-2)), (out["kld"], ref["kld"])

    print("KERNEL_OK")
</pallas_src>

<mosaic_0001>
module attributes {stable_mosaic.version = 11 : i64} {
  func.func @updown_decode_kernel(%arg0: memref<8x8x32xf32, #tpu.memory_space<vmem>>, %arg1: memref<7x8x128xf32, #tpu.memory_space<vmem>>, %arg2: memref<8x8x128xf32, #tpu.memory_space<vmem>>, %arg3: memref<7x8x16xf32, #tpu.memory_space<vmem>>, %arg4: memref<8x7xf32, #tpu.memory_space<vmem>>, %arg5: memref<32x256xf32, #tpu.memory_space<vmem>>, %arg6: memref<32x512xf32, #tpu.memory_space<vmem>>, %arg7: memref<32x256xf32, #tpu.memory_space<vmem>>, %arg8: memref<16x128xf32, #tpu.memory_space<vmem>>, %arg9: memref<1x128xf32, #tpu.memory_space<vmem>>, %arg10: memref<1x128xf32, #tpu.memory_space<vmem>>, %arg11: memref<1x128xf32, #tpu.memory_space<vmem>>, %arg12: memref<32x128xf32, #tpu.memory_space<vmem>>, %arg13: memref<1x128xf32, #tpu.memory_space<vmem>>, %arg14: memref<56x128xf32, #tpu.memory_space<vmem>>, %arg15: memref<8x16xf32, #tpu.memory_space<vmem>>, %arg16: memref<56x32xf32, #tpu.memory_space<vmem>>, %arg17: memref<56x128xf32, #tpu.memory_space<vmem>>) attributes {dimension_semantics = [], scalar_prefetch = 0 : i64, scratch_operands = 2 : i64, tpu.core_type = #tpu.core_type<tc>} {
    %c0 = arith.constant 0 : index
    %c0_0 = arith.constant 0 : index
    %c0_1 = arith.constant 0 : index
    %0 = vector.load %arg0[%c0, %c0_0, %c0_1] : memref<8x8x32xf32, #tpu.memory_space<vmem>>, vector<8x8x32xf32>
    %c0_2 = arith.constant 0 : index
    %c0_3 = arith.constant 0 : index
    %c0_4 = arith.constant 0 : index
    %1 = vector.load %arg2[%c0_2, %c0_3, %c0_4] : memref<8x8x128xf32, #tpu.memory_space<vmem>>, vector<8x8x128xf32>
    %c0_5 = arith.constant 0 : index
    %c0_6 = arith.constant 0 : index
    %2 = vector.load %arg9[%c0_5, %c0_6] : memref<1x128xf32, #tpu.memory_space<vmem>>, vector<1x128xf32>
    %3 = vector.shape_cast %2 : vector<1x128xf32> to vector<1x1x128xf32>
    %c0_7 = arith.constant 0 : index
    %c0_8 = arith.constant 0 : index
    %4 = vector.load %arg10[%c0_7, %c0_8] : memref<1x128xf32, #tpu.memory_space<vmem>>, vector<1x128xf32>
    %c0_9 = arith.constant 0 : index
    %c0_10 = arith.constant 0 : index
    %5 = vector.load %arg11[%c0_9, %c0_10] : memref<1x128xf32, #tpu.memory_space<vmem>>, vector<1x128xf32>
    %6 = tpu.iota {dimensions = array<i32: 1>} : vector<8x128xi32>
    %c64_i32 = arith.constant 64 : i32
    %7 = vector.broadcast %c64_i32 : i32 to vector<8x128xi32>
    %8 = arith.cmpi sge, %6, %7 : vector<8x128xi32>
    %c96_i32 = arith.constant 96 : i32
    %9 = vector.broadcast %c96_i32 : i32 to vector<8x128xi32>
    %10 = arith.cmpi slt, %6, %9 : vector<8x128xi32>
    %11 = arith.andi %8, %10 : vector<8x128xi1>
    %cst = arith.constant 0.000000e+00 : f32
    %12 = vector.broadcast %cst : f32 to vector<8x32xf32>
    %cst_11 = arith.constant 0.000000e+00 : f32
    %13 = vector.broadcast %cst_11 : f32 to vector<8x128xf32>
    %c0_i32 = arith.constant 0 : i32
    %c0_12 = arith.constant 0 : index
    %c0_13 = arith.constant 0 : index
    %14 = vector.load %arg5[%c0_12, %c0_13] : memref<32x256xf32, #tpu.memory_space<vmem>>, vector<32x256xf32>
    %cst_14 = arith.constant dense<0.000000e+00> : vector<8x256xf32>
    %15 = tpu.matmul %12, %14, %cst_14 {dimension_numbers = #tpu.dot_dimension_numbers<[1], [0], [0], [1], [0, 0, 1, 1], [], []>} : vector<8x32xf32>, vector<32x256xf32>, vector<8x256xf32> -> vector<8x256xf32>
    %16 = arith.index_cast %c0_i32 : i32 to index
    %c0_15 = arith.constant 0 : index
    %c0_16 = arith.constant 0 : index
    %17 = vector.load %arg1[%16, %c0_15, %c0_16] : memref<7x8x128xf32, #tpu.memory_space<vmem>>, vector<1x8x128xf32>
    %18 = vector.shape_cast %17 : vector<1x8x128xf32> to vector<8x128xf32>
    %19 = vector.extract_strided_slice %15 {offsets = [0, 0], sizes = [8, 128], strides = [1, 1]} : vector<8x256xf32> to vector<8x128xf32>
    %20 = arith.addf %18, %19 : vector<8x128xf32>
    %21 = arith.addf %20, %13 : vector<8x128xf32>
    %22 = math.tanh %21 : vector<8x128xf32>
    %23 = arith.negf %21 : vector<8x128xf32>
    %24 = math.exp %23 : vector<8x128xf32>
    %cst_17 = arith.constant 1.000000e+00 : f32
    %25 = vector.broadcast %cst_17 : f32 to vector<8x128xf32>
    %26 = arith.addf %25, %24 : vector<8x128xf32>
    %27 = arith.divf %25, %26 : vector<8x128xf32>
    %28 = arith.select %11, %22, %27 : vector<8x128xi1>, vector<8x128xf32>
    %29 = vector.extract_strided_slice %28 {offsets = [0, 0], sizes = [8, 32], strides = [1, 1]} : vector<8x128xf32> to vector<8x32xf32>
    %30 = vector.extract_strided_slice %28 {offsets = [0, 32], sizes = [8, 32], strides = [1, 1]} : vector<8x128xf32> to vector<8x32xf32>
    %31 = vector.extract_strided_slice %28 {offsets = [0, 64], sizes = [8, 32], strides = [1, 1]} : vector<8x128xf32> to vector<8x32xf32>
    %32 = vector.extract_strided_slice %28 {offsets = [0, 96], sizes = [8, 32], strides = [1, 1]} : vector<8x128xf32> to vector<8x32xf32>
    %33 = arith.mulf %30, %12 : vector<8x32xf32>
    %34 = arith.mulf %29, %31 : vector<8x32xf32>
    %35 = arith.addf %33, %34 : vector<8x32xf32>
    %36 = math.tanh %35 : vector<8x32xf32>
    %37 = arith.mulf %32, %36 : vector<8x32xf32>
    %c0_18 = arith.constant 0 : index
    %c0_19 = arith.constant 0 : index
    %38 = vector.load %arg6[%c0_18, %c0_19] : memref<32x512xf32, #tpu.memory_space<vmem>>, vector<32x512xf32>
    %cst_20 = arith.constant dense<0.000000e+00> : vector<8x512xf32>
    %39 = tpu.matmul %37, %38, %cst_20 {dimension_numbers = #tpu.dot_dimension_numbers<[1], [0], [0], [1], [0, 0, 1, 1], [], []>} : vector<8x32xf32>, vector<32x512xf32>, vector<8x512xf32> -> vector<8x512xf32>
    %40 = vector.extract_strided_slice %39 {offsets = [0, 0], sizes = [8, 128], strides = [1, 1]} : vector<8x512xf32> to vector<8x128xf32>
    %41 = vector.extract_strided_slice %39 {offsets = [0, 128], sizes = [8, 128], strides = [1, 1]} : vector<8x512xf32> to vector<8x128xf32>
    %42 = vector.extract_strided_slice %39 {offsets = [0, 256], sizes = [8, 128], strides = [1, 1]} : vector<8x512xf32> to vector<8x128xf32>
    %43 = vector.extract_strided_slice %39 {offsets = [0, 384], sizes = [8, 128], strides = [1, 1]} : vector<8x512xf32> to vector<8x128xf32>
    %44 = vector.shape_cast %42 : vector<8x128xf32> to vector<8x1x128xf32>
    %45 = vector.broadcast %44 : vector<8x1x128xf32> to vector<8x8x128xf32>
    %46 = arith.addf %1, %45 : vector<8x8x128xf32>
    %47 = math.tanh %46 : vector<8x8x128xf32>
    %48 = vector.broadcast %3 : vector<1x1x128xf32> to vector<8x8x128xf32>
    %49 = arith.mulf %47, %48 : vector<8x8x128xf32>
    %cst_21 = arith.constant dense<0.000000e+00> : vector<8x8xf32>
    %50 = vector.multi_reduction <add>, %49, %cst_21 [2] : vector<8x8x128xf32> to vector<8x8xf32>
    %cst_22 = arith.constant dense<0xFF800000> : vector<8xf32>
    %51 = vector.multi_reduction <maximumf>, %50, %cst_22 [1] : vector<8x8xf32> to vector<8xf32>
    %52 = vector.shape_cast %51 : vector<8xf32> to vector<8x1xf32>
    %53 = vector.broadcast %52 : vector<8x1xf32> to vector<8x8xf32>
    %54 = arith.subf %50, %53 : vector<8x8xf32>
    %55 = math.exp %54 : vector<8x8xf32>
    %cst_23 = arith.constant dense<0.000000e+00> : vector<8xf32>
    %56 = vector.multi_reduction <add>, %55, %cst_23 [1] : vector<8x8xf32> to vector<8xf32>
    %57 = vector.shape_cast %56 : vector<8xf32> to vector<8x1xf32>
    %58 = vector.broadcast %57 : vector<8x1xf32> to vector<8x8xf32>
    %59 = arith.divf %55, %58 : vector<8x8xf32>
    %60 = vector.shape_cast %59 : vector<8x8xf32> to vector<8x8x1xf32>
    %61 = vector.broadcast %60 : vector<8x8x1xf32> to vector<8x8x32xf32>
    %62 = arith.mulf %61, %0 : vector<8x8x32xf32>
    %cst_24 = arith.constant dense<0.000000e+00> : vector<8x32xf32>
    %63 = vector.multi_reduction <add>, %62, %cst_24 [1] : vector<8x8x32xf32> to vector<8x32xf32>
    %c0_25 = arith.constant 0 : index
    %c0_26 = arith.constant 0 : index
    %64 = vector.load %arg7[%c0_25, %c0_26] : memref<32x256xf32, #tpu.memory_space<vmem>>, vector<32x256xf32>
    %cst_27 = arith.constant dense<0.000000e+00> : vector<8x256xf32>
    %65 = tpu.matmul %63, %64, %cst_27 {dimension_numbers = #tpu.dot_dimension_numbers<[1], [0], [0], [1], [0, 0, 1, 1], [], []>} : vector<8x32xf32>, vector<32x256xf32>, vector<8x256xf32> -> vector<8x256xf32>
    %66 = vector.extract_strided_slice %65 {offsets = [0, 0], sizes = [8, 128], strides = [1, 1]} : vector<8x256xf32> to vector<8x128xf32>
    %67 = vector.extract_strided_slice %65 {offsets = [0, 128], sizes = [8, 128], strides = [1, 1]} : vector<8x256xf32> to vector<8x128xf32>
    %68 = arith.addf %43, %67 : vector<8x128xf32>
    %69 = vector.broadcast %5 : vector<1x128xf32> to vector<8x128xf32>
    %70 = arith.addf %68, %69 : vector<8x128xf32>
    %71 = vector.extract_strided_slice %70 {offsets = [0, 0], sizes = [8, 16], strides = [1, 1]} : vector<8x128xf32> to vector<8x16xf32>
    %72 = vector.extract_strided_slice %70 {offsets = [0, 16], sizes = [8, 16], strides = [1, 1]} : vector<8x128xf32> to vector<8x16xf32>
    %cst_28 = arith.constant 5.000000e-01 : f32
    %73 = vector.broadcast %cst_28 : f32 to vector<8x16xf32>
    %74 = arith.mulf %73, %72 : vector<8x16xf32>
    %75 = math.exp %74 : vector<8x16xf32>
    %76 = arith.index_cast %c0_i32 : i32 to index
    %c0_29 = arith.constant 0 : index
    %c0_30 = arith.constant 0 : index
    %77 = vector.load %arg3[%76, %c0_29, %c0_30] : memref<7x8x16xf32, #tpu.memory_space<vmem>>, vector<1x8x16xf32>
    %78 = vector.shape_cast %77 : vector<1x8x16xf32> to vector<8x16xf32>
    %79 = arith.mulf %75, %78 : vector<8x16xf32>
    %80 = arith.addf %71, %79 : vector<8x16xf32>
    %81 = arith.addf %66, %40 : vector<8x128xf32>
    %82 = vector.extract_strided_slice %15 {offsets = [0, 128], sizes = [8, 128], strides = [1, 1]} : vector<8x256xf32> to vector<8x128xf32>
    %83 = arith.addf %81, %82 : vector<8x128xf32>
    %c0_31 = arith.constant 0 : index
    %c0_32 = arith.constant 0 : index
    %84 = vector.load %arg8[%c0_31, %c0_32] : memref<16x128xf32, #tpu.memory_space<vmem>>, vector<16x128xf32>
    %cst_33 = arith.constant dense<0.000000e+00> : vector<8x128xf32>
    %85 = tpu.matmul %80, %84, %cst_33 {dimension_numbers = #tpu.dot_dimension_numbers<[1], [0], [0], [1], [0, 0, 1, 1], [], []>} : vector<8x16xf32>, vector<16x128xf32>, vector<8x128xf32> -> vector<8x128xf32>
    %86 = arith.addf %83, %85 : vector<8x128xf32>
    %87 = vector.broadcast %4 : vector<1x128xf32> to vector<8x128xf32>
    %88 = arith.addf %86, %87 : vector<8x128xf32>
    %89 = math.tanh %88 : vector<8x128xf32>
    %90 = arith.negf %88 : vector<8x128xf32>
    %91 = math.exp %90 : vector<8x128xf32>
    %cst_34 = arith.constant 1.000000e+00 : f32
    %92 = vector.broadcast %cst_34 : f32 to vector<8x128xf32>
    %93 = arith.addf %92, %91 : vector<8x128xf32>
    %94 = arith.divf %92, %93 : vector<8x128xf32>
    %95 = arith.select %11, %89, %94 : vector<8x128xi1>, vector<8x128xf32>
    %96 = vector.extract_strided_slice %95 {offsets = [0, 0], sizes = [8, 32], strides = [1, 1]} : vector<8x128xf32> to vector<8x32xf32>
    %97 = vector.extract_strided_slice %95 {offsets = [0, 32], sizes = [8, 32], strides = [1, 1]} : vector<8x128xf32> to vector<8x32xf32>
    %98 = vector.extract_strided_slice %95 {offsets = [0, 64], sizes = [8, 32], strides = [1, 1]} : vector<8x128xf32> to vector<8x32xf32>
    %99 = vector.extract_strided_slice %95 {offsets = [0, 96], sizes = [8, 32], strides = [1, 1]} : vector<8x128xf32> to vector<8x32xf32>
    %100 = arith.mulf %97, %12 : vector<8x32xf32>
    %101 = arith.mulf %96, %98 : vector<8x32xf32>
    %102 = arith.addf %100, %101 : vector<8x32xf32>
    %103 = math.tanh %102 : vector<8x32xf32>
    %104 = arith.mulf %99, %103 : vector<8x32xf32>
    %c8_i32 = arith.constant 8 : i32
    %105 = arith.muli %c0_i32, %c8_i32 : i32
    %106 = tpu.assume_multiple %105, 8 : i32
    %107 = arith.index_cast %106 : i32 to index
    %c0_35 = arith.constant 0 : index
    %108 = vector.load %arg16[%107, %c0_35] : memref<56x32xf32, #tpu.memory_space<vmem>>, vector<8x32xf32>
    tpu.vector_store %arg16[%107, %c0_35], %104 {strides = array<i32>} : memref<56x32xf32, #tpu.memory_space<vmem>>, vector<8x32xf32>,
    %109 = arith.index_cast %106 : i32 to index
    %c0_36 = arith.constant 0 : index
    %110 = vector.load %arg17[%109, %c0_36] : memref<56x128xf32, #tpu.memory_space<vmem>>, vector<8x128xf32>
    tpu.vector_store %arg17[%109, %c0_36], %70 {strides = array<i32>} : memref<56x128xf32, #tpu.memory_space<vmem>>, vector<8x128xf32>,
    %c1_i32 = arith.constant 1 : i32
    %c0_37 = arith.constant 0 : index
    %c0_38 = arith.constant 0 : index
    %111 = vector.load %arg5[%c0_37, %c0_38] : memref<32x256xf32, #tpu.memory_space<vmem>>, vector<32x256xf32>
    %cst_39 = arith.constant dense<0.000000e+00> : vector<8x256xf32>
    %112 = tpu.matmul %104, %111, %cst_39 {dimension_numbers = #tpu.dot_dimension_numbers<[1], [0], [0], [1], [0, 0, 1, 1], [], []>} : vector<8x32xf32>, vector<32x256xf32>, vector<8x256xf32> -> vector<8x256xf32>
    %113 = arith.index_cast %c1_i32 : i32 to index
    %c0_40 = arith.constant 0 : index
    %c0_41 = arith.constant 0 : index
    %114 = vector.load %arg1[%113, %c0_40, %c0_41] : memref<7x8x128xf32, #tpu.memory_space<vmem>>, vector<1x8x128xf32>
    %115 = vector.shape_cast %114 : vector<1x8x128xf32> to vector<8x128xf32>
    %116 = vector.extract_strided_slice %112 {offsets = [0, 0], sizes = [8, 128], strides = [1, 1]} : vector<8x256xf32> to vector<8x128xf32>
    %117 = arith.addf %115, %116 : vector<8x128xf32>
    %118 = arith.addf %117, %41 : vector<8x128xf32>
    %119 = math.tanh %118 : vector<8x128xf32>
    %120 = arith.negf %118 : vector<8x128xf32>
    %121 = math.exp %120 : vector<8x128xf32>
    %cst_42 = arith.constant 1.000000e+00 : f32
    %122 = vector.broadcast %cst_42 : f32 to vector<8x128xf32>
    %123 = arith.addf %122, %121 : vector<8x128xf32>
    %124 = arith.divf %122, %123 : vector<8x128xf32>
    %125 = arith.select %11, %119, %124 : vector<8x128xi1>, vector<8x128xf32>
    %126 = vector.extract_strided_slice %125 {offsets = [0, 0], sizes = [8, 32], strides = [1, 1]} : vector<8x128xf32> to vector<8x32xf32>
    %127 = vector.extract_strided_slice %125 {offsets = [0, 32], sizes = [8, 32], strides = [1, 1]} : vector<8x128xf32> to vector<8x32xf32>
    %128 = vector.extract_strided_slice %125 {offsets = [0, 64], sizes = [8, 32], strides = [1, 1]} : vector<8x128xf32> to vector<8x32xf32>
    %129 = vector.extract_strided_slice %125 {offsets = [0, 96], sizes = [8, 32], strides = [1, 1]} : vector<8x128xf32> to vector<8x32xf32>
    %130 = arith.mulf %127, %35 : vector<8x32xf32>
    %131 = arith.mulf %126, %128 : vector<8x32xf32>
    %132 = arith.addf %130, %131 : vector<8x32xf32>
    %133 = math.tanh %132 : vector<8x32xf32>
    %134 = arith.mulf %129, %133 : vector<8x32xf32>
    %c0_43 = arith.constant 0 : index
    %c0_44 = arith.constant 0 : index
    %135 = vector.load %arg6[%c0_43, %c0_44] : memref<32x512xf32, #tpu.memory_space<vmem>>, vector<32x512xf32>
    %cst_45 = arith.constant dense<0.000000e+00> : vector<8x512xf32>
    %136 = tpu.matmul %134, %135, %cst_45 {dimension_numbers = #tpu.dot_dimension_numbers<[1], [0], [0], [1], [0, 0, 1, 1], [], []>} : vector<8x32xf32>, vector<32x512xf32>, vector<8x512xf32> -> vector<8x512xf32>
    %137 = vector.extract_strided_slice %136 {offsets = [0, 0], sizes = [8, 128], strides = [1, 1]} : vector<8x512xf32> to vector<8x128xf32>
    %138 = vector.extract_strided_slice %136 {offsets = [0, 128], sizes = [8, 128], strides = [1, 1]} : vector<8x512xf32> to vector<8x128xf32>
    %139 = vector.extract_strided_slice %136 {offsets = [0, 256], sizes = [8, 128], strides = [1, 1]} : vector<8x512xf32> to vector<8x128xf32>
    %140 = vector.extract_strided_slice %136 {offsets = [0, 384], sizes = [8, 128], strides = [1, 1]} : vector<8x512xf32> to vector<8x128xf32>
    %141 = vector.shape_cast %139 : vector<8x128xf32> to vector<8x1x128xf32>
    %142 = vector.broadcast %141 : vector<8x1x128xf32> to vector<8x8x128xf32>
    %143 = arith.addf %1, %142 : vector<8x8x128xf32>
    %144 = math.tanh %143 : vector<8x8x128xf32>
    %145 = vector.broadcast %3 : vector<1x1x128xf32> to vector<8x8x128xf32>
    %146 = arith.mulf %144, %145 : vector<8x8x128xf32>
    %cst_46 = arith.constant dense<0.000000e+00> : vector<8x8xf32>
    %147 = vector.multi_reduction <add>, %146, %cst_46 [2] : vector<8x8x128xf32> to vector<8x8xf32>
    %cst_47 = arith.constant dense<0xFF800000> : vector<8xf32>
    %148 = vector.multi_reduction <maximumf>, %147, %cst_47 [1] : vector<8x8xf32> to vector<8xf32>
    %149 = vector.shape_cast %148 : vector<8xf32> to vector<8x1xf32>
    %150 = vector.broadcast %149 : vector<8x1xf32> to vector<8x8xf32>
    %151 = arith.subf %147, %150 : vector<8x8xf32>
    %152 = math.exp %151 : vector<8x8xf32>
    %cst_48 = arith.constant dense<0.000000e+00> : vector<8xf32>
    %153 = vector.multi_reduction <add>, %152, %cst_48 [1] : vector<8x8xf32> to vector<8xf32>
    %154 = vector.shape_cast %153 : vector<8xf32> to vector<8x1xf32>
    %155 = vector.broadcast %154 : vector<8x1xf32> to vector<8x8xf32>
    %156 = arith.divf %152, %155 : vector<8x8xf32>
    %157 = vector.shape_cast %156 : vector<8x8xf32> to vector<8x8x1xf32>
    %158 = vector.broadcast %157 : vector<8x8x1xf32> to vector<8x8x32xf32>
    %159 = arith.mulf %158, %0 : vector<8x8x32xf32>
    %cst_49 = arith.constant dense<0.000000e+00> : vector<8x32xf32>
    %160 = vector.multi_reduction <add>, %159, %cst_49 [1] : vector<8x8x32xf32> to vector<8x32xf32>
    %c0_50 = arith.constant 0 : index
    %c0_51 = arith.constant 0 : index
    %161 = vector.load %arg7[%c0_50, %c0_51] : memref<32x256xf32, #tpu.memory_space<vmem>>, vector<32x256xf32>
    %cst_52 = arith.constant dense<0.000000e+00> : vector<8x256xf32>
    %162 = tpu.matmul %160, %161, %cst_52 {dimension_numbers = #tpu.dot_dimension_numbers<[1], [0], [0], [1], [0, 0, 1, 1], [], []>} : vector<8x32xf32>, vector<32x256xf32>, vector<8x256xf32> -> vector<8x256xf32>
    %163 = vector.extract_strided_slice %162 {offsets = [0, 0], sizes = [8, 128], strides = [1, 1]} : vector<8x256xf32> to vector<8x128xf32>
    %164 = vector.extract_strided_slice %162 {offsets = [0, 128], sizes = [8, 128], strides = [1, 1]} : vector<8x256xf32> to vector<8x128xf32>
    %165 = arith.addf %140, %164 : vector<8x128xf32>
    %166 = vector.broadcast %5 : vector<1x128xf32> to vector<8x128xf32>
    %167 = arith.addf %165, %166 : vector<8x128xf32>
    %168 = vector.extract_strided_slice %167 {offsets = [0, 0], sizes = [8, 16], strides = [1, 1]} : vector<8x128xf32> to vector<8x16xf32>
    %169 = vector.extract_strided_slice %167 {offsets = [0, 16], sizes = [8, 16], strides = [1, 1]} : vector<8x128xf32> to vector<8x16xf32>
    %cst_53 = arith.constant 5.000000e-01 : f32
    %170 = vector.broadcast %cst_53 : f32 to vector<8x16xf32>
    %171 = arith.mulf %170, %169 : vector<8x16xf32>
    %172 = math.exp %171 : vector<8x16xf32>
    %173 = arith.index_cast %c1_i32 : i32 to index
    %c0_54 = arith.constant 0 : index
    %c0_55 = arith.constant 0 : index
    %174 = vector.load %arg3[%173, %c0_54, %c0_55] : memref<7x8x16xf32, #tpu.memory_space<vmem>>, vector<1x8x16xf32>
    %175 = vector.shape_cast %174 : vector<1x8x16xf32> to vector<8x16xf32>
    %176 = arith.mulf %172, %175 : vector<8x16xf32>
    %177 = arith.addf %168, %176 : vector<8x16xf32>
    %178 = arith.addf %163, %137 : vector<8x128xf32>
    %179 = vector.extract_strided_slice %112 {offsets = [0, 128], sizes = [8, 128], strides = [1, 1]} : vector<8x256xf32> to vector<8x128xf32>
    %180 = arith.addf %178, %179 : vector<8x128xf32>
    %c0_56 = arith.constant 0 : index
    %c0_57 = arith.constant 0 : index
    %181 = vector.load %arg8[%c0_56, %c0_57] : memref<16x128xf32, #tpu.memory_space<vmem>>, vector<16x128xf32>
    %cst_58 = arith.constant dense<0.000000e+00> : vector<8x128xf32>
    %182 = tpu.matmul %177, %181, %cst_58 {dimension_numbers = #tpu.dot_dimension_numbers<[1], [0], [0], [1], [0, 0, 1, 1], [], []>} : vector<8x16xf32>, vector<16x128xf32>, vector<8x128xf32> -> vector<8x128xf32>
    %183 = arith.addf %180, %182 : vector<8x128xf32>
    %184 = vector.broadcast %4 : vector<1x128xf32> to vector<8x128xf32>
    %185 = arith.addf %183, %184 : vector<8x128xf32>
    %186 = math.tanh %185 : vector<8x128xf32>
    %187 = arith.negf %185 : vector<8x128xf32>
    %188 = math.exp %187 : vector<8x128xf32>
    %cst_59 = arith.constant 1.000000e+00 : f32
    %189 = vector.broadcast %cst_59 : f32 to vector<8x128xf32>
    %190 = arith.addf %189, %188 : vector<8x128xf32>
    %191 = arith.divf %189, %190 : vector<8x128xf32>
    %192 = arith.select %11, %186, %191 : vector<8x128xi1>, vector<8x128xf32>
    %193 = vector.extract_strided_slice %192 {offsets = [0, 0], sizes = [8, 32], strides = [1, 1]} : vector<8x128xf32> to vector<8x32xf32>
    %194 = vector.extract_strided_slice %192 {offsets = [0, 32], sizes = [8, 32], strides = [1, 1]} : vector<8x128xf32> to vector<8x32xf32>
    %195 = vector.extract_strided_slice %192 {offsets = [0, 64], sizes = [8, 32], strides = [1, 1]} : vector<8x128xf32> to vector<8x32xf32>
    %196 = vector.extract_strided_slice %192 {offsets = [0, 96], sizes = [8, 32], strides = [1, 1]} : vector<8x128xf32> to vector<8x32xf32>
    %197 = arith.mulf %194, %102 : vector<8x32xf32>
    %198 = arith.mulf %193, %195 : vector<8x32xf32>
    %199 = arith.addf %197, %198 : vector<8x32xf32>
    %200 = math.tanh %199 : vector<8x32xf32>
    %201 = arith.mulf %196, %200 : vector<8x32xf32>
    %c8_i32_60 = arith.constant 8 : i32
    %202 = arith.muli %c1_i32, %c8_i32_60 : i32
    %203 = tpu.assume_multiple %202, 8 : i32
    %204 = arith.index_cast %203 : i32 to index
    %c0_61 = arith.constant 0 : index
    %205 = vector.load %arg16[%204, %c0_61] : memref<56x32xf32, #tpu.memory_space<vmem>>, vector<8x32xf32>
    tpu.vector_store %arg16[%204, %c0_61], %201 {strides = array<i32>} : memref<56x32xf32, #tpu.memory_space<vmem>>, vector<8x32xf32>,
    %206 = arith.index_cast %203 : i32 to index
    %c0_62 = arith.constant 0 : index
    %207 = vector.load %arg17[%206, %c0_62] : memref<56x128xf32, #tpu.memory_space<vmem>>, vector<8x128xf32>
    tpu.vector_store %arg17[%206, %c0_62], %167 {strides = array<i32>} : memref<56x128xf32, #tpu.memory_space<vmem>>, vector<8x128xf32>,
    %c2_i32 = arith.constant 2 : i32
    %c0_63 = arith.constant 0 : index
    %c0_64 = arith.constant 0 : index
    %208 = vector.load %arg5[%c0_63, %c0_64] : memref<32x256xf32, #tpu.memory_space<vmem>>, vector<32x256xf32>
    %cst_65 = arith.constant dense<0.000000e+00> : vector<8x256xf32>
    %209 = tpu.matmul %201, %208, %cst_65 {dimension_numbers = #tpu.dot_dimension_numbers<[1], [0], [0], [1], [0, 0, 1, 1], [], []>} : vector<8x32xf32>, vector<32x256xf32>, vector<8x256xf32> -> vector<8x256xf32>
    %210 = arith.index_cast %c2_i32 : i32 to index
    %c0_66 = arith.constant 0 : index
    %c0_67 = arith.constant 0 : index
    %211 = vector.load %arg1[%210, %c0_66, %c0_67] : memref<7x8x128xf32, #tpu.memory_space<vmem>>, vector<1x8x128xf32>
    %212 = vector.shape_cast %211 : vector<1x8x128xf32> to vector<8x128xf32>
    %213 = vector.extract_strided_slice %209 {offsets = [0, 0], sizes = [8, 128], strides = [1, 1]} : vector<8x256xf32> to vector<8x128xf32>
    %214 = arith.addf %212, %213 : vector<8x128xf32>
    %215 = arith.addf %214, %138 : vector<8x128xf32>
    %216 = math.tanh %215 : vector<8x128xf32>
    %217 = arith.negf %215 : vector<8x128xf32>
    %218 = math.exp %217 : vector<8x128xf32>
    %cst_68 = arith.constant 1.000000e+00 : f32
    %219 = vector.broadcast %cst_68 : f32 to vector<8x128xf32>
    %220 = arith.addf %219, %218 : vector<8x128xf32>
    %221 = arith.divf %219, %220 : vector<8x128xf32>
    %222 = arith.select %11, %216, %221 : vector<8x128xi1>, vector<8x128xf32>
    %223 = vector.extract_strided_slice %222 {offsets = [0, 0], sizes = [8, 32], strides = [1, 1]} : vector<8x128xf32> to vector<8x32xf32>
    %224 = vector.extract_strided_slice %222 {offsets = [0, 32], sizes = [8, 32], strides = [1, 1]} : vector<8x128xf32> to vector<8x32xf32>
    %225 = vector.extract_strided_slice %222 {offsets = [0, 64], sizes = [8, 32], strides = [1, 1]} : vector<8x128xf32> to vector<8x32xf32>
    %226 = vector.extract_strided_slice %222 {offsets = [0, 96], sizes = [8, 32], strides = [1, 1]} : vector<8x128xf32> to vector<8x32xf32>
    %227 = arith.mulf %224, %132 : vector<8x32xf32>
    %228 = arith.mulf %223, %225 : vector<8x32xf32>
    %229 = arith.addf %227, %228 : vector<8x32xf32>
    %230 = math.tanh %229 : vector<8x32xf32>
    %231 = arith.mulf %226, %230 : vector<8x32xf32>
    %c0_69 = arith.constant 0 : index
    %c0_70 = arith.constant 0 : index
    %232 = vector.load %arg6[%c0_69, %c0_70] : memref<32x512xf32, #tpu.memory_space<vmem>>, vector<32x512xf32>
    %cst_71 = arith.constant dense<0.000000e+00> : vector<8x512xf32>
    %233 = tpu.matmul %231, %232, %cst_71 {dimension_numbers = #tpu.dot_dimension_numbers<[1], [0], [0], [1], [0, 0, 1, 1], [], []>} : vector<8x32xf32>, vector<32x512xf32>, vector<8x512xf32> -> vector<8x512xf32>
    %234 = vector.extract_strided_slice %233 {offsets = [0, 0], sizes = [8, 128], strides = [1, 1]} : vector<8x512xf32> to vector<8x128xf32>
    %235 = vector.extract_strided_slice %233 {offsets = [0, 128], sizes = [8, 128], strides = [1, 1]} : vector<8x512xf32> to vector<8x128xf32>
    %236 = vector.extract_strided_slice %233 {offsets = [0, 256], sizes = [8, 128], strides = [1, 1]} : vector<8x512xf32> to vector<8x128xf32>
    %237 = vector.extract_strided_slice %233 {offsets = [0, 384], sizes = [8, 128], strides = [1, 1]} : vector<8x512xf32> to vector<8x128xf32>
    %238 = vector.shape_cast %236 : vector<8x128xf32> to vector<8x1x128xf32>
    %239 = vector.broadcast %238 : vector<8x1x128xf32> to vector<8x8x128xf32>
    %240 = arith.addf %1, %239 : vector<8x8x128xf32>
    %241 = math.tanh %240 : vector<8x8x128xf32>
    %242 = vector.broadcast %3 : vector<1x1x128xf32> to vector<8x8x128xf32>
    %243 = arith.mulf %241, %242 : vector<8x8x128xf32>
    %cst_72 = arith.constant dense<0.000000e+00> : vector<8x8xf32>
    %244 = vector.multi_reduction <add>, %243, %cst_72 [2] : vector<8x8x128xf32> to vector<8x8xf32>
    %cst_73 = arith.constant dense<0xFF800000> : vector<8xf32>
    %245 = vector.multi_reduction <maximumf>, %244, %cst_73 [1] : vector<8x8xf32> to vector<8xf32>
    %246 = vector.shape_cast %245 : vector<8xf32> to vector<8x1xf32>
    %247 = vector.broadcast %246 : vector<8x1xf32> to vector<8x8xf32>
    %248 = arith.subf %244, %247 : vector<8x8xf32>
    %249 = math.exp %248 : vector<8x8xf32>
    %cst_74 = arith.constant dense<0.000000e+00> : vector<8xf32>
    %250 = vector.multi_reduction <add>, %249, %cst_74 [1] : vector<8x8xf32> to vector<8xf32>
    %251 = vector.shape_cast %250 : vector<8xf32> to vector<8x1xf32>
    %252 = vector.broadcast %251 : vector<8x1xf32> to vector<8x8xf32>
    %253 = arith.divf %249, %252 : vector<8x8xf32>
    %254 = vector.shape_cast %253 : vector<8x8xf32> to vector<8x8x1xf32>
    %255 = vector.broadcast %254 : vector<8x8x1xf32> to vector<8x8x32xf32>
    %256 = arith.mulf %255, %0 : vector<8x8x32xf32>
    %cst_75 = arith.constant dense<0.000000e+00> : vector<8x32xf32>
    %257 = vector.multi_reduction <add>, %256, %cst_75 [1] : vector<8x8x32xf32> to vector<8x32xf32>
    %c0_76 = arith.constant 0 : index
    %c0_77 = arith.constant 0 : index
    %258 = vector.load %arg7[%c0_76, %c0_77] : memref<32x256xf32, #tpu.memory_space<vmem>>, vector<32x256xf32>
    %cst_78 = arith.constant dense<0.000000e+00> : vector<8x256xf32>
    %259 = tpu.matmul %257, %258, %cst_78 {dimension_numbers = #tpu.dot_dimension_numbers<[1], [0], [0], [1], [0, 0, 1, 1], [], []>} : vector<8x32xf32>, vector<32x256xf32>, vector<8x256xf32> -> vector<8x256xf32>
    %260 = vector.extract_strided_slice %259 {offsets = [0, 0], sizes = [8, 128], strides = [1, 1]} : vector<8x256xf32> to vector<8x128xf32>
    %261 = vector.extract_strided_slice %259 {offsets = [0, 128], sizes = [8, 128], strides = [1, 1]} : vector<8x256xf32> to vector<8x128xf32>
    %262 = arith.addf %237, %261 : vector<8x128xf32>
    %263 = vector.broadcast %5 : vector<1x128xf32> to vector<8x128xf32>
    %264 = arith.addf %262, %263 : vector<8x128xf32>
    %265 = vector.extract_strided_slice %264 {offsets = [0, 0], sizes = [8, 16], strides = [1, 1]} : vector<8x128xf32> to vector<8x16xf32>
    %266 = vector.extract_strided_slice %264 {offsets = [0, 16], sizes = [8, 16], strides = [1, 1]} : vector<8x128xf32> to vector<8x16xf32>
    %cst_79 = arith.constant 5.000000e-01 : f32
    %267 = vector.broadcast %cst_79 : f32 to vector<8x16xf32>
    %268 = arith.mulf %267, %266 : vector<8x16xf32>
    %269 = math.exp %268 : vector<8x16xf32>
    %270 = arith.index_cast %c2_i32 : i32 to index
    %c0_80 = arith.constant 0 : index
    %c0_81 = arith.constant 0 : index
    %271 = vector.load %arg3[%270, %c0_80, %c0_81] : memref<7x8x16xf32, #tpu.memory_space<vmem>>, vector<1x8x16xf32>
    %272 = vector.shape_cast %271 : vector<1x8x16xf32> to vector<8x16xf32>
    %273 = arith.mulf %269, %272 : vector<8x16xf32>
    %274 = arith.addf %265, %273 : vector<8x16xf32>
    %275 = arith.addf %260, %234 : vector<8x128xf32>
    %276 = vector.extract_strided_slice %209 {offsets = [0, 128], sizes = [8, 128], strides = [1, 1]} : vector<8x256xf32> to vector<8x128xf32>
    %277 = arith.addf %275, %276 : vector<8x128xf32>
    %c0_82 = arith.constant 0 : index
    %c0_83 = arith.constant 0 : index
    %278 = vector.load %arg8[%c0_82, %c0_83] : memref<16x128xf32, #tpu.memory_space<vmem>>, vector<16x128xf32>
    %cst_84 = arith.constant dense<0.000000e+00> : vector<8x128xf32>
    %279 = tpu.matmul %274, %278, %cst_84 {dimension_numbers = #tpu.dot_dimension_numbers<[1], [0], [0], [1], [0, 0, 1, 1], [], []>} : vector<8x16xf32>, vector<16x128xf32>, vector<8x128xf32> -> vector<8x128xf32>
    %280 = arith.addf %277, %279 : vector<8x128xf32>
    %281 = vector.broadcast %4 : vector<1x128xf32> to vector<8x128xf32>
    %282 = arith.addf %280, %281 : vector<8x128xf32>
    %283 = math.tanh %282 : vector<8x128xf32>
    %284 = arith.negf %282 : vector<8x128xf32>
    %285 = math.exp %284 : vector<8x128xf32>
    %cst_85 = arith.constant 1.000000e+00 : f32
    %286 = vector.broadcast %cst_85 : f32 to vector<8x128xf32>
    %287 = arith.addf %286, %285 : vector<8x128xf32>
    %288 = arith.divf %286, %287 : vector<8x128xf32>
    %289 = arith.select %11, %283, %288 : vector<8x128xi1>, vector<8x128xf32>
    %290 = vector.extract_strided_slice %289 {offsets = [0, 0], sizes = [8, 32], strides = [1, 1]} : vector<8x128xf32> to vector<8x32xf32>
    %291 = vector.extract_strided_slice %289 {offsets = [0, 32], sizes = [8, 32], strides = [1, 1]} : vector<8x128xf32> to vector<8x32xf32>
    %292 = vector.extract_strided_slice %289 {offsets = [0, 64], sizes = [8, 32], strides = [1, 1]} : vector<8x128xf32> to vector<8x32xf32>
    %293 = vector.extract_strided_slice %289 {offsets = [0, 96], sizes = [8, 32], strides = [1, 1]} : vector<8x128xf32> to vector<8x32xf32>
    %294 = arith.mulf %291, %199 : vector<8x32xf32>
    %295 = arith.mulf %290, %292 : vector<8x32xf32>
    %296 = arith.addf %294, %295 : vector<8x32xf32>
    %297 = math.tanh %296 : vector<8x32xf32>
    %298 = arith.mulf %293, %297 : vector<8x32xf32>
    %c8_i32_86 = arith.constant 8 : i32
    %299 = arith.muli %c2_i32, %c8_i32_86 : i32
    %300 = tpu.assume_multiple %299, 8 : i32
    %301 = arith.index_cast %300 : i32 to index
    %c0_87 = arith.constant 0 : index
    %302 = vector.load %arg16[%301, %c0_87] : memref<56x32xf32, #tpu.memory_space<vmem>>, vector<8x32xf32>
    tpu.vector_store %arg16[%301, %c0_87], %298 {strides = array<i32>} : memref<56x32xf32, #tpu.memory_space<vmem>>, vector<8x32xf32>,
    %303 = arith.index_cast %300 : i32 to index
    %c0_88 = arith.constant 0 : index
    %304 = vector.load %arg17[%303, %c0_88] : memref<56x128xf32, #tpu.memory_space<vmem>>, vector<8x128xf32>
    tpu.vector_store %arg17[%303, %c0_88], %264 {strides = array<i32>} : memref<56x128xf32, #tpu.memory_space<vmem>>, vector<8x128xf32>,
    %c3_i32 = arith.constant 3 : i32
    %c0_89 = arith.constant 0 : index
    %c0_90 = arith.constant 0 : index
    %305 = vector.load %arg5[%c0_89, %c0_90] : memref<32x256xf32, #tpu.memory_space<vmem>>, vector<32x256xf32>
    %cst_91 = arith.constant dense<0.000000e+00> : vector<8x256xf32>
    %306 = tpu.matmul %298, %305, %cst_91 {dimension_numbers = #tpu.dot_dimension_numbers<[1], [0], [0], [1], [0, 0, 1, 1], [], []>} : vector<8x32xf32>, vector<32x256xf32>, vector<8x256xf32> -> vector<8x256xf32>
    %307 = arith.index_cast %c3_i32 : i32 to index
    %c0_92 = arith.constant 0 : index
    %c0_93 = arith.constant 0 : index
    %308 = vector.load %arg1[%307, %c0_92, %c0_93] : memref<7x8x128xf32, #tpu.memory_space<vmem>>, vector<1x8x128xf32>
    %309 = vector.shape_cast %308 : vector<1x8x128xf32> to vector<8x128xf32>
    %310 = vector.extract_strided_slice %306 {offsets = [0, 0], sizes = [8, 128], strides = [1, 1]} : vector<8x256xf32> to vector<8x128xf32>
    %311 = arith.addf %309, %310 : vector<8x128xf32>
    %312 = arith.addf %311, %235 : vector<8x128xf32>
    %313 = math.tanh %312 : vector<8x128xf32>
    %314 = arith.negf %312 : vector<8x128xf32>
    %315 = math.exp %314 : vector<8x128xf32>
    %cst_94 = arith.constant 1.000000e+00 : f32
    %316 = vector.broadcast %cst_94 : f32 to vector<8x128xf32>
    %317 = arith.addf %316, %315 : vector<8x128xf32>
    %318 = arith.divf %316, %317 : vector<8x128xf32>
    %319 = arith.select %11, %313, %318 : vector<8x128xi1>, vector<8x128xf32>
    %320 = vector.extract_strided_slice %319 {offsets = [0, 0], sizes = [8, 32], strides = [1, 1]} : vector<8x128xf32> to vector<8x32xf32>
    %321 = vector.extract_strided_slice %319 {offsets = [0, 32], sizes = [8, 32], strides = [1, 1]} : vector<8x128xf32> to vector<8x32xf32>
    %322 = vector.extract_strided_slice %319 {offsets = [0, 64], sizes = [8, 32], strides = [1, 1]} : vector<8x128xf32> to vector<8x32xf32>
    %323 = vector.extract_strided_slice %319 {offsets = [0, 96], sizes = [8, 32], strides = [1, 1]} : vector<8x128xf32> to vector<8x32xf32>
    %324 = arith.mulf %321, %229 : vector<8x32xf32>
    %325 = arith.mulf %320, %322 : vector<8x32xf32>
    %326 = arith.addf %324, %325 : vector<8x32xf32>
    %327 = math.tanh %326 : vector<8x32xf32>
    %328 = arith.mulf %323, %327 : vector<8x32xf32>
    %c0_95 = arith.constant 0 : index
    %c0_96 = arith.constant 0 : index
    %329 = vector.load %arg6[%c0_95, %c0_96] : memref<32x512xf32, #tpu.memory_space<vmem>>, vector<32x512xf32>
    %cst_97 = arith.constant dense<0.000000e+00> : vector<8x512xf32>
    %330 = tpu.matmul %328, %329, %cst_97 {dimension_numbers = #tpu.dot_dimension_numbers<[1], [0], [0], [1], [0, 0, 1, 1], [], []>} : vector<8x32xf32>, vector<32x512xf32>, vector<8x512xf32> -> vector<8x512xf32>
    %331 = vector.extract_strided_slice %330 {offsets = [0, 0], sizes = [8, 128], strides = [1, 1]} : vector<8x512xf32> to vector<8x128xf32>
    %332 = vector.extract_strided_slice %330 {offsets = [0, 128], sizes = [8, 128], strides = [1, 1]} : vector<8x512xf32> to vector<8x128xf32>
    %333 = vector.extract_strided_slice %330 {offsets = [0, 256], sizes = [8, 128], strides = [1, 1]} : vector<8x512xf32> to vector<8x128xf32>
    %334 = vector.extract_strided_slice %330 {offsets = [0, 384], sizes = [8, 128], strides = [1, 1]} : vector<8x512xf32> to vector<8x128xf32>
    %335 = vector.shape_cast %333 : vector<8x128xf32> to vector<8x1x128xf32>
    %336 = vector.broadcast %335 : vector<8x1x128xf32> to vector<8x8x128xf32>
    %337 = arith.addf %1, %336 : vector<8x8x128xf32>
    %338 = math.tanh %337 : vector<8x8x128xf32>
    %339 = vector.broadcast %3 : vector<1x1x128xf32> to vector<8x8x128xf32>
    %340 = arith.mulf %338, %339 : vector<8x8x128xf32>
    %cst_98 = arith.constant dense<0.000000e+00> : vector<8x8xf32>
    %341 = vector.multi_reduction <add>, %340, %cst_98 [2] : vector<8x8x128xf32> to vector<8x8xf32>
    %cst_99 = arith.constant dense<0xFF800000> : vector<8xf32>
    %342 = vector.multi_reduction <maximumf>, %341, %cst_99 [1] : vector<8x8xf32> to vector<8xf32>
    %343 = vector.shape_cast %342 : vector<8xf32> to vector<8x1xf32>
    %344 = vector.broadcast %343 : vector<8x1xf32> to vector<8x8xf32>
    %345 = arith.subf %341, %344 : vector<8x8xf32>
    %346 = math.exp %345 : vector<8x8xf32>
    %cst_100 = arith.constant dense<0.000000e+00> : vector<8xf32>
    %347 = vector.multi_reduction <add>, %346, %cst_100 [1] : vector<8x8xf32> to vector<8xf32>
    %348 = vector.shape_cast %347 : vector<8xf32> to vector<8x1xf32>
    %349 = vector.broadcast %348 : vector<8x1xf32> to vector<8x8xf32>
    %350 = arith.divf %346, %349 : vector<8x8xf32>
    %351 = vector.shape_cast %350 : vector<8x8xf32> to vector<8x8x1xf32>
    %352 = vector.broadcast %351 : vector<8x8x1xf32> to vector<8x8x32xf32>
    %353 = arith.mulf %352, %0 : vector<8x8x32xf32>
    %cst_101 = arith.constant dense<0.000000e+00> : vector<8x32xf32>
    %354 = vector.multi_reduction <add>, %353, %cst_101 [1] : vector<8x8x32xf32> to vector<8x32xf32>
    %c0_102 = arith.constant 0 : index
    %c0_103 = arith.constant 0 : index
    %355 = vector.load %arg7[%c0_102, %c0_103] : memref<32x256xf32, #tpu.memory_space<vmem>>, vector<32x256xf32>
    %cst_104 = arith.constant dense<0.000000e+00> : vector<8x256xf32>
    %356 = tpu.matmul %354, %355, %cst_104 {dimension_numbers = #tpu.dot_dimension_numbers<[1], [0], [0], [1], [0, 0, 1, 1], [], []>} : vector<8x32xf32>, vector<32x256xf32>, vector<8x256xf32> -> vector<8x256xf32>
    %357 = vector.extract_strided_slice %356 {offsets = [0, 0], sizes = [8, 128], strides = [1, 1]} : vector<8x256xf32> to vector<8x128xf32>
    %358 = vector.extract_strided_slice %356 {offsets = [0, 128], sizes = [8, 128], strides = [1, 1]} : vector<8x256xf32> to vector<8x128xf32>
    %359 = arith.addf %334, %358 : vector<8x128xf32>
    %360 = vector.broadcast %5 : vector<1x128xf32> to vector<8x128xf32>
    %361 = arith.addf %359, %360 : vector<8x128xf32>
    %362 = vector.extract_strided_slice %361 {offsets = [0, 0], sizes = [8, 16], strides = [1, 1]} : vector<8x128xf32> to vector<8x16xf32>
    %363 = vector.extract_strided_slice %361 {offsets = [0, 16], sizes = [8, 16], strides = [1, 1]} : vector<8x128xf32> to vector<8x16xf32>
    %cst_105 = arith.constant 5.000000e-01 : f32
    %364 = vector.broadcast %cst_105 : f32 to vector<8x16xf32>
    %365 = arith.mulf %364, %363 : vector<8x16xf32>
    %366 = math.exp %365 : vector<8x16xf32>
    %367 = arith.index_cast %c3_i32 : i32 to index
    %c0_106 = arith.constant 0 : index
    %c0_107 = arith.constant 0 : index
    %368 = vector.load %arg3[%367, %c0_106, %c0_107] : memref<7x8x16xf32, #tpu.memory_space<vmem>>, vector<1x8x16xf32>
    %369 = vector.shape_cast %368 : vector<1x8x16xf32> to vector<8x16xf32>
    %370 = arith.mulf %366, %369 : vector<8x16xf32>
    %371 = arith.addf %362, %370 : vector<8x16xf32>
    %372 = arith.addf %357, %331 : vector<8x128xf32>
    %373 = vector.extract_strided_slice %306 {offsets = [0, 128], sizes = [8, 128], strides = [1, 1]} : vector<8x256xf32> to vector<8x128xf32>
    %374 = arith.addf %372, %373 : vector<8x128xf32>
    %c0_108 = arith.constant 0 : index
    %c0_109 = arith.constant 0 : index
    %375 = vector.load %arg8[%c0_108, %c0_109] : memref<16x128xf32, #tpu.memory_space<vmem>>, vector<16x128xf32>
    %cst_110 = arith.constant dense<0.000000e+00> : vector<8x128xf32>
    %376 = tpu.matmul %371, %375, %cst_110 {dimension_numbers = #tpu.dot_dimension_numbers<[1], [0], [0], [1], [0, 0, 1, 1], [], []>} : vector<8x16xf32>, vector<16x128xf32>, vector<8x128xf32> -> vector<8x128xf32>
    %377 = arith.addf %374, %376 : vector<8x128xf32>
    %378 = vector.broadcast %4 : vector<1x128xf32> to vector<8x128xf32>
    %379 = arith.addf %377, %378 : vector<8x128xf32>
    %380 = math.tanh %379 : vector<8x128xf32>
    %381 = arith.negf %379 : vector<8x128xf32>
    %382 = math.exp %381 : vector<8x128xf32>
    %cst_111 = arith.constant 1.000000e+00 : f32
    %383 = vector.broadcast %cst_111 : f32 to vector<8x128xf32>
    %384 = arith.addf %383, %382 : vector<8x128xf32>
    %385 = arith.divf %383, %384 : vector<8x128xf32>
    %386 = arith.select %11, %380, %385 : vector<8x128xi1>, vector<8x128xf32>
    %387 = vector.extract_strided_slice %386 {offsets = [0, 0], sizes = [8, 32], strides = [1, 1]} : vector<8x128xf32> to vector<8x32xf32>
    %388 = vector.extract_strided_slice %386 {offsets = [0, 32], sizes = [8, 32], strides = [1, 1]} : vector<8x128xf32> to vector<8x32xf32>
    %389 = vector.extract_strided_slice %386 {offsets = [0, 64], sizes = [8, 32], strides = [1, 1]} : vector<8x128xf32> to vector<8x32xf32>
    %390 = vector.extract_strided_slice %386 {offsets = [0, 96], sizes = [8, 32], strides = [1, 1]} : vector<8x128xf32> to vector<8x32xf32>
    %391 = arith.mulf %388, %296 : vector<8x32xf32>
    %392 = arith.mulf %387, %389 : vector<8x32xf32>
    %393 = arith.addf %391, %392 : vector<8x32xf32>
    %394 = math.tanh %393 : vector<8x32xf32>
    %395 = arith.mulf %390, %394 : vector<8x32xf32>
    %c8_i32_112 = arith.constant 8 : i32
    %396 = arith.muli %c3_i32, %c8_i32_112 : i32
    %397 = tpu.assume_multiple %396, 8 : i32
    %398 = arith.index_cast %397 : i32 to index
    %c0_113 = arith.constant 0 : index
    %399 = vector.load %arg16[%398, %c0_113] : memref<56x32xf32, #tpu.memory_space<vmem>>, vector<8x32xf32>
    tpu.vector_store %arg16[%398, %c0_113], %395 {strides = array<i32>} : memref<56x32xf32, #tpu.memory_space<vmem>>, vector<8x32xf32>,
    %400 = arith.index_cast %397 : i32 to index
    %c0_114 = arith.constant 0 : index
    %401 = vector.load %arg17[%400, %c0_114] : memref<56x128xf32, #tpu.memory_space<vmem>>, vector<8x128xf32>
    tpu.vector_store %arg17[%400, %c0_114], %361 {strides = array<i32>} : memref<56x128xf32, #tpu.memory_space<vmem>>, vector<8x128xf32>,
    %c4_i32 = arith.constant 4 : i32
    %c0_115 = arith.constant 0 : index
    %c0_116 = arith.constant 0 : index
    %402 = vector.load %arg5[%c0_115, %c0_116] : memref<32x256xf32, #tpu.memory_space<vmem>>, vector<32x256xf32>
    %cst_117 = arith.constant dense<0.000000e+00> : vector<8x256xf32>
    %403 = tpu.matmul %395, %402, %cst_117 {dimension_numbers = #tpu.dot_dimension_numbers<[1], [0], [0], [1], [0, 0, 1, 1], [], []>} : vector<8x32xf32>, vector<32x256xf32>, vector<8x256xf32> -> vector<8x256xf32>
    %404 = arith.index_cast %c4_i32 : i32 to index
    %c0_118 = arith.constant 0 : index
    %c0_119 = arith.constant 0 : index
    %405 = vector.load %arg1[%404, %c0_118, %c0_119] : memref<7x8x128xf32, #tpu.memory_space<vmem>>, vector<1x8x128xf32>
    %406 = vector.shape_cast %405 : vector<1x8x128xf32> to vector<8x128xf32>
    %407 = vector.extract_strided_slice %403 {offsets = [0, 0], sizes = [8, 128], strides = [1, 1]} : vector<8x256xf32> to vector<8x128xf32>
    %408 = arith.addf %406, %407 : vector<8x128xf32>
    %409 = arith.addf %408, %332 : vector<8x128xf32>
    %410 = math.tanh %409 : vector<8x128xf32>
    %411 = arith.negf %409 : vector<8x128xf32>
    %412 = math.exp %411 : vector<8x128xf32>
    %cst_120 = arith.constant 1.000000e+00 : f32
    %413 = vector.broadcast %cst_120 : f32 to vector<8x128xf32>
    %414 = arith.addf %413, %412 : vector<8x128xf32>
    %415 = arith.divf %413, %414 : vector<8x128xf32>
    %416 = arith.select %11, %410, %415 : vector<8x128xi1>, vector<8x128xf32>
    %417 = vector.extract_strided_slice %416 {offsets = [0, 0], sizes = [8, 32], strides = [1, 1]} : vector<8x128xf32> to vector<8x32xf32>
    %418 = vector.extract_strided_slice %416 {offsets = [0, 32], sizes = [8, 32], strides = [1, 1]} : vector<8x128xf32> to vector<8x32xf32>
    %419 = vector.extract_strided_slice %416 {offsets = [0, 64], sizes = [8, 32], strides = [1, 1]} : vector<8x128xf32> to vector<8x32xf32>
    %420 = vector.extract_strided_slice %416 {offsets = [0, 96], sizes = [8, 32], strides = [1, 1]} : vector<8x128xf32> to vector<8x32xf32>
    %421 = arith.mulf %418, %326 : vector<8x32xf32>
    %422 = arith.mulf %417, %419 : vector<8x32xf32>
    %423 = arith.addf %421, %422 : vector<8x32xf32>
    %424 = math.tanh %423 : vector<8x32xf32>
    %425 = arith.mulf %420, %424 : vector<8x32xf32>
    %c0_121 = arith.constant 0 : index
    %c0_122 = arith.constant 0 : index
    %426 = vector.load %arg6[%c0_121, %c0_122] : memref<32x512xf32, #tpu.memory_space<vmem>>, vector<32x512xf32>
    %cst_123 = arith.constant dense<0.000000e+00> : vector<8x512xf32>
    %427 = tpu.matmul %425, %426, %cst_123 {dimension_numbers = #tpu.dot_dimension_numbers<[1], [0], [0], [1], [0, 0, 1, 1], [], []>} : vector<8x32xf32>, vector<32x512xf32>, vector<8x512xf32> -> vector<8x512xf32>
    %428 = vector.extract_strided_slice %427 {offsets = [0, 0], sizes = [8, 128], strides = [1, 1]} : vector<8x512xf32> to vector<8x128xf32>
    %429 = vector.extract_strided_slice %427 {offsets = [0, 128], sizes = [8, 128], strides = [1, 1]} : vector<8x512xf32> to vector<8x128xf32>
    %430 = vector.extract_strided_slice %427 {offsets = [0, 256], sizes = [8, 128], strides = [1, 1]} : vector<8x512xf32> to vector<8x128xf32>
    %431 = vector.extract_strided_slice %427 {offsets = [0, 384], sizes = [8, 128], strides = [1, 1]} : vector<8x512xf32> to vector<8x128xf32>
    %432 = vector.shape_cast %430 : vector<8x128xf32> to vector<8x1x128xf32>
    %433 = vector.broadcast %432 : vector<8x1x128xf32> to vector<8x8x128xf32>
    %434 = arith.addf %1, %433 : vector<8x8x128xf32>
    %435 = math.tanh %434 : vector<8x8x128xf32>
    %436 = vector.broadcast %3 : vector<1x1x128xf32> to vector<8x8x128xf32>
    %437 = arith.mulf %435, %436 : vector<8x8x128xf32>
    %cst_124 = arith.constant dense<0.000000e+00> : vector<8x8xf32>
    %438 = vector.multi_reduction <add>, %437, %cst_124 [2] : vector<8x8x128xf32> to vector<8x8xf32>
    %cst_125 = arith.constant dense<0xFF800000> : vector<8xf32>
    %439 = vector.multi_reduction <maximumf>, %438, %cst_125 [1] : vector<8x8xf32> to vector<8xf32>
    %440 = vector.shape_cast %439 : vector<8xf32> to vector<8x1xf32>
    %441 = vector.broadcast %440 : vector<8x1xf32> to vector<8x8xf32>
    %442 = arith.subf %438, %441 : vector<8x8xf32>
    %443 = math.exp %442 : vector<8x8xf32>
    %cst_126 = arith.constant dense<0.000000e+00> : vector<8xf32>
    %444 = vector.multi_reduction <add>, %443, %cst_126 [1] : vector<8x8xf32> to vector<8xf32>
    %445 = vector.shape_cast %444 : vector<8xf32> to vector<8x1xf32>
    %446 = vector.broadcast %445 : vector<8x1xf32> to vector<8x8xf32>
    %447 = arith.divf %443, %446 : vector<8x8xf32>
    %448 = vector.shape_cast %447 : vector<8x8xf32> to vector<8x8x1xf32>
    %449 = vector.broadcast %448 : vector<8x8x1xf32> to vector<8x8x32xf32>
    %450 = arith.mulf %449, %0 : vector<8x8x32xf32>
    %cst_127 = arith.constant dense<0.000000e+00> : vector<8x32xf32>
    %451 = vector.multi_reduction <add>, %450, %cst_127 [1] : vector<8x8x32xf32> to vector<8x32xf32>
    %c0_128 = arith.constant 0 : index
    %c0_129 = arith.constant 0 : index
    %452 = vector.load %arg7[%c0_128, %c0_129] : memref<32x256xf32, #tpu.memory_space<vmem>>, vector<32x256xf32>
    %cst_130 = arith.constant dense<0.000000e+00> : vector<8x256xf32>
    %453 = tpu.matmul %451, %452, %cst_130 {dimension_numbers = #tpu.dot_dimension_numbers<[1], [0], [0], [1], [0, 0, 1, 1], [], []>} : vector<8x32xf32>, vector<32x256xf32>, vector<8x256xf32> -> vector<8x256xf32>
    %454 = vector.extract_strided_slice %453 {offsets = [0, 0], sizes = [8, 128], strides = [1, 1]} : vector<8x256xf32> to vector<8x128xf32>
    %455 = vector.extract_strided_slice %453 {offsets = [0, 128], sizes = [8, 128], strides = [1, 1]} : vector<8x256xf32> to vector<8x128xf32>
    %456 = arith.addf %431, %455 : vector<8x128xf32>
    %457 = vector.broadcast %5 : vector<1x128xf32> to vector<8x128xf32>
    %458 = arith.addf %456, %457 : vector<8x128xf32>
    %459 = vector.extract_strided_slice %458 {offsets = [0, 0], sizes = [8, 16], strides = [1, 1]} : vector<8x128xf32> to vector<8x16xf32>
    %460 = vector.extract_strided_slice %458 {offsets = [0, 16], sizes = [8, 16], strides = [1, 1]} : vector<8x128xf32> to vector<8x16xf32>
    %cst_131 = arith.constant 5.000000e-01 : f32
    %461 = vector.broadcast %cst_131 : f32 to vector<8x16xf32>
    %462 = arith.mulf %461, %460 : vector<8x16xf32>
    %463 = math.exp %462 : vector<8x16xf32>
    %464 = arith.index_cast %c4_i32 : i32 to index
    %c0_132 = arith.constant 0 : index
    %c0_133 = arith.constant 0 : index
    %465 = vector.load %arg3[%464, %c0_132, %c0_133] : memref<7x8x16xf32, #tpu.memory_space<vmem>>, vector<1x8x16xf32>
    %466 = vector.shape_cast %465 : vector<1x8x16xf32> to vector<8x16xf32>
    %467 = arith.mulf %463, %466 : vector<8x16xf32>
    %468 = arith.addf %459, %467 : vector<8x16xf32>
    %469 = arith.addf %454, %428 : vector<8x128xf32>
    %470 = vector.extract_strided_slice %403 {offsets = [0, 128], sizes = [8, 128], strides = [1, 1]} : vector<8x256xf32> to vector<8x128xf32>
    %471 = arith.addf %469, %470 : vector<8x128xf32>
    %c0_134 = arith.constant 0 : index
    %c0_135 = arith.constant 0 : index
    %472 = vector.load %arg8[%c0_134, %c0_135] : memref<16x128xf32, #tpu.memory_space<vmem>>, vector<16x128xf32>
    %cst_136 = arith.constant dense<0.000000e+00> : vector<8x128xf32>
    %473 = tpu.matmul %468, %472, %cst_136 {dimension_numbers = #tpu.dot_dimension_numbers<[1], [0], [0], [1], [0, 0, 1, 1], [], []>} : vector<8x16xf32>, vector<16x128xf32>, vector<8x128xf32> -> vector<8x128xf32>
    %474 = arith.addf %471, %473 : vector<8x128xf32>
    %475 = vector.broadcast %4 : vector<1x128xf32> to vector<8x128xf32>
    %476 = arith.addf %474, %475 : vector<8x128xf32>
    %477 = math.tanh %476 : vector<8x128xf32>
    %478 = arith.negf %476 : vector<8x128xf32>
    %479 = math.exp %478 : vector<8x128xf32>
    %cst_137 = arith.constant 1.000000e+00 : f32
    %480 = vector.broadcast %cst_137 : f32 to vector<8x128xf32>
    %481 = arith.addf %480, %479 : vector<8x128xf32>
    %482 = arith.divf %480, %481 : vector<8x128xf32>
    %483 = arith.select %11, %477, %482 : vector<8x128xi1>, vector<8x128xf32>
    %484 = vector.extract_strided_slice %483 {offsets = [0, 0], sizes = [8, 32], strides = [1, 1]} : vector<8x128xf32> to vector<8x32xf32>
    %485 = vector.extract_strided_slice %483 {offsets = [0, 32], sizes = [8, 32], strides = [1, 1]} : vector<8x128xf32> to vector<8x32xf32>
    %486 = vector.extract_strided_slice %483 {offsets = [0, 64], sizes = [8, 32], strides = [1, 1]} : vector<8x128xf32> to vector<8x32xf32>
    %487 = vector.extract_strided_slice %483 {offsets = [0, 96], sizes = [8, 32], strides = [1, 1]} : vector<8x128xf32> to vector<8x32xf32>
    %488 = arith.mulf %485, %393 : vector<8x32xf32>
    %489 = arith.mulf %484, %486 : vector<8x32xf32>
    %490 = arith.addf %488, %489 : vector<8x32xf32>
    %491 = math.tanh %490 : vector<8x32xf32>
    %492 = arith.mulf %487, %491 : vector<8x32xf32>
    %c8_i32_138 = arith.constant 8 : i32
    %493 = arith.muli %c4_i32, %c8_i32_138 : i32
    %494 = tpu.assume_multiple %493, 8 : i32
    %495 = arith.index_cast %494 : i32 to index
    %c0_139 = arith.constant 0 : index
    %496 = vector.load %arg16[%495, %c0_139] : memref<56x32xf32, #tpu.memory_space<vmem>>, vector<8x32xf32>
    tpu.vector_store %arg16[%495, %c0_139], %492 {strides = array<i32>} : memref<56x32xf32, #tpu.memory_space<vmem>>, vector<8x32xf32>,
    %497 = arith.index_cast %494 : i32 to index
    %c0_140 = arith.constant 0 : index
    %498 = vector.load %arg17[%497, %c0_140] : memref<56x128xf32, #tpu.memory_space<vmem>>, vector<8x128xf32>
    tpu.vector_store %arg17[%497, %c0_140], %458 {strides = array<i32>} : memref<56x128xf32, #tpu.memory_space<vmem>>, vector<8x128xf32>,
    %c5_i32 = arith.constant 5 : i32
    %c0_141 = arith.constant 0 : index
    %c0_142 = arith.constant 0 : index
    %499 = vector.load %arg5[%c0_141, %c0_142] : memref<32x256xf32, #tpu.memory_space<vmem>>, vector<32x256xf32>
    %cst_143 = arith.constant dense<0.000000e+00> : vector<8x256xf32>
    %500 = tpu.matmul %492, %499, %cst_143 {dimension_numbers = #tpu.dot_dimension_numbers<[1], [0], [0], [1], [0, 0, 1, 1], [], []>} : vector<8x32xf32>, vector<32x256xf32>, vector<8x256xf32> -> vector<8x256xf32>
    %501 = arith.index_cast %c5_i32 : i32 to index
    %c0_144 = arith.constant 0 : index
    %c0_145 = arith.constant 0 : index
    %502 = vector.load %arg1[%501, %c0_144, %c0_145] : memref<7x8x128xf32, #tpu.memory_space<vmem>>, vector<1x8x128xf32>
    %503 = vector.shape_cast %502 : vector<1x8x128xf32> to vector<8x128xf32>
    %504 = vector.extract_strided_slice %500 {offsets = [0, 0], sizes = [8, 128], strides = [1, 1]} : vector<8x256xf32> to vector<8x128xf32>
    %505 = arith.addf %503, %504 : vector<8x128xf32>
    %506 = arith.addf %505, %429 : vector<8x128xf32>
    %507 = math.tanh %506 : vector<8x128xf32>
    %508 = arith.negf %506 : vector<8x128xf32>
    %509 = math.exp %508 : vector<8x128xf32>
    %cst_146 = arith.constant 1.000000e+00 : f32
    %510 = vector.broadcast %cst_146 : f32 to vector<8x128xf32>
    %511 = arith.addf %510, %509 : vector<8x128xf32>
    %512 = arith.divf %510, %511 : vector<8x128xf32>
    %513 = arith.select %11, %507, %512 : vector<8x128xi1>, vector<8x128xf32>
    %514 = vector.extract_strided_slice %513 {offsets = [0, 0], sizes = [8, 32], strides = [1, 1]} : vector<8x128xf32> to vector<8x32xf32>
    %515 = vector.extract_strided_slice %513 {offsets = [0, 32], sizes = [8, 32], strides = [1, 1]} : vector<8x128xf32> to vector<8x32xf32>
    %516 = vector.extract_strided_slice %513 {offsets = [0, 64], sizes = [8, 32], strides = [1, 1]} : vector<8x128xf32> to vector<8x32xf32>
    %517 = vector.extract_strided_slice %513 {offsets = [0, 96], sizes = [8, 32], strides = [1, 1]} : vector<8x128xf32> to vector<8x32xf32>
    %518 = arith.mulf %515, %423 : vector<8x32xf32>
    %519 = arith.mulf %514, %516 : vector<8x32xf32>
    %520 = arith.addf %518, %519 : vector<8x32xf32>
    %521 = math.tanh %520 : vector<8x32xf32>
    %522 = arith.mulf %517, %521 : vector<8x32xf32>
    %c0_147 = arith.constant 0 : index
    %c0_148 = arith.constant 0 : index
    %523 = vector.load %arg6[%c0_147, %c0_148] : memref<32x512xf32, #tpu.memory_space<vmem>>, vector<32x512xf32>
    %cst_149 = arith.constant dense<0.000000e+00> : vector<8x512xf32>
    %524 = tpu.matmul %522, %523, %cst_149 {dimension_numbers = #tpu.dot_dimension_numbers<[1], [0], [0], [1], [0, 0, 1, 1], [], []>} : vector<8x32xf32>, vector<32x512xf32>, vector<8x512xf32> -> vector<8x512xf32>
    %525 = vector.extract_strided_slice %524 {offsets = [0, 0], sizes = [8, 128], strides = [1, 1]} : vector<8x512xf32> to vector<8x128xf32>
    %526 = vector.extract_strided_slice %524 {offsets = [0, 128], sizes = [8, 128], strides = [1, 1]} : vector<8x512xf32> to vector<8x128xf32>
    %527 = vector.extract_strided_slice %524 {offsets = [0, 256], sizes = [8, 128], strides = [1, 1]} : vector<8x512xf32> to vector<8x128xf32>
    %528 = vector.extract_strided_slice %524 {offsets = [0, 384], sizes = [8, 128], strides = [1, 1]} : vector<8x512xf32> to vector<8x128xf32>
    %529 = vector.shape_cast %527 : vector<8x128xf32> to vector<8x1x128xf32>
    %530 = vector.broadcast %529 : vector<8x1x128xf32> to vector<8x8x128xf32>
    %531 = arith.addf %1, %530 : vector<8x8x128xf32>
    %532 = math.tanh %531 : vector<8x8x128xf32>
    %533 = vector.broadcast %3 : vector<1x1x128xf32> to vector<8x8x128xf32>
    %534 = arith.mulf %532, %533 : vector<8x8x128xf32>
    %cst_150 = arith.constant dense<0.000000e+00> : vector<8x8xf32>
    %535 = vector.multi_reduction <add>, %534, %cst_150 [2] : vector<8x8x128xf32> to vector<8x8xf32>
    %cst_151 = arith.constant dense<0xFF800000> : vector<8xf32>
    %536 = vector.multi_reduction <maximumf>, %535, %cst_151 [1] : vector<8x8xf32> to vector<8xf32>
    %537 = vector.shape_cast %536 : vector<8xf32> to vector<8x1xf32>
    %538 = vector.broadcast %537 : vector<8x1xf32> to vector<8x8xf32>
    %539 = arith.subf %535, %538 : vector<8x8xf32>
    %540 = math.exp %539 : vector<8x8xf32>
    %cst_152 = arith.constant dense<0.000000e+00> : vector<8xf32>
    %541 = vector.multi_reduction <add>, %540, %cst_152 [1] : vector<8x8xf32> to vector<8xf32>
    %542 = vector.shape_cast %541 : vector<8xf32> to vector<8x1xf32>
    %543 = vector.broadcast %542 : vector<8x1xf32> to vector<8x8xf32>
    %544 = arith.divf %540, %543 : vector<8x8xf32>
    %545 = vector.shape_cast %544 : vector<8x8xf32> to vector<8x8x1xf32>
    %546 = vector.broadcast %545 : vector<8x8x1xf32> to vector<8x8x32xf32>
    %547 = arith.mulf %546, %0 : vector<8x8x32xf32>
    %cst_153 = arith.constant dense<0.000000e+00> : vector<8x32xf32>
    %548 = vector.multi_reduction <add>, %547, %cst_153 [1] : vector<8x8x32xf32> to vector<8x32xf32>
    %c0_154 = arith.constant 0 : index
    %c0_155 = arith.constant 0 : index
    %549 = vector.load %arg7[%c0_154, %c0_155] : memref<32x256xf32, #tpu.memory_space<vmem>>, vector<32x256xf32>
    %cst_156 = arith.constant dense<0.000000e+00> : vector<8x256xf32>
    %550 = tpu.matmul %548, %549, %cst_156 {dimension_numbers = #tpu.dot_dimension_numbers<[1], [0], [0], [1], [0, 0, 1, 1], [], []>} : vector<8x32xf32>, vector<32x256xf32>, vector<8x256xf32> -> vector<8x256xf32>
    %551 = vector.extract_strided_slice %550 {offsets = [0, 0], sizes = [8, 128], strides = [1, 1]} : vector<8x256xf32> to vector<8x128xf32>
    %552 = vector.extract_strided_slice %550 {offsets = [0, 128], sizes = [8, 128], strides = [1, 1]} : vector<8x256xf32> to vector<8x128xf32>
    %553 = arith.addf %528, %552 : vector<8x128xf32>
    %554 = vector.broadcast %5 : vector<1x128xf32> to vector<8x128xf32>
    %555 = arith.addf %553, %554 : vector<8x128xf32>
    %556 = vector.extract_strided_slice %555 {offsets = [0, 0], sizes = [8, 16], strides = [1, 1]} : vector<8x128xf32> to vector<8x16xf32>
    %557 = vector.extract_strided_slice %555 {offsets = [0, 16], sizes = [8, 16], strides = [1, 1]} : vector<8x128xf32> to vector<8x16xf32>
    %cst_157 = arith.constant 5.000000e-01 : f32
    %558 = vector.broadcast %cst_157 : f32 to vector<8x16xf32>
    %559 = arith.mulf %558, %557 : vector<8x16xf32>
    %560 = math.exp %559 : vector<8x16xf32>
    %561 = arith.index_cast %c5_i32 : i32 to index
    %c0_158 = arith.constant 0 : index
    %c0_159 = arith.constant 0 : index
    %562 = vector.load %arg3[%561, %c0_158, %c0_159] : memref<7x8x16xf32, #tpu.memory_space<vmem>>, vector<1x8x16xf32>
    %563 = vector.shape_cast %562 : vector<1x8x16xf32> to vector<8x16xf32>
    %564 = arith.mulf %560, %563 : vector<8x16xf32>
    %565 = arith.addf %556, %564 : vector<8x16xf32>
    %566 = arith.addf %551, %525 : vector<8x128xf32>
    %567 = vector.extract_strided_slice %500 {offsets = [0, 128], sizes = [8, 128], strides = [1, 1]} : vector<8x256xf32> to vector<8x128xf32>
    %568 = arith.addf %566, %567 : vector<8x128xf32>
    %c0_160 = arith.constant 0 : index
    %c0_161 = arith.constant 0 : index
    %569 = vector.load %arg8[%c0_160, %c0_161] : memref<16x128xf32, #tpu.memory_space<vmem>>, vector<16x128xf32>
    %cst_162 = arith.constant dense<0.000000e+00> : vector<8x128xf32>
    %570 = tpu.matmul %565, %569, %cst_162 {dimension_numbers = #tpu.dot_dimension_numbers<[1], [0], [0], [1], [0, 0, 1, 1], [], []>} : vector<8x16xf32>, vector<16x128xf32>, vector<8x128xf32> -> vector<8x128xf32>
    %571 = arith.addf %568, %570 : vector<8x128xf32>
    %572 = vector.broadcast %4 : vector<1x128xf32> to vector<8x128xf32>
    %573 = arith.addf %571, %572 : vector<8x128xf32>
    %574 = math.tanh %573 : vector<8x128xf32>
    %575 = arith.negf %573 : vector<8x128xf32>
    %576 = math.exp %575 : vector<8x128xf32>
    %cst_163 = arith.constant 1.000000e+00 : f32
    %577 = vector.broadcast %cst_163 : f32 to vector<8x128xf32>
    %578 = arith.addf %577, %576 : vector<8x128xf32>
    %579 = arith.divf %577, %578 : vector<8x128xf32>
    %580 = arith.select %11, %574, %579 : vector<8x128xi1>, vector<8x128xf32>
    %581 = vector.extract_strided_slice %580 {offsets = [0, 0], sizes = [8, 32], strides = [1, 1]} : vector<8x128xf32> to vector<8x32xf32>
    %582 = vector.extract_strided_slice %580 {offsets = [0, 32], sizes = [8, 32], strides = [1, 1]} : vector<8x128xf32> to vector<8x32xf32>
    %583 = vector.extract_strided_slice %580 {offsets = [0, 64], sizes = [8, 32], strides = [1, 1]} : vector<8x128xf32> to vector<8x32xf32>
    %584 = vector.extract_strided_slice %580 {offsets = [0, 96], sizes = [8, 32], strides = [1, 1]} : vector<8x128xf32> to vector<8x32xf32>
    %585 = arith.mulf %582, %490 : vector<8x32xf32>
    %586 = arith.mulf %581, %583 : vector<8x32xf32>
    %587 = arith.addf %585, %586 : vector<8x32xf32>
    %588 = math.tanh %587 : vector<8x32xf32>
    %589 = arith.mulf %584, %588 : vector<8x32xf32>
    %c8_i32_164 = arith.constant 8 : i32
    %590 = arith.muli %c5_i32, %c8_i32_164 : i32
    %591 = tpu.assume_multiple %590, 8 : i32
    %592 = arith.index_cast %591 : i32 to index
    %c0_165 = arith.constant 0 : index
    %593 = vector.load %arg16[%592, %c0_165] : memref<56x32xf32, #tpu.memory_space<vmem>>, vector<8x32xf32>
    tpu.vector_store %arg16[%592, %c0_165], %589 {strides = array<i32>} : memref<56x32xf32, #tpu.memory_space<vmem>>, vector<8x32xf32>,
    %594 = arith.index_cast %591 : i32 to index
    %c0_166 = arith.constant 0 : index
    %595 = vector.load %arg17[%594, %c0_166] : memref<56x128xf32, #tpu.memory_space<vmem>>, vector<8x128xf32>
    tpu.vector_store %arg17[%594, %c0_166], %555 {strides = array<i32>} : memref<56x128xf32, #tpu.memory_space<vmem>>, vector<8x128xf32>,
    %c6_i32 = arith.constant 6 : i32
    %c0_167 = arith.constant 0 : index
    %c0_168 = arith.constant 0 : index
    %596 = vector.load %arg5[%c0_167, %c0_168] : memref<32x256xf32, #tpu.memory_space<vmem>>, vector<32x256xf32>
    %cst_169 = arith.constant dense<0.000000e+00> : vector<8x256xf32>
    %597 = tpu.matmul %589, %596, %cst_169 {dimension_numbers = #tpu.dot_dimension_numbers<[1], [0], [0], [1], [0, 0, 1, 1], [], []>} : vector<8x32xf32>, vector<32x256xf32>, vector<8x256xf32> -> vector<8x256xf32>
    %598 = arith.index_cast %c6_i32 : i32 to index
    %c0_170 = arith.constant 0 : index
    %c0_171 = arith.constant 0 : index
    %599 = vector.load %arg1[%598, %c0_170, %c0_171] : memref<7x8x128xf32, #tpu.memory_space<vmem>>, vector<1x8x128xf32>
    %600 = vector.shape_cast %599 : vector<1x8x128xf32> to vector<8x128xf32>
    %601 = vector.extract_strided_slice %597 {offsets = [0, 0], sizes = [8, 128], strides = [1, 1]} : vector<8x256xf32> to vector<8x128xf32>
    %602 = arith.addf %600, %601 : vector<8x128xf32>
    %603 = arith.addf %602, %526 : vector<8x128xf32>
    %604 = math.tanh %603 : vector<8x128xf32>
    %605 = arith.negf %603 : vector<8x128xf32>
    %606 = math.exp %605 : vector<8x128xf32>
    %cst_172 = arith.constant 1.000000e+00 : f32
    %607 = vector.broadcast %cst_172 : f32 to vector<8x128xf32>
    %608 = arith.addf %607, %606 : vector<8x128xf32>
    %609 = arith.divf %607, %608 : vector<8x128xf32>
    %610 = arith.select %11, %604, %609 : vector<8x128xi1>, vector<8x128xf32>
    %611 = vector.extract_strided_slice %610 {offsets = [0, 0], sizes = [8, 32], strides = [1, 1]} : vector<8x128xf32> to vector<8x32xf32>
    %612 = vector.extract_strided_slice %610 {offsets = [0, 32], sizes = [8, 32], strides = [1, 1]} : vector<8x128xf32> to vector<8x32xf32>
    %613 = vector.extract_strided_slice %610 {offsets = [0, 64], sizes = [8, 32], strides = [1, 1]} : vector<8x128xf32> to vector<8x32xf32>
    %614 = vector.extract_strided_slice %610 {offsets = [0, 96], sizes = [8, 32], strides = [1, 1]} : vector<8x128xf32> to vector<8x32xf32>
    %615 = arith.mulf %612, %520 : vector<8x32xf32>
    %616 = arith.mulf %611, %613 : vector<8x32xf32>
    %617 = arith.addf %615, %616 : vector<8x32xf32>
    %618 = math.tanh %617 : vector<8x32xf32>
    %619 = arith.mulf %614, %618 : vector<8x32xf32>
    %c0_173 = arith.constant 0 : index
    %c0_174 = arith.constant 0 : index
    %620 = vector.load %arg6[%c0_173, %c0_174] : memref<32x512xf32, #tpu.memory_space<vmem>>, vector<32x512xf32>
    %cst_175 = arith.constant dense<0.000000e+00> : vector<8x512xf32>
    %621 = tpu.matmul %619, %620, %cst_175 {dimension_numbers = #tpu.dot_dimension_numbers<[1], [0], [0], [1], [0, 0, 1, 1], [], []>} : vector<8x32xf32>, vector<32x512xf32>, vector<8x512xf32> -> vector<8x512xf32>
    %622 = vector.extract_strided_slice %621 {offsets = [0, 0], sizes = [8, 128], strides = [1, 1]} : vector<8x512xf32> to vector<8x128xf32>
    %623 = vector.extract_strided_slice %621 {offsets = [0, 128], sizes = [8, 128], strides = [1, 1]} : vector<8x512xf32> to vector<8x128xf32>
    %624 = vector.extract_strided_slice %621 {offsets = [0, 256], sizes = [8, 128], strides = [1, 1]} : vector<8x512xf32> to vector<8x128xf32>
    %625 = vector.extract_strided_slice %621 {offsets = [0, 384], sizes = [8, 128], strides = [1, 1]} : vector<8x512xf32> to vector<8x128xf32>
    %626 = vector.shape_cast %624 : vector<8x128xf32> to vector<8x1x128xf32>
    %627 = vector.broadcast %626 : vector<8x1x128xf32> to vector<8x8x128xf32>
    %628 = arith.addf %1, %627 : vector<8x8x128xf32>
    %629 = math.tanh %628 : vector<8x8x128xf32>
    %630 = vector.broadcast %3 : vector<1x1x128xf32> to vector<8x8x128xf32>
    %631 = arith.mulf %629, %630 : vector<8x8x128xf32>
    %cst_176 = arith.constant dense<0.000000e+00> : vector<8x8xf32>
    %632 = vector.multi_reduction <add>, %631, %cst_176 [2] : vector<8x8x128xf32> to vector<8x8xf32>
    %cst_177 = arith.constant dense<0xFF800000> : vector<8xf32>
    %633 = vector.multi_reduction <maximumf>, %632, %cst_177 [1] : vector<8x8xf32> to vector<8xf32>
    %634 = vector.shape_cast %633 : vector<8xf32> to vector<8x1xf32>
    %635 = vector.broadcast %634 : vector<8x1xf32> to vector<8x8xf32>
    %636 = arith.subf %632, %635 : vector<8x8xf32>
    %637 = math.exp %636 : vector<8x8xf32>
    %cst_178 = arith.constant dense<0.000000e+00> : vector<8xf32>
    %638 = vector.multi_reduction <add>, %637, %cst_178 [1] : vector<8x8xf32> to vector<8xf32>
    %639 = vector.shape_cast %638 : vector<8xf32> to vector<8x1xf32>
    %640 = vector.broadcast %639 : vector<8x1xf32> to vector<8x8xf32>
    %641 = arith.divf %637, %640 : vector<8x8xf32>
    %642 = vector.shape_cast %641 : vector<8x8xf32> to vector<8x8x1xf32>
    %643 = vector.broadcast %642 : vector<8x8x1xf32> to vector<8x8x32xf32>
    %644 = arith.mulf %643, %0 : vector<8x8x32xf32>
    %cst_179 = arith.constant dense<0.000000e+00> : vector<8x32xf32>
    %645 = vector.multi_reduction <add>, %644, %cst_179 [1] : vector<8x8x32xf32> to vector<8x32xf32>
    %c0_180 = arith.constant 0 : index
    %c0_181 = arith.constant 0 : index
    %646 = vector.load %arg7[%c0_180, %c0_181] : memref<32x256xf32, #tpu.memory_space<vmem>>, vector<32x256xf32>
    %cst_182 = arith.constant dense<0.000000e+00> : vector<8x256xf32>
    %647 = tpu.matmul %645, %646, %cst_182 {dimension_numbers = #tpu.dot_dimension_numbers<[1], [0], [0], [1], [0, 0, 1, 1], [], []>} : vector<8x32xf32>, vector<32x256xf32>, vector<8x256xf32> -> vector<8x256xf32>
    %648 = vector.extract_strided_slice %647 {offsets = [0, 0], sizes = [8, 128], strides = [1, 1]} : vector<8x256xf32> to vector<8x128xf32>
    %649 = vector.extract_strided_slice %647 {offsets = [0, 128], sizes = [8, 128], strides = [1, 1]} : vector<8x256xf32> to vector<8x128xf32>
    %650 = arith.addf %625, %649 : vector<8x128xf32>
    %651 = vector.broadcast %5 : vector<1x128xf32> to vector<8x128xf32>
    %652 = arith.addf %650, %651 : vector<8x128xf32>
    %653 = vector.extract_strided_slice %652 {offsets = [0, 0], sizes = [8, 16], strides = [1, 1]} : vector<8x128xf32> to vector<8x16xf32>
    %654 = vector.extract_strided_slice %652 {offsets = [0, 16], sizes = [8, 16], strides = [1, 1]} : vector<8x128xf32> to vector<8x16xf32>
    %cst_183 = arith.constant 5.000000e-01 : f32
    %655 = vector.broadcast %cst_183 : f32 to vector<8x16xf32>
    %656 = arith.mulf %655, %654 : vector<8x16xf32>
    %657 = math.exp %656 : vector<8x16xf32>
    %658 = arith.index_cast %c6_i32 : i32 to index
    %c0_184 = arith.constant 0 : index
    %c0_185 = arith.constant 0 : index
    %659 = vector.load %arg3[%658, %c0_184, %c0_185] : memref<7x8x16xf32, #tpu.memory_space<vmem>>, vector<1x8x16xf32>
    %660 = vector.shape_cast %659 : vector<1x8x16xf32> to vector<8x16xf32>
    %661 = arith.mulf %657, %660 : vector<8x16xf32>
    %662 = arith.addf %653, %661 : vector<8x16xf32>
    %663 = arith.addf %648, %622 : vector<8x128xf32>
    %664 = vector.extract_strided_slice %597 {offsets = [0, 128], sizes = [8, 128], strides = [1, 1]} : vector<8x256xf32> to vector<8x128xf32>
    %665 = arith.addf %663, %664 : vector<8x128xf32>
    %c0_186 = arith.constant 0 : index
    %c0_187 = arith.constant 0 : index
    %666 = vector.load %arg8[%c0_186, %c0_187] : memref<16x128xf32, #tpu.memory_space<vmem>>, vector<16x128xf32>
    %cst_188 = arith.constant dense<0.000000e+00> : vector<8x128xf32>
    %667 = tpu.matmul %662, %666, %cst_188 {dimension_numbers = #tpu.dot_dimension_numbers<[1], [0], [0], [1], [0, 0, 1, 1], [], []>} : vector<8x16xf32>, vector<16x128xf32>, vector<8x128xf32> -> vector<8x128xf32>
    %668 = arith.addf %665, %667 : vector<8x128xf32>
    %669 = vector.broadcast %4 : vector<1x128xf32> to vector<8x128xf32>
    %670 = arith.addf %668, %669 : vector<8x128xf32>
    %671 = math.tanh %670 : vector<8x128xf32>
    %672 = arith.negf %670 : vector<8x128xf32>
    %673 = math.exp %672 : vector<8x128xf32>
    %cst_189 = arith.constant 1.000000e+00 : f32
    %674 = vector.broadcast %cst_189 : f32 to vector<8x128xf32>
    %675 = arith.addf %674, %673 : vector<8x128xf32>
    %676 = arith.divf %674, %675 : vector<8x128xf32>
    %677 = arith.select %11, %671, %676 : vector<8x128xi1>, vector<8x128xf32>
    %678 = vector.extract_strided_slice %677 {offsets = [0, 0], sizes = [8, 32], strides = [1, 1]} : vector<8x128xf32> to vector<8x32xf32>
    %679 = vector.extract_strided_slice %677 {offsets = [0, 32], sizes = [8, 32], strides = [1, 1]} : vector<8x128xf32> to vector<8x32xf32>
    %680 = vector.extract_strided_slice %677 {offsets = [0, 64], sizes = [8, 32], strides = [1, 1]} : vector<8x128xf32> to vector<8x32xf32>
    %681 = vector.extract_strided_slice %677 {offsets = [0, 96], sizes = [8, 32], strides = [1, 1]} : vector<8x128xf32> to vector<8x32xf32>
    %682 = arith.mulf %679, %587 : vector<8x32xf32>
    %683 = arith.mulf %678, %680 : vector<8x32xf32>
    %684 = arith.addf %682, %683 : vector<8x32xf32>
    %685 = math.tanh %684 : vector<8x32xf32>
    %686 = arith.mulf %681, %685 : vector<8x32xf32>
    %c8_i32_190 = arith.constant 8 : i32
    %687 = arith.muli %c6_i32, %c8_i32_190 : i32
    %688 = tpu.assume_multiple %687, 8 : i32
    %689 = arith.index_cast %688 : i32 to index
    %c0_191 = arith.constant 0 : index
    %690 = vector.load %arg16[%689, %c0_191] : memref<56x32xf32, #tpu.memory_space<vmem>>, vector<8x32xf32>
    tpu.vector_store %arg16[%689, %c0_191], %686 {strides = array<i32>} : memref<56x32xf32, #tpu.memory_space<vmem>>, vector<8x32xf32>,
    %691 = arith.index_cast %688 : i32 to index
    %c0_192 = arith.constant 0 : index
    %692 = vector.load %arg17[%691, %c0_192] : memref<56x128xf32, #tpu.memory_space<vmem>>, vector<8x128xf32>
    tpu.vector_store %arg17[%691, %c0_192], %652 {strides = array<i32>} : memref<56x128xf32, #tpu.memory_space<vmem>>, vector<8x128xf32>,
    %c7_i32 = arith.constant 7 : i32
    %c0_193 = arith.constant 0 : index
    %c0_194 = arith.constant 0 : index
    %693 = vector.load %arg16[%c0_193, %c0_194] : memref<56x32xf32, #tpu.memory_space<vmem>>, vector<56x32xf32>
    %c0_195 = arith.constant 0 : index
    %c0_196 = arith.constant 0 : index
    %694 = vector.load %arg12[%c0_195, %c0_196] : memref<32x128xf32, #tpu.memory_space<vmem>>, vector<32x128xf32>
    %cst_197 = arith.constant dense<0.000000e+00> : vector<56x128xf32>
    %695 = tpu.matmul %693, %694, %cst_197 {dimension_numbers = #tpu.dot_dimension_numbers<[1], [0], [0], [1], [0, 0, 1, 1], [], []>} : vector<56x32xf32>, vector<32x128xf32>, vector<56x128xf32> -> vector<56x128xf32>
    %c0_198 = arith.constant 0 : index
    %c0_199 = arith.constant 0 : index
    %696 = vector.load %arg13[%c0_198, %c0_199] : memref<1x128xf32, #tpu.memory_space<vmem>>, vector<1x128xf32>
    %697 = vector.broadcast %696 : vector<1x128xf32> to vector<56x128xf32>
    %698 = arith.addf %695, %697 : vector<56x128xf32>
    %c0_200 = arith.constant 0 : index
    %c0_201 = arith.constant 0 : index
    %699 = vector.load %arg14[%c0_200, %c0_201] : memref<56x128xf32, #tpu.memory_space<vmem>>, vector<56x128xf32>
    tpu.vector_store %arg14[%c0_200, %c0_201], %698 {strides = array<i32>} : memref<56x128xf32, #tpu.memory_space<vmem>>, vector<56x128xf32>,
    %c0_202 = arith.constant 0 : index
    %c0_203 = arith.constant 0 : index
    %700 = vector.load %arg17[%c0_202, %c0_203] : memref<56x128xf32, #tpu.memory_space<vmem>>, vector<56x128xf32>
    %701 = vector.extract_strided_slice %700 {offsets = [0, 0], sizes = [56, 16], strides = [1, 1]} : vector<56x128xf32> to vector<56x16xf32>
    %702 = vector.extract_strided_slice %700 {offsets = [0, 16], sizes = [56, 16], strides = [1, 1]} : vector<56x128xf32> to vector<56x16xf32>
    %cst_204 = arith.constant 1.000000e+00 : f32
    %703 = vector.broadcast %cst_204 : f32 to vector<56x16xf32>
    %704 = arith.addf %703, %702 : vector<56x16xf32>
    %705 = arith.mulf %701, %701 : vector<56x16xf32>
    %706 = arith.subf %704, %705 : vector<56x16xf32>
    %707 = math.exp %702 : vector<56x16xf32>
    %708 = arith.subf %706, %707 : vector<56x16xf32>
    %cst_205 = arith.constant -5.000000e-01 : f32
    %709 = vector.broadcast %cst_205 : f32 to vector<56x16xf32>
    %710 = arith.mulf %709, %708 : vector<56x16xf32>
    %cst_206 = arith.constant 0.000000e+00 : f32
    %711 = vector.broadcast %cst_206 : f32 to vector<8x16xf32>
    %c0_207 = arith.constant 0 : index
    %c0_208 = arith.constant 0 : index
    %712 = vector.load %arg4[%c0_207, %c0_208] : memref<8x7xf32, #tpu.memory_space<vmem>>, vector<8x1xf32>
    %713 = vector.extract_strided_slice %710 {offsets = [0, 0], sizes = [8, 16], strides = [1, 1]} : vector<56x16xf32> to vector<8x16xf32>
    %714 = vector.broadcast %712 : vector<8x1xf32> to vector<8x16xf32>
    %715 = arith.mulf %714, %713 : vector<8x16xf32>
    %716 = arith.addf %711, %715 : vector<8x16xf32>
    %c0_209 = arith.constant 0 : index
    %c1 = arith.constant 1 : index
    %717 = vector.load %arg4[%c0_209, %c1] : memref<8x7xf32, #tpu.memory_space<vmem>>, vector<8x1xf32>
    %718 = vector.extract_strided_slice %710 {offsets = [8, 0], sizes = [8, 16], strides = [1, 1]} : vector<56x16xf32> to vector<8x16xf32>
    %719 = vector.broadcast %717 : vector<8x1xf32> to vector<8x16xf32>
    %720 = arith.mulf %719, %718 : vector<8x16xf32>
    %721 = arith.addf %716, %720 : vector<8x16xf32>
    %c0_210 = arith.constant 0 : index
    %c2 = arith.constant 2 : index
    %722 = vector.load %arg4[%c0_210, %c2] : memref<8x7xf32, #tpu.memory_space<vmem>>, vector<8x1xf32>
    %723 = vector.extract_strided_slice %710 {offsets = [16, 0], sizes = [8, 16], strides = [1, 1]} : vector<56x16xf32> to vector<8x16xf32>
    %724 = vector.broadcast %722 : vector<8x1xf32> to vector<8x16xf32>
    %725 = arith.mulf %724, %723 : vector<8x16xf32>
    %726 = arith.addf %721, %725 : vector<8x16xf32>
    %c0_211 = arith.constant 0 : index
    %c3 = arith.constant 3 : index
    %727 = vector.load %arg4[%c0_211, %c3] : memref<8x7xf32, #tpu.memory_space<vmem>>, vector<8x1xf32>
    %728 = vector.extract_strided_slice %710 {offsets = [24, 0], sizes = [8, 16], strides = [1, 1]} : vector<56x16xf32> to vector<8x16xf32>
    %729 = vector.broadcast %727 : vector<8x1xf32> to vector<8x16xf32>
    %730 = arith.mulf %729, %728 : vector<8x16xf32>
    %731 = arith.addf %726, %730 : vector<8x16xf32>
    %c0_212 = arith.constant 0 : index
    %c4 = arith.constant 4 : index
    %732 = vector.load %arg4[%c0_212, %c4] : memref<8x7xf32, #tpu.memory_space<vmem>>, vector<8x1xf32>
    %733 = vector.extract_strided_slice %710 {offsets = [32, 0], sizes = [8, 16], strides = [1, 1]} : vector<56x16xf32> to vector<8x16xf32>
    %734 = vector.broadcast %732 : vector<8x1xf32> to vector<8x16xf32>
    %735 = arith.mulf %734, %733 : vector<8x16xf32>
    %736 = arith.addf %731, %735 : vector<8x16xf32>
    %c0_213 = arith.constant 0 : index
    %c5 = arith.constant 5 : index
    %737 = vector.load %arg4[%c0_213, %c5] : memref<8x7xf32, #tpu.memory_space<vmem>>, vector<8x1xf32>
    %738 = vector.extract_strided_slice %710 {offsets = [40, 0], sizes = [8, 16], strides = [1, 1]} : vector<56x16xf32> to vector<8x16xf32>
    %739 = vector.broadcast %737 : vector<8x1xf32> to vector<8x16xf32>
    %740 = arith.mulf %739, %738 : vector<8x16xf32>
    %741 = arith.addf %736, %740 : vector<8x16xf32>
    %c0_214 = arith.constant 0 : index
    %c6 = arith.constant 6 : index
    %742 = vector.load %arg4[%c0_214, %c6] : memref<8x7xf32, #tpu.memory_space<vmem>>, vector<8x1xf32>
    %743 = vector.extract_strided_slice %710 {offsets = [48, 0], sizes = [8, 16], strides = [1, 1]} : vector<56x16xf32> to vector<8x16xf32>
    %744 = vector.broadcast %742 : vector<8x1xf32> to vector<8x16xf32>
    %745 = arith.mulf %744, %743 : vector<8x16xf32>
    %746 = arith.addf %741, %745 : vector<8x16xf32>
    %c0_215 = arith.constant 0 : index
    %c0_216 = arith.constant 0 : index
    %747 = vector.load %arg15[%c0_215, %c0_216] : memref<8x16xf32, #tpu.memory_space<vmem>>, vector<8x16xf32>
    tpu.vector_store %arg15[%c0_215, %c0_216], %746 {strides = array<i32>} : memref<8x16xf32, #tpu.memory_space<vmem>>, vector<8x16xf32>,
    return
  }
}

</mosaic_0001>

<bundles_post_ra>
// kernel: updown_captioner_forward.1
= control target key start
LH: loop header
LB: loop body
LE: loop exit
PB: predicated region body
PF: predicated region fallthrough
CT: control target
= control target key end

     0   :  { %v10687_v3 = vmov 0.0   ;;  %v68_v13 = vlaneseq  ;;  %s8238_s21 = smov 64   ;;  %s8239_s22 = smov 32   ;;  %vm81_vm3 = vcmask 261120   ;;  %v8240_v61 = vmov 1966171168   ;;  %s10671_s5 = inlined_call_operand.vmem [shape: f32[32,256], index: 5, kind: input, shape index: {}]   ;;  %s10672_s1 = inlined_call_operand.vmem [shape: f32[7,8,128], index: 1, kind: input, shape index: {}]   ;;  %s10673_s6 = inlined_call_operand.vmem [shape: f32[32,512], index: 6, kind: input, shape index: {}]   ;;  %s10674_s2 = inlined_call_operand.vmem [shape: f32[8,8,128], index: 2, kind: input, shape index: {}]   ;;  %s10675_s9 = inlined_call_operand.vmem [shape: f32[1,128], index: 9, kind: input, shape index: {}]   ;;  %s10676_s7 = inlined_call_operand.vmem [shape: f32[32,256], index: 7, kind: input, shape index: {}]   ;;  %s10677_s3 = inlined_call_operand.vmem [shape: f32[7,8,16], index: 3, kind: input, shape index: {}]   ;;  %s10678_s0 = inlined_call_operand.vmem [shape: f32[8,8,32], index: 0, kind: input, shape index: {}]   ;;  %s10679_s8 = inlined_call_operand.vmem [shape: f32[16,128], index: 8, kind: input, shape index: {}]   ;;  %s10680_s11 = inlined_call_operand.vmem [shape: f32[1,128], index: 11, kind: input, shape index: {}]   ;;  %s10681_s10 = inlined_call_operand.vmem [shape: f32[1,128], index: 10, kind: input, shape index: {}]   ;;  %s10682_s12 = inlined_call_operand.vmem [shape: f32[32,128], index: 12, kind: input, shape index: {}]   ;;  %s10683_s13 = inlined_call_operand.vmem [shape: f32[1,128], index: 13, kind: input, shape index: {}]   ;;  %s10684_s14 = inlined_call_operand.vmem [shape: f32[56,128], index: 14, kind: output, shape index: {0}]   ;;  %s10685_s4 = inlined_call_operand.vmem [shape: f32[8,7], index: 4, kind: input, shape index: {}]   ;;  %s10686_s15 = inlined_call_operand.vmem [shape: f32[8,16], index: 15, kind: output, shape index: {1}]  }
   0x1   :  { %v74_v0 = vld [vmem:[%s10671_s5 + $0x8] sm:$0xff]  ;;  %v76_v1 = vld [vmem:[%s10671_s5 + $0x18] sm:$0xff]  ;;  %v73_v2 = vld [vmem:[%s10671_s5] sm:$0xff]  ;;  %149 = vmatprep.mubr.f32.mxu0 %v10687_v3  ;;  %269 = vmatprep.mubr.f32.mxu1 %v10687_v3  ;;  %v350_v62 = vunpack.c.l.s4 %v8240_v61  ;;  %vm523_vm4 = vcmask 1041409   ;;  %vm525_vm5 = vcmask 1042434   ;;  %vm527_vm6 = vcmask 1043459  }
   0x2   :  { %v8343_v4 = vpack.c.bf16 %v76_v1, %v74_v0  ;;  %v75_v5 = vld [vmem:[%s10671_s5 + $0x10] sm:$0xff]  ;;  %v78_v6 = vld [vmem:[%s10671_s5 + $0x28] sm:$0xff]  ;;  %v80_v7 = vld [vmem:[%s10671_s5 + $0x38] sm:$0xff]  ;;  %v69_v14 = vand.u32 127, %v68_v13  ;;  %v8372_v15 = vshrl.u32 %v68_v13, 7  ;;  %vm529_vm7 = vcmask 1044484  }
   0x3   :  { %v8354_v8 = vpack.c.bf16 %v75_v5, %v73_v2  ;;  %v8356_v9 = vpack.c.bf16 %v80_v7, %v78_v6  ;;  %v77_v10 = vld [vmem:[%s10671_s5 + $0x20] sm:$0xff]  ;;  %v79_v11 = vld [vmem:[%s10671_s5 + $0x30] sm:$0xff]  ;;  %v185_v33 = vld [vmem:[%s10673_s6 + $0x8] sm:$0xff]  ;;  %v351_v63 = vunpack.c.0.s8 %v350_v62  ;;  %vm531_vm8 = vcmask 1045509   ;;  %s8242_s26 = smov 16   ;;  %s8245_s24 = smov 112  }
   0x4   :  { %7426 = vmatprep.subr.bf16.mxu0 %v8343_v4  ;;  %v8366_v12 = vpack.c.bf16 %v79_v11, %v77_v10  ;;  %v8375_v16 = vsub.s32 %v69_v14, %v8372_v15  ;;  %v156_v17 = vld [vmem:[%s10672_s1] sm:$0xff]  ;;  %vm70_vm0 = vcmp.ge.s32.totalorder %v69_v14, 64  ;;  %vm71_vm1 = vcmp.lt.s32.totalorder %v69_v14, 96  ;;  %v189_v34 = vld [vmem:[%s10673_s6 + $0x28] sm:$0xff]  ;;  %v187_v35 = vld [vmem:[%s10673_s6 + $0x18] sm:$0xff] }
   0x5   :  { %7428 = vmatpush1.bf16.msra.mxu0 %v8354_v8  ;;  %vm8382_vm2 = vmand %vm70_vm0, %vm71_vm1  ;;  %v8402_v36 = vpack.c.bf16 %v189_v34, %v185_v33  ;;  %v191_v37 = vld [vmem:[%s10673_s6 + $0x38] sm:$0xff]  ;;  %v184_v38 = vld [vmem:[%s10673_s6] sm:$0xff]  ;;  %v8471_v0 = vsub.s32 %v351_v63, %v8372_v15  ;;  %v8481_v11 = vsub.s32 0, %v8372_v15  ;;  %vm533_vm9 = vcmask 1046534  }
   0x6   :  { %7430 = vmatprep.subr.bf16.mxu0 %v8356_v9  ;;  %10762 = vst [vmem:[#allocation4_spill] sm:$0xff] %v8375_v16  ;;  %v188_v39 = vld [vmem:[%s10673_s6 + $0x20] sm:$0xff]  ;;  %v8413_v40 = vpack.c.bf16 %v191_v37, %v187_v35  ;;  %v186_v42 = vld [vmem:[%s10673_s6 + $0x10] sm:$0xff]  ;;  %v193_v44 = vld [vmem:[%s10673_s6 + $0x48] sm:$0xff]  ;;  %vm535_vm10 = vcmask 1047559   ;;  %vm538_vm11 = vcmask 64512  }
   0x7   :  { %v8415_v41 = vpack.c.bf16 %v188_v39, %v184_v38  ;;  %v190_v43 = vld [vmem:[%s10673_s6 + $0x30] sm:$0xff]  ;;  %7434 = vmatprep.subr.bf16.mxu1 %v8402_v36  ;;  %v197_v46 = vld [vmem:[%s10673_s6 + $0x68] sm:$0xff]  ;;  %v195_v47 = vld [vmem:[%s10673_s6 + $0x58] sm:$0xff]  ;;  %vm8244_vm12 = vmmov 0   ;;  %vm965_vm13 = vcmask 130048   ;;  %v8248_v24 = vmov 4  }
   0x8   :  { %v8427_v45 = vpack.c.bf16 %v190_v43, %v186_v42  ;;  %v199_v48 = vld [vmem:[%s10673_s6 + $0x78] sm:$0xff]  ;;  %v8440_v49 = vpack.c.bf16 %v197_v46, %v193_v44  ;;  %v192_v51 = vld [vmem:[%s10673_s6 + $0x40] sm:$0xff]  ;;  %v194_v53 = vld [vmem:[%s10673_s6 + $0x50] sm:$0xff] }
   0x9   :  { %7432 = vmatpush1.bf16.msra.mxu0 %v8366_v12  ;;  %7436 = vmatpush1.bf16.msra.mxu1 %v8415_v41  ;;  %v8442_v50 = vpack.c.bf16 %v199_v48, %v195_v47  ;;  %v196_v52 = vld [vmem:[%s10673_s6 + $0x60] sm:$0xff]  ;;  %v198_v55 = vld [vmem:[%s10673_s6 + $0x70] sm:$0xff]  ;;  %v8516_v38 = vld [vmem:[%s10674_s2 + $0x18] sm:$0xff] }
   0xa   :  { %7442 = vmatprep.subr.bf16.mxu0 %v8413_v40  ;;  %v8454_v54 = vpack.c.bf16 %v196_v52, %v192_v51  ;;  %7438 = vmatprep.subr.bf16.mxu1 %v8440_v49  ;;  %v8461_v56 = vpack.c.bf16 %v198_v55, %v194_v53  ;;  %v8525_v46 = vld [vmem:[%s10674_s2 + $0x30] sm:$0xff]  ;;  %v8533_v53 = vld [vmem:[%s10674_s2 + $0x28] sm:$0xff] }
   0xc   :  { %150 = vmatmul.mubr.f32.vlgmr.msra.gmra.mrb[0].mxu0 %v10687_v3 }
   0xd   :  { %340 = vmatprep.mubr.f32.mxu0 %v10687_v3  ;;  %7444 = vmatpush1.bf16.msra.mxu0 %v8427_v45 }
   0xe   :  { %7446 = vmatprep.subr.bf16.mxu0 %v8442_v50  ;;  %7440 = vmatpush1.bf16.msra.mxu1 %v8454_v54 }
  0x11   :  { %7448 = vmatpush1.bf16.msra.mxu0 %v8461_v56 }
  0xdf   :  { %v151_v18 = vpop.f32.mrb[0].mxu0 }
  0xe0   :  { %v157_v19 = vadd.f32 %v156_v17, %v151_v18  ;;  %v8380_v20 = vpop.f32.mrb[1].mxu0  ;;  %v8488_v18 = vld [vmem:[%s10674_s2] sm:$0xff] }
  0xe2   :  { %v7244_v21 = vmul.f32 -1.442695, %v157_v19 }
  0xe4   :  { %7704 = vpow2.f32 %v7244_v21 }
  0xe5   :  { %7706 = vtanh.f32 %v157_v19 }
  0xee   :  { %v7705_v22 = vpop.eup %7704 }
  0xef   :  { %v163_v23 = vadd.f32 1.0, %v7705_v22  ;;  %v7707_v25 = vpop.eup %7706 }
  0xf1   :  { %7708 = vrcp.f32 %v163_v23 }
  0xfb   :  { %v7709_v26 = vpop.eup %7708 }
  0xfc   :  { %v166_v27 = vsel %vm8382_vm2, %v7707_v25, %v7709_v26  ;;  %v8496_v26 = vld [vmem:[%s10674_s2 + $0x8] sm:$0xff] }
  0xfd   :  { %169 = vrot.lane.b32.xlu0 %v166_v27, %s8238_s21  ;;  %v167_v30 = vmul.f32 0.0, %v166_v27 }
 0x16f   :  { %v170_v28 = vpop.permute.xlu0 %169 }
 0x170   :  { %v172_v29 = vmul.f32 %v170_v28, %v166_v27 }
 0x172   :  { %174 = vrot.lane.b32.xlu0 %v172_v29, %s8239_s22 }
 0x1e4   :  { %v175_v31 = vpop.permute.xlu0 %174 }
 0x1e5   :  { %v8390_v32 = vadd.f32 %v175_v31, %v167_v30  ;;  %v8507_v31 = vld [vmem:[%s10674_s2 + $0x20] sm:$0xff] }
 0x1e7   :  { %7710 = vtanh.f32 %v8390_v32 }
 0x1f1   :  { %v7711_v57 = vpop.eup %7710 }
 0x1f2   :  { %180 = vrot.lane.b32.xlu1 %v7711_v57, %s8238_s21 }
 0x264   :  { %v181_v58 = vpop.permute.xlu1 %180 }
 0x265   :  { %v183_v59 = vmul.f32 %v181_v58, %v166_v27  ;;  %v8501_v27 = vld [vmem:[%s10674_s2 + $0x10] sm:$0xff] }
 0x267   :  { %201 = vrot.lane.b32.xlu1 %v183_v59, %s8239_s22  ;;  %v8541_v59 = vld [vmem:[%s10674_s2 + $0x38] sm:$0xff] }
 0x2d9   :  { %v202_v60 = vpop.permute.xlu1 %201 }
 0x2da   :  { %7245 = vmatmul.mubr.msk.f32.vlgmr.msra.gmra.mrb[0].mxu1 %vm81_vm3, %v202_v60  ;;  %7246 = vmatmul.mubr.msk.f32.vlgmr.msra.gmra.mrb[2].mxu0 %vm81_vm3, %v202_v60  ;;  %v8546_v60 = vld [vmem:[%s10675_s9] ss:$0 sm:$0xff] }
 0x2db   :  { %932 = vmatprep.mubr.f32.mxu1 %v10687_v3 }
 0x3ad   :  { %v8473_v1 = vpop.f32.mrb[0].mxu1  ;;  %v342_v2 = vpop.f32.mrb[2].mxu0 }
 0x3ae   :  { %v348_v5 = vcombine.high %v342_v2, %v342_v2  ;;  %v355_v6 = vrot.slane %v342_v2, %v8471_v0  ;;  %v8476_v7 = vpop.f32.mrb[1].mxu1  ;;  %v8478_v10 = vpop.f32.mrb[3].mxu0 }
 0x3b0   :  { %v362_v13 = vrot.slane %v348_v5, %v8471_v0  ;;  %v363_v14 = vcombine.high %v355_v6, %v355_v6  ;;  %v371_v17 = vrot.slane %v355_v6, %v8471_v0 }
 0x3b2   :  { %v364_v19 = vcombine.high %v362_v13, %v362_v13  ;;  %v378_v21 = vrot.slane %v362_v13, %v8471_v0  ;;  %v385_v22 = vrot.slane %v363_v14, %v8471_v0  ;;  %v393_v23 = vcombine.high %v371_v17, %v371_v17 }
 0x3b3   :  { %v400_v25 = vrot.slane %v371_v17, %v8481_v11 }
 0x3b4   :  { %v394_v28 = vcombine.high %v378_v21, %v378_v21  ;;  %v395_v29 = vcombine.high %v385_v22, %v385_v22  ;;  %v404_v30 = vrot.slane %v385_v22, %v8481_v11  ;;  %v392_v33 = vrot.slane %v364_v19, %v8471_v0 }
 0x3b5   :  { %v408_v34 = vrot.slane %v393_v23, %v8481_v11  ;;  %v416_v35 = vrot.slane %v378_v21, %v8481_v11  ;;  %v437_v37 = vadd.f32 %v400_v25, %v8488_v18 }
 0x3b6   :  { %v412_v39 = vrot.slane %v395_v29, %v8481_v11  ;;  %v424_v42 = vrot.slane %v394_v28, %v8481_v11  ;;  %v438_v43 = vadd.f32 %v404_v30, %v8496_v26  ;;  %v396_v48 = vcombine.high %v392_v33, %v392_v33 }
 0x3b7   :  { %v439_v44 = vadd.f32 %v408_v34, %v8501_v27  ;;  %7712 = vtanh.f32 %v437_v37  ;;  %v441_v47 = vadd.f32 %v416_v35, %v8507_v31  ;;  %v420_v51 = vrot.slane %v392_v33, %v8481_v11 }
 0x3b8   :  { %v440_v52 = vadd.f32 %v412_v39, %v8516_v38  ;;  %7714 = vtanh.f32 %v438_v43  ;;  %v443_v55 = vadd.f32 %v424_v42, %v8525_v46  ;;  %v428_v57 = vrot.slane %v396_v48, %v8481_v11 }
 0x3b9   :  { %7716 = vtanh.f32 %v439_v44  ;;  %v442_v58 = vadd.f32 %v420_v51, %v8533_v53 }
 0x3ba   :  { %7718 = vtanh.f32 %v441_v47  ;;  %v444_v62 = vadd.f32 %v428_v57, %v8541_v59 }
 0x3bb   :  { %7720 = vtanh.f32 %v440_v52 }
 0x3bc   :  { %7722 = vtanh.f32 %v443_v55 }
 0x3bd   :  { %7724 = vtanh.f32 %v442_v58 }
 0x3be   :  { %7726 = vtanh.f32 %v444_v62 }
 0x3c1   :  { %v7713_v61 = vpop.eup %7712 }
 0x3c2   :  { %v459_v63 = vmul.f32 %v7713_v61, %v8546_v60  ;;  %v7715_v2 = vpop.eup %7714 }
 0x3c3   :  { %v7717_v5 = vpop.eup %7716  ;;  %v460_v6 = vmul.f32 %v7715_v2, %v8546_v60 }
 0x3c4   :  { %467 = vadd.xlane.f32.xlu0 %v459_v63  ;;  %v7719_v13 = vpop.eup %7718  ;;  %v461_v14 = vmul.f32 %v7717_v5, %v8546_v60 }
 0x3c5   :  { %469 = vadd.xlane.f32.xlu1 %v460_v6  ;;  %v7721_v17 = vpop.eup %7720  ;;  %v463_v19 = vmul.f32 %v7719_v13, %v8546_v60 }
 0x3c6   :  { %v7723_v21 = vpop.eup %7722  ;;  %v462_v22 = vmul.f32 %v7721_v17, %v8546_v60 }
 0x3c7   :  { %v7725_v23 = vpop.eup %7724  ;;  %v465_v25 = vmul.f32 %v7723_v21, %v8546_v60  ;;  %v8574_v21 = vsub.s32 1, %v8372_v15 }
 0x3c8   :  { %471 = vadd.xlane.f32.xlu0 %v461_v14  ;;  %v464_v28 = vmul.f32 %v7725_v23, %v8546_v60  ;;  %v7727_v29 = vpop.eup %7726  ;;  %v8580_v23 = vsub.s32 3, %v8372_v15 }
 0x3c9   :  { %475 = vadd.xlane.f32.xlu1 %v463_v19  ;;  %v466_v30 = vmul.f32 %v7727_v29, %v8546_v60  ;;  %v8241_v19 = vmov 0   ;;  %10765 = vst [vmem:[#allocation5_spill] sm:$0xff] %v8574_v21 }
 0x3ca   :  { %7696 = vset.pattern.permute.xlu1 %v8241_v19  ;;  %7695 = vset.pattern.permute.xlu0 %v8241_v19  ;;  %10767 = vst [vmem:[#allocation7_spill] sm:$0xff] %v8580_v23 }
 0x3cc   :  { %473 = vadd.xlane.f32.xlu0 %v462_v22  ;;  %v8577_v22 = vsub.s32 2, %v8372_v15 }
 0x3cd   :  { %479 = vadd.xlane.f32.xlu1 %v465_v25 }
 0x3ce   :  { %10766 = vst [vmem:[#allocation6_spill] sm:$0xff] %v8577_v22 }
 0x3d0   :  { %477 = vadd.xlane.f32.xlu0 %v464_v28 }
 0x3d4   :  { %481 = vadd.xlane.f32.xlu0 %v466_v30 }
 0x451   :  { %v468_v33 = vpop.xlane.xlu0 %467 }
 0x452   :  { %v470_v34 = vpop.xlane.xlu1 %469  ;;  %v494_v39 = vrot.slane %v468_v33, %v8375_v16 }
 0x453   :  { %v498_v35 = vrot.slane %v470_v34, %v8375_v16 }
 0x455   :  { %v472_v37 = vpop.xlane.xlu0 %471  ;;  %v524_v43 = vsel %vm523_vm4, %v498_v35, %v494_v39  ;;  %v8586_v35 = vsub.s32 4, %v8372_v15 }
 0x456   :  { %v502_v42 = vrot.slane %v472_v37, %v8375_v16  ;;  %v476_v44 = vpop.xlane.xlu1 %475 }
 0x457   :  { %v510_v55 = vrot.slane %v476_v44, %v8375_v16  ;;  %10768 = vst [vmem:[#allocation8_spill] sm:$0xff] %v8586_v35 }
 0x458   :  { %v526_v51 = vsel %vm525_vm5, %v502_v42, %v524_v43 }
 0x459   :  { %v474_v47 = vpop.xlane.xlu0 %473 }
 0x45a   :  { %v506_v48 = vrot.slane %v474_v47, %v8375_v16  ;;  %v480_v58 = vpop.xlane.xlu1 %479 }
 0x45b   :  { %v518_v2 = vrot.slane %v480_v58, %v8375_v16 }
 0x45c   :  { %v528_v52 = vsel %vm527_vm6, %v506_v48, %v526_v51 }
 0x45d   :  { %v478_v57 = vpop.xlane.xlu0 %477  ;;  %v530_v62 = vsel %vm529_vm7, %v510_v55, %v528_v52  ;;  %v8590_v55 = vsub.s32 5, %v8372_v15 }
 0x45e   :  { %v514_v61 = vrot.slane %v478_v57, %v8375_v16 }
 0x45f   :  { %10769 = vst [vmem:[#allocation9_spill] sm:$0xff] %v8590_v55 }
 0x460   :  { %v532_v63 = vsel %vm531_vm8, %v514_v61, %v530_v62 }
 0x461   :  { %v482_v5 = vpop.xlane.xlu0 %481  ;;  %v534_v13 = vsel %vm533_vm9, %v518_v2, %v532_v63  ;;  %v8594_v2 = vsub.s32 6, %v8372_v15 }
 0x462   :  { %v522_v6 = vrot.slane %v482_v5, %v8375_v16 }
 0x463   :  { %10770 = vst [vmem:[#allocation10_spill] sm:$0xff] %v8594_v2 }
 0x464   :  { %v536_v14 = vsel %vm535_vm10, %v522_v6, %v534_v13 }
 0x465   :  { %v539_v17 = vsel %vm538_vm11, %v536_v14, -inf }
 0x466   :  { %540 = vmax.xlane.f32.xlu1 %v539_v17 }
 0x4f3   :  { %v541_v25 = vpop.xlane.xlu1 %540 }
 0x4f4   :  { %v546_v28 = vrot.slane %v541_v25, %v8481_v11  ;;  %v550_v29 = vrot.slane %v541_v25, %v8574_v21  ;;  %v554_v30 = vrot.slane %v541_v25, %v8577_v22  ;;  %v558_v39 = vrot.slane %v541_v25, %v8580_v23 }
 0x4f5   :  { %v562_v61 = vrot.slane %v541_v25, %v8586_v35  ;;  %v566_v6 = vrot.slane %v541_v25, %v8590_v55  ;;  %v570_v13 = vrot.slane %v541_v25, %v8594_v2 }
 0x4f6   :  { %v584_v42 = vsub.f32 %v470_v34, %v550_v29  ;;  %v583_v43 = vsub.f32 %v468_v33, %v546_v28  ;;  %v585_v48 = vsub.f32 %v472_v37, %v554_v30  ;;  %v586_v63 = vsub.f32 %v474_v47, %v558_v39 }
 0x4f7   :  { %v587_v33 = vsub.f32 %v476_v44, %v562_v61  ;;  %v8598_v37 = vsub.s32 7, %v8372_v15  ;;  %v588_v17 = vsub.f32 %v478_v57, %v566_v6  ;;  %v589_v30 = vsub.f32 %v480_v58, %v570_v13 }
 0x4f8   :  { %v593_v51 = vmul.f32 1.442695, %v584_v42  ;;  %v591_v52 = vmul.f32 1.442695, %v583_v43  ;;  %v595_v62 = vmul.f32 1.442695, %v585_v48 }
 0x4f9   :  { %v597_v34 = vmul.f32 1.442695, %v586_v63  ;;  %10771 = vst [vmem:[#allocation11_spill] sm:$0xff] %v8598_v37  ;;  %v599_v14 = vmul.f32 1.442695, %v587_v33  ;;  %v574_v28 = vrot.slane %v541_v25, %v8598_v37 }
 0x4fa   :  { %7728 = vpow2.f32 %v593_v51  ;;  %v601_v29 = vmul.f32 1.442695, %v588_v17  ;;  %v603_v15 = vmul.f32 1.442695, %v589_v30 }
 0x4fb   :  { %7730 = vpow2.f32 %v591_v52  ;;  %v590_v39 = vsub.f32 %v482_v5, %v574_v28 }
 0x4fc   :  { %7732 = vpow2.f32 %v595_v62 }
 0x4fd   :  { %7734 = vpow2.f32 %v597_v34  ;;  %v605_v57 = vmul.f32 1.442695, %v590_v39 }
 0x4fe   :  { %7736 = vpow2.f32 %v599_v14 }
 0x4ff   :  { %7738 = vpow2.f32 %v601_v29 }
 0x500   :  { %7740 = vpow2.f32 %v603_v15 }
 0x501   :  { %7742 = vpow2.f32 %v605_v57 }
 0x504   :  { %v8601_v19 = vpop.eup %7728 }
 0x505   :  { %v7731_v47 = vpop.eup %7730  ;;  %619 = vperm.xlu1 %7696, %v8601_v19  }
 0x506   :  { %616 = vperm.xlu0 %7695, %v7731_v47   ;;  %v8605_v44 = vpop.eup %7732 }
 0x507   :  { %v8608_v42 = vpop.eup %7734 }
 0x508   :  { %v8611_v43 = vpop.eup %7736 }
 0x509   :  { %622 = vperm.xlu1 %7696, %v8605_v44   ;;  %v8614_v25 = vpop.eup %7738 }
 0x50a   :  { %v8617_v58 = vpop.eup %7740 }
 0x50b   :  { %v8620_v5 = vpop.eup %7742 }
 0x50d   :  { %625 = vperm.xlu1 %7696, %v8608_v42  }
 0x511   :  { %628 = vperm.xlu1 %7696, %v8611_v43  }
 0x515   :  { %631 = vperm.xlu1 %7696, %v8614_v25  }
 0x519   :  { %634 = vperm.xlu1 %7696, %v8617_v58  }
 0x51d   :  { %637 = vperm.xlu1 %7696, %v8620_v5  }
 0x584   :  { %v620_v48 = vpop.permute.xlu1 %619 }
 0x585   :  { %v617_v62 = vpop.permute.xlu0 %616  ;;  %v646_v6 = vrot.slane %v620_v48, %v8375_v16 }
 0x586   :  { %v642_v34 = vrot.slane %v617_v62, %v8375_v16 }
 0x588   :  { %v623_v51 = vpop.permute.xlu1 %622  ;;  %v671_v28 = vsel %vm523_vm4, %v646_v6, %v642_v34 }
 0x589   :  { %v650_v33 = vrot.slane %v623_v51, %v8375_v16 }
 0x58b   :  { %v672_v30 = vsel %vm525_vm5, %v650_v33, %v671_v28 }
 0x58c   :  { %v626_v52 = vpop.permute.xlu1 %625 }
 0x58d   :  { %v654_v13 = vrot.slane %v626_v52, %v8375_v16 }
 0x58f   :  { %v673_v39 = vsel %vm527_vm6, %v654_v13, %v672_v30 }
 0x590   :  { %v629_v61 = vpop.permute.xlu1 %628 }
 0x591   :  { %v658_v14 = vrot.slane %v629_v61, %v8375_v16 }
 0x593   :  { %v674_v57 = vsel %vm529_vm7, %v658_v14, %v673_v39 }
 0x594   :  { %v632_v63 = vpop.permute.xlu1 %631 }
 0x595   :  { %v662_v29 = vrot.slane %v632_v63, %v8375_v16 }
 0x597   :  { %v675_v52 = vsel %vm531_vm8, %v662_v29, %v674_v57 }
 0x598   :  { %v635_v17 = vpop.permute.xlu1 %634 }
 0x599   :  { %v666_v15 = vrot.slane %v635_v17, %v8375_v16 }
 0x59b   :  { %v676_v61 = vsel %vm533_vm9, %v666_v15, %v675_v52 }
 0x59c   :  { %v638_v48 = vpop.permute.xlu1 %637 }
 0x59d   :  { %v670_v51 = vrot.slane %v638_v48, %v8375_v16 }
 0x59f   :  { %v677_v62 = vsel %vm535_vm10, %v670_v51, %v676_v61 }
 0x5a0   :  { %v679_v6 = vsel %vm538_vm11, %v677_v62, 0.0 }
 0x5a1   :  { %680 = vadd.xlane.f32.xlu1 %v679_v6 }
 0x62e   :  { %v681_v63 = vpop.xlane.xlu1 %680 }
 0x62f   :  { %v686_v34 = vrot.slane %v681_v63, %v8481_v11  ;;  %v690_v33 = vrot.slane %v681_v63, %v8574_v21  ;;  %v694_v13 = vrot.slane %v681_v63, %v8577_v22  ;;  %v698_v14 = vrot.slane %v681_v63, %v8580_v23 }
 0x630   :  { %v702_v28 = vrot.slane %v681_v63, %v8586_v35  ;;  %v706_v15 = vrot.slane %v681_v63, %v8590_v55  ;;  %v710_v48 = vrot.slane %v681_v63, %v8594_v2  ;;  %v714_v61 = vrot.slane %v681_v63, %v8598_v37 }
 0x631   :  { %7744 = vrcp.f32 %v686_v34 }
 0x632   :  { %7746 = vrcp.f32 %v690_v33 }
 0x633   :  { %7748 = vrcp.f32 %v694_v13 }
 0x634   :  { %7750 = vrcp.f32 %v698_v14 }
 0x635   :  { %7752 = vrcp.f32 %v702_v28  ;;  %v850_v28 = vld [vmem:[%s10676_s7 + $0x38] sm:$0xff] }
 0x636   :  { %7754 = vrcp.f32 %v706_v15 }
 0x637   :  { %7756 = vrcp.f32 %v710_v48 }
 0x638   :  { %7758 = vrcp.f32 %v714_v61  ;;  %v8703_v61 = vld [vmem:[%s10678_s0] sm:$0xff] }
 0x639   :  { %10773 = vst [vmem:[#allocation13_spill] sm:$0xff] %v8703_v61 }
 0x63b   :  { %v7745_v17 = vpop.eup %7744 }
 0x63c   :  { %v724_v29 = vmul.f32 %v7745_v17, %v7731_v47  ;;  %v7747_v30 = vpop.eup %7746 }
 0x63d   :  { %v726_v39 = vmul.f32 %v7747_v30, %v8601_v19  ;;  %v7749_v57 = vpop.eup %7748  ;;  %v849_v30 = vld [vmem:[%s10676_s7 + $0x30] sm:$0xff] }
 0x63e   :  { %741 = vperm.xlu0 %7695, %v724_v29   ;;  %v728_v51 = vmul.f32 %v7749_v57, %v8605_v44  ;;  %v7751_v52 = vpop.eup %7750  ;;  %v847_v29 = vld [vmem:[%s10676_s7 + $0x20] sm:$0xff] }
 0x63f   :  { %v730_v47 = vmul.f32 %v7751_v52, %v8608_v42  ;;  %v7753_v62 = vpop.eup %7752  ;;  %v844_v42 = vld [vmem:[%s10676_s7 + $0x8] sm:$0xff]  ;;  %v950_v57 = vld [vmem:[%s10677_s3] sm:$0xff] }
 0x640   :  { %v732_v6 = vmul.f32 %v7753_v62, %v8611_v43  ;;  %v7755_v19 = vpop.eup %7754  ;;  %v846_v43 = vld [vmem:[%s10676_s7 + $0x18] sm:$0xff]  ;;  %v8698_v52 = vld [vmem:[%s10678_s0 + $0x8] sm:$0xff] }
 0x641   :  { %v734_v34 = vmul.f32 %v7755_v19, %v8614_v25  ;;  %v7757_v33 = vpop.eup %7756  ;;  %v8660_v63 = vpack.c.bf16 %v846_v43, %v844_v42  ;;  %v843_v25 = vld [vmem:[%s10676_s7] sm:$0xff]  ;;  %10772 = vst [vmem:[#allocation12_spill] sm:$0xff] %v8698_v52 }
 0x642   :  { %746 = vperm.xlu0 %7695, %v726_v39   ;;  %v736_v44 = vmul.f32 %v7757_v33, %v8617_v58  ;;  %v7759_v13 = vpop.eup %7758  ;;  %v845_v58 = vld [vmem:[%s10676_s7 + $0x10] sm:$0xff]  ;;  %v8686_v39 = vpack.c.bf16 %v849_v30, %v847_v29 }
 0x643   :  { %v738_v14 = vmul.f32 %v7759_v13, %v8620_v5  ;;  %v848_v5 = vld [vmem:[%s10676_s7 + $0x28] sm:$0xff]  ;;  %v8671_v17 = vpack.c.bf16 %v845_v58, %v843_v25  ;;  %7450 = vmatprep.subr.bf16.mxu1 %v8660_v63  ;;  %v8725_v25 = vld [vmem:[%s10678_s0 + $0x20] sm:$0xff] }
 0x644   :  { %v8683_v15 = vpack.c.bf16 %v850_v28, %v848_v5  ;;  %10776 = vst [vmem:[#allocation16_spill] sm:$0xff] %v8725_v25 }
 0x645   :  { %7452 = vmatpush1.bf16.msra.mxu1 %v8671_v17 }
 0x646   :  { %751 = vperm.xlu0 %7695, %v728_v51   ;;  %7454 = vmatprep.subr.bf16.mxu1 %v8683_v15 }
 0x649   :  { %7456 = vmatpush1.bf16.msra.mxu1 %v8686_v39 }
 0x64a   :  { %756 = vperm.xlu0 %7695, %v730_v47   ;;  %7461 = vmatprep.subr.bf16.mxu1 %v8343_v4  ;;  %v8708_v47 = vld [vmem:[%s10678_s0 + $0x10] sm:$0xff] }
 0x64b   :  { %10774 = vst [vmem:[#allocation14_spill] sm:$0xff] %v8708_v47 }
 0x64e   :  { %761 = vperm.xlu0 %7695, %v732_v6  }
 0x652   :  { %766 = vperm.xlu0 %7695, %v734_v34   ;;  %v8716_v34 = vld [vmem:[%s10678_s0 + $0x18] sm:$0xff] }
 0x653   :  { %10775 = vst [vmem:[#allocation15_spill] sm:$0xff] %v8716_v34 }
 0x656   :  { %771 = vperm.xlu0 %7695, %v736_v44  }
 0x65a   :  { %776 = vperm.xlu0 %7695, %v738_v14  }
 0x65e   :  { %952 = vrot.lane.b32.xlu0 %v950_v57, %s8242_s26 }
 0x6bd   :  { %v742_v48 = vpop.permute.xlu0 %741 }
 0x6be   :  { %v779_v6 = vmul.f32 %v742_v48, %v8703_v61 }
 0x6c0   :  { %v787_v14 = vsel %vm81_vm3, %v779_v6, 0.0 }
 0x6c1   :  { %v747_v51 = vpop.permute.xlu0 %746  ;;  %v788_v28 = vrot.slane %v787_v14, 4 }
 0x6c2   :  { %v780_v62 = vmul.f32 %v747_v51, %v8698_v52  ;;  %v8732_v51 = vld [vmem:[%s10678_s0 + $0x28] sm:$0xff] }
 0x6c3   :  { %10777 = vst [vmem:[#allocation17_spill] sm:$0xff] %v8732_v51  ;;  %v789_v6 = vadd.f32 %v788_v28, %v787_v14 }
 0x6c4   :  { %v794_v33 = vsel %vm81_vm3, %v780_v62, 0.0 }
 0x6c5   :  { %v752_v4 = vpop.permute.xlu0 %751  ;;  %v795_v43 = vrot.slane %v794_v33, 4 }
 0x6c6   :  { %v781_v19 = vmul.f32 %v752_v4, %v8708_v47 }
 0x6c7   :  { %v796_v48 = vadd.f32 %v795_v43, %v794_v33  ;;  %v8739_v33 = vld [vmem:[%s10678_s0 + $0x30] sm:$0xff] }
 0x6c8   :  { %v801_v44 = vsel %vm81_vm3, %v781_v19, 0.0  ;;  %10778 = vst [vmem:[#allocation18_spill] sm:$0xff] %v8739_v33 }
 0x6c9   :  { %v757_v13 = vpop.permute.xlu0 %756  ;;  %v802_v58 = vrot.slane %v801_v44, 4 }
 0x6ca   :  { %v782_v42 = vmul.f32 %v757_v13, %v8716_v34  ;;  %v797_v34 = vrot.slane %v796_v48, 2 }
 0x6cb   :  { %v803_v62 = vadd.f32 %v802_v58, %v801_v44 }
 0x6cc   :  { %v808_v5 = vsel %vm81_vm3, %v782_v42, 0.0  ;;  %v798_v28 = vadd.f32 %v797_v34, %v796_v48 }
 0x6cd   :  { %v809_v29 = vrot.slane %v808_v5, 4  ;;  %v762_v30 = vpop.permute.xlu0 %761  ;;  %v804_v43 = vrot.slane %v803_v62, 2 }
 0x6ce   :  { %v783_v57 = vmul.f32 %v762_v30, %v8725_v25  ;;  %v790_v25 = vrot.slane %v789_v6, 2  ;;  %v799_v23 = vrot.slane %v798_v28, 1 }
 0x6cf   :  { %v810_v19 = vadd.f32 %v809_v29, %v808_v5 }
 0x6d0   :  { %v815_v4 = vsel %vm81_vm3, %v783_v57, 0.0 }
 0x6d1   :  { %v816_v13 = vrot.slane %v815_v4, 4  ;;  %v767_v3 = vpop.permute.xlu0 %766  ;;  %v811_v44 = vrot.slane %v810_v19, 2 }
 0x6d2   :  { %v784_v42 = vmul.f32 %v767_v3, %v8732_v51  ;;  %v8746_v3 = vld [vmem:[%s10678_s0 + $0x38] sm:$0xff]  ;;  %v791_v51 = vadd.f32 %v790_v25, %v789_v6 }
 0x6d3   :  { %v817_v47 = vadd.f32 %v816_v13, %v815_v4  ;;  %10779 = vst [vmem:[#allocation19_spill] sm:$0xff] %v8746_v3  ;;  %v805_v4 = vadd.f32 %v804_v43, %v803_v62  ;;  %v812_v61 = vadd.f32 %v811_v44, %v810_v19 }
 0x6d4   :  { %v822_v30 = vsel %vm81_vm3, %v784_v42, 0.0 }
 0x6d5   :  { %v823_v58 = vrot.slane %v822_v30, 4  ;;  %v772_v57 = vpop.permute.xlu0 %771  ;;  %v818_v14 = vrot.slane %v817_v47, 2  ;;  %v806_v48 = vrot.slane %v805_v4, 1 }
 0x6d6   :  { %v785_v5 = vmul.f32 %v772_v57, %v8739_v33  ;;  %v813_v33 = vrot.slane %v812_v61, 1 }
 0x6d7   :  { %v824_v29 = vadd.f32 %v823_v58, %v822_v30  ;;  %v819_v55 = vadd.f32 %v818_v14, %v817_v47  ;;  %v792_v58 = vrot.slane %v791_v51, 1  ;;  %v807_v44 = vadd.f32 %v806_v48, %v805_v4 }
 0x6d8   :  { %v829_v13 = vsel %vm81_vm3, %v785_v5, 0.0  ;;  %v800_v5 = vadd.f32 %v799_v23, %v798_v28  ;;  %v814_v47 = vadd.f32 %v813_v33, %v812_v61 }
 0x6d9   :  { %v825_v42 = vrot.slane %v824_v29, 2  ;;  %v830_v52 = vrot.slane %v829_v13, 4  ;;  %v777_v37 = vpop.permute.xlu0 %776  ;;  %v820_v43 = vrot.slane %v819_v55, 1  ;;  %v793_v22 = vadd.f32 %v792_v58, %v791_v51  ;;  %v8800_v58 = vld [vmem:[%s10681_s10] ss:$0 sm:$0xff] }
 0x6da   :  { %v786_v2 = vmul.f32 %v777_v37, %v8746_v3 }
 0x6db   :  { %v826_v57 = vadd.f32 %v825_v42, %v824_v29  ;;  %v831_v34 = vadd.f32 %v830_v52, %v829_v13  ;;  %v821_v3 = vadd.f32 %v820_v43, %v819_v55  ;;  %v859_v52 = vsel %vm523_vm4, %v800_v5, %v793_v22  ;;  %v964_v55 = vld [vmem:[%s10679_s8 + $0x8] sm:$0xff] }
 0x6dc   :  { %v836_v30 = vsel %vm81_vm3, %v786_v2, 0.0  ;;  %v860_v2 = vsel %vm525_vm5, %v807_v44, %v859_v52  ;;  %v10780_v22 = vmov 0.0  }
 0x6dd   :  { %v832_v35 = vrot.slane %v831_v34, 2  ;;  %v837_v62 = vrot.slane %v836_v30, 4  ;;  %v827_v25 = vrot.slane %v826_v57, 1  ;;  %v861_v21 = vsel %vm527_vm6, %v814_v47, %v860_v2  ;;  %7351 = vmatprep.mubr.msk.f32.mxu0 %vm8244_vm12, %v10780_v22 }
 0x6de   :  { %v862_v23 = vsel %vm529_vm7, %v821_v3, %v861_v21  ;;  %v10713_v21 = vmov 0.0|0.0  }
 0x6df   :  { %v833_v6 = vadd.f32 %v832_v35, %v831_v34  ;;  %v838_v19 = vadd.f32 %v837_v62, %v836_v30  ;;  %v828_v29 = vadd.f32 %v827_v25, %v826_v57  ;;  %7457 = vmatprep.subr.bf16.mxu0 %v10713_v21 }
 0x6e1   :  { %v834_v14 = vrot.slane %v833_v6, 1  ;;  %v839_v37 = vrot.slane %v838_v19, 2  ;;  %v863_v28 = vsel %vm531_vm8, %v828_v29, %v862_v23  ;;  %v7254_v23 = vld [vmem:[%s10672_s1 + $0x8] sm:$0xff] }
 0x6e3   :  { %v840_v13 = vadd.f32 %v839_v37, %v838_v19  ;;  %v835_v42 = vadd.f32 %v834_v14, %v833_v6 }
 0x6e5   :  { %v841_v16 = vrot.slane %v840_v13, 1  ;;  %v864_v61 = vsel %vm533_vm9, %v835_v42, %v863_v28 }
 0x6e7   :  { %v842_v35 = vadd.f32 %v841_v16, %v840_v13  ;;  %v963_v16 = vld [vmem:[%s10679_s8] sm:$0xff] }
 0x6e9   :  { %v865_v51 = vsel %vm535_vm10, %v842_v35, %v864_v61 }
 0x6ea   :  { %7248 = vmatmul.mubr.msk.f32.vlgmr.msra.gmra.mrb[2].mxu1 %vm81_vm3, %v865_v51 }
 0x6eb   :  { %7463 = vmatpush1.bf16.msra.mxu1 %v8354_v8  ;;  %1152 = vmatprep.mubr.f32.mxu1 %v10780_v22  ;;  %v8771_v8 = vpack.c.bf16 %v964_v55, %v963_v16 }
 0x6ec   :  { %7465 = vmatprep.subr.bf16.mxu1 %v8356_v9 }
 0x6ed   :  { %7459 = vmatpush3.bf16.msra.mxu0 %v8771_v8 }
 0x6ee   :  { %7469 = vmatprep.subr.bf16.mxu0 %v8402_v36  ;;  %v953_v36 = vpop.permute.xlu0 %952 }
 0x6ef   :  { %7467 = vmatpush1.bf16.msra.mxu1 %v8366_v12 }
 0x6f0   :  { %7477 = vmatprep.subr.bf16.mxu1 %v8413_v40  ;;  %v8779_v40 = vld [vmem:[%s10680_s11] ss:$0 sm:$0xff] }
 0x7bd   :  { %v934_v9 = vpop.f32.mrb[2].mxu1 }
 0x7be   :  { %v961_v12 = vadd.f32 %v934_v9, %v8473_v1  ;;  %v936_v33 = vpop.f32.mrb[3].mxu1 }
 0x7bf   :  { %v939_v3 = vadd.f32 %v936_v33, %v8478_v10 }
 0x7c0   :  { %v962_v4 = vadd.f32 %v961_v12, %v8380_v20 }
 0x7c1   :  { %v8784_v57 = vadd.f32 %v8779_v40, %v939_v3 }
 0x7c3   :  { %10781 = vst [vmem:[#allocation20_spill] sm:$0xff] %v8784_v57  ;;  %v947_v34 = vmul.f32 0.5, %v8784_v57 }
 0x7c5   :  { %v948_v48 = vmul.f32 1.442695, %v947_v34 }
 0x7c7   :  { %7760 = vpow2.f32 %v948_v48 }
 0x7d1   :  { %v7761_v1 = vpop.eup %7760 }
 0x7d2   :  { %v955_v30 = vmul.f32 %v7761_v1, %v953_v36 }
 0x7d4   :  { %957 = vrot.lane.b32.xlu1 %v955_v30, %s8245_s24 }
 0x846   :  { %v958_v10 = vpop.permute.xlu1 %957 }
 0x847   :  { %v960_v20 = vadd.f32 %v958_v10, %v8784_v57 }
 0x849   :  { %7352 = vmatmul.mubr.msk.f32.vlgmr.msra.gmra.mrb[4].mxu0 %vm965_vm13, %v960_v20 }
 0x84a   :  { %7471 = vmatpush1.bf16.msra.mxu0 %v8415_v41  ;;  %1273 = vmatprep.mubr.f32.mxu0 %v10780_v22 }
 0x84b   :  { %7473 = vmatprep.subr.bf16.mxu0 %v8440_v49 }
 0x84e   :  { %7475 = vmatpush1.bf16.msra.mxu0 %v8454_v54 }
 0x84f   :  { %7485 = vmatprep.subr.bf16.mxu0 %v8660_v63 }
 0x91c   :  { %v1035_v62 = vpop.f32.mrb[4].mxu0 }
 0x91d   :  { %v1039_v43 = vadd.f32 %v1035_v62, %v962_v4  ;;  %v7353_v5 = vpop.f32.mrb[5].mxu0 }
 0x91f   :  { %v1046_v25 = vadd.f32 %v8800_v58, %v1039_v43 }
 0x921   :  { %v7252_v6 = vmul.f32 -1.442695, %v1046_v25 }
 0x923   :  { %7762 = vpow2.f32 %v7252_v6 }
 0x924   :  { %7764 = vtanh.f32 %v1046_v25 }
 0x92d   :  { %v7763_v41 = vpop.eup %7762 }
 0x92e   :  { %v1051_v19 = vadd.f32 1.0, %v7763_v41  ;;  %v7765_v49 = vpop.eup %7764 }
 0x930   :  { %7766 = vrcp.f32 %v1051_v19 }
 0x93a   :  { %v7767_v54 = vpop.eup %7766 }
 0x93b   :  { %v1054_v63 = vsel %vm8382_vm2, %v7765_v49, %v7767_v54 }
 0x93c   :  { %1057 = vrot.lane.b32.xlu0 %v1054_v63, %s8238_s21  ;;  %v1055_v14 = vmul.f32 0.0, %v1054_v63 }
 0x9ae   :  { %v1058_v44 = vpop.permute.xlu0 %1057 }
 0x9af   :  { %v1060_v47 = vmul.f32 %v1058_v44, %v1054_v63 }
 0x9b1   :  { %1062 = vrot.lane.b32.xlu0 %v1060_v47, %s8239_s22 }
 0xa23   :  { %v1063_v37 = vpop.permute.xlu0 %1062 }
 0xa24   :  { %v8807_v52 = vadd.f32 %v1063_v37, %v1055_v14 }
 0xa26   :  { %7768 = vtanh.f32 %v8807_v52 }
 0xa30   :  { %v7769_v29 = vpop.eup %7768 }
 0xa31   :  { %1068 = vrot.lane.b32.xlu0 %v7769_v29, %s8238_s21 }
 0xaa3   :  { %v1069_v13 = vpop.permute.xlu0 %1068 }
 0xaa4   :  { %v1071_v2 = vmul.f32 %v1069_v13, %v1054_v63 }
 0xaa6   :  { %1073 = vrot.lane.b32.xlu0 %v1071_v2, %s8239_s22 }
 0xb18   :  { %v1074_v42 = vpop.permute.xlu0 %1073 }
 0xb19   :  { %1076 = vst.msk [vmem:[#allocation2] sm:$0xff] %vm81_vm3, %v1074_v42  ;;  %7253 = vmatmul.mubr.msk.f32.vlgmr.msra.gmra.mrb[4].mxu1 %vm81_vm3, %v1074_v42 }
 0xb1a   :  { %7479 = vmatpush1.bf16.msra.mxu1 %v8427_v45  ;;  %1344 = vmatprep.mubr.f32.mxu1 %v10780_v22 }
 0xb1b   :  { %7481 = vmatprep.subr.bf16.mxu1 %v8442_v50 }
 0xb1e   :  { %7483 = vmatpush1.bf16.msra.mxu1 %v8461_v56 }
 0xb1f   :  { %7492 = vmatprep.subr.bf16.mxu1 %v10713_v21 }
 0xbec   :  { %v1154_v35 = vpop.f32.mrb[4].mxu1 }
 0xbed   :  { %v1161_v28 = vadd.f32 %v7254_v23, %v1154_v35  ;;  %v8822_v61 = vpop.f32.mrb[5].mxu1 }
 0xbef   :  { %v1162_v51 = vadd.f32 %v1161_v28, %v8476_v7 }
 0xbf1   :  { %v7255_v16 = vmul.f32 -1.442695, %v1162_v51 }
 0xbf3   :  { %7770 = vpow2.f32 %v7255_v16 }
 0xbf4   :  { %7772 = vtanh.f32 %v1162_v51 }
 0xbfd   :  { %v7771_v45 = vpop.eup %7770 }
 0xbfe   :  { %v1167_v55 = vadd.f32 1.0, %v7771_v45  ;;  %v7773_v50 = vpop.eup %7772 }
 0xc00   :  { %7774 = vrcp.f32 %v1167_v55 }
 0xc0a   :  { %v7775_v56 = vpop.eup %7774 }
 0xc0b   :  { %v1170_v9 = vsel %vm8382_vm2, %v7773_v50, %v7775_v56 }
 0xc0c   :  { %1173 = vrot.lane.b32.xlu1 %v1170_v9, %s8238_s21  ;;  %v1171_v3 = vmul.f32 %v1170_v9, %v8390_v32 }
 0xc7e   :  { %v1174_v12 = vpop.permute.xlu1 %1173 }
 0xc7f   :  { %v1176_v33 = vmul.f32 %v1174_v12, %v1170_v9 }
 0xc81   :  { %1178 = vrot.lane.b32.xlu0 %v1176_v33, %s8239_s22 }
 0xcf3   :  { %v1179_v7 = vpop.permute.xlu0 %1178 }
 0xcf4   :  { %v8830_v4 = vadd.f32 %v1179_v7, %v1171_v3 }
 0xcf6   :  { %7776 = vtanh.f32 %v8830_v4 }
 0xd00   :  { %v7777_v34 = vpop.eup %7776 }
 0xd01   :  { %1184 = vrot.lane.b32.xlu1 %v7777_v34, %s8238_s21 }
 0xd73   :  { %v1185_v48 = vpop.permute.xlu1 %1184 }
 0xd74   :  { %v1187_v36 = vmul.f32 %v1185_v48, %v1170_v9 }
 0xd76   :  { %1205 = vrot.lane.b32.xlu0 %v1187_v36, %s8239_s22 }
 0xde8   :  { %v1206_v1 = vpop.permute.xlu0 %1205 }
 0xde9   :  { %7256 = vmatmul.mubr.msk.f32.vlgmr.msra.gmra.mrb[6].mxu0 %vm81_vm3, %v1206_v1  ;;  %7257 = vmatmul.mubr.msk.f32.vlgmr.msra.gmra.mrb[6].mxu1 %vm81_vm3, %v1206_v1 }
 0xdea   :  { %7487 = vmatpush1.bf16.msra.mxu0 %v8671_v17  ;;  %1922 = vmatprep.mubr.f32.mxu0 %v10780_v22 }
 0xdeb   :  { %7489 = vmatprep.subr.bf16.mxu0 %v8683_v15  ;;  %7494 = vmatpush3.bf16.msra.mxu1 %v8771_v8 }
 0xdec   :  { %7358 = vmatprep.mubr.msk.f32.mxu1 %vm8244_vm12, %v10780_v22 }
 0xdee   :  { %7491 = vmatpush1.bf16.msra.mxu0 %v8686_v39 }
 0xebc   :  { %v8844_v32 = vpop.f32.mrb[6].mxu0  ;;  %v1346_v30 = vpop.f32.mrb[6].mxu1 }
 0xebd   :  { %v1352_v10 = vcombine.high %v1346_v30, %v1346_v30  ;;  %v1359_v20 = vrot.slane %v1346_v30, %v8471_v0  ;;  %v8847_v62 = vpop.f32.mrb[7].mxu0  ;;  %v8849_v17 = vpop.f32.mrb[7].mxu1  ;;  %v10782_v30 = vld [vmem:[#allocation4_spill] sm:$0xff] }
 0xebf   :  { %v1366_v43 = vrot.slane %v1352_v10, %v8471_v0  ;;  %v1367_v15 = vcombine.high %v1359_v20, %v1359_v20  ;;  %v1375_v8 = vrot.slane %v1359_v20, %v8471_v0 }
 0xec1   :  { %v1368_v5 = vcombine.high %v1366_v43, %v1366_v43  ;;  %v1382_v25 = vrot.slane %v1366_v43, %v8471_v0  ;;  %v1389_v39 = vrot.slane %v1367_v15, %v8471_v0  ;;  %v1397_v6 = vcombine.high %v1375_v8, %v1375_v8 }
 0xec2   :  { %v1404_v41 = vrot.slane %v1375_v8, %v8481_v11 }
 0xec3   :  { %v1398_v19 = vcombine.high %v1382_v25, %v1382_v25  ;;  %v1399_v49 = vcombine.high %v1389_v39, %v1389_v39  ;;  %v1408_v54 = vrot.slane %v1389_v39, %v8481_v11  ;;  %v1412_v63 = vrot.slane %v1397_v6, %v8481_v11 }
 0xec4   :  { %v1420_v44 = vrot.slane %v1382_v25, %v8481_v11  ;;  %v1441_v47 = vadd.f32 %v1404_v41, %v8488_v18  ;;  %v1396_v14 = vrot.slane %v1368_v5, %v8471_v0 }
 0xec5   :  { %v1428_v37 = vrot.slane %v1398_v19, %v8481_v11  ;;  %v1416_v29 = vrot.slane %v1399_v49, %v8481_v11  ;;  %v1442_v13 = vadd.f32 %v1408_v54, %v8496_v26  ;;  %v1443_v2 = vadd.f32 %v1412_v63, %v8501_v27 }
 0xec6   :  { %7778 = vtanh.f32 %v1441_v47  ;;  %v1445_v42 = vadd.f32 %v1420_v44, %v8507_v31  ;;  %v1400_v35 = vcombine.high %v1396_v14, %v1396_v14  ;;  %v1424_v28 = vrot.slane %v1396_v14, %v8481_v11 }
 0xec7   :  { %7780 = vtanh.f32 %v1442_v13  ;;  %v1447_v23 = vadd.f32 %v1428_v37, %v8525_v46  ;;  %v1444_v18 = vadd.f32 %v1416_v29, %v8516_v38 }
 0xec8   :  { %7782 = vtanh.f32 %v1443_v2  ;;  %v1432_v51 = vrot.slane %v1400_v35, %v8481_v11  ;;  %v1446_v26 = vadd.f32 %v1424_v28, %v8533_v53  ;;  %v10784_v28 = vld [vmem:[#allocation6_spill] sm:$0xff] }
 0xec9   :  { %7784 = vtanh.f32 %v1445_v42 }
 0xeca   :  { %7786 = vtanh.f32 %v1447_v23  ;;  %v1448_v46 = vadd.f32 %v1432_v51, %v8541_v59  ;;  %v10783_v23 = vld [vmem:[#allocation5_spill] sm:$0xff]  ;;  %v10785_v51 = vld [vmem:[#allocation8_spill] sm:$0xff] }
 0xecb   :  { %7788 = vtanh.f32 %v1444_v18 }
 0xecc   :  { %7790 = vtanh.f32 %v1446_v26 }
 0xecd   :  { %7792 = vtanh.f32 %v1448_v46 }
 0xed0   :  { %v7779_v27 = vpop.eup %7778 }
 0xed1   :  { %v1457_v16 = vmul.f32 %v7779_v27, %v8546_v60  ;;  %v7781_v31 = vpop.eup %7780  ;;  %v10786_v27 = vld [vmem:[#allocation7_spill] sm:$0xff] }
 0xed2   :  { %v1458_v45 = vmul.f32 %v7781_v31, %v8546_v60  ;;  %v7783_v55 = vpop.eup %7782 }
 0xed3   :  { %1465 = vadd.xlane.f32.xlu1 %v1457_v16  ;;  %v7785_v38 = vpop.eup %7784  ;;  %v1459_v53 = vmul.f32 %v7783_v55, %v8546_v60  ;;  %v10787_v55 = vld [vmem:[#allocation10_spill] sm:$0xff] }
 0xed4   :  { %1467 = vadd.xlane.f32.xlu0 %v1458_v45  ;;  %v1461_v50 = vmul.f32 %v7785_v38, %v8546_v60  ;;  %v7787_v56 = vpop.eup %7786 }
 0xed5   :  { %v7789_v9 = vpop.eup %7788  ;;  %v1463_v12 = vmul.f32 %v7787_v56, %v8546_v60 }
 0xed6   :  { %v1460_v33 = vmul.f32 %v7789_v9, %v8546_v60  ;;  %v7791_v59 = vpop.eup %7790  ;;  %v10788_v9 = vld [vmem:[#allocation9_spill] sm:$0xff] }
 0xed7   :  { %1473 = vadd.xlane.f32.xlu1 %v1461_v50  ;;  %v1462_v3 = vmul.f32 %v7791_v59, %v8546_v60  ;;  %v7793_v7 = vpop.eup %7792 }
 0xed8   :  { %1469 = vadd.xlane.f32.xlu0 %v1459_v53  ;;  %v1464_v34 = vmul.f32 %v7793_v7, %v8546_v60 }
 0xedb   :  { %1477 = vadd.xlane.f32.xlu1 %v1463_v12 }
 0xedc   :  { %1471 = vadd.xlane.f32.xlu0 %v1460_v33 }
 0xee0   :  { %1475 = vadd.xlane.f32.xlu0 %v1462_v3 }
 0xee4   :  { %1479 = vadd.xlane.f32.xlu0 %v1464_v34  ;;  %v10789_v34 = vld [vmem:[#allocation11_spill] sm:$0xff] }
 0xf60   :  { %v1466_v36 = vpop.xlane.xlu1 %1465 }
 0xf61   :  { %v1468_v48 = vpop.xlane.xlu0 %1467  ;;  %v1492_v43 = vrot.slane %v1466_v36, %v10782_v30 }
 0xf62   :  { %v1496_v10 = vrot.slane %v1468_v48, %v10782_v30 }
 0xf64   :  { %v1474_v15 = vpop.xlane.xlu1 %1473  ;;  %v1521_v5 = vsel %vm523_vm4, %v1496_v10, %v1492_v43 }
 0xf65   :  { %v1470_v1 = vpop.xlane.xlu0 %1469  ;;  %v1508_v6 = vrot.slane %v1474_v15, %v10782_v30 }
 0xf66   :  { %v1500_v20 = vrot.slane %v1470_v1, %v10782_v30 }
 0xf68   :  { %v1522_v39 = vsel %vm525_vm5, %v1500_v20, %v1521_v5  ;;  %v1478_v19 = vpop.xlane.xlu1 %1477 }
 0xf69   :  { %v1472_v8 = vpop.xlane.xlu0 %1471  ;;  %v1516_v44 = vrot.slane %v1478_v19, %v10782_v30 }
 0xf6a   :  { %v1504_v25 = vrot.slane %v1472_v8, %v10782_v30 }
 0xf6c   :  { %v1523_v60 = vsel %vm527_vm6, %v1504_v25, %v1522_v39 }
 0xf6d   :  { %v1476_v41 = vpop.xlane.xlu0 %1475  ;;  %v1524_v54 = vsel %vm529_vm7, %v1508_v6, %v1523_v60 }
 0xf6e   :  { %v1512_v49 = vrot.slane %v1476_v41, %v10782_v30 }
 0xf70   :  { %v1525_v63 = vsel %vm531_vm8, %v1512_v49, %v1524_v54 }
 0xf71   :  { %v1480_v47 = vpop.xlane.xlu0 %1479  ;;  %v1526_v37 = vsel %vm533_vm9, %v1516_v44, %v1525_v63 }
 0xf72   :  { %v1520_v14 = vrot.slane %v1480_v47, %v10782_v30 }
 0xf74   :  { %v1527_v29 = vsel %vm535_vm10, %v1520_v14, %v1526_v37 }
 0xf75   :  { %v1529_v13 = vsel %vm538_vm11, %v1527_v29, -inf }
 0xf76   :  { %1530 = vmax.xlane.f32.xlu1 %v1529_v13 }
0x1003   :  { %v1531_v2 = vpop.xlane.xlu1 %1530 }
0x1004   :  { %v1536_v42 = vrot.slane %v1531_v2, %v8481_v11  ;;  %v1540_v35 = vrot.slane %v1531_v2, %v10783_v23  ;;  %v1544_v18 = vrot.slane %v1531_v2, %v10784_v28  ;;  %v1552_v26 = vrot.slane %v1531_v2, %v10785_v51 }
0x1005   :  { %v1548_v16 = vrot.slane %v1531_v2, %v10786_v27  ;;  %v1560_v38 = vrot.slane %v1531_v2, %v10787_v55  ;;  %v1556_v12 = vrot.slane %v1531_v2, %v10788_v9  ;;  %v1564_v10 = vrot.slane %v1531_v2, %v10789_v34 }
0x1006   :  { %v1574_v31 = vsub.f32 %v1468_v48, %v1540_v35  ;;  %v1573_v46 = vsub.f32 %v1466_v36, %v1536_v42  ;;  %v1575_v45 = vsub.f32 %v1470_v1, %v1544_v18  ;;  %v1577_v50 = vsub.f32 %v1474_v15, %v1552_v26 }
0x1007   :  { %v1576_v59 = vsub.f32 %v1472_v8, %v1548_v16  ;;  %v1579_v7 = vsub.f32 %v1478_v19, %v1560_v38  ;;  %v1578_v48 = vsub.f32 %v1476_v41, %v1556_v12  ;;  %v1580_v43 = vsub.f32 %v1480_v47, %v1564_v10 }
0x1008   :  { %v1583_v56 = vmul.f32 1.442695, %v1574_v31  ;;  %v1581_v53 = vmul.f32 1.442695, %v1573_v46  ;;  %v1585_v33 = vmul.f32 1.442695, %v1575_v45 }
0x1009   :  { %v1589_v3 = vmul.f32 1.442695, %v1577_v50  ;;  %v1587_v20 = vmul.f32 1.442695, %v1576_v59  ;;  %v1593_v36 = vmul.f32 1.442695, %v1579_v7 }
0x100a   :  { %7794 = vpow2.f32 %v1583_v56  ;;  %v1591_v1 = vmul.f32 1.442695, %v1578_v48  ;;  %v1595_v8 = vmul.f32 1.442695, %v1580_v43 }
0x100b   :  { %7796 = vpow2.f32 %v1581_v53 }
0x100c   :  { %7798 = vpow2.f32 %v1585_v33 }
0x100d   :  { %7800 = vpow2.f32 %v1589_v3 }
0x100e   :  { %7802 = vpow2.f32 %v1587_v20 }
0x100f   :  { %7804 = vpow2.f32 %v1593_v36 }
0x1010   :  { %7806 = vpow2.f32 %v1591_v1 }
0x1011   :  { %7808 = vpow2.f32 %v1595_v8 }
0x1014   :  { %v8904_v15 = vpop.eup %7794 }
0x1015   :  { %v7797_v5 = vpop.eup %7796  ;;  %1609 = vperm.xlu1 %7696, %v8904_v15  }
0x1016   :  { %1606 = vperm.xlu0 %7695, %v7797_v5   ;;  %v8907_v25 = vpop.eup %7798 }
0x1017   :  { %v8909_v39 = vpop.eup %7800 }
0x1018   :  { %v8913_v60 = vpop.eup %7802 }
0x1019   :  { %1612 = vperm.xlu1 %7696, %v8907_v25   ;;  %v8915_v6 = vpop.eup %7804 }
0x101a   :  { %1618 = vperm.xlu0 %7695, %v8909_v39   ;;  %v8919_v41 = vpop.eup %7806 }
0x101b   :  { %v7809_v19 = vpop.eup %7808 }
0x101d   :  { %1615 = vperm.xlu1 %7696, %v8913_v60  }
0x101e   :  { %1624 = vperm.xlu0 %7695, %v8915_v6  }
0x1021   :  { %1621 = vperm.xlu1 %7696, %v8919_v41  }
0x1025   :  { %1627 = vperm.xlu1 %7696, %v7809_v19  }
0x1094   :  { %v1610_v49 = vpop.permute.xlu1 %1609 }
0x1095   :  { %v1607_v54 = vpop.permute.xlu0 %1606  ;;  %v1636_v44 = vrot.slane %v1610_v49, %v10782_v30 }
0x1096   :  { %v1632_v47 = vrot.slane %v1607_v54, %v10782_v30 }
0x1098   :  { %v1613_v63 = vpop.permute.xlu1 %1612  ;;  %v1661_v13 = vsel %vm523_vm4, %v1636_v44, %v1632_v47 }
0x1099   :  { %v1640_v14 = vrot.slane %v1613_v63, %v10782_v30  ;;  %v1619_v37 = vpop.permute.xlu0 %1618 }
0x109a   :  { %v1648_v18 = vrot.slane %v1619_v37, %v10782_v30 }
0x109b   :  { %v1662_v42 = vsel %vm525_vm5, %v1640_v14, %v1661_v13 }
0x109c   :  { %v1616_v29 = vpop.permute.xlu1 %1615 }
0x109d   :  { %v1644_v2 = vrot.slane %v1616_v29, %v10782_v30  ;;  %v1625_v16 = vpop.permute.xlu0 %1624 }
0x109e   :  { %v1656_v38 = vrot.slane %v1625_v16, %v10782_v30 }
0x109f   :  { %v1663_v35 = vsel %vm527_vm6, %v1644_v2, %v1662_v42 }
0x10a0   :  { %v1622_v26 = vpop.permute.xlu1 %1621  ;;  %v1664_v46 = vsel %vm529_vm7, %v1648_v18, %v1663_v35 }
0x10a1   :  { %v1652_v31 = vrot.slane %v1622_v26, %v10782_v30  ;;  %v10790_v26 = vld [vmem:[#allocation12_spill] sm:$0xff] }
0x10a3   :  { %v1665_v45 = vsel %vm531_vm8, %v1652_v31, %v1664_v46 }
0x10a4   :  { %v1628_v50 = vpop.permute.xlu1 %1627  ;;  %v1666_v53 = vsel %vm533_vm9, %v1656_v38, %v1665_v45  ;;  %v10792_v38 = vld [vmem:[#allocation14_spill] sm:$0xff] }
0x10a5   :  { %v1660_v56 = vrot.slane %v1628_v50, %v10782_v30 }
0x10a7   :  { %v1667_v12 = vsel %vm535_vm10, %v1660_v56, %v1666_v53 }
0x10a8   :  { %v1669_v33 = vsel %vm538_vm11, %v1667_v12, 0.0  ;;  %v10793_v12 = vld [vmem:[#allocation19_spill] sm:$0xff] }
0x10a9   :  { %1670 = vadd.xlane.f32.xlu0 %v1669_v33 }
0x1136   :  { %v1671_v59 = vpop.xlane.xlu0 %1670 }
0x1137   :  { %v1704_v3 = vrot.slane %v1671_v59, %v10789_v34  ;;  %v1676_v7 = vrot.slane %v1671_v59, %v8481_v11  ;;  %v1680_v10 = vrot.slane %v1671_v59, %v10783_v23  ;;  %v1684_v20 = vrot.slane %v1671_v59, %v10784_v28 }
0x1138   :  { %v1688_v48 = vrot.slane %v1671_v59, %v10786_v27  ;;  %v1692_v8 = vrot.slane %v1671_v59, %v10785_v51  ;;  %v1696_v63 = vrot.slane %v1671_v59, %v10788_v9  ;;  %v1700_v14 = vrot.slane %v1671_v59, %v10787_v55 }
0x1139   :  { %7810 = vrcp.f32 %v1704_v3 }
0x113a   :  { %7812 = vrcp.f32 %v1676_v7 }
0x113b   :  { %7814 = vrcp.f32 %v1680_v10  ;;  %v10794_v10 = vld [vmem:[#allocation15_spill] sm:$0xff] }
0x113c   :  { %7816 = vrcp.f32 %v1684_v20 }
0x113d   :  { %7818 = vrcp.f32 %v1688_v48 }
0x113e   :  { %7820 = vrcp.f32 %v1692_v8 }
0x113f   :  { %7822 = vrcp.f32 %v1696_v63  ;;  %v10795_v63 = vld [vmem:[#allocation16_spill] sm:$0xff] }
0x1140   :  { %7824 = vrcp.f32 %v1700_v14 }
0x1143   :  { %v7811_v36 = vpop.eup %7810 }
0x1144   :  { %v7813_v1 = vpop.eup %7812  ;;  %v1728_v43 = vmul.f32 %v7811_v36, %v7809_v19 }
0x1145   :  { %v1714_v49 = vmul.f32 %v7813_v1, %v7797_v5  ;;  %v7815_v54 = vpop.eup %7814 }
0x1146   :  { %1766 = vperm.xlu0 %7695, %v1728_v43   ;;  %v1716_v44 = vmul.f32 %v7815_v54, %v8904_v15  ;;  %v7817_v47 = vpop.eup %7816 }
0x1147   :  { %1731 = vperm.xlu1 %7696, %v1714_v49   ;;  %v1718_v37 = vmul.f32 %v7817_v47, %v8907_v25  ;;  %v7819_v19 = vpop.eup %7818  ;;  %v7259_v25 = vld [vmem:[%s10677_s3 + $0x8] sm:$0xff] }
0x1148   :  { %v1720_v5 = vmul.f32 %v7819_v19, %v8913_v60  ;;  %v7821_v29 = vpop.eup %7820 }
0x1149   :  { %v1722_v13 = vmul.f32 %v7821_v29, %v8909_v39  ;;  %v7823_v2 = vpop.eup %7822  ;;  %v10791_v39 = vld [vmem:[#allocation13_spill] sm:$0xff] }
0x114a   :  { %v1724_v15 = vmul.f32 %v7823_v2, %v8919_v41  ;;  %v7825_v42 = vpop.eup %7824 }
0x114b   :  { %1736 = vperm.xlu1 %7696, %v1716_v44   ;;  %v1726_v35 = vmul.f32 %v7825_v42, %v8915_v6  ;;  %v10796_v42 = vld [vmem:[#allocation17_spill] sm:$0xff] }
0x114f   :  { %1741 = vperm.xlu1 %7696, %v1718_v37  }
0x1153   :  { %1746 = vperm.xlu1 %7696, %v1720_v5  }
0x1157   :  { %1751 = vperm.xlu1 %7696, %v1722_v13  }
0x115b   :  { %1756 = vperm.xlu1 %7696, %v1724_v15  }
0x115f   :  { %1761 = vperm.xlu1 %7696, %v1726_v35  }
0x1163   :  { %1937 = vrot.lane.b32.xlu1 %v7259_v25, %s8242_s26 }
0x11c5   :  { %v1767_v45 = vpop.permute.xlu0 %1766 }
0x11c6   :  { %v1732_v60 = vpop.permute.xlu1 %1731  ;;  %v1776_v33 = vmul.f32 %v1767_v45, %v10793_v12 }
0x11c7   :  { %v1769_v31 = vmul.f32 %v1732_v60, %v10791_v39 }
0x11c8   :  { %v1826_v1 = vsel %vm81_vm3, %v1776_v33, 0.0 }
0x11c9   :  { %v1777_v6 = vsel %vm81_vm3, %v1769_v31, 0.0  ;;  %v1827_v14 = vrot.slane %v1826_v1, 4 }
0x11ca   :  { %v1737_v18 = vpop.permute.xlu1 %1736  ;;  %v1778_v7 = vrot.slane %v1777_v6, 4 }
0x11cb   :  { %v1770_v16 = vmul.f32 %v1737_v18, %v10790_v26  ;;  %v1828_v60 = vadd.f32 %v1827_v14, %v1826_v1 }
0x11cc   :  { %v1779_v54 = vadd.f32 %v1778_v7, %v1777_v6 }
0x11cd   :  { %v1784_v46 = vsel %vm81_vm3, %v1770_v16, 0.0 }
0x11ce   :  { %v1742_v41 = vpop.permute.xlu1 %1741  ;;  %v1785_v56 = vrot.slane %v1784_v46, 4  ;;  %v1780_v2 = vrot.slane %v1779_v54, 2 }
0x11cf   :  { %v1771_v50 = vmul.f32 %v1742_v41, %v10792_v38  ;;  %v10797_v38 = vld [vmem:[#allocation18_spill] sm:$0xff] }
0x11d0   :  { %v1786_v48 = vadd.f32 %v1785_v56, %v1784_v46  ;;  %v1781_v41 = vadd.f32 %v1780_v2, %v1779_v54 }
0x11d1   :  { %v1791_v53 = vsel %vm81_vm3, %v1771_v50, 0.0 }
0x11d2   :  { %v1792_v59 = vrot.slane %v1791_v53, 4  ;;  %v1747_v3 = vpop.permute.xlu1 %1746  ;;  %v1787_v37 = vrot.slane %v1786_v48, 2 }
0x11d3   :  { %v1772_v20 = vmul.f32 %v1747_v3, %v10794_v10  ;;  %v1782_v10 = vrot.slane %v1781_v41, 1 }
0x11d4   :  { %v1793_v43 = vadd.f32 %v1792_v59, %v1791_v53  ;;  %v1788_v18 = vadd.f32 %v1787_v37, %v1786_v48  ;;  %v1829_v53 = vrot.slane %v1828_v60, 2 }
0x11d5   :  { %v1798_v36 = vsel %vm81_vm3, %v1772_v20, 0.0 }
0x11d6   :  { %v1799_v8 = vrot.slane %v1798_v36, 4  ;;  %v1752_v49 = vpop.permute.xlu1 %1751  ;;  %v1794_v5 = vrot.slane %v1793_v43, 2  ;;  %v1789_v12 = vrot.slane %v1788_v18, 1 }
0x11d7   :  { %v1773_v44 = vmul.f32 %v1752_v49, %v10795_v63 }
0x11d8   :  { %v1800_v47 = vadd.f32 %v1799_v8, %v1798_v36  ;;  %v1795_v16 = vadd.f32 %v1794_v5, %v1793_v43  ;;  %v1830_v43 = vadd.f32 %v1829_v53, %v1828_v60  ;;  %v1790_v8 = vadd.f32 %v1789_v12, %v1788_v18 }
0x11d9   :  { %v1805_v19 = vsel %vm81_vm3, %v1773_v44, 0.0  ;;  %v1783_v44 = vadd.f32 %v1782_v10, %v1781_v41 }
0x11da   :  { %v1806_v29 = vrot.slane %v1805_v19, 4  ;;  %v1757_v13 = vpop.permute.xlu1 %1756  ;;  %v1801_v15 = vrot.slane %v1800_v47, 2  ;;  %v1796_v59 = vrot.slane %v1795_v16, 1 }
0x11db   :  { %v1774_v35 = vmul.f32 %v1757_v13, %v10796_v42  ;;  %v1849_v5 = vsel %vm523_vm4, %v1790_v8, %v1783_v44 }
0x11dc   :  { %v1807_v25 = vadd.f32 %v1806_v29, %v1805_v19  ;;  %v1802_v45 = vadd.f32 %v1801_v15, %v1800_v47  ;;  %v1797_v49 = vadd.f32 %v1796_v59, %v1795_v16  ;;  %v1831_v19 = vrot.slane %v1830_v43, 1 }
0x11dd   :  { %v1812_v26 = vsel %vm81_vm3, %v1774_v35, 0.0 }
0x11de   :  { %v1808_v39 = vrot.slane %v1807_v25, 2  ;;  %v1813_v31 = vrot.slane %v1812_v26, 4  ;;  %v1762_v46 = vpop.permute.xlu1 %1761  ;;  %v1803_v20 = vrot.slane %v1802_v45, 1  ;;  %v1850_v13 = vsel %vm525_vm5, %v1797_v49, %v1849_v5  ;;  %v2059_v49 = vld [vmem:[%s10671_s5 + $0x8] sm:$0xff]  ;;  %v2062_v5 = vld [vmem:[%s10671_s5 + $0x20] sm:$0xff] }
0x11df   :  { %v1775_v50 = vmul.f32 %v1762_v46, %v10797_v38 }
0x11e0   :  { %v1809_v6 = vadd.f32 %v1808_v39, %v1807_v25  ;;  %v1814_v56 = vadd.f32 %v1813_v31, %v1812_v26  ;;  %v1804_v47 = vadd.f32 %v1803_v20, %v1802_v45  ;;  %v1832_v25 = vadd.f32 %v1831_v19, %v1830_v43 }
0x11e1   :  { %v1819_v33 = vsel %vm81_vm3, %v1775_v50, 0.0 }
0x11e2   :  { %v1815_v3 = vrot.slane %v1814_v56, 2  ;;  %v1820_v7 = vrot.slane %v1819_v33, 4  ;;  %v1810_v48 = vrot.slane %v1809_v6, 1  ;;  %v1851_v15 = vsel %vm527_vm6, %v1804_v47, %v1850_v13  ;;  %v2063_v47 = vld [vmem:[%s10671_s5 + $0x28] sm:$0xff] }
0x11e4   :  { %v1816_v36 = vadd.f32 %v1815_v3, %v1814_v56  ;;  %v1821_v1 = vadd.f32 %v1820_v7, %v1819_v33  ;;  %v1811_v14 = vadd.f32 %v1810_v48, %v1809_v6  ;;  %v1938_v6 = vpop.permute.xlu1 %1937 }
0x11e6   :  { %v1817_v54 = vrot.slane %v1816_v36, 1  ;;  %v1822_v63 = vrot.slane %v1821_v1, 2  ;;  %v1852_v35 = vsel %vm529_vm7, %v1811_v14, %v1851_v15  ;;  %v2065_v14 = vld [vmem:[%s10671_s5 + $0x38] sm:$0xff] }
0x11e7   :  { %v9023_v19 = vpack.c.bf16 %v2065_v14, %v2063_v47  ;;  %v2178_v47 = vld [vmem:[%s10673_s6 + $0x50] sm:$0xff] }
0x11e8   :  { %v1823_v37 = vadd.f32 %v1822_v63, %v1821_v1  ;;  %v1818_v29 = vadd.f32 %v1817_v54, %v1816_v36  ;;  %v2061_v54 = vld [vmem:[%s10671_s5 + $0x18] sm:$0xff]  ;;  %v2058_v63 = vld [vmem:[%s10671_s5] sm:$0xff] }
0x11e9   :  { %v9010_v44 = vpack.c.bf16 %v2061_v54, %v2059_v49 }
0x11ea   :  { %v1824_v2 = vrot.slane %v1823_v37, 1  ;;  %v1853_v60 = vsel %vm531_vm8, %v1818_v29, %v1852_v35  ;;  %v2064_v29 = vld [vmem:[%s10671_s5 + $0x30] sm:$0xff] }
0x11eb   :  { %7496 = vmatprep.subr.bf16.mxu0 %v9010_v44  ;;  %v9033_v13 = vpack.c.bf16 %v2064_v29, %v2062_v5  ;;  %v2182_v5 = vld [vmem:[%s10673_s6 + $0x70] sm:$0xff] }
0x11ec   :  { %v1825_v42 = vadd.f32 %v1824_v2, %v1823_v37  ;;  %v9124_v29 = vpack.c.bf16 %v2182_v5, %v2178_v47  ;;  %v9175_v47 = vld [vmem:[%s10674_s2 + $0x20] sm:$0xff] }
0x11ee   :  { %v1854_v18 = vsel %vm533_vm9, %v1825_v42, %v1853_v60 }
0x11ef   :  { %v1855_v26 = vsel %vm535_vm10, %v1832_v25, %v1854_v18  ;;  %v7263_v25 = vld [vmem:[%s10672_s1 + $0x10] sm:$0xff] }
0x11f0   :  { %7258 = vmatmul.mubr.msk.f32.vlgmr.msra.gmra.mrb[8].mxu0 %vm81_vm3, %v1855_v26 }
0x11f1   :  { %2132 = vmatprep.mubr.f32.mxu0 %v10780_v22 }
0x12c3   :  { %v1924_v16 = vpop.f32.mrb[8].mxu0 }
0x12c4   :  { %v1946_v39 = vadd.f32 %v1924_v16, %v8844_v32  ;;  %v1926_v31 = vpop.f32.mrb[9].mxu0 }
0x12c5   :  { %v1929_v46 = vadd.f32 %v1926_v31, %v8849_v17 }
0x12c6   :  { %v1947_v41 = vadd.f32 %v1946_v39, %v8822_v61 }
0x12c7   :  { %v8985_v45 = vadd.f32 %v8779_v40, %v1929_v46 }
0x12c9   :  { %10798 = vst [vmem:[#allocation4_spill] sm:$0xff] %v8985_v45  ;;  %v1931_v38 = vmul.f32 0.5, %v8985_v45 }
0x12cb   :  { %v1932_v50 = vmul.f32 1.442695, %v1931_v38 }
0x12cd   :  { %7826 = vpow2.f32 %v1932_v50 }
0x12d7   :  { %v7827_v56 = vpop.eup %7826 }
0x12d8   :  { %v1940_v53 = vmul.f32 %v7827_v56, %v1938_v6 }
0x12da   :  { %1942 = vrot.lane.b32.xlu1 %v1940_v53, %s8245_s24 }
0x134c   :  { %v1943_v12 = vpop.permute.xlu1 %1942 }
0x134d   :  { %v1945_v32 = vadd.f32 %v1943_v12, %v8985_v45 }
0x134f   :  { %7359 = vmatmul.mubr.msk.f32.vlgmr.msra.gmra.mrb[8].mxu1 %vm965_vm13, %v1945_v32  ;;  %v2169_v32 = vld [vmem:[%s10673_s6 + $0x8] sm:$0xff] }
0x1350   :  { %2253 = vmatprep.mubr.f32.mxu1 %v10780_v22 }
0x1422   :  { %v2019_v61 = vpop.f32.mrb[8].mxu1 }
0x1423   :  { %v2023_v17 = vadd.f32 %v2019_v61, %v1947_v41  ;;  %v7360_v40 = vpop.f32.mrb[9].mxu1  ;;  %v2173_v61 = vld [vmem:[%s10673_s6 + $0x28] sm:$0xff] }
0x1424   :  { %v9065_v40 = vpack.c.bf16 %v2173_v61, %v2169_v32 }
0x1425   :  { %v2024_v33 = vadd.f32 %v8800_v58, %v2023_v17  ;;  %v2171_v17 = vld [vmem:[%s10673_s6 + $0x18] sm:$0xff] }
0x1426   :  { %7504 = vmatprep.subr.bf16.mxu1 %v9065_v40 }
0x1427   :  { %v7261_v59 = vmul.f32 -1.442695, %v2024_v33 }
0x1429   :  { %7828 = vpow2.f32 %v7261_v59  ;;  %v2172_v59 = vld [vmem:[%s10673_s6 + $0x20] sm:$0xff] }
0x142a   :  { %7830 = vtanh.f32 %v2024_v33  ;;  %v2168_v33 = vld [vmem:[%s10673_s6] sm:$0xff] }
0x1433   :  { %v7829_v3 = vpop.eup %7828 }
0x1434   :  { %v2029_v7 = vadd.f32 1.0, %v7829_v3  ;;  %v7831_v10 = vpop.eup %7830 }
0x1436   :  { %7832 = vrcp.f32 %v2029_v7  ;;  %v9078_v7 = vpack.c.bf16 %v2172_v59, %v2168_v33 }
0x1438   :  { %7506 = vmatpush1.bf16.msra.mxu1 %v9078_v7 }
0x1440   :  { %v7833_v20 = vpop.eup %7832 }
0x1441   :  { %v2032_v48 = vsel %vm8382_vm2, %v7831_v10, %v7833_v20  ;;  %v2170_v10 = vld [vmem:[%s10673_s6 + $0x10] sm:$0xff] }
0x1442   :  { %2035 = vrot.lane.b32.xlu1 %v2032_v48, %s8238_s21  ;;  %v2033_v43 = vmul.f32 %v2032_v48, %v8807_v52  ;;  %v2060_v52 = vld [vmem:[%s10671_s5 + $0x10] sm:$0xff] }
0x1443   :  { %v9021_v37 = vpack.c.bf16 %v2060_v52, %v2058_v63  ;;  %v2174_v20 = vld [vmem:[%s10673_s6 + $0x30] sm:$0xff]  ;;  %v2176_v63 = vld [vmem:[%s10673_s6 + $0x40] sm:$0xff] }
0x1444   :  { %v2180_v52 = vld [vmem:[%s10673_s6 + $0x60] sm:$0xff] }
0x1445   :  { %7498 = vmatpush1.bf16.msra.mxu0 %v9021_v37  ;;  %v9117_v14 = vpack.c.bf16 %v2180_v52, %v2176_v63  ;;  %v9169_v63 = vld [vmem:[%s10674_s2 + $0x10] sm:$0xff] }
0x1446   :  { %7500 = vmatprep.subr.bf16.mxu0 %v9023_v19 }
0x1449   :  { %7502 = vmatpush1.bf16.msra.mxu0 %v9033_v13 }
0x14b4   :  { %v2036_v36 = vpop.permute.xlu1 %2035 }
0x14b5   :  { %v2038_v1 = vmul.f32 %v2036_v36, %v2032_v48  ;;  %v9090_v36 = vpack.c.bf16 %v2174_v20, %v2170_v10  ;;  %v9155_v10 = vld [vmem:[%s10674_s2] sm:$0xff] }
0x14b7   :  { %2040 = vrot.lane.b32.xlu1 %v2038_v1, %s8239_s22  ;;  %v2181_v1 = vld [vmem:[%s10673_s6 + $0x68] sm:$0xff] }
0x1529   :  { %v2041_v58 = vpop.permute.xlu1 %2040 }
0x152a   :  { %v8998_v8 = vadd.f32 %v2041_v58, %v2033_v43  ;;  %v2179_v43 = vld [vmem:[%s10673_s6 + $0x58] sm:$0xff] }
0x152b   :  { %v2183_v58 = vld [vmem:[%s10673_s6 + $0x78] sm:$0xff] }
0x152c   :  { %7834 = vtanh.f32 %v8998_v8  ;;  %v9105_v54 = vpack.c.bf16 %v2183_v58, %v2179_v43  ;;  %v9163_v43 = vld [vmem:[%s10674_s2 + $0x8] sm:$0xff] }
0x1536   :  { %v7835_v2 = vpop.eup %7834 }
0x1537   :  { %2046 = vrot.lane.b32.xlu1 %v7835_v2, %s8238_s21 }
0x15a9   :  { %v2047_v15 = vpop.permute.xlu1 %2046 }
0x15aa   :  { %v2049_v42 = vmul.f32 %v2047_v15, %v2032_v48  ;;  %v2177_v48 = vld [vmem:[%s10673_s6 + $0x48] sm:$0xff] }
0x15ab   :  { %v9103_v49 = vpack.c.bf16 %v2181_v1, %v2177_v48 }
0x15ac   :  { %2051 = vrot.lane.b32.xlu1 %v2049_v42, %s8239_s22 }
0x15ad   :  { %7508 = vmatprep.subr.bf16.mxu1 %v9103_v49 }
0x15ae   :  { %7510 = vmatpush1.bf16.msra.mxu1 %v9117_v14 }
0x161e   :  { %v2052_v35 = vpop.permute.xlu1 %2051 }
0x161f   :  { %2055 = vst.msk [vmem:[#allocation2 + $0x8] sm:$0xff] %vm81_vm3, %v2052_v35  ;;  %7262 = vmatmul.mubr.msk.f32.vlgmr.msra.gmra.mrb[10].mxu0 %vm81_vm3, %v2052_v35 }
0x1620   :  { %2324 = vmatprep.mubr.f32.mxu0 %v10780_v22 }
0x16f2   :  { %v2134_v60 = vpop.f32.mrb[10].mxu0 }
0x16f3   :  { %v2141_v18 = vadd.f32 %v7263_v25, %v2134_v60  ;;  %v9045_v26 = vpop.f32.mrb[11].mxu0 }
0x16f5   :  { %v2142_v16 = vadd.f32 %v2141_v18, %v8847_v62 }
0x16f7   :  { %v7264_v39 = vmul.f32 -1.442695, %v2142_v16 }
0x16f9   :  { %7836 = vpow2.f32 %v7264_v39 }
0x16fa   :  { %7838 = vtanh.f32 %v2142_v16 }
0x1703   :  { %v7837_v31 = vpop.eup %7836 }
0x1704   :  { %v2147_v46 = vadd.f32 1.0, %v7837_v31  ;;  %v7839_v41 = vpop.eup %7838 }
0x1706   :  { %7840 = vrcp.f32 %v2147_v46 }
0x1710   :  { %v7841_v38 = vpop.eup %7840 }
0x1711   :  { %v2150_v50 = vsel %vm8382_vm2, %v7839_v41, %v7841_v38 }
0x1712   :  { %2153 = vrot.lane.b32.xlu0 %v2150_v50, %s8238_s21  ;;  %v2151_v53 = vmul.f32 %v2150_v50, %v8830_v4  ;;  %v2175_v4 = vld [vmem:[%s10673_s6 + $0x38] sm:$0xff] }
0x1713   :  { %v9076_v3 = vpack.c.bf16 %v2175_v4, %v2171_v17 }
0x1715   :  { %7512 = vmatprep.subr.bf16.mxu0 %v9076_v3 }
0x1716   :  { %7514 = vmatpush1.bf16.msra.mxu0 %v9090_v36 }
0x1717   :  { %7516 = vmatprep.subr.bf16.mxu0 %v9105_v54 }
0x171a   :  { %7518 = vmatpush1.bf16.msra.mxu0 %v9124_v29 }
0x171b   :  { %7527 = vmatprep.subr.bf16.mxu0 %v10713_v21 }
0x1784   :  { %v2154_v6 = vpop.permute.xlu0 %2153 }
0x1785   :  { %v2156_v56 = vmul.f32 %v2154_v6, %v2150_v50 }
0x1787   :  { %2158 = vrot.lane.b32.xlu1 %v2156_v56, %s8239_s22 }
0x17f9   :  { %v2159_v62 = vpop.permute.xlu1 %2158 }
0x17fa   :  { %v9053_v12 = vadd.f32 %v2159_v62, %v2151_v53 }
0x17fc   :  { %7842 = vtanh.f32 %v9053_v12 }
0x1806   :  { %v7843_v2 = vpop.eup %7842 }
0x1807   :  { %2164 = vrot.lane.b32.xlu0 %v7843_v2, %s8238_s21 }
0x1879   :  { %v2165_v15 = vpop.permute.xlu0 %2164 }
0x187a   :  { %v2167_v42 = vmul.f32 %v2165_v15, %v2150_v50 }
0x187c   :  { %2185 = vrot.lane.b32.xlu1 %v2167_v42, %s8239_s22  ;;  %v9182_v42 = vld [vmem:[%s10674_s2 + $0x18] sm:$0xff] }
0x18ee   :  { %v2186_v35 = vpop.permute.xlu1 %2185 }
0x18ef   :  { %7265 = vmatmul.mubr.msk.f32.vlgmr.msra.gmra.mrb[10].mxu1 %vm81_vm3, %v2186_v35  ;;  %7266 = vmatmul.mubr.msk.f32.vlgmr.msra.gmra.mrb[12].mxu0 %vm81_vm3, %v2186_v35 }
0x18f0   :  { %2902 = vmatprep.mubr.f32.mxu1 %v10780_v22  ;;  %7365 = vmatprep.mubr.msk.f32.mxu0 %vm8244_vm12, %v10780_v22 }
0x19c2   :  { %v9136_v25 = vpop.f32.mrb[10].mxu1  ;;  %v2326_v60 = vpop.f32.mrb[12].mxu0 }
0x19c3   :  { %v2332_v18 = vcombine.high %v2326_v60, %v2326_v60  ;;  %v2339_v16 = vrot.slane %v2326_v60, %v8471_v0  ;;  %v9139_v39 = vpop.f32.mrb[11].mxu1  ;;  %v9141_v31 = vpop.f32.mrb[13].mxu0  ;;  %v9188_v60 = vld [vmem:[%s10674_s2 + $0x30] sm:$0xff] }
0x19c5   :  { %v2346_v46 = vrot.slane %v2332_v18, %v8471_v0  ;;  %v2347_v41 = vcombine.high %v2339_v16, %v2339_v16  ;;  %v2355_v38 = vrot.slane %v2339_v16, %v8471_v0 }
0x19c7   :  { %v2348_v50 = vcombine.high %v2346_v46, %v2346_v46  ;;  %v2362_v6 = vrot.slane %v2346_v46, %v8471_v0  ;;  %v2369_v56 = vrot.slane %v2347_v41, %v8471_v0  ;;  %v2377_v53 = vcombine.high %v2355_v38, %v2355_v38  ;;  %v9195_v46 = vld [vmem:[%s10674_s2 + $0x28] sm:$0xff] }
0x19c8   :  { %v2384_v62 = vrot.slane %v2355_v38, %v8481_v11  ;;  %10799 = vst [vmem:[#allocation12_spill] sm:$0xff] %v9195_v46 }
0x19c9   :  { %v2378_v32 = vcombine.high %v2362_v6, %v2362_v6  ;;  %v2379_v61 = vcombine.high %v2369_v56, %v2369_v56  ;;  %v2388_v17 = vrot.slane %v2369_v56, %v8481_v11  ;;  %v2376_v4 = vrot.slane %v2348_v50, %v8471_v0  ;;  %v9201_v50 = vld [vmem:[%s10674_s2 + $0x38] sm:$0xff]  ;;  %v9207_v56 = vld [vmem:[%s10675_s9] ss:$0 sm:$0xff] }
0x19ca   :  { %v2392_v33 = vrot.slane %v2377_v53, %v8481_v11  ;;  %v2400_v59 = vrot.slane %v2362_v6, %v8481_v11  ;;  %v2421_v20 = vadd.f32 %v9155_v10, %v2384_v62  ;;  %10800 = vst [vmem:[#allocation13_spill] sm:$0xff] %v9201_v50  ;;  %10801 = vst [vmem:[#allocation14_spill] sm:$0xff] %v9207_v56 }
0x19cb   :  { %v2396_v48 = vrot.slane %v2379_v61, %v8481_v11  ;;  %v2408_v1 = vrot.slane %v2378_v32, %v8481_v11  ;;  %v2422_v58 = vadd.f32 %v9163_v43, %v2388_v17  ;;  %v2380_v2 = vcombine.high %v2376_v4, %v2376_v4 }
0x19cc   :  { %v2423_v52 = vadd.f32 %v9169_v63, %v2392_v33  ;;  %7844 = vtanh.f32 %v2421_v20  ;;  %v2425_v5 = vadd.f32 %v9175_v47, %v2400_v59  ;;  %v2404_v15 = vrot.slane %v2376_v4, %v8481_v11 }
0x19cd   :  { %v2424_v35 = vadd.f32 %v9182_v42, %v2396_v48  ;;  %7846 = vtanh.f32 %v2422_v58  ;;  %v2427_v18 = vadd.f32 %v9188_v60, %v2408_v1  ;;  %v2412_v16 = vrot.slane %v2380_v2, %v8481_v11 }
0x19ce   :  { %7848 = vtanh.f32 %v2423_v52  ;;  %v2426_v41 = vadd.f32 %v9195_v46, %v2404_v15 }
0x19cf   :  { %7850 = vtanh.f32 %v2425_v5  ;;  %v2428_v6 = vadd.f32 %v9201_v50, %v2412_v16 }
0x19d0   :  { %7852 = vtanh.f32 %v2424_v35 }
0x19d1   :  { %7854 = vtanh.f32 %v2427_v18 }
0x19d2   :  { %7856 = vtanh.f32 %v2426_v41 }
0x19d3   :  { %7858 = vtanh.f32 %v2428_v6 }
0x19d6   :  { %v7845_v38 = vpop.eup %7844 }
0x19d7   :  { %v2437_v53 = vmul.f32 %v9207_v56, %v7845_v38  ;;  %v7847_v62 = vpop.eup %7846 }
0x19d8   :  { %v7849_v32 = vpop.eup %7848  ;;  %v2438_v61 = vmul.f32 %v9207_v56, %v7847_v62 }
0x19d9   :  { %2445 = vadd.xlane.f32.xlu0 %v2437_v53  ;;  %v7851_v17 = vpop.eup %7850  ;;  %v2439_v4 = vmul.f32 %v9207_v56, %v7849_v32 }
0x19da   :  { %2447 = vadd.xlane.f32.xlu1 %v2438_v61  ;;  %v7853_v33 = vpop.eup %7852  ;;  %v2441_v59 = vmul.f32 %v9207_v56, %v7851_v17 }
0x19db   :  { %v7855_v20 = vpop.eup %7854  ;;  %v2440_v48 = vmul.f32 %v9207_v56, %v7853_v33 }
0x19dc   :  { %v7857_v1 = vpop.eup %7856  ;;  %v2443_v58 = vmul.f32 %v9207_v56, %v7855_v20 }
0x19dd   :  { %2449 = vadd.xlane.f32.xlu0 %v2439_v4  ;;  %v2442_v52 = vmul.f32 %v9207_v56, %v7857_v1  ;;  %v7859_v5 = vpop.eup %7858 }
0x19de   :  { %2453 = vadd.xlane.f32.xlu1 %v2441_v59  ;;  %v2444_v2 = vmul.f32 %v9207_v56, %v7859_v5 }
0x19e1   :  { %2451 = vadd.xlane.f32.xlu0 %v2440_v48 }
0x19e2   :  { %2457 = vadd.xlane.f32.xlu1 %v2443_v58 }
0x19e5   :  { %2455 = vadd.xlane.f32.xlu0 %v2442_v52 }
0x19e9   :  { %2459 = vadd.xlane.f32.xlu0 %v2444_v2 }
0x1a66   :  { %v2446_v15 = vpop.xlane.xlu0 %2445 }
0x1a67   :  { %v2448_v35 = vpop.xlane.xlu1 %2447  ;;  %v2472_v41 = vrot.slane %v2446_v15, %v10782_v30 }
0x1a68   :  { %v2476_v18 = vrot.slane %v2448_v35, %v10782_v30 }
0x1a6a   :  { %v2450_v16 = vpop.xlane.xlu0 %2449  ;;  %v2501_v6 = vsel %vm523_vm4, %v2476_v18, %v2472_v41 }
0x1a6b   :  { %v2480_v38 = vrot.slane %v2450_v16, %v10782_v30  ;;  %v2454_v53 = vpop.xlane.xlu1 %2453 }
0x1a6c   :  { %v2488_v4 = vrot.slane %v2454_v53, %v10782_v30 }
0x1a6d   :  { %v2502_v61 = vsel %vm525_vm5, %v2480_v38, %v2501_v6 }
0x1a6e   :  { %v2452_v62 = vpop.xlane.xlu0 %2451 }
0x1a6f   :  { %v2484_v32 = vrot.slane %v2452_v62, %v10782_v30  ;;  %v2458_v59 = vpop.xlane.xlu1 %2457 }
0x1a70   :  { %v2496_v58 = vrot.slane %v2458_v59, %v10782_v30 }
0x1a71   :  { %v2503_v17 = vsel %vm527_vm6, %v2484_v32, %v2502_v61 }
0x1a72   :  { %v2456_v33 = vpop.xlane.xlu0 %2455  ;;  %v2504_v48 = vsel %vm529_vm7, %v2488_v4, %v2503_v17 }
0x1a73   :  { %v2492_v20 = vrot.slane %v2456_v33, %v10782_v30 }
0x1a75   :  { %v2505_v1 = vsel %vm531_vm8, %v2492_v20, %v2504_v48 }
0x1a76   :  { %v2460_v52 = vpop.xlane.xlu0 %2459  ;;  %v2506_v2 = vsel %vm533_vm9, %v2496_v58, %v2505_v1 }
0x1a77   :  { %v2500_v5 = vrot.slane %v2460_v52, %v10782_v30 }
0x1a79   :  { %v2507_v18 = vsel %vm535_vm10, %v2500_v5, %v2506_v2 }
0x1a7a   :  { %v2509_v41 = vsel %vm538_vm11, %v2507_v18, -inf }
0x1a7b   :  { %2510 = vmax.xlane.f32.xlu1 %v2509_v41 }
0x1b08   :  { %v2511_v38 = vpop.xlane.xlu1 %2510 }
0x1b09   :  { %v2516_v6 = vrot.slane %v2511_v38, %v8481_v11  ;;  %v2520_v32 = vrot.slane %v2511_v38, %v10783_v23  ;;  %v2524_v61 = vrot.slane %v2511_v38, %v10784_v28  ;;  %v2528_v17 = vrot.slane %v2511_v38, %v10786_v27 }
0x1b0a   :  { %v2532_v4 = vrot.slane %v2511_v38, %v10785_v51  ;;  %v2536_v1 = vrot.slane %v2511_v38, %v10788_v9  ;;  %v2540_v18 = vrot.slane %v2511_v38, %v10787_v55  ;;  %v2544_v57 = vrot.slane %v2511_v38, %v10789_v34 }
0x1b0b   :  { %v2554_v20 = vsub.f32 %v2448_v35, %v2520_v32  ;;  %v2553_v48 = vsub.f32 %v2446_v15, %v2516_v6  ;;  %v2555_v21 = vsub.f32 %v2450_v16, %v2524_v61  ;;  %v2556_v58 = vsub.f32 %v2452_v62, %v2528_v17 }
0x1b0c   :  { %v2557_v45 = vsub.f32 %v2454_v53, %v2532_v4  ;;  %v2558_v56 = vsub.f32 %v2456_v33, %v2536_v1  ;;  %v2559_v35 = vsub.f32 %v2458_v59, %v2540_v18  ;;  %v2560_v16 = vsub.f32 %v2460_v52, %v2544_v57 }
0x1b0d   :  { %v2563_v5 = vmul.f32 1.442695, %v2554_v20  ;;  %v2561_v2 = vmul.f32 1.442695, %v2553_v48  ;;  %v2565_v41 = vmul.f32 1.442695, %v2555_v21 }
0x1b0e   :  { %v2567_v50 = vmul.f32 1.442695, %v2556_v58  ;;  %v2569_v46 = vmul.f32 1.442695, %v2557_v45  ;;  %v2571_v15 = vmul.f32 1.442695, %v2558_v56 }
0x1b0f   :  { %7860 = vpow2.f32 %v2563_v5  ;;  %v2573_v62 = vmul.f32 1.442695, %v2559_v35  ;;  %v2575_v6 = vmul.f32 1.442695, %v2560_v16 }
0x1b10   :  { %7862 = vpow2.f32 %v2561_v2 }
0x1b11   :  { %7864 = vpow2.f32 %v2565_v41 }
0x1b12   :  { %7866 = vpow2.f32 %v2567_v50 }
0x1b13   :  { %7868 = vpow2.f32 %v2569_v46 }
0x1b14   :  { %7870 = vpow2.f32 %v2571_v15 }
0x1b15   :  { %7872 = vpow2.f32 %v2573_v62 }
0x1b16   :  { %7874 = vpow2.f32 %v2575_v6 }
0x1b19   :  { %v7861_v32 = vpop.eup %7860 }
0x1b1a   :  { %v7863_v61 = vpop.eup %7862  ;;  %2589 = vperm.xlu1 %7696, %v7861_v32  }
0x1b1b   :  { %2586 = vperm.xlu0 %7695, %v7863_v61   ;;  %v7865_v21 = vpop.eup %7864 }
0x1b1c   :  { %v7867_v53 = vpop.eup %7866 }
0x1b1d   :  { %v9241_v33 = vpop.eup %7868 }
0x1b1e   :  { %2592 = vperm.xlu1 %7696, %v7865_v21   ;;  %v9243_v45 = vpop.eup %7870 }
0x1b1f   :  { %2595 = vperm.xlu0 %7695, %v7867_v53   ;;  %v9247_v57 = vpop.eup %7872 }
0x1b20   :  { %v9249_v46 = vpop.eup %7874 }
0x1b22   :  { %2598 = vperm.xlu1 %7696, %v9241_v33  }
0x1b23   :  { %2601 = vperm.xlu0 %7695, %v9243_v45  }
0x1b26   :  { %2604 = vperm.xlu1 %7696, %v9247_v57  }
0x1b27   :  { %2607 = vperm.xlu0 %7695, %v9249_v46  }
0x1b99   :  { %v2590_v50 = vpop.permute.xlu1 %2589 }
0x1b9a   :  { %v2587_v56 = vpop.permute.xlu0 %2586  ;;  %v2616_v59 = vrot.slane %v2590_v50, %v10782_v30 }
0x1b9b   :  { %v2612_v52 = vrot.slane %v2587_v56, %v10782_v30 }
0x1b9d   :  { %v2593_v38 = vpop.permute.xlu1 %2592  ;;  %v2641_v20 = vsel %vm523_vm4, %v2616_v59, %v2612_v52 }
0x1b9e   :  { %v2620_v17 = vrot.slane %v2593_v38, %v10782_v30  ;;  %v2596_v4 = vpop.permute.xlu0 %2595 }
0x1b9f   :  { %v2624_v48 = vrot.slane %v2596_v4, %v10782_v30 }
0x1ba0   :  { %v2642_v1 = vsel %vm525_vm5, %v2620_v17, %v2641_v20 }
0x1ba1   :  { %v2599_v58 = vpop.permute.xlu1 %2598  ;;  %v2643_v18 = vsel %vm527_vm6, %v2624_v48, %v2642_v1 }
0x1ba2   :  { %v2628_v5 = vrot.slane %v2599_v58, %v10782_v30  ;;  %v2602_v2 = vpop.permute.xlu0 %2601 }
0x1ba3   :  { %v2632_v41 = vrot.slane %v2602_v2, %v10782_v30 }
0x1ba4   :  { %v2644_v35 = vsel %vm529_vm7, %v2628_v5, %v2643_v18 }
0x1ba5   :  { %v2605_v15 = vpop.permute.xlu1 %2604  ;;  %v2645_v6 = vsel %vm531_vm8, %v2632_v41, %v2644_v35 }
0x1ba6   :  { %v2636_v16 = vrot.slane %v2605_v15, %v10782_v30  ;;  %v2608_v62 = vpop.permute.xlu0 %2607 }
0x1ba7   :  { %v2640_v50 = vrot.slane %v2608_v62, %v10782_v30 }
0x1ba8   :  { %v2646_v56 = vsel %vm533_vm9, %v2636_v16, %v2645_v6 }
0x1ba9   :  { %v2647_v59 = vsel %vm535_vm10, %v2640_v50, %v2646_v56 }
0x1baa   :  { %v2649_v52 = vsel %vm538_vm11, %v2647_v59, 0.0 }
0x1bab   :  { %2650 = vadd.xlane.f32.xlu1 %v2649_v52 }
0x1c38   :  { %v2651_v38 = vpop.xlane.xlu1 %2650 }
0x1c39   :  { %v2656_v17 = vrot.slane %v2651_v38, %v8481_v11  ;;  %v2660_v4 = vrot.slane %v2651_v38, %v10783_v23  ;;  %v2664_v20 = vrot.slane %v2651_v38, %v10784_v28  ;;  %v2668_v48 = vrot.slane %v2651_v38, %v10786_v27 }
0x1c3a   :  { %v2672_v58 = vrot.slane %v2651_v38, %v10785_v51  ;;  %v2676_v18 = vrot.slane %v2651_v38, %v10788_v9  ;;  %v2680_v15 = vrot.slane %v2651_v38, %v10787_v55  ;;  %v2684_v6 = vrot.slane %v2651_v38, %v10789_v34  ;;  %v9374_v34 = vld [vmem:[%s10678_s0 + $0x38] sm:$0xff] }
0x1c3b   :  { %7876 = vrcp.f32 %v2656_v17  ;;  %10809 = vst [vmem:[#allocation23_spill] sm:$0xff] %v9374_v34 }
0x1c3c   :  { %7878 = vrcp.f32 %v2660_v4 }
0x1c3d   :  { %7880 = vrcp.f32 %v2664_v20 }
0x1c3e   :  { %7882 = vrcp.f32 %v2668_v48  ;;  %v2820_v48 = vld [vmem:[%s10676_s7 + $0x38] sm:$0xff] }
0x1c3f   :  { %7884 = vrcp.f32 %v2672_v58  ;;  %v2819_v58 = vld [vmem:[%s10676_s7 + $0x30] sm:$0xff] }
0x1c40   :  { %7886 = vrcp.f32 %v2676_v18  ;;  %v7268_v18 = vld [vmem:[%s10677_s3 + $0x10] sm:$0xff] }
0x1c41   :  { %7888 = vrcp.f32 %v2680_v15  ;;  %v9325_v15 = vld [vmem:[%s10678_s0 + $0x8] sm:$0xff] }
0x1c42   :  { %7890 = vrcp.f32 %v2684_v6  ;;  %10802 = vst [vmem:[#allocation19_spill] sm:$0xff] %v9325_v15  ;;  %v9331_v6 = vld [vmem:[%s10678_s0] sm:$0xff] }
0x1c43   :  { %10803 = vst [vmem:[#allocation15_spill] sm:$0xff] %v9331_v6 }
0x1c45   :  { %v7877_v1 = vpop.eup %7876 }
0x1c46   :  { %v2694_v5 = vmul.f32 %v7877_v1, %v7863_v61  ;;  %v7879_v2 = vpop.eup %7878  ;;  %v2817_v1 = vld [vmem:[%s10676_s7 + $0x20] sm:$0xff] }
0x1c47   :  { %v2696_v41 = vmul.f32 %v7879_v2, %v7861_v32  ;;  %v7881_v35 = vpop.eup %7880  ;;  %v9313_v2 = vpack.c.bf16 %v2819_v58, %v2817_v1 }
0x1c48   :  { %2711 = vperm.xlu0 %7695, %v2694_v5   ;;  %v2698_v16 = vmul.f32 %v7881_v35, %v7865_v21  ;;  %v7883_v62 = vpop.eup %7882 }
0x1c49   :  { %v2700_v50 = vmul.f32 %v7883_v62, %v7867_v53  ;;  %v7885_v56 = vpop.eup %7884  ;;  %v2814_v53 = vld [vmem:[%s10676_s7 + $0x8] sm:$0xff] }
0x1c4a   :  { %v2702_v61 = vmul.f32 %v7885_v56, %v9241_v33  ;;  %v7887_v59 = vpop.eup %7886  ;;  %v2816_v33 = vld [vmem:[%s10676_s7 + $0x18] sm:$0xff] }
0x1c4b   :  { %v2704_v32 = vmul.f32 %v7887_v59, %v9243_v45  ;;  %v7889_v52 = vpop.eup %7888  ;;  %v9287_v38 = vpack.c.bf16 %v2816_v33, %v2814_v53  ;;  %v2813_v45 = vld [vmem:[%s10676_s7] sm:$0xff] }
0x1c4c   :  { %2716 = vperm.xlu0 %7695, %v2696_v41   ;;  %v2706_v17 = vmul.f32 %v7889_v52, %v9247_v57  ;;  %v7891_v21 = vpop.eup %7890  ;;  %v2815_v57 = vld [vmem:[%s10676_s7 + $0x10] sm:$0xff] }
0x1c4d   :  { %v2708_v4 = vmul.f32 %v7891_v21, %v9249_v46  ;;  %v2818_v46 = vld [vmem:[%s10676_s7 + $0x28] sm:$0xff]  ;;  %v9298_v20 = vpack.c.bf16 %v2815_v57, %v2813_v45  ;;  %7520 = vmatprep.subr.bf16.mxu1 %v9287_v38 }
0x1c4e   :  { %v9310_v5 = vpack.c.bf16 %v2820_v48, %v2818_v46  ;;  %v9353_v48 = vld [vmem:[%s10678_s0 + $0x20] sm:$0xff] }
0x1c4f   :  { %7522 = vmatpush1.bf16.msra.mxu1 %v9298_v20  ;;  %10806 = vst [vmem:[#allocation18_spill] sm:$0xff] %v9353_v48 }
0x1c50   :  { %2721 = vperm.xlu0 %7695, %v2698_v16   ;;  %7524 = vmatprep.subr.bf16.mxu1 %v9310_v5 }
0x1c53   :  { %7526 = vmatpush1.bf16.msra.mxu1 %v9313_v2 }
0x1c54   :  { %2726 = vperm.xlu0 %7695, %v2700_v50   ;;  %7531 = vmatprep.subr.bf16.mxu1 %v9010_v44  ;;  %v9337_v44 = vld [vmem:[%s10678_s0 + $0x10] sm:$0xff] }
0x1c55   :  { %10804 = vst [vmem:[#allocation16_spill] sm:$0xff] %v9337_v44 }
0x1c58   :  { %2731 = vperm.xlu0 %7695, %v2702_v61  }
0x1c5c   :  { %2736 = vperm.xlu0 %7695, %v2704_v32  }
0x1c60   :  { %2741 = vperm.xlu0 %7695, %v2706_v17   ;;  %v9346_v17 = vld [vmem:[%s10678_s0 + $0x18] sm:$0xff] }
0x1c61   :  { %10805 = vst [vmem:[#allocation17_spill] sm:$0xff] %v9346_v17 }
0x1c64   :  { %2746 = vperm.xlu0 %7695, %v2708_v4  }
0x1c68   :  { %2917 = vrot.lane.b32.xlu0 %v7268_v18, %s8242_s26 }
0x1cc7   :  { %v2712_v41 = vpop.permute.xlu0 %2711 }
0x1cc8   :  { %v2749_v50 = vmul.f32 %v9331_v6, %v2712_v41 }
0x1cca   :  { %v2757_v52 = vsel %vm81_vm3, %v2749_v50, 0.0 }
0x1ccb   :  { %v2717_v35 = vpop.permute.xlu0 %2716  ;;  %v2758_v45 = vrot.slane %v2757_v52, 4 }
0x1ccc   :  { %v2750_v16 = vmul.f32 %v9325_v15, %v2717_v35 }
0x1ccd   :  { %v2759_v35 = vadd.f32 %v2758_v45, %v2757_v52 }
0x1cce   :  { %v2764_v61 = vsel %vm81_vm3, %v2750_v16, 0.0 }
0x1ccf   :  { %v2722_v62 = vpop.permute.xlu0 %2721  ;;  %v2765_v4 = vrot.slane %v2764_v61, 4 }
0x1cd0   :  { %v2751_v56 = vmul.f32 %v9337_v44, %v2722_v62 }
0x1cd1   :  { %v2766_v58 = vadd.f32 %v2765_v4, %v2764_v61  ;;  %v2760_v61 = vrot.slane %v2759_v35, 2 }
0x1cd2   :  { %v2771_v59 = vsel %vm81_vm3, %v2751_v56, 0.0  ;;  %v9360_v56 = vld [vmem:[%s10678_s0 + $0x28] sm:$0xff] }
0x1cd3   :  { %v2727_v32 = vpop.permute.xlu0 %2726  ;;  %v2772_v53 = vrot.slane %v2771_v59, 4  ;;  %10807 = vst [vmem:[#allocation21_spill] sm:$0xff] %v9360_v56 }
0x1cd4   :  { %v2752_v21 = vmul.f32 %v9346_v17, %v2727_v32 }
0x1cd5   :  { %v2773_v18 = vadd.f32 %v2772_v53, %v2771_v59 }
0x1cd6   :  { %v2778_v33 = vsel %vm81_vm3, %v2752_v21, 0.0  ;;  %v2767_v21 = vrot.slane %v2766_v58, 2 }
0x1cd7   :  { %v2779_v57 = vrot.slane %v2778_v33, 4  ;;  %v2732_v46 = vpop.permute.xlu0 %2731  ;;  %v2774_v44 = vrot.slane %v2773_v18, 2 }
0x1cd8   :  { %v2753_v1 = vmul.f32 %v9353_v48, %v2732_v46 }
0x1cd9   :  { %v2780_v16 = vadd.f32 %v2779_v57, %v2778_v33  ;;  %v9367_v33 = vld [vmem:[%s10678_s0 + $0x30] sm:$0xff]  ;;  %v2768_v57 = vadd.f32 %v2767_v21, %v2766_v58 }
0x1cda   :  { %v2785_v41 = vsel %vm81_vm3, %v2753_v1, 0.0  ;;  %10808 = vst [vmem:[#allocation22_spill] sm:$0xff] %v9367_v33 }
0x1cdb   :  { %v2786_v62 = vrot.slane %v2785_v41, 4  ;;  %v2737_v50 = vpop.permute.xlu0 %2736  ;;  %v2781_v59 = vrot.slane %v2780_v16, 2  ;;  %v2769_v27 = vrot.slane %v2768_v57, 1 }
0x1cdc   :  { %v2754_v32 = vmul.f32 %v9360_v56, %v2737_v50  ;;  %v2775_v50 = vadd.f32 %v2774_v44, %v2773_v18 }
0x1cdd   :  { %v2787_v17 = vadd.f32 %v2786_v62, %v2785_v41  ;;  %v2761_v62 = vadd.f32 %v2760_v61, %v2759_v35  ;;  %v2782_v56 = vadd.f32 %v2781_v59, %v2780_v16  ;;  %v2770_v59 = vadd.f32 %v2769_v27, %v2768_v57 }
0x1cde   :  { %v2792_v46 = vsel %vm81_vm3, %v2754_v32, 0.0  ;;  %v2776_v21 = vrot.slane %v2775_v50, 1 }
0x1cdf   :  { %v2793_v4 = vrot.slane %v2792_v46, 4  ;;  %v2742_v53 = vpop.permute.xlu0 %2741  ;;  %v2788_v52 = vrot.slane %v2787_v17, 2  ;;  %v2762_v18 = vrot.slane %v2761_v62, 1  ;;  %v2783_v35 = vrot.slane %v2782_v56, 1 }
0x1ce0   :  { %v2755_v45 = vmul.f32 %v9367_v33, %v2742_v53 }
0x1ce1   :  { %v2794_v1 = vadd.f32 %v2793_v4, %v2792_v46  ;;  %v2789_v15 = vadd.f32 %v2788_v52, %v2787_v17  ;;  %v2763_v33 = vadd.f32 %v2762_v18, %v2761_v62  ;;  %v2784_v55 = vadd.f32 %v2783_v35, %v2782_v56  ;;  %v9424_v35 = vld [vmem:[%s10681_s10] ss:$0 sm:$0xff] }
0x1ce2   :  { %v2799_v41 = vsel %vm81_vm3, %v2755_v45, 0.0  ;;  %v2777_v45 = vadd.f32 %v2776_v21, %v2775_v50 }
0x1ce3   :  { %v2795_v32 = vrot.slane %v2794_v1, 2  ;;  %v2800_v48 = vrot.slane %v2799_v41, 4  ;;  %v2747_v6 = vpop.permute.xlu0 %2746  ;;  %v2790_v61 = vrot.slane %v2789_v15, 1 }
0x1ce4   :  { %v2756_v9 = vmul.f32 %v9374_v34, %v2747_v6 }
0x1ce5   :  { %v2796_v53 = vadd.f32 %v2795_v32, %v2794_v1  ;;  %v2801_v58 = vadd.f32 %v2800_v48, %v2799_v41  ;;  %v2791_v34 = vadd.f32 %v2790_v61, %v2789_v15  ;;  %v2829_v48 = vsel %vm523_vm4, %v2770_v59, %v2763_v33 }
0x1ce6   :  { %v2806_v44 = vsel %vm81_vm3, %v2756_v9, 0.0  ;;  %v2830_v9 = vsel %vm525_vm5, %v2777_v45, %v2829_v48 }
0x1ce7   :  { %v2802_v16 = vrot.slane %v2801_v58, 2  ;;  %v2807_v46 = vrot.slane %v2806_v44, 4  ;;  %v2797_v17 = vrot.slane %v2796_v53, 1  ;;  %v2831_v28 = vsel %vm527_vm6, %v2784_v55, %v2830_v9  ;;  %v7272_v9 = vld [vmem:[%s10672_s1 + $0x18] sm:$0xff] }
0x1ce8   :  { %v2832_v27 = vsel %vm529_vm7, %v2791_v34, %v2831_v28  ;;  %v2929_v28 = vld [vmem:[%s10679_s8 + $0x8] sm:$0xff] }
0x1ce9   :  { %v2803_v4 = vadd.f32 %v2802_v16, %v2801_v58  ;;  %v2808_v52 = vadd.f32 %v2807_v46, %v2806_v44  ;;  %v2798_v1 = vadd.f32 %v2797_v17, %v2796_v53 }
0x1ceb   :  { %v2804_v51 = vrot.slane %v2803_v4, 1  ;;  %v2809_v6 = vrot.slane %v2808_v52, 2  ;;  %v2833_v50 = vsel %vm531_vm8, %v2798_v1, %v2832_v27 }
0x1ced   :  { %v2810_v41 = vadd.f32 %v2809_v6, %v2808_v52  ;;  %v2805_v32 = vadd.f32 %v2804_v51, %v2803_v4 }
0x1cef   :  { %v2811_v23 = vrot.slane %v2810_v41, 1  ;;  %v2834_v56 = vsel %vm533_vm9, %v2805_v32, %v2833_v50 }
0x1cf1   :  { %v2812_v57 = vadd.f32 %v2811_v23, %v2810_v41  ;;  %v2928_v23 = vld [vmem:[%s10679_s8] sm:$0xff] }
0x1cf2   :  { %v9397_v51 = vpack.c.bf16 %v2929_v28, %v2928_v23 }
0x1cf3   :  { %v2835_v62 = vsel %vm535_vm10, %v2812_v57, %v2834_v56 }
0x1cf4   :  { %7267 = vmatmul.mubr.msk.f32.vlgmr.msra.gmra.mrb[12].mxu1 %vm81_vm3, %v2835_v62  ;;  %7529 = vmatpush3.bf16.msra.mxu0 %v9397_v51 }
0x1cf5   :  { %7533 = vmatpush1.bf16.msra.mxu1 %v9021_v37  ;;  %3112 = vmatprep.mubr.f32.mxu1 %v10780_v22 }
0x1cf6   :  { %7535 = vmatprep.subr.bf16.mxu1 %v9023_v19  ;;  %7539 = vmatprep.subr.bf16.mxu0 %v9065_v40  ;;  %v2918_v40 = vpop.permute.xlu0 %2917 }
0x1cf9   :  { %7537 = vmatpush1.bf16.msra.mxu1 %v9033_v13 }
0x1cfa   :  { %7547 = vmatprep.subr.bf16.mxu1 %v9076_v3  ;;  %v9407_v3 = vld [vmem:[%s10680_s11] ss:$0 sm:$0xff] }
0x1dc7   :  { %v2904_v55 = vpop.f32.mrb[12].mxu1 }
0x1dc8   :  { %v2926_v34 = vadd.f32 %v2904_v55, %v9136_v25  ;;  %v2906_v37 = vpop.f32.mrb[13].mxu1 }
0x1dc9   :  { %v2909_v19 = vadd.f32 %v2906_v37, %v9141_v31 }
0x1dca   :  { %v2927_v13 = vadd.f32 %v2926_v34, %v9045_v26 }
0x1dcb   :  { %v9410_v15 = vadd.f32 %v9407_v3, %v2909_v19 }
0x1dcd   :  { %10810 = vst [vmem:[#allocation24_spill] sm:$0xff] %v9410_v15  ;;  %v2911_v33 = vmul.f32 0.5, %v9410_v15 }
0x1dcf   :  { %v2912_v53 = vmul.f32 1.442695, %v2911_v33 }
0x1dd1   :  { %7892 = vpow2.f32 %v2912_v53 }
0x1ddb   :  { %v7893_v58 = vpop.eup %7892 }
0x1ddc   :  { %v2920_v25 = vmul.f32 %v7893_v58, %v2918_v40 }
0x1dde   :  { %2922 = vrot.lane.b32.xlu1 %v2920_v25, %s8245_s24 }
0x1e50   :  { %v2923_v31 = vpop.permute.xlu1 %2922 }
0x1e51   :  { %v2925_v26 = vadd.f32 %v2923_v31, %v9410_v15 }
0x1e53   :  { %7366 = vmatmul.mubr.msk.f32.vlgmr.msra.gmra.mrb[14].mxu0 %vm965_vm13, %v2925_v26 }
0x1e54   :  { %7541 = vmatpush1.bf16.msra.mxu0 %v9078_v7  ;;  %3233 = vmatprep.mubr.f32.mxu0 %v10780_v22 }
0x1e55   :  { %7543 = vmatprep.subr.bf16.mxu0 %v9103_v49 }
0x1e58   :  { %7545 = vmatpush1.bf16.msra.mxu0 %v9117_v14 }
0x1e59   :  { %7555 = vmatprep.subr.bf16.mxu0 %v9287_v38 }
0x1f26   :  { %v2999_v21 = vpop.f32.mrb[14].mxu0 }
0x1f27   :  { %v3003_v44 = vadd.f32 %v2999_v21, %v2927_v13  ;;  %v7367_v18 = vpop.f32.mrb[15].mxu0 }
0x1f29   :  { %v3004_v16 = vadd.f32 %v9424_v35, %v3003_v44 }
0x1f2b   :  { %v7270_v46 = vmul.f32 -1.442695, %v3004_v16 }
0x1f2d   :  { %7894 = vpow2.f32 %v7270_v46 }
0x1f2e   :  { %7896 = vtanh.f32 %v3004_v16 }
0x1f37   :  { %v7895_v7 = vpop.eup %7894 }
0x1f38   :  { %v3009_v61 = vadd.f32 1.0, %v7895_v7  ;;  %v7897_v49 = vpop.eup %7896 }
0x1f3a   :  { %7898 = vrcp.f32 %v3009_v61 }
0x1f44   :  { %v7899_v14 = vpop.eup %7898 }
0x1f45   :  { %v3012_v38 = vsel %vm8382_vm2, %v7897_v49, %v7899_v14 }
0x1f46   :  { %3015 = vrot.lane.b32.xlu0 %v3012_v38, %s8238_s21  ;;  %v3013_v4 = vmul.f32 %v3012_v38, %v8998_v8  ;;  %v10811_v8 = vmov 0.0|0.0  }
0x1fb8   :  { %v3016_v59 = vpop.permute.xlu0 %3015 }
0x1fb9   :  { %v3018_v17 = vmul.f32 %v3016_v59, %v3012_v38 }
0x1fbb   :  { %3020 = vrot.lane.b32.xlu0 %v3018_v17, %s8239_s22 }
0x202d   :  { %v3021_v52 = vpop.permute.xlu0 %3020 }
0x202e   :  { %v9432_v45 = vadd.f32 %v3021_v52, %v3013_v4 }
0x2030   :  { %7900 = vtanh.f32 %v9432_v45 }
0x203a   :  { %v7901_v6 = vpop.eup %7900 }
0x203b   :  { %3026 = vrot.lane.b32.xlu0 %v7901_v6, %s8238_s21 }
0x20ad   :  { %v3027_v48 = vpop.permute.xlu0 %3026 }
0x20ae   :  { %v3029_v1 = vmul.f32 %v3027_v48, %v3012_v38 }
0x20b0   :  { %3031 = vrot.lane.b32.xlu0 %v3029_v1, %s8239_s22 }
0x2122   :  { %v3032_v41 = vpop.permute.xlu0 %3031 }
0x2123   :  { %3035 = vst.msk [vmem:[#allocation2 + $0x10] sm:$0xff] %vm81_vm3, %v3032_v41  ;;  %7271 = vmatmul.mubr.msk.f32.vlgmr.msra.gmra.mrb[14].mxu1 %vm81_vm3, %v3032_v41 }
0x2124   :  { %7549 = vmatpush1.bf16.msra.mxu1 %v9090_v36  ;;  %3304 = vmatprep.mubr.f32.mxu1 %v10780_v22 }
0x2125   :  { %7551 = vmatprep.subr.bf16.mxu1 %v9105_v54 }
0x2128   :  { %7553 = vmatpush1.bf16.msra.mxu1 %v9124_v29 }
0x2129   :  { %7562 = vmatprep.subr.bf16.mxu1 %v10811_v8 }
0x21f6   :  { %v3114_v32 = vpop.f32.mrb[14].mxu1 }
0x21f7   :  { %v3121_v27 = vadd.f32 %v7272_v9, %v3114_v32  ;;  %v9447_v57 = vpop.f32.mrb[15].mxu1 }
0x21f9   :  { %v3122_v50 = vadd.f32 %v3121_v27, %v9139_v39  ;;  %v10812_v27 = vld [vmem:[#allocation12_spill] sm:$0xff] }
0x21fb   :  { %v7273_v56 = vmul.f32 -1.442695, %v3122_v50 }
0x21fd   :  { %7902 = vpow2.f32 %v7273_v56 }
0x21fe   :  { %7904 = vtanh.f32 %v3122_v50  ;;  %v10813_v50 = vld [vmem:[#allocation14_spill] sm:$0xff] }
0x2207   :  { %v7903_v36 = vpop.eup %7902 }
0x2208   :  { %v3127_v62 = vadd.f32 1.0, %v7903_v36  ;;  %v7905_v54 = vpop.eup %7904  ;;  %v10814_v36 = vld [vmem:[#allocation13_spill] sm:$0xff] }
0x220a   :  { %7906 = vrcp.f32 %v3127_v62 }
0x2214   :  { %v7907_v29 = vpop.eup %7906 }
0x2215   :  { %v3130_v23 = vsel %vm8382_vm2, %v7905_v54, %v7907_v29 }
0x2216   :  { %3133 = vrot.lane.b32.xlu1 %v3130_v23, %s8238_s21  ;;  %v3131_v34 = vmul.f32 %v3130_v23, %v9053_v12 }
0x2288   :  { %v3134_v28 = vpop.permute.xlu1 %3133 }
0x2289   :  { %v3136_v55 = vmul.f32 %v3134_v28, %v3130_v23 }
0x228b   :  { %3138 = vrot.lane.b32.xlu0 %v3136_v55, %s8239_s22 }
0x22fd   :  { %v3139_v39 = vpop.permute.xlu0 %3138 }
0x22fe   :  { %v9455_v37 = vadd.f32 %v3139_v39, %v3131_v34 }
0x2300   :  { %7908 = vtanh.f32 %v9455_v37 }
0x230a   :  { %v7909_v19 = vpop.eup %7908 }
0x230b   :  { %3144 = vrot.lane.b32.xlu1 %v7909_v19, %s8238_s21 }
0x237d   :  { %v3145_v13 = vpop.permute.xlu1 %3144 }
0x237e   :  { %v3147_v33 = vmul.f32 %v3145_v13, %v3130_v23 }
0x2380   :  { %3165 = vrot.lane.b32.xlu0 %v3147_v33, %s8239_s22 }
0x23f2   :  { %v3166_v53 = vpop.permute.xlu0 %3165 }
0x23f3   :  { %7274 = vmatmul.mubr.msk.f32.vlgmr.msra.gmra.mrb[16].mxu0 %vm81_vm3, %v3166_v53  ;;  %7275 = vmatmul.mubr.msk.f32.vlgmr.msra.gmra.mrb[16].mxu1 %vm81_vm3, %v3166_v53 }
0x23f4   :  { %7557 = vmatpush1.bf16.msra.mxu0 %v9298_v20  ;;  %3882 = vmatprep.mubr.f32.mxu0 %v10780_v22 }
0x23f5   :  { %7559 = vmatprep.subr.bf16.mxu0 %v9310_v5  ;;  %7564 = vmatpush3.bf16.msra.mxu1 %v9397_v51 }
0x23f6   :  { %7372 = vmatprep.mubr.msk.f32.mxu1 %vm8244_vm12, %v10780_v22 }
0x23f8   :  { %7561 = vmatpush1.bf16.msra.mxu0 %v9313_v2 }
0x24c6   :  { %v9469_v12 = vpop.f32.mrb[16].mxu0  ;;  %v3306_v40 = vpop.f32.mrb[16].mxu1 }
0x24c7   :  { %v3312_v58 = vcombine.high %v3306_v40, %v3306_v40  ;;  %v3319_v25 = vrot.slane %v3306_v40, %v8471_v0  ;;  %v9472_v31 = vpop.f32.mrb[17].mxu0  ;;  %v9474_v20 = vpop.f32.mrb[17].mxu1 }
0x24c9   :  { %v3326_v26 = vrot.slane %v3312_v58, %v8471_v0  ;;  %v3327_v5 = vcombine.high %v3319_v25, %v3319_v25  ;;  %v3335_v51 = vrot.slane %v3319_v25, %v8471_v0 }
0x24cb   :  { %v3328_v21 = vcombine.high %v3326_v26, %v3326_v26  ;;  %v3342_v44 = vrot.slane %v3326_v26, %v8471_v0  ;;  %v3349_v2 = vrot.slane %v3327_v5, %v8471_v0  ;;  %v3357_v18 = vcombine.high %v3335_v51, %v3335_v51 }
0x24cc   :  { %v3364_v16 = vrot.slane %v3335_v51, %v8481_v11 }
0x24cd   :  { %v3358_v46 = vcombine.high %v3342_v44, %v3342_v44  ;;  %v3359_v7 = vcombine.high %v3349_v2, %v3349_v2  ;;  %v3368_v61 = vrot.slane %v3349_v2, %v8481_v11  ;;  %v3372_v49 = vrot.slane %v3357_v18, %v8481_v11 }
0x24ce   :  { %v3380_v14 = vrot.slane %v3342_v44, %v8481_v11  ;;  %v3401_v38 = vadd.f32 %v9155_v10, %v3364_v16  ;;  %v3356_v59 = vrot.slane %v3328_v21, %v8471_v0 }
0x24cf   :  { %v3388_v17 = vrot.slane %v3358_v46, %v8481_v11  ;;  %v3376_v4 = vrot.slane %v3359_v7, %v8481_v11  ;;  %v3402_v52 = vadd.f32 %v9163_v43, %v3368_v61  ;;  %v3403_v6 = vadd.f32 %v9169_v63, %v3372_v49 }
0x24d0   :  { %7910 = vtanh.f32 %v3401_v38  ;;  %v3405_v48 = vadd.f32 %v9175_v47, %v3380_v14  ;;  %v3360_v41 = vcombine.high %v3356_v59, %v3356_v59  ;;  %v3384_v9 = vrot.slane %v3356_v59, %v8481_v11 }
0x24d1   :  { %7912 = vtanh.f32 %v3402_v52  ;;  %v3407_v1 = vadd.f32 %v9188_v60, %v3388_v17  ;;  %v3404_v10 = vadd.f32 %v9182_v42, %v3376_v4 }
0x24d2   :  { %7914 = vtanh.f32 %v3403_v6  ;;  %v3392_v32 = vrot.slane %v3360_v41, %v8481_v11  ;;  %v3406_v43 = vadd.f32 %v10812_v27, %v3384_v9  ;;  %v10816_v27 = vld [vmem:[#allocation6_spill] sm:$0xff] }
0x24d3   :  { %7916 = vtanh.f32 %v3405_v48 }
0x24d4   :  { %7918 = vtanh.f32 %v3407_v1  ;;  %v3408_v62 = vadd.f32 %v10814_v36, %v3392_v32 }
0x24d5   :  { %7920 = vtanh.f32 %v3404_v10  ;;  %v10815_v10 = vld [vmem:[#allocation5_spill] sm:$0xff] }
0x24d6   :  { %7922 = vtanh.f32 %v3406_v43 }
0x24d7   :  { %7924 = vtanh.f32 %v3408_v62 }
0x24da   :  { %v7911_v63 = vpop.eup %7910 }
0x24db   :  { %v3417_v56 = vmul.f32 %v10813_v50, %v7911_v63  ;;  %v7913_v47 = vpop.eup %7912  ;;  %v10817_v63 = vld [vmem:[#allocation8_spill] sm:$0xff] }
0x24dc   :  { %v3418_v60 = vmul.f32 %v10813_v50, %v7913_v47  ;;  %v7915_v54 = vpop.eup %7914 }
0x24dd   :  { %3425 = vadd.xlane.f32.xlu1 %v3417_v56  ;;  %v7917_v42 = vpop.eup %7916  ;;  %v3419_v28 = vmul.f32 %v10813_v50, %v7915_v54  ;;  %v10818_v56 = vld [vmem:[#allocation10_spill] sm:$0xff] }
0x24de   :  { %3427 = vadd.xlane.f32.xlu0 %v3418_v60  ;;  %v3421_v29 = vmul.f32 %v10813_v50, %v7917_v42  ;;  %v7919_v23 = vpop.eup %7918  ;;  %v10819_v60 = vld [vmem:[#allocation7_spill] sm:$0xff] }
0x24df   :  { %v7921_v55 = vpop.eup %7920  ;;  %v3423_v34 = vmul.f32 %v10813_v50, %v7919_v23 }
0x24e0   :  { %v3420_v39 = vmul.f32 %v10813_v50, %v7921_v55  ;;  %v7923_v19 = vpop.eup %7922 }
0x24e1   :  { %3433 = vadd.xlane.f32.xlu1 %v3421_v29  ;;  %v3422_v13 = vmul.f32 %v10813_v50, %v7923_v19  ;;  %v7925_v33 = vpop.eup %7924 }
0x24e2   :  { %3429 = vadd.xlane.f32.xlu0 %v3419_v28  ;;  %v3424_v53 = vmul.f32 %v10813_v50, %v7925_v33 }
0x24e5   :  { %3437 = vadd.xlane.f32.xlu1 %v3423_v34 }
0x24e6   :  { %3431 = vadd.xlane.f32.xlu0 %v3420_v39  ;;  %v10820_v39 = vld [vmem:[#allocation9_spill] sm:$0xff] }
0x24ea   :  { %3435 = vadd.xlane.f32.xlu0 %v3422_v13 }
0x24ee   :  { %3439 = vadd.xlane.f32.xlu0 %v3424_v53 }
0x256a   :  { %v3426_v58 = vpop.xlane.xlu1 %3425 }
0x256b   :  { %v3428_v40 = vpop.xlane.xlu0 %3427  ;;  %v3452_v51 = vrot.slane %v3426_v58, %v10782_v30 }
0x256c   :  { %v3456_v26 = vrot.slane %v3428_v40, %v10782_v30 }
0x256e   :  { %v3434_v21 = vpop.xlane.xlu1 %3433  ;;  %v3481_v2 = vsel %vm523_vm4, %v3456_v26, %v3452_v51  ;;  %v10821_v26 = vld [vmem:[#allocation11_spill] sm:$0xff] }
0x256f   :  { %v3430_v25 = vpop.xlane.xlu0 %3429  ;;  %v3468_v7 = vrot.slane %v3434_v21, %v10782_v30 }
0x2570   :  { %v3460_v5 = vrot.slane %v3430_v25, %v10782_v30 }
0x2572   :  { %v3482_v16 = vsel %vm525_vm5, %v3460_v5, %v3481_v2  ;;  %v3438_v49 = vpop.xlane.xlu1 %3437 }
0x2573   :  { %v3432_v44 = vpop.xlane.xlu0 %3431  ;;  %v3476_v17 = vrot.slane %v3438_v49, %v10782_v30 }
0x2574   :  { %v3464_v18 = vrot.slane %v3432_v44, %v10782_v30 }
0x2576   :  { %v3483_v46 = vsel %vm527_vm6, %v3464_v18, %v3482_v16 }
0x2577   :  { %v3436_v61 = vpop.xlane.xlu0 %3435  ;;  %v3484_v38 = vsel %vm529_vm7, %v3468_v7, %v3483_v46 }
0x2578   :  { %v3472_v14 = vrot.slane %v3436_v61, %v10782_v30 }
0x257a   :  { %v3485_v59 = vsel %vm531_vm8, %v3472_v14, %v3484_v38 }
0x257b   :  { %v3440_v4 = vpop.xlane.xlu0 %3439  ;;  %v3486_v6 = vsel %vm533_vm9, %v3476_v17, %v3485_v59 }
0x257c   :  { %v3480_v52 = vrot.slane %v3440_v4, %v10782_v30 }
0x257e   :  { %v3487_v48 = vsel %vm535_vm10, %v3480_v52, %v3486_v6 }
0x257f   :  { %v3489_v1 = vsel %vm538_vm11, %v3487_v48, -inf }
0x2580   :  { %3490 = vmax.xlane.f32.xlu1 %v3489_v1 }
0x260d   :  { %v3491_v41 = vpop.xlane.xlu1 %3490 }
0x260e   :  { %v3496_v9 = vrot.slane %v3491_v41, %v8481_v11  ;;  %v3500_v32 = vrot.slane %v3491_v41, %v10815_v10  ;;  %v3504_v43 = vrot.slane %v3491_v41, %v10816_v27  ;;  %v3512_v50 = vrot.slane %v3491_v41, %v10817_v63 }
0x260f   :  { %v3520_v47 = vrot.slane %v3491_v41, %v10818_v56  ;;  %v3508_v54 = vrot.slane %v3491_v41, %v10819_v60  ;;  %v3516_v19 = vrot.slane %v3491_v41, %v10820_v39  ;;  %v3524_v5 = vrot.slane %v3491_v41, %v10821_v26 }
0x2610   :  { %v3533_v36 = vsub.f32 %v3426_v58, %v3496_v9  ;;  %v3534_v62 = vsub.f32 %v3428_v40, %v3500_v32  ;;  %v3535_v42 = vsub.f32 %v3430_v25, %v3504_v43  ;;  %v3537_v29 = vsub.f32 %v3434_v21, %v3512_v50 }
0x2611   :  { %v3539_v55 = vsub.f32 %v3438_v49, %v3520_v47  ;;  %v3536_v13 = vsub.f32 %v3432_v44, %v3508_v54  ;;  %v3538_v58 = vsub.f32 %v3436_v61, %v3516_v19  ;;  %v3540_v25 = vsub.f32 %v3440_v4, %v3524_v5 }
0x2612   :  { %v3541_v23 = vmul.f32 1.442695, %v3533_v36  ;;  %v3543_v28 = vmul.f32 1.442695, %v3534_v62  ;;  %v3549_v34 = vmul.f32 1.442695, %v3537_v29 }
0x2613   :  { %v3545_v33 = vmul.f32 1.442695, %v3535_v42  ;;  %v3553_v53 = vmul.f32 1.442695, %v3539_v55  ;;  %v3547_v40 = vmul.f32 1.442695, %v3536_v13 }
0x2614   :  { %7926 = vpow2.f32 %v3541_v23  ;;  %v3551_v51 = vmul.f32 1.442695, %v3538_v58  ;;  %v3555_v44 = vmul.f32 1.442695, %v3540_v25 }
0x2615   :  { %7928 = vpow2.f32 %v3543_v28 }
0x2616   :  { %7930 = vpow2.f32 %v3549_v34 }
0x2617   :  { %7932 = vpow2.f32 %v3545_v33 }
0x2618   :  { %7934 = vpow2.f32 %v3553_v53 }
0x2619   :  { %7936 = vpow2.f32 %v3547_v40 }
0x261a   :  { %7938 = vpow2.f32 %v3551_v51 }
0x261b   :  { %7940 = vpow2.f32 %v3555_v44 }
0x261e   :  { %v7927_v21 = vpop.eup %7926 }
0x261f   :  { %v9529_v2 = vpop.eup %7928  ;;  %3566 = vperm.xlu0 %7695, %v7927_v21  }
0x2620   :  { %3569 = vperm.xlu1 %7696, %v9529_v2   ;;  %v9532_v18 = vpop.eup %7930 }
0x2621   :  { %v9534_v16 = vpop.eup %7932 }
0x2622   :  { %v9538_v46 = vpop.eup %7934 }
0x2623   :  { %3578 = vperm.xlu0 %7695, %v9532_v18   ;;  %v7937_v7 = vpop.eup %7936 }
0x2624   :  { %3572 = vperm.xlu1 %7696, %v9534_v16   ;;  %v9541_v61 = vpop.eup %7938 }
0x2625   :  { %v7941_v49 = vpop.eup %7940 }
0x2627   :  { %3584 = vperm.xlu0 %7695, %v9538_v46  }
0x2628   :  { %3575 = vperm.xlu1 %7696, %v7937_v7  }
0x262c   :  { %3581 = vperm.xlu1 %7696, %v9541_v61  }
0x2630   :  { %3587 = vperm.xlu1 %7696, %v7941_v49  }
0x269e   :  { %v3567_v38 = vpop.permute.xlu0 %3566 }
0x269f   :  { %v3570_v14 = vpop.permute.xlu1 %3569  ;;  %v3592_v4 = vrot.slane %v3567_v38, %v10782_v30 }
0x26a0   :  { %v3596_v17 = vrot.slane %v3570_v14, %v10782_v30 }
0x26a2   :  { %v3579_v6 = vpop.permute.xlu0 %3578  ;;  %v3621_v1 = vsel %vm523_vm4, %v3596_v17, %v3592_v4 }
0x26a3   :  { %v3573_v59 = vpop.permute.xlu1 %3572  ;;  %v3608_v43 = vrot.slane %v3579_v6, %v10782_v30 }
0x26a4   :  { %v3600_v52 = vrot.slane %v3573_v59, %v10782_v30 }
0x26a6   :  { %v3622_v9 = vsel %vm525_vm5, %v3600_v52, %v3621_v1  ;;  %v3585_v47 = vpop.permute.xlu0 %3584 }
0x26a7   :  { %v3576_v48 = vpop.permute.xlu1 %3575  ;;  %v3616_v42 = vrot.slane %v3585_v47, %v10782_v30 }
0x26a8   :  { %v3604_v41 = vrot.slane %v3576_v48, %v10782_v30 }
0x26aa   :  { %v3623_v32 = vsel %vm527_vm6, %v3604_v41, %v3622_v9 }
0x26ab   :  { %v3582_v50 = vpop.permute.xlu1 %3581  ;;  %v3624_v62 = vsel %vm529_vm7, %v3608_v43, %v3623_v32 }
0x26ac   :  { %v3612_v36 = vrot.slane %v3582_v50, %v10782_v30  ;;  %v10822_v50 = vld [vmem:[#allocation19_spill] sm:$0xff] }
0x26ae   :  { %v3625_v54 = vsel %vm531_vm8, %v3612_v36, %v3624_v62 }
0x26af   :  { %v3588_v29 = vpop.permute.xlu1 %3587  ;;  %v3626_v28 = vsel %vm533_vm9, %v3616_v42, %v3625_v54  ;;  %v10824_v42 = vld [vmem:[#allocation16_spill] sm:$0xff] }
0x26b0   :  { %v3620_v23 = vrot.slane %v3588_v29, %v10782_v30 }
0x26b2   :  { %v3627_v55 = vsel %vm535_vm10, %v3620_v23, %v3626_v28 }
0x26b3   :  { %v3629_v34 = vsel %vm538_vm11, %v3627_v55, 0.0  ;;  %v10825_v55 = vld [vmem:[#allocation23_spill] sm:$0xff] }
0x26b4   :  { %3630 = vadd.xlane.f32.xlu0 %v3629_v34 }
0x2741   :  { %v3631_v19 = vpop.xlane.xlu0 %3630 }
0x2742   :  { %v3664_v13 = vrot.slane %v3631_v19, %v10821_v26  ;;  %v3636_v33 = vrot.slane %v3631_v19, %v8481_v11  ;;  %v3640_v53 = vrot.slane %v3631_v19, %v10815_v10  ;;  %v3644_v5 = vrot.slane %v3631_v19, %v10816_v27 }
0x2743   :  { %v3648_v58 = vrot.slane %v3631_v19, %v10819_v60  ;;  %v3652_v44 = vrot.slane %v3631_v19, %v10817_v63  ;;  %v3656_v59 = vrot.slane %v3631_v19, %v10820_v39  ;;  %v3660_v52 = vrot.slane %v3631_v19, %v10818_v56 }
0x2744   :  { %7942 = vrcp.f32 %v3664_v13 }
0x2745   :  { %7944 = vrcp.f32 %v3636_v33 }
0x2746   :  { %7946 = vrcp.f32 %v3640_v53  ;;  %v10826_v53 = vld [vmem:[#allocation17_spill] sm:$0xff] }
0x2747   :  { %7948 = vrcp.f32 %v3644_v5 }
0x2748   :  { %7950 = vrcp.f32 %v3648_v58 }
0x2749   :  { %7952 = vrcp.f32 %v3652_v44 }
0x274a   :  { %7954 = vrcp.f32 %v3656_v59  ;;  %v10827_v59 = vld [vmem:[#allocation18_spill] sm:$0xff] }
0x274b   :  { %7956 = vrcp.f32 %v3660_v52 }
0x274e   :  { %v7943_v40 = vpop.eup %7942 }
0x274f   :  { %v7945_v25 = vpop.eup %7944  ;;  %v3688_v51 = vmul.f32 %v7943_v40, %v7941_v49 }
0x2750   :  { %v3674_v14 = vmul.f32 %v7945_v25, %v7927_v21  ;;  %v7947_v38 = vpop.eup %7946 }
0x2751   :  { %3726 = vperm.xlu0 %7695, %v3688_v51   ;;  %v3676_v17 = vmul.f32 %v7947_v38, %v9529_v2  ;;  %v7949_v4 = vpop.eup %7948 }
0x2752   :  { %3691 = vperm.xlu1 %7696, %v3674_v14   ;;  %v3678_v6 = vmul.f32 %v7949_v4, %v9534_v16  ;;  %v7951_v49 = vpop.eup %7950  ;;  %v7277_v16 = vld [vmem:[%s10677_s3 + $0x18] sm:$0xff] }
0x2753   :  { %v3680_v48 = vmul.f32 %v7951_v49, %v7937_v7  ;;  %v7953_v21 = vpop.eup %7952 }
0x2754   :  { %v3682_v1 = vmul.f32 %v7953_v21, %v9532_v18  ;;  %v7955_v41 = vpop.eup %7954  ;;  %v10823_v18 = vld [vmem:[#allocation15_spill] sm:$0xff] }
0x2755   :  { %v3684_v9 = vmul.f32 %v7955_v41, %v9541_v61  ;;  %v7957_v2 = vpop.eup %7956 }
0x2756   :  { %3696 = vperm.xlu1 %7696, %v3676_v17   ;;  %v3686_v32 = vmul.f32 %v7957_v2, %v9538_v46  ;;  %v10828_v2 = vld [vmem:[#allocation21_spill] sm:$0xff] }
0x275a   :  { %3701 = vperm.xlu1 %7696, %v3678_v6  }
0x275e   :  { %3706 = vperm.xlu1 %7696, %v3680_v48  }
0x2762   :  { %3711 = vperm.xlu1 %7696, %v3682_v1  }
0x2766   :  { %3716 = vperm.xlu1 %7696, %v3684_v9  }
0x276a   :  { %3721 = vperm.xlu1 %7696, %v3686_v32  }
0x276e   :  { %3897 = vrot.lane.b32.xlu1 %v7277_v16, %s8242_s26 }
0x27d0   :  { %v3727_v54 = vpop.permute.xlu0 %3726 }
0x27d1   :  { %v3692_v7 = vpop.permute.xlu1 %3691  ;;  %v3736_v34 = vmul.f32 %v10825_v55, %v3727_v54 }
0x27d2   :  { %v3729_v36 = vmul.f32 %v10823_v18, %v3692_v7 }
0x27d3   :  { %v3786_v25 = vsel %vm81_vm3, %v3736_v34, 0.0 }
0x27d4   :  { %v3737_v46 = vsel %vm81_vm3, %v3729_v36, 0.0  ;;  %v3787_v52 = vrot.slane %v3786_v25, 4 }
0x27d5   :  { %v3697_v43 = vpop.permute.xlu1 %3696  ;;  %v3738_v33 = vrot.slane %v3737_v46, 4 }
0x27d6   :  { %v3730_v47 = vmul.f32 %v10822_v50, %v3697_v43  ;;  %v3788_v7 = vadd.f32 %v3787_v52, %v3786_v25 }
0x27d7   :  { %v3739_v38 = vadd.f32 %v3738_v33, %v3737_v46 }
0x27d8   :  { %v3744_v62 = vsel %vm81_vm3, %v3730_v47, 0.0 }
0x27d9   :  { %v3702_v61 = vpop.permute.xlu1 %3701  ;;  %v3745_v23 = vrot.slane %v3744_v62, 4  ;;  %v3740_v41 = vrot.slane %v3739_v38, 2 }
0x27da   :  { %v3731_v29 = vmul.f32 %v10824_v42, %v3702_v61  ;;  %v10829_v42 = vld [vmem:[#allocation22_spill] sm:$0xff] }
0x27db   :  { %v3746_v58 = vadd.f32 %v3745_v23, %v3744_v62  ;;  %v3741_v61 = vadd.f32 %v3740_v41, %v3739_v38 }
0x27dc   :  { %v3751_v28 = vsel %vm81_vm3, %v3731_v29, 0.0 }
0x27dd   :  { %v3752_v19 = vrot.slane %v3751_v28, 4  ;;  %v3707_v13 = vpop.permute.xlu1 %3706  ;;  %v3747_v6 = vrot.slane %v3746_v58, 2 }
0x27de   :  { %v3732_v5 = vmul.f32 %v10826_v53, %v3707_v13  ;;  %v3742_v53 = vrot.slane %v3741_v61, 1 }
0x27df   :  { %v3753_v51 = vadd.f32 %v3752_v19, %v3751_v28  ;;  %v3748_v43 = vadd.f32 %v3747_v6, %v3746_v58  ;;  %v3789_v28 = vrot.slane %v3788_v7, 2 }
0x27e0   :  { %v3758_v40 = vsel %vm81_vm3, %v3732_v5, 0.0 }
0x27e1   :  { %v3759_v44 = vrot.slane %v3758_v40, 4  ;;  %v3712_v14 = vpop.permute.xlu1 %3711  ;;  %v3754_v48 = vrot.slane %v3753_v51, 2  ;;  %v3749_v55 = vrot.slane %v3748_v43, 1 }
0x27e2   :  { %v3733_v17 = vmul.f32 %v10827_v59, %v3712_v14 }
0x27e3   :  { %v3760_v4 = vadd.f32 %v3759_v44, %v3758_v40  ;;  %v3755_v47 = vadd.f32 %v3754_v48, %v3753_v51  ;;  %v3790_v51 = vadd.f32 %v3789_v28, %v3788_v7  ;;  %v3750_v44 = vadd.f32 %v3749_v55, %v3748_v43 }
0x27e4   :  { %v3765_v49 = vsel %vm81_vm3, %v3733_v17, 0.0  ;;  %v3743_v17 = vadd.f32 %v3742_v53, %v3741_v61 }
0x27e5   :  { %v3766_v21 = vrot.slane %v3765_v49, 4  ;;  %v3717_v1 = vpop.permute.xlu1 %3716  ;;  %v3761_v9 = vrot.slane %v3760_v4, 2  ;;  %v3756_v19 = vrot.slane %v3755_v47, 1 }
0x27e6   :  { %v3734_v32 = vmul.f32 %v10828_v2, %v3717_v1  ;;  %v3809_v48 = vsel %vm523_vm4, %v3750_v44, %v3743_v17 }
0x27e7   :  { %v3767_v16 = vadd.f32 %v3766_v21, %v3765_v49  ;;  %v3762_v54 = vadd.f32 %v3761_v9, %v3760_v4  ;;  %v3757_v14 = vadd.f32 %v3756_v19, %v3755_v47  ;;  %v3791_v49 = vrot.slane %v3790_v51, 1 }
0x27e8   :  { %v3772_v50 = vsel %vm81_vm3, %v3734_v32, 0.0 }
0x27e9   :  { %v3768_v18 = vrot.slane %v3767_v16, 2  ;;  %v3773_v36 = vrot.slane %v3772_v50, 4  ;;  %v3722_v62 = vpop.permute.xlu1 %3721  ;;  %v3763_v5 = vrot.slane %v3762_v54, 1  ;;  %v3810_v1 = vsel %vm525_vm5, %v3757_v14, %v3809_v48  ;;  %v4019_v14 = vld [vmem:[%s10671_s5 + $0x8] sm:$0xff]  ;;  %v4022_v48 = vld [vmem:[%s10671_s5 + $0x20] sm:$0xff] }
0x27ea   :  { %v3735_v29 = vmul.f32 %v10829_v42, %v3722_v62 }
0x27eb   :  { %v3769_v46 = vadd.f32 %v3768_v18, %v3767_v16  ;;  %v3774_v23 = vadd.f32 %v3773_v36, %v3772_v50  ;;  %v3764_v4 = vadd.f32 %v3763_v5, %v3762_v54  ;;  %v3792_v16 = vadd.f32 %v3791_v49, %v3790_v51 }
0x27ec   :  { %v3779_v34 = vsel %vm81_vm3, %v3735_v29, 0.0 }
0x27ed   :  { %v3775_v13 = vrot.slane %v3774_v23, 2  ;;  %v3780_v33 = vrot.slane %v3779_v34, 4  ;;  %v3770_v58 = vrot.slane %v3769_v46, 1  ;;  %v3811_v9 = vsel %vm527_vm6, %v3764_v4, %v3810_v1  ;;  %v4023_v4 = vld [vmem:[%s10671_s5 + $0x28] sm:$0xff] }
0x27ef   :  { %v3776_v40 = vadd.f32 %v3775_v13, %v3774_v23  ;;  %v3781_v25 = vadd.f32 %v3780_v33, %v3779_v34  ;;  %v3771_v52 = vadd.f32 %v3770_v58, %v3769_v46  ;;  %v3898_v46 = vpop.permute.xlu1 %3897 }
0x27f1   :  { %v3777_v38 = vrot.slane %v3776_v40, 1  ;;  %v3782_v59 = vrot.slane %v3781_v25, 2  ;;  %v3812_v32 = vsel %vm529_vm7, %v3771_v52, %v3811_v9  ;;  %v4025_v52 = vld [vmem:[%s10671_s5 + $0x38] sm:$0xff] }
0x27f2   :  { %v9644_v49 = vpack.c.bf16 %v4025_v52, %v4023_v4  ;;  %v4138_v4 = vld [vmem:[%s10673_s6 + $0x50] sm:$0xff] }
0x27f3   :  { %v3783_v6 = vadd.f32 %v3782_v59, %v3781_v25  ;;  %v3778_v21 = vadd.f32 %v3777_v38, %v3776_v40  ;;  %v4021_v38 = vld [vmem:[%s10671_s5 + $0x18] sm:$0xff]  ;;  %v4018_v59 = vld [vmem:[%s10671_s5] sm:$0xff] }
0x27f4   :  { %v9631_v17 = vpack.c.bf16 %v4021_v38, %v4019_v14 }
0x27f5   :  { %v3784_v41 = vrot.slane %v3783_v6, 1  ;;  %v3813_v7 = vsel %vm531_vm8, %v3778_v21, %v3812_v32  ;;  %v4024_v21 = vld [vmem:[%s10671_s5 + $0x30] sm:$0xff] }
0x27f6   :  { %7566 = vmatprep.subr.bf16.mxu0 %v9631_v17  ;;  %v9654_v1 = vpack.c.bf16 %v4024_v21, %v4022_v48  ;;  %v4142_v48 = vld [vmem:[%s10673_s6 + $0x70] sm:$0xff] }
0x27f7   :  { %v3785_v2 = vadd.f32 %v3784_v41, %v3783_v6  ;;  %v9745_v21 = vpack.c.bf16 %v4142_v48, %v4138_v4  ;;  %v9796_v4 = vld [vmem:[%s10674_s2 + $0x20] sm:$0xff] }
0x27f9   :  { %v3814_v43 = vsel %vm533_vm9, %v3785_v2, %v3813_v7 }
0x27fa   :  { %v3815_v50 = vsel %vm535_vm10, %v3792_v16, %v3814_v43  ;;  %v7281_v16 = vld [vmem:[%s10672_s1 + $0x20] sm:$0xff] }
0x27fb   :  { %7276 = vmatmul.mubr.msk.f32.vlgmr.msra.gmra.mrb[18].mxu0 %vm81_vm3, %v3815_v50 }
0x27fc   :  { %4092 = vmatprep.mubr.f32.mxu0 %v10780_v22 }
0x28ce   :  { %v3884_v47 = vpop.f32.mrb[18].mxu0 }
0x28cf   :  { %v3906_v18 = vadd.f32 %v3884_v47, %v9469_v12  ;;  %v3886_v36 = vpop.f32.mrb[19].mxu0 }
0x28d0   :  { %v3889_v62 = vadd.f32 %v3886_v36, %v9474_v20 }
0x28d1   :  { %v3907_v61 = vadd.f32 %v3906_v18, %v9447_v57 }
0x28d2   :  { %v9606_v54 = vadd.f32 %v9407_v3, %v3889_v62 }
0x28d4   :  { %10830 = vst [vmem:[#allocation12_spill] sm:$0xff] %v9606_v54  ;;  %v3891_v42 = vmul.f32 0.5, %v9606_v54 }
0x28d6   :  { %v3892_v29 = vmul.f32 1.442695, %v3891_v42 }
0x28d8   :  { %7958 = vpow2.f32 %v3892_v29 }
0x28e2   :  { %v7959_v23 = vpop.eup %7958 }
0x28e3   :  { %v3900_v28 = vmul.f32 %v7959_v23, %v3898_v46 }
0x28e5   :  { %3902 = vrot.lane.b32.xlu1 %v3900_v28, %s8245_s24 }
0x2957   :  { %v3903_v55 = vpop.permute.xlu1 %3902 }
0x2958   :  { %v3905_v12 = vadd.f32 %v3903_v55, %v9606_v54 }
0x295a   :  { %7373 = vmatmul.mubr.msk.f32.vlgmr.msra.gmra.mrb[18].mxu1 %vm965_vm13, %v3905_v12  ;;  %v4129_v12 = vld [vmem:[%s10673_s6 + $0x8] sm:$0xff] }
0x295b   :  { %4213 = vmatprep.mubr.f32.mxu1 %v10780_v22 }
0x2a2d   :  { %v3979_v57 = vpop.f32.mrb[18].mxu1 }
0x2a2e   :  { %v3983_v20 = vadd.f32 %v3979_v57, %v3907_v61  ;;  %v7374_v3 = vpop.f32.mrb[19].mxu1  ;;  %v4133_v57 = vld [vmem:[%s10673_s6 + $0x28] sm:$0xff] }
0x2a2f   :  { %v9686_v3 = vpack.c.bf16 %v4133_v57, %v4129_v12 }
0x2a30   :  { %v3984_v34 = vadd.f32 %v9424_v35, %v3983_v20  ;;  %v4131_v20 = vld [vmem:[%s10673_s6 + $0x18] sm:$0xff] }
0x2a31   :  { %7574 = vmatprep.subr.bf16.mxu1 %v9686_v3 }
0x2a32   :  { %v7279_v19 = vmul.f32 -1.442695, %v3984_v34 }
0x2a34   :  { %7960 = vpow2.f32 %v7279_v19  ;;  %v4132_v19 = vld [vmem:[%s10673_s6 + $0x20] sm:$0xff] }
0x2a35   :  { %7962 = vtanh.f32 %v3984_v34  ;;  %v4128_v34 = vld [vmem:[%s10673_s6] sm:$0xff] }
0x2a3e   :  { %v7961_v13 = vpop.eup %7960 }
0x2a3f   :  { %v3989_v33 = vadd.f32 1.0, %v7961_v13  ;;  %v7963_v53 = vpop.eup %7962 }
0x2a41   :  { %7964 = vrcp.f32 %v3989_v33  ;;  %v9699_v33 = vpack.c.bf16 %v4132_v19, %v4128_v34 }
0x2a43   :  { %7576 = vmatpush1.bf16.msra.mxu1 %v9699_v33 }
0x2a4b   :  { %v7965_v5 = vpop.eup %7964 }
0x2a4c   :  { %v3992_v58 = vsel %vm8382_vm2, %v7963_v53, %v7965_v5  ;;  %v4130_v53 = vld [vmem:[%s10673_s6 + $0x10] sm:$0xff] }
0x2a4d   :  { %3995 = vrot.lane.b32.xlu1 %v3992_v58, %s8238_s21  ;;  %v3993_v51 = vmul.f32 %v3992_v58, %v9432_v45  ;;  %v4020_v45 = vld [vmem:[%s10671_s5 + $0x10] sm:$0xff] }
0x2a4e   :  { %v9642_v6 = vpack.c.bf16 %v4020_v45, %v4018_v59  ;;  %v4134_v5 = vld [vmem:[%s10673_s6 + $0x30] sm:$0xff]  ;;  %v4136_v59 = vld [vmem:[%s10673_s6 + $0x40] sm:$0xff] }
0x2a4f   :  { %v4140_v45 = vld [vmem:[%s10673_s6 + $0x60] sm:$0xff] }
0x2a50   :  { %7568 = vmatpush1.bf16.msra.mxu0 %v9642_v6  ;;  %v9738_v52 = vpack.c.bf16 %v4140_v45, %v4136_v59  ;;  %v9790_v59 = vld [vmem:[%s10674_s2 + $0x10] sm:$0xff] }
0x2a51   :  { %7570 = vmatprep.subr.bf16.mxu0 %v9644_v49 }
0x2a54   :  { %7572 = vmatpush1.bf16.msra.mxu0 %v9654_v1 }
0x2abf   :  { %v3996_v40 = vpop.permute.xlu1 %3995 }
0x2ac0   :  { %v3998_v25 = vmul.f32 %v3996_v40, %v3992_v58  ;;  %v9711_v40 = vpack.c.bf16 %v4134_v5, %v4130_v53  ;;  %v9776_v53 = vld [vmem:[%s10674_s2] sm:$0xff] }
0x2ac2   :  { %4000 = vrot.lane.b32.xlu1 %v3998_v25, %s8239_s22  ;;  %v4141_v25 = vld [vmem:[%s10673_s6 + $0x68] sm:$0xff] }
0x2b34   :  { %v4001_v35 = vpop.permute.xlu1 %4000 }
0x2b35   :  { %v9619_v44 = vadd.f32 %v4001_v35, %v3993_v51  ;;  %v4139_v51 = vld [vmem:[%s10673_s6 + $0x58] sm:$0xff] }
0x2b36   :  { %v4143_v35 = vld [vmem:[%s10673_s6 + $0x78] sm:$0xff] }
0x2b37   :  { %7966 = vtanh.f32 %v9619_v44  ;;  %v9726_v38 = vpack.c.bf16 %v4143_v35, %v4139_v51  ;;  %v9784_v51 = vld [vmem:[%s10674_s2 + $0x8] sm:$0xff] }
0x2b41   :  { %v7967_v41 = vpop.eup %7966 }
0x2b42   :  { %4006 = vrot.lane.b32.xlu1 %v7967_v41, %s8238_s21 }
0x2bb4   :  { %v4007_v9 = vpop.permute.xlu1 %4006 }
0x2bb5   :  { %v4009_v2 = vmul.f32 %v4007_v9, %v3992_v58  ;;  %v4137_v58 = vld [vmem:[%s10673_s6 + $0x48] sm:$0xff] }
0x2bb6   :  { %v9724_v14 = vpack.c.bf16 %v4141_v25, %v4137_v58 }
0x2bb7   :  { %4011 = vrot.lane.b32.xlu1 %v4009_v2, %s8239_s22 }
0x2bb8   :  { %7578 = vmatprep.subr.bf16.mxu1 %v9724_v14 }
0x2bb9   :  { %7580 = vmatpush1.bf16.msra.mxu1 %v9738_v52 }
0x2c29   :  { %v4012_v32 = vpop.permute.xlu1 %4011 }
0x2c2a   :  { %4015 = vst.msk [vmem:[#allocation2 + $0x18] sm:$0xff] %vm81_vm3, %v4012_v32  ;;  %7280 = vmatmul.mubr.msk.f32.vlgmr.msra.gmra.mrb[20].mxu0 %vm81_vm3, %v4012_v32 }
0x2c2b   :  { %4284 = vmatprep.mubr.f32.mxu0 %v10780_v22 }
0x2cfd   :  { %v4094_v7 = vpop.f32.mrb[20].mxu0 }
0x2cfe   :  { %v4101_v43 = vadd.f32 %v7281_v16, %v4094_v7  ;;  %v9666_v50 = vpop.f32.mrb[21].mxu0 }
0x2d00   :  { %v4102_v47 = vadd.f32 %v4101_v43, %v9472_v31 }
0x2d02   :  { %v7282_v18 = vmul.f32 -1.442695, %v4102_v47 }
0x2d04   :  { %7968 = vpow2.f32 %v7282_v18 }
0x2d05   :  { %7970 = vtanh.f32 %v4102_v47 }
0x2d0e   :  { %v7969_v36 = vpop.eup %7968 }
0x2d0f   :  { %v4107_v62 = vadd.f32 1.0, %v7969_v36  ;;  %v7971_v61 = vpop.eup %7970 }
0x2d11   :  { %7972 = vrcp.f32 %v4107_v62 }
0x2d1b   :  { %v7973_v42 = vpop.eup %7972 }
0x2d1c   :  { %v4110_v29 = vsel %vm8382_vm2, %v7971_v61, %v7973_v42 }
0x2d1d   :  { %4113 = vrot.lane.b32.xlu0 %v4110_v29, %s8238_s21  ;;  %v4111_v28 = vmul.f32 %v4110_v29, %v9455_v37  ;;  %v4135_v37 = vld [vmem:[%s10673_s6 + $0x38] sm:$0xff] }
0x2d1e   :  { %v9697_v13 = vpack.c.bf16 %v4135_v37, %v4131_v20 }
0x2d20   :  { %7582 = vmatprep.subr.bf16.mxu0 %v9697_v13 }
0x2d21   :  { %7584 = vmatpush1.bf16.msra.mxu0 %v9711_v40 }
0x2d22   :  { %7586 = vmatprep.subr.bf16.mxu0 %v9726_v38 }
0x2d25   :  { %7588 = vmatpush1.bf16.msra.mxu0 %v9745_v21 }
0x2d26   :  { %7597 = vmatprep.subr.bf16.mxu0 %v10811_v8 }
0x2d8f   :  { %v4114_v46 = vpop.permute.xlu0 %4113 }
0x2d90   :  { %v4116_v23 = vmul.f32 %v4114_v46, %v4110_v29 }
0x2d92   :  { %4118 = vrot.lane.b32.xlu1 %v4116_v23, %s8239_s22 }
0x2e04   :  { %v4119_v31 = vpop.permute.xlu1 %4118 }
0x2e05   :  { %v9674_v55 = vadd.f32 %v4119_v31, %v4111_v28 }
0x2e07   :  { %7974 = vtanh.f32 %v9674_v55 }
0x2e11   :  { %v7975_v41 = vpop.eup %7974 }
0x2e12   :  { %4124 = vrot.lane.b32.xlu0 %v7975_v41, %s8238_s21 }
0x2e84   :  { %v4125_v9 = vpop.permute.xlu0 %4124 }
0x2e85   :  { %v4127_v2 = vmul.f32 %v4125_v9, %v4110_v29 }
0x2e87   :  { %4145 = vrot.lane.b32.xlu1 %v4127_v2, %s8239_s22  ;;  %v9803_v2 = vld [vmem:[%s10674_s2 + $0x18] sm:$0xff] }
0x2e88   :  { %10831 = vst [vmem:[#allocation14_spill] sm:$0xff] %v9803_v2 }
0x2ef9   :  { %v4146_v32 = vpop.permute.xlu1 %4145 }
0x2efa   :  { %7283 = vmatmul.mubr.msk.f32.vlgmr.msra.gmra.mrb[20].mxu1 %vm81_vm3, %v4146_v32  ;;  %7284 = vmatmul.mubr.msk.f32.vlgmr.msra.gmra.mrb[22].mxu0 %vm81_vm3, %v4146_v32 }
0x2efb   :  { %4862 = vmatprep.mubr.f32.mxu1 %v10780_v22  ;;  %7379 = vmatprep.mubr.msk.f32.mxu0 %vm8244_vm12, %v10780_v22 }
0x2fcd   :  { %v9757_v16 = vpop.f32.mrb[20].mxu1  ;;  %v4286_v7 = vpop.f32.mrb[22].mxu0 }
0x2fce   :  { %v4292_v43 = vcombine.high %v4286_v7, %v4286_v7  ;;  %v4299_v47 = vrot.slane %v4286_v7, %v8471_v0  ;;  %v9760_v18 = vpop.f32.mrb[21].mxu1  ;;  %v9762_v36 = vpop.f32.mrb[23].mxu0  ;;  %v9809_v7 = vld [vmem:[%s10674_s2 + $0x30] sm:$0xff] }
0x2fd0   :  { %v4306_v62 = vrot.slane %v4292_v43, %v8471_v0  ;;  %v4307_v61 = vcombine.high %v4299_v47, %v4299_v47  ;;  %v4315_v42 = vrot.slane %v4299_v47, %v8471_v0 }
0x2fd2   :  { %v4308_v29 = vcombine.high %v4306_v62, %v4306_v62  ;;  %v4322_v46 = vrot.slane %v4306_v62, %v8471_v0  ;;  %v4329_v23 = vrot.slane %v4307_v61, %v8471_v0  ;;  %v4337_v28 = vcombine.high %v4315_v42, %v4315_v42  ;;  %v9816_v62 = vld [vmem:[%s10674_s2 + $0x28] sm:$0xff] }
0x2fd3   :  { %v4344_v31 = vrot.slane %v4315_v42, %v8481_v11  ;;  %10832 = vst [vmem:[#allocation13_spill] sm:$0xff] %v9816_v62 }
0x2fd4   :  { %v4338_v12 = vcombine.high %v4322_v46, %v4322_v46  ;;  %v4339_v57 = vcombine.high %v4329_v23, %v4329_v23  ;;  %v4348_v20 = vrot.slane %v4329_v23, %v8481_v11  ;;  %v4336_v37 = vrot.slane %v4308_v29, %v8471_v0  ;;  %v9822_v29 = vld [vmem:[%s10674_s2 + $0x38] sm:$0xff]  ;;  %v9828_v23 = vld [vmem:[%s10675_s9] ss:$0 sm:$0xff] }
0x2fd5   :  { %v4352_v34 = vrot.slane %v4337_v28, %v8481_v11  ;;  %v4360_v19 = vrot.slane %v4322_v46, %v8481_v11  ;;  %v4381_v5 = vadd.f32 %v9776_v53, %v4344_v31  ;;  %10833 = vst [vmem:[#allocation19_spill] sm:$0xff] %v9822_v29  ;;  %10834 = vst [vmem:[#allocation15_spill] sm:$0xff] %v9828_v23 }
0x2fd6   :  { %v4356_v58 = vrot.slane %v4339_v57, %v8481_v11  ;;  %v4368_v25 = vrot.slane %v4338_v12, %v8481_v11  ;;  %v4382_v35 = vadd.f32 %v9784_v51, %v4348_v20  ;;  %v4340_v41 = vcombine.high %v4336_v37, %v4336_v37 }
0x2fd7   :  { %v4383_v45 = vadd.f32 %v9790_v59, %v4352_v34  ;;  %7976 = vtanh.f32 %v4381_v5  ;;  %v4385_v48 = vadd.f32 %v9796_v4, %v4360_v19  ;;  %v4364_v9 = vrot.slane %v4336_v37, %v8481_v11 }
0x2fd8   :  { %v4384_v32 = vadd.f32 %v9803_v2, %v4356_v58  ;;  %7978 = vtanh.f32 %v4382_v35  ;;  %v4387_v43 = vadd.f32 %v9809_v7, %v4368_v25  ;;  %v4372_v47 = vrot.slane %v4340_v41, %v8481_v11 }
0x2fd9   :  { %7980 = vtanh.f32 %v4383_v45  ;;  %v4386_v61 = vadd.f32 %v9816_v62, %v4364_v9 }
0x2fda   :  { %7982 = vtanh.f32 %v4385_v48  ;;  %v4388_v46 = vadd.f32 %v9822_v29, %v4372_v47 }
0x2fdb   :  { %7984 = vtanh.f32 %v4384_v32 }
0x2fdc   :  { %7986 = vtanh.f32 %v4387_v43 }
0x2fdd   :  { %7988 = vtanh.f32 %v4386_v61 }
0x2fde   :  { %7990 = vtanh.f32 %v4388_v46 }
0x2fe1   :  { %v7977_v42 = vpop.eup %7976 }
0x2fe2   :  { %v4397_v28 = vmul.f32 %v9828_v23, %v7977_v42  ;;  %v7979_v31 = vpop.eup %7978 }
0x2fe3   :  { %v7981_v12 = vpop.eup %7980  ;;  %v4398_v57 = vmul.f32 %v9828_v23, %v7979_v31 }
0x2fe4   :  { %4405 = vadd.xlane.f32.xlu0 %v4397_v28  ;;  %v7983_v20 = vpop.eup %7982  ;;  %v4399_v37 = vmul.f32 %v9828_v23, %v7981_v12 }
0x2fe5   :  { %4407 = vadd.xlane.f32.xlu1 %v4398_v57  ;;  %v7985_v34 = vpop.eup %7984  ;;  %v4401_v19 = vmul.f32 %v9828_v23, %v7983_v20 }
0x2fe6   :  { %v7987_v5 = vpop.eup %7986  ;;  %v4400_v58 = vmul.f32 %v9828_v23, %v7985_v34 }
0x2fe7   :  { %v7989_v25 = vpop.eup %7988  ;;  %v4403_v35 = vmul.f32 %v9828_v23, %v7987_v5 }
0x2fe8   :  { %4409 = vadd.xlane.f32.xlu0 %v4399_v37  ;;  %v4402_v45 = vmul.f32 %v9828_v23, %v7989_v25  ;;  %v7991_v48 = vpop.eup %7990 }
0x2fe9   :  { %4413 = vadd.xlane.f32.xlu1 %v4401_v19  ;;  %v4404_v41 = vmul.f32 %v9828_v23, %v7991_v48 }
0x2fec   :  { %4411 = vadd.xlane.f32.xlu0 %v4400_v58 }
0x2fed   :  { %4417 = vadd.xlane.f32.xlu1 %v4403_v35 }
0x2ff0   :  { %4415 = vadd.xlane.f32.xlu0 %v4402_v45 }
0x2ff4   :  { %4419 = vadd.xlane.f32.xlu0 %v4404_v41 }
0x3071   :  { %v4406_v9 = vpop.xlane.xlu0 %4405 }
0x3072   :  { %v4408_v32 = vpop.xlane.xlu1 %4407  ;;  %v4432_v61 = vrot.slane %v4406_v9, %v10782_v30 }
0x3073   :  { %v4436_v43 = vrot.slane %v4408_v32, %v10782_v30 }
0x3075   :  { %v4410_v47 = vpop.xlane.xlu0 %4409  ;;  %v4461_v46 = vsel %vm523_vm4, %v4436_v43, %v4432_v61 }
0x3076   :  { %v4440_v42 = vrot.slane %v4410_v47, %v10782_v30  ;;  %v4414_v28 = vpop.xlane.xlu1 %4413 }
0x3077   :  { %v4448_v37 = vrot.slane %v4414_v28, %v10782_v30 }
0x3078   :  { %v4462_v57 = vsel %vm525_vm5, %v4440_v42, %v4461_v46 }
0x3079   :  { %v4412_v31 = vpop.xlane.xlu0 %4411 }
0x307a   :  { %v4444_v12 = vrot.slane %v4412_v31, %v10782_v30  ;;  %v4418_v19 = vpop.xlane.xlu1 %4417 }
0x307b   :  { %v4456_v35 = vrot.slane %v4418_v19, %v10782_v30 }
0x307c   :  { %v4463_v20 = vsel %vm527_vm6, %v4444_v12, %v4462_v57 }
0x307d   :  { %v4416_v34 = vpop.xlane.xlu0 %4415  ;;  %v4464_v58 = vsel %vm529_vm7, %v4448_v37, %v4463_v20 }
0x307e   :  { %v4452_v5 = vrot.slane %v4416_v34, %v10782_v30 }
0x3080   :  { %v4465_v25 = vsel %vm531_vm8, %v4452_v5, %v4464_v58 }
0x3081   :  { %v4420_v45 = vpop.xlane.xlu0 %4419  ;;  %v4466_v41 = vsel %vm533_vm9, %v4456_v35, %v4465_v25 }
0x3082   :  { %v4460_v48 = vrot.slane %v4420_v45, %v10782_v30 }
0x3084   :  { %v4467_v43 = vsel %vm535_vm10, %v4460_v48, %v4466_v41 }
0x3085   :  { %v4469_v61 = vsel %vm538_vm11, %v4467_v43, -inf }
0x3086   :  { %4470 = vmax.xlane.f32.xlu1 %v4469_v61 }
0x3113   :  { %v4471_v42 = vpop.xlane.xlu1 %4470 }
0x3114   :  { %v4476_v46 = vrot.slane %v4471_v42, %v8481_v11  ;;  %v4480_v12 = vrot.slane %v4471_v42, %v10815_v10  ;;  %v4484_v57 = vrot.slane %v4471_v42, %v10816_v27  ;;  %v4488_v20 = vrot.slane %v4471_v42, %v10819_v60 }
0x3115   :  { %v4496_v37 = vrot.slane %v4471_v42, %v10820_v39  ;;  %v4492_v25 = vrot.slane %v4471_v42, %v10817_v63  ;;  %v4504_v43 = vrot.slane %v4471_v42, %v10821_v26  ;;  %v4500_v29 = vrot.slane %v4471_v42, %v10818_v56 }
0x3116   :  { %v4513_v5 = vsub.f32 %v4406_v9, %v4476_v46  ;;  %v4514_v58 = vsub.f32 %v4408_v32, %v4480_v12  ;;  %v4516_v54 = vsub.f32 %v4412_v31, %v4488_v20  ;;  %v4515_v35 = vsub.f32 %v4410_v47, %v4484_v57 }
0x3117   :  { %v4518_v61 = vsub.f32 %v4416_v34, %v4496_v37  ;;  %v4517_v23 = vsub.f32 %v4414_v28, %v4492_v25  ;;  %v4520_v2 = vsub.f32 %v4420_v45, %v4504_v43  ;;  %v4519_v32 = vsub.f32 %v4418_v19, %v4500_v29 }
0x3118   :  { %v4521_v48 = vmul.f32 1.442695, %v4513_v5  ;;  %v4523_v41 = vmul.f32 1.442695, %v4514_v58  ;;  %v4527_v15 = vmul.f32 1.442695, %v4516_v54 }
0x3119   :  { %v4525_v62 = vmul.f32 1.442695, %v4515_v35  ;;  %v4531_v9 = vmul.f32 1.442695, %v4518_v61  ;;  %v4529_v31 = vmul.f32 1.442695, %v4517_v23 }
0x311a   :  { %7992 = vpow2.f32 %v4521_v48  ;;  %v4535_v47 = vmul.f32 1.442695, %v4520_v2  ;;  %v4533_v46 = vmul.f32 1.442695, %v4519_v32 }
0x311b   :  { %7994 = vpow2.f32 %v4523_v41 }
0x311c   :  { %7996 = vpow2.f32 %v4527_v15 }
0x311d   :  { %7998 = vpow2.f32 %v4525_v62 }
0x311e   :  { %8000 = vpow2.f32 %v4531_v9 }
0x311f   :  { %8002 = vpow2.f32 %v4529_v31 }
0x3120   :  { %8004 = vpow2.f32 %v4535_v47 }
0x3121   :  { %8006 = vpow2.f32 %v4533_v46 }
0x3124   :  { %v7993_v12 = vpop.eup %7992 }
0x3125   :  { %v7995_v57 = vpop.eup %7994  ;;  %4546 = vperm.xlu0 %7695, %v7993_v12  }
0x3126   :  { %4549 = vperm.xlu1 %7696, %v7995_v57   ;;  %v9862_v54 = vpop.eup %7996 }
0x3127   :  { %v7999_v28 = vpop.eup %7998 }
0x3128   :  { %v9865_v15 = vpop.eup %8000 }
0x3129   :  { %4555 = vperm.xlu0 %7695, %v9862_v54   ;;  %v8003_v62 = vpop.eup %8002 }
0x312a   :  { %4552 = vperm.xlu1 %7696, %v7999_v28   ;;  %v9868_v2 = vpop.eup %8004 }
0x312b   :  { %v9870_v29 = vpop.eup %8006 }
0x312d   :  { %4561 = vperm.xlu0 %7695, %v9865_v15  }
0x312e   :  { %4558 = vperm.xlu1 %7696, %v8003_v62  }
0x3131   :  { %4567 = vperm.xlu0 %7695, %v9868_v2  }
0x3132   :  { %4564 = vperm.xlu1 %7696, %v9870_v29  }
0x31a4   :  { %v4547_v23 = vpop.permute.xlu0 %4546 }
0x31a5   :  { %v4550_v34 = vpop.permute.xlu1 %4549  ;;  %v4572_v45 = vrot.slane %v4547_v23, %v10782_v30 }
0x31a6   :  { %v4576_v19 = vrot.slane %v4550_v34, %v10782_v30 }
0x31a8   :  { %v4556_v42 = vpop.permute.xlu0 %4555  ;;  %v4601_v5 = vsel %vm523_vm4, %v4576_v19, %v4572_v45 }
0x31a9   :  { %v4553_v20 = vpop.permute.xlu1 %4552  ;;  %v4584_v58 = vrot.slane %v4556_v42, %v10782_v30 }
0x31aa   :  { %v4580_v37 = vrot.slane %v4553_v20, %v10782_v30 }
0x31ac   :  { %v4602_v25 = vsel %vm525_vm5, %v4580_v37, %v4601_v5  ;;  %v4562_v35 = vpop.permute.xlu0 %4561 }
0x31ad   :  { %v4559_v48 = vpop.permute.xlu1 %4558  ;;  %v4603_v43 = vsel %vm527_vm6, %v4584_v58, %v4602_v25  ;;  %v4592_v61 = vrot.slane %v4562_v35, %v10782_v30 }
0x31ae   :  { %v4588_v41 = vrot.slane %v4559_v48, %v10782_v30 }
0x31b0   :  { %v4604_v9 = vsel %vm529_vm7, %v4588_v41, %v4603_v43  ;;  %v4568_v32 = vpop.permute.xlu0 %4567 }
0x31b1   :  { %v4565_v31 = vpop.permute.xlu1 %4564  ;;  %v4600_v47 = vrot.slane %v4568_v32, %v10782_v30  ;;  %v4605_v23 = vsel %vm531_vm8, %v4592_v61, %v4604_v9 }
0x31b2   :  { %v4596_v46 = vrot.slane %v4565_v31, %v10782_v30 }
0x31b4   :  { %v4606_v34 = vsel %vm533_vm9, %v4596_v46, %v4605_v23 }
0x31b5   :  { %v4607_v19 = vsel %vm535_vm10, %v4600_v47, %v4606_v34 }
0x31b6   :  { %v4609_v45 = vsel %vm538_vm11, %v4607_v19, 0.0 }
0x31b7   :  { %4610 = vadd.xlane.f32.xlu1 %v4609_v45 }
0x3244   :  { %v4611_v42 = vpop.xlane.xlu1 %4610 }
0x3245   :  { %v4616_v20 = vrot.slane %v4611_v42, %v8481_v11  ;;  %v4620_v37 = vrot.slane %v4611_v42, %v10815_v10  ;;  %v4624_v5 = vrot.slane %v4611_v42, %v10816_v27  ;;  %v4628_v58 = vrot.slane %v4611_v42, %v10819_v60 }
0x3246   :  { %v4632_v35 = vrot.slane %v4611_v42, %v10817_v63  ;;  %v4636_v43 = vrot.slane %v4611_v42, %v10820_v39  ;;  %v4640_v32 = vrot.slane %v4611_v42, %v10818_v56  ;;  %v4644_v46 = vrot.slane %v4611_v42, %v10821_v26  ;;  %v9995_v26 = vld [vmem:[%s10678_s0 + $0x38] sm:$0xff] }
0x3247   :  { %8008 = vrcp.f32 %v4616_v20  ;;  %10842 = vst [vmem:[#allocation26_spill] sm:$0xff] %v9995_v26 }
0x3248   :  { %8010 = vrcp.f32 %v4620_v37 }
0x3249   :  { %8012 = vrcp.f32 %v4624_v5 }
0x324a   :  { %8014 = vrcp.f32 %v4628_v58  ;;  %v4780_v58 = vld [vmem:[%s10676_s7 + $0x38] sm:$0xff] }
0x324b   :  { %8016 = vrcp.f32 %v4632_v35  ;;  %v4779_v35 = vld [vmem:[%s10676_s7 + $0x30] sm:$0xff] }
0x324c   :  { %8018 = vrcp.f32 %v4636_v43  ;;  %v7286_v43 = vld [vmem:[%s10677_s3 + $0x20] sm:$0xff] }
0x324d   :  { %8020 = vrcp.f32 %v4640_v32  ;;  %v9946_v32 = vld [vmem:[%s10678_s0 + $0x8] sm:$0xff] }
0x324e   :  { %8022 = vrcp.f32 %v4644_v46  ;;  %10835 = vst [vmem:[#allocation16_spill] sm:$0xff] %v9946_v32  ;;  %v9952_v46 = vld [vmem:[%s10678_s0] sm:$0xff] }
0x324f   :  { %10836 = vst [vmem:[#allocation23_spill] sm:$0xff] %v9952_v46 }
0x3251   :  { %v8009_v25 = vpop.eup %8008 }
0x3252   :  { %v4654_v48 = vmul.f32 %v8009_v25, %v7993_v12  ;;  %v8011_v41 = vpop.eup %8010  ;;  %v4777_v25 = vld [vmem:[%s10676_s7 + $0x20] sm:$0xff] }
0x3253   :  { %v4656_v61 = vmul.f32 %v8011_v41, %v7995_v57  ;;  %v8013_v9 = vpop.eup %8012  ;;  %v9934_v41 = vpack.c.bf16 %v4779_v35, %v4777_v25 }
0x3254   :  { %4671 = vperm.xlu0 %7695, %v4654_v48   ;;  %v4658_v31 = vmul.f32 %v8013_v9, %v7999_v28  ;;  %v8015_v47 = vpop.eup %8014 }
0x3255   :  { %v4660_v23 = vmul.f32 %v8015_v47, %v9862_v54  ;;  %v8017_v12 = vpop.eup %8016  ;;  %v4774_v54 = vld [vmem:[%s10676_s7 + $0x8] sm:$0xff] }
0x3256   :  { %v4662_v34 = vmul.f32 %v8017_v12, %v8003_v62  ;;  %v8019_v19 = vpop.eup %8018  ;;  %v4776_v62 = vld [vmem:[%s10676_s7 + $0x18] sm:$0xff] }
0x3257   :  { %v4664_v57 = vmul.f32 %v8019_v19, %v9865_v15  ;;  %v8021_v45 = vpop.eup %8020  ;;  %v9908_v42 = vpack.c.bf16 %v4776_v62, %v4774_v54  ;;  %v4773_v15 = vld [vmem:[%s10676_s7] sm:$0xff] }
0x3258   :  { %4676 = vperm.xlu0 %7695, %v4656_v61   ;;  %v4666_v20 = vmul.f32 %v8021_v45, %v9870_v29  ;;  %v8023_v28 = vpop.eup %8022  ;;  %v4775_v29 = vld [vmem:[%s10676_s7 + $0x10] sm:$0xff] }
0x3259   :  { %v4668_v37 = vmul.f32 %v8023_v28, %v9868_v2  ;;  %v4778_v2 = vld [vmem:[%s10676_s7 + $0x28] sm:$0xff]  ;;  %v9919_v5 = vpack.c.bf16 %v4775_v29, %v4773_v15  ;;  %7590 = vmatprep.subr.bf16.mxu1 %v9908_v42 }
0x325a   :  { %v9931_v48 = vpack.c.bf16 %v4780_v58, %v4778_v2  ;;  %v9974_v58 = vld [vmem:[%s10678_s0 + $0x20] sm:$0xff] }
0x325b   :  { %7592 = vmatpush1.bf16.msra.mxu1 %v9919_v5  ;;  %10839 = vst [vmem:[#allocation21_spill] sm:$0xff] %v9974_v58 }
0x325c   :  { %4681 = vperm.xlu0 %7695, %v4658_v31   ;;  %7594 = vmatprep.subr.bf16.mxu1 %v9931_v48 }
0x325f   :  { %7596 = vmatpush1.bf16.msra.mxu1 %v9934_v41 }
0x3260   :  { %4686 = vperm.xlu0 %7695, %v4660_v23   ;;  %7601 = vmatprep.subr.bf16.mxu1 %v9631_v17  ;;  %v9958_v17 = vld [vmem:[%s10678_s0 + $0x10] sm:$0xff] }
0x3261   :  { %10837 = vst [vmem:[#allocation17_spill] sm:$0xff] %v9958_v17 }
0x3264   :  { %4691 = vperm.xlu0 %7695, %v4662_v34  }
0x3268   :  { %4696 = vperm.xlu0 %7695, %v4664_v57  }
0x326c   :  { %4701 = vperm.xlu0 %7695, %v4666_v20   ;;  %v9967_v20 = vld [vmem:[%s10678_s0 + $0x18] sm:$0xff] }
0x326d   :  { %10838 = vst [vmem:[#allocation18_spill] sm:$0xff] %v9967_v20 }
0x3270   :  { %4706 = vperm.xlu0 %7695, %v4668_v37  }
0x3274   :  { %4877 = vrot.lane.b32.xlu0 %v7286_v43, %s8242_s26 }
0x32d3   :  { %v4672_v61 = vpop.permute.xlu0 %4671 }
0x32d4   :  { %v4709_v23 = vmul.f32 %v9952_v46, %v4672_v61 }
0x32d6   :  { %v4717_v45 = vsel %vm81_vm3, %v4709_v23, 0.0 }
0x32d7   :  { %v4677_v9 = vpop.permute.xlu0 %4676  ;;  %v4718_v15 = vrot.slane %v4717_v45, 4 }
0x32d8   :  { %v4710_v31 = vmul.f32 %v9946_v32, %v4677_v9 }
0x32d9   :  { %v4719_v9 = vadd.f32 %v4718_v15, %v4717_v45 }
0x32da   :  { %v4724_v34 = vsel %vm81_vm3, %v4710_v31, 0.0 }
0x32db   :  { %v4682_v47 = vpop.permute.xlu0 %4681  ;;  %v4725_v37 = vrot.slane %v4724_v34, 4 }
0x32dc   :  { %v4711_v12 = vmul.f32 %v9958_v17, %v4682_v47 }
0x32dd   :  { %v4726_v35 = vadd.f32 %v4725_v37, %v4724_v34  ;;  %v4720_v34 = vrot.slane %v4719_v9, 2 }
0x32de   :  { %v4731_v19 = vsel %vm81_vm3, %v4711_v12, 0.0  ;;  %v9981_v12 = vld [vmem:[%s10678_s0 + $0x28] sm:$0xff] }
0x32df   :  { %v4687_v57 = vpop.permute.xlu0 %4686  ;;  %v4732_v54 = vrot.slane %v4731_v19, 4  ;;  %10840 = vst [vmem:[#allocation22_spill] sm:$0xff] %v9981_v12 }
0x32e0   :  { %v4712_v28 = vmul.f32 %v9967_v20, %v4687_v57 }
0x32e1   :  { %v4733_v43 = vadd.f32 %v4732_v54, %v4731_v19 }
0x32e2   :  { %v4738_v62 = vsel %vm81_vm3, %v4712_v28, 0.0  ;;  %v4727_v28 = vrot.slane %v4726_v35, 2 }
0x32e3   :  { %v4739_v29 = vrot.slane %v4738_v62, 4  ;;  %v4692_v2 = vpop.permute.xlu0 %4691  ;;  %v4734_v17 = vrot.slane %v4733_v43, 2 }
0x32e4   :  { %v4713_v25 = vmul.f32 %v9974_v58, %v4692_v2 }
0x32e5   :  { %v4740_v31 = vadd.f32 %v4739_v29, %v4738_v62  ;;  %v9988_v62 = vld [vmem:[%s10678_s0 + $0x30] sm:$0xff]  ;;  %v4728_v29 = vadd.f32 %v4727_v28, %v4726_v35 }
0x32e6   :  { %v4745_v61 = vsel %vm81_vm3, %v4713_v25, 0.0  ;;  %10841 = vst [vmem:[#allocation25_spill] sm:$0xff] %v9988_v62 }
0x32e7   :  { %v4746_v47 = vrot.slane %v4745_v61, 4  ;;  %v4697_v23 = vpop.permute.xlu0 %4696  ;;  %v4741_v19 = vrot.slane %v4740_v31, 2  ;;  %v4729_v60 = vrot.slane %v4728_v29, 1 }
0x32e8   :  { %v4714_v57 = vmul.f32 %v9981_v12, %v4697_v23  ;;  %v4735_v23 = vadd.f32 %v4734_v17, %v4733_v43 }
0x32e9   :  { %v4747_v20 = vadd.f32 %v4746_v47, %v4745_v61  ;;  %v4721_v47 = vadd.f32 %v4720_v34, %v4719_v9  ;;  %v4742_v12 = vadd.f32 %v4741_v19, %v4740_v31  ;;  %v4730_v19 = vadd.f32 %v4729_v60, %v4728_v29 }
0x32ea   :  { %v4752_v2 = vsel %vm81_vm3, %v4714_v57, 0.0  ;;  %v4736_v28 = vrot.slane %v4735_v23, 1 }
0x32eb   :  { %v4753_v37 = vrot.slane %v4752_v2, 4  ;;  %v4702_v54 = vpop.permute.xlu0 %4701  ;;  %v4748_v45 = vrot.slane %v4747_v20, 2  ;;  %v4722_v43 = vrot.slane %v4721_v47, 1  ;;  %v4743_v9 = vrot.slane %v4742_v12, 1 }
0x32ec   :  { %v4715_v15 = vmul.f32 %v9988_v62, %v4702_v54 }
0x32ed   :  { %v4754_v25 = vadd.f32 %v4753_v37, %v4752_v2  ;;  %v4749_v32 = vadd.f32 %v4748_v45, %v4747_v20  ;;  %v4723_v62 = vadd.f32 %v4722_v43, %v4721_v47  ;;  %v4744_v56 = vadd.f32 %v4743_v9, %v4742_v12  ;;  %v10045_v9 = vld [vmem:[%s10681_s10] ss:$0 sm:$0xff] }
0x32ee   :  { %v4759_v61 = vsel %vm81_vm3, %v4715_v15, 0.0  ;;  %v4737_v15 = vadd.f32 %v4736_v28, %v4735_v23 }
0x32ef   :  { %v4755_v57 = vrot.slane %v4754_v25, 2  ;;  %v4760_v58 = vrot.slane %v4759_v61, 4  ;;  %v4707_v46 = vpop.permute.xlu0 %4706  ;;  %v4750_v34 = vrot.slane %v4749_v32, 1 }
0x32f0   :  { %v4716_v39 = vmul.f32 %v9995_v26, %v4707_v46 }
0x32f1   :  { %v4756_v54 = vadd.f32 %v4755_v57, %v4754_v25  ;;  %v4761_v35 = vadd.f32 %v4760_v58, %v4759_v61  ;;  %v4751_v26 = vadd.f32 %v4750_v34, %v4749_v32  ;;  %v4789_v58 = vsel %vm523_vm4, %v4730_v19, %v4723_v62 }
0x32f2   :  { %v4766_v17 = vsel %vm81_vm3, %v4716_v39, 0.0  ;;  %v4790_v39 = vsel %vm525_vm5, %v4737_v15, %v4789_v58 }
0x32f3   :  { %v4762_v31 = vrot.slane %v4761_v35, 2  ;;  %v4767_v2 = vrot.slane %v4766_v17, 4  ;;  %v4757_v20 = vrot.slane %v4756_v54, 1  ;;  %v4791_v27 = vsel %vm527_vm6, %v4744_v56, %v4790_v39 }
0x32f4   :  { %v4792_v60 = vsel %vm529_vm7, %v4751_v26, %v4791_v27  ;;  %v4889_v27 = vld [vmem:[%s10679_s8 + $0x8] sm:$0xff] }
0x32f5   :  { %v4763_v37 = vadd.f32 %v4762_v31, %v4761_v35  ;;  %v4768_v45 = vadd.f32 %v4767_v2, %v4766_v17  ;;  %v4758_v25 = vadd.f32 %v4757_v20, %v4756_v54 }
0x32f7   :  { %v4764_v63 = vrot.slane %v4763_v37, 1  ;;  %v4769_v46 = vrot.slane %v4768_v45, 2  ;;  %v4793_v23 = vsel %vm531_vm8, %v4758_v25, %v4792_v60 }
0x32f9   :  { %v4770_v61 = vadd.f32 %v4769_v46, %v4768_v45  ;;  %v4765_v57 = vadd.f32 %v4764_v63, %v4763_v37 }
0x32fb   :  { %v4771_v10 = vrot.slane %v4770_v61, 1  ;;  %v4794_v12 = vsel %vm533_vm9, %v4765_v57, %v4793_v23 }
0x32fd   :  { %v4772_v29 = vadd.f32 %v4771_v10, %v4770_v61  ;;  %v4888_v10 = vld [vmem:[%s10679_s8] sm:$0xff] }
0x32fe   :  { %v10018_v63 = vpack.c.bf16 %v4889_v27, %v4888_v10 }
0x32ff   :  { %v4795_v47 = vsel %vm535_vm10, %v4772_v29, %v4794_v12 }
0x3300   :  { %7285 = vmatmul.mubr.msk.f32.vlgmr.msra.gmra.mrb[22].mxu1 %vm81_vm3, %v4795_v47  ;;  %7599 = vmatpush3.bf16.msra.mxu0 %v10018_v63 }
0x3301   :  { %7603 = vmatpush1.bf16.msra.mxu1 %v9642_v6  ;;  %5072 = vmatprep.mubr.f32.mxu1 %v10780_v22 }
0x3302   :  { %7605 = vmatprep.subr.bf16.mxu1 %v9644_v49  ;;  %7609 = vmatprep.subr.bf16.mxu0 %v9686_v3  ;;  %v4878_v3 = vpop.permute.xlu0 %4877 }
0x3305   :  { %7607 = vmatpush1.bf16.msra.mxu1 %v9654_v1 }
0x3306   :  { %7617 = vmatprep.subr.bf16.mxu1 %v9697_v13  ;;  %v10028_v13 = vld [vmem:[%s10680_s11] ss:$0 sm:$0xff] }
0x33d3   :  { %v4864_v56 = vpop.f32.mrb[22].mxu1 }
0x33d4   :  { %v4886_v26 = vadd.f32 %v4864_v56, %v9757_v16  ;;  %v4866_v6 = vpop.f32.mrb[23].mxu1 }
0x33d5   :  { %v4869_v49 = vadd.f32 %v4866_v6, %v9762_v36 }
0x33d6   :  { %v4887_v1 = vadd.f32 %v4886_v26, %v9666_v50 }
0x33d7   :  { %v10031_v32 = vadd.f32 %v10028_v13, %v4869_v49 }
0x33d9   :  { %v4871_v62 = vmul.f32 0.5, %v10031_v32 }
0x33db   :  { %v4872_v54 = vmul.f32 1.442695, %v4871_v62 }
0x33dd   :  { %8024 = vpow2.f32 %v4872_v54 }
0x33e7   :  { %v8025_v35 = vpop.eup %8024 }
0x33e8   :  { %v4880_v16 = vmul.f32 %v8025_v35, %v4878_v3 }
0x33ea   :  { %4882 = vrot.lane.b32.xlu1 %v4880_v16, %s8245_s24 }
0x345c   :  { %v4883_v36 = vpop.permute.xlu1 %4882 }
0x345d   :  { %v4885_v50 = vadd.f32 %v4883_v36, %v10031_v32 }
0x345f   :  { %7380 = vmatmul.mubr.msk.f32.vlgmr.msra.gmra.mrb[24].mxu0 %vm965_vm13, %v4885_v50 }
0x3460   :  { %7611 = vmatpush1.bf16.msra.mxu0 %v9699_v33  ;;  %5193 = vmatprep.mubr.f32.mxu0 %v10780_v22 }
0x3461   :  { %7613 = vmatprep.subr.bf16.mxu0 %v9724_v14 }
0x3464   :  { %7615 = vmatpush1.bf16.msra.mxu0 %v9738_v52 }
0x3465   :  { %7625 = vmatprep.subr.bf16.mxu0 %v9908_v42 }
0x3532   :  { %v4959_v28 = vpop.f32.mrb[24].mxu0 }
0x3533   :  { %v4963_v17 = vadd.f32 %v4959_v28, %v4887_v1  ;;  %v7381_v43 = vpop.f32.mrb[25].mxu0 }
0x3535   :  { %v4964_v31 = vadd.f32 %v10045_v9, %v4963_v17 }
0x3537   :  { %v7288_v2 = vmul.f32 -1.442695, %v4964_v31 }
0x3539   :  { %8026 = vpow2.f32 %v7288_v2 }
0x353a   :  { %8028 = vtanh.f32 %v4964_v31 }
0x3543   :  { %v8027_v33 = vpop.eup %8026 }
0x3544   :  { %v4969_v34 = vadd.f32 1.0, %v8027_v33  ;;  %v8029_v14 = vpop.eup %8028 }
0x3546   :  { %8030 = vrcp.f32 %v4969_v34 }
0x3550   :  { %v8031_v52 = vpop.eup %8030 }
0x3551   :  { %v4972_v42 = vsel %vm8382_vm2, %v8029_v14, %v8031_v52 }
0x3552   :  { %4975 = vrot.lane.b32.xlu0 %v4972_v42, %s8238_s21  ;;  %v4973_v37 = vmul.f32 %v4972_v42, %v9619_v44  ;;  %v7290_v44 = vld [vmem:[%s10672_s1 + $0x28] sm:$0xff] }
0x35c4   :  { %v4976_v19 = vpop.permute.xlu0 %4975 }
0x35c5   :  { %v4978_v20 = vmul.f32 %v4976_v19, %v4972_v42 }
0x35c7   :  { %4980 = vrot.lane.b32.xlu0 %v4978_v20, %s8239_s22 }
0x3639   :  { %v4981_v45 = vpop.permute.xlu0 %4980 }
0x363a   :  { %v10053_v15 = vadd.f32 %v4981_v45, %v4973_v37 }
0x363c   :  { %8032 = vtanh.f32 %v10053_v15 }
0x3646   :  { %v8033_v46 = vpop.eup %8032 }
0x3647   :  { %4986 = vrot.lane.b32.xlu0 %v8033_v46, %s8238_s21 }
0x36b9   :  { %v4987_v58 = vpop.permute.xlu0 %4986 }
0x36ba   :  { %v4989_v25 = vmul.f32 %v4987_v58, %v4972_v42 }
0x36bc   :  { %4991 = vrot.lane.b32.xlu0 %v4989_v25, %s8239_s22 }
0x372e   :  { %v4992_v61 = vpop.permute.xlu0 %4991 }
0x372f   :  { %4995 = vst.msk [vmem:[#allocation2 + $0x20] sm:$0xff] %vm81_vm3, %v4992_v61  ;;  %7289 = vmatmul.mubr.msk.f32.vlgmr.msra.gmra.mrb[24].mxu1 %vm81_vm3, %v4992_v61 }
0x3730   :  { %7619 = vmatpush1.bf16.msra.mxu1 %v9711_v40  ;;  %5264 = vmatprep.mubr.f32.mxu1 %v10780_v22 }
0x3731   :  { %7621 = vmatprep.subr.bf16.mxu1 %v9726_v38 }
0x3734   :  { %7623 = vmatpush1.bf16.msra.mxu1 %v9745_v21 }
0x3735   :  { %7632 = vmatprep.subr.bf16.mxu1 %v10811_v8 }
0x3802   :  { %v5074_v39 = vpop.f32.mrb[24].mxu1 }
0x3803   :  { %v5081_v57 = vadd.f32 %v7290_v44, %v5074_v39  ;;  %v10068_v60 = vpop.f32.mrb[25].mxu1 }
0x3805   :  { %v5082_v29 = vadd.f32 %v5081_v57, %v9760_v18  ;;  %v10844_v57 = vld [vmem:[#allocation13_spill] sm:$0xff] }
0x3807   :  { %v7291_v23 = vmul.f32 -1.442695, %v5082_v29 }
0x3809   :  { %8034 = vpow2.f32 %v7291_v23 }
0x380a   :  { %8036 = vtanh.f32 %v5082_v29  ;;  %v10845_v29 = vld [vmem:[#allocation15_spill] sm:$0xff] }
0x3813   :  { %v8035_v40 = vpop.eup %8034 }
0x3814   :  { %v5087_v12 = vadd.f32 1.0, %v8035_v40  ;;  %v8037_v38 = vpop.eup %8036  ;;  %v10846_v40 = vld [vmem:[#allocation19_spill] sm:$0xff] }
0x3816   :  { %8038 = vrcp.f32 %v5087_v12 }
0x3820   :  { %v8039_v21 = vpop.eup %8038 }
0x3821   :  { %v5090_v47 = vsel %vm8382_vm2, %v8037_v38, %v8039_v21 }
0x3822   :  { %5093 = vrot.lane.b32.xlu1 %v5090_v47, %s8238_s21  ;;  %v5091_v56 = vmul.f32 %v5090_v47, %v9674_v55 }
0x3894   :  { %v5094_v10 = vpop.permute.xlu1 %5093 }
0x3895   :  { %v5096_v27 = vmul.f32 %v5094_v10, %v5090_v47 }
0x3897   :  { %5098 = vrot.lane.b32.xlu0 %v5096_v27, %s8239_s22 }
0x3909   :  { %v5099_v18 = vpop.permute.xlu0 %5098 }
0x390a   :  { %v10076_v26 = vadd.f32 %v5099_v18, %v5091_v56 }
0x390c   :  { %8040 = vtanh.f32 %v10076_v26 }
0x3916   :  { %v8041_v6 = vpop.eup %8040 }
0x3917   :  { %5104 = vrot.lane.b32.xlu1 %v8041_v6, %s8238_s21 }
0x3989   :  { %v5105_v49 = vpop.permute.xlu1 %5104 }
0x398a   :  { %v5107_v1 = vmul.f32 %v5105_v49, %v5090_v47 }
0x398c   :  { %5125 = vrot.lane.b32.xlu0 %v5107_v1, %s8239_s22 }
0x39fe   :  { %v5126_v62 = vpop.permute.xlu0 %5125 }
0x39ff   :  { %7292 = vmatmul.mubr.msk.f32.vlgmr.msra.gmra.mrb[26].mxu0 %vm81_vm3, %v5126_v62  ;;  %7293 = vmatmul.mubr.msk.f32.vlgmr.msra.gmra.mrb[26].mxu1 %vm81_vm3, %v5126_v62 }
0x3a00   :  { %7627 = vmatpush1.bf16.msra.mxu0 %v9919_v5  ;;  %5842 = vmatprep.mubr.f32.mxu0 %v10780_v22 }
0x3a01   :  { %7629 = vmatprep.subr.bf16.mxu0 %v9931_v48  ;;  %7634 = vmatpush3.bf16.msra.mxu1 %v10018_v63 }
0x3a02   :  { %7386 = vmatprep.mubr.msk.f32.mxu1 %vm8244_vm12, %v10780_v22 }
0x3a04   :  { %7631 = vmatpush1.bf16.msra.mxu0 %v9934_v41 }
0x3ad2   :  { %v10090_v55 = vpop.f32.mrb[26].mxu0  ;;  %v5266_v54 = vpop.f32.mrb[26].mxu1 }
0x3ad3   :  { %v5272_v3 = vcombine.high %v5266_v54, %v5266_v54  ;;  %v5279_v35 = vrot.slane %v5266_v54, %v8471_v0  ;;  %v10093_v16 = vpop.f32.mrb[27].mxu0  ;;  %v10095_v5 = vpop.f32.mrb[27].mxu1 }
0x3ad5   :  { %v5286_v36 = vrot.slane %v5272_v3, %v8471_v0  ;;  %v5287_v48 = vcombine.high %v5279_v35, %v5279_v35  ;;  %v5295_v63 = vrot.slane %v5279_v35, %v8471_v0 }
0x3ad7   :  { %v5288_v50 = vcombine.high %v5286_v36, %v5286_v36  ;;  %v5302_v28 = vrot.slane %v5286_v36, %v8471_v0  ;;  %v5309_v41 = vrot.slane %v5287_v48, %v8471_v0  ;;  %v5317_v17 = vcombine.high %v5295_v63, %v5295_v63 }
0x3ad8   :  { %v5324_v43 = vrot.slane %v5295_v63, %v8481_v11 }
0x3ad9   :  { %v5318_v31 = vcombine.high %v5302_v28, %v5302_v28  ;;  %v5319_v2 = vcombine.high %v5309_v41, %v5309_v41  ;;  %v5328_v33 = vrot.slane %v5309_v41, %v8481_v11  ;;  %v5332_v34 = vrot.slane %v5317_v17, %v8481_v11 }
0x3ada   :  { %v5340_v14 = vrot.slane %v5302_v28, %v8481_v11  ;;  %v5361_v52 = vadd.f32 %v9776_v53, %v5324_v43  ;;  %v5316_v42 = vrot.slane %v5288_v50, %v8471_v0  ;;  %v10843_v53 = vld [vmem:[#allocation14_spill] sm:$0xff] }
0x3adb   :  { %v5348_v19 = vrot.slane %v5318_v31, %v8481_v11  ;;  %v5336_v20 = vrot.slane %v5319_v2, %v8481_v11  ;;  %v5362_v37 = vadd.f32 %v9784_v51, %v5328_v33  ;;  %v5363_v45 = vadd.f32 %v9790_v59, %v5332_v34 }
0x3adc   :  { %8042 = vtanh.f32 %v5361_v52  ;;  %v5365_v46 = vadd.f32 %v9796_v4, %v5340_v14  ;;  %v5320_v25 = vcombine.high %v5316_v42, %v5316_v42  ;;  %v5344_v61 = vrot.slane %v5316_v42, %v8481_v11 }
0x3add   :  { %8044 = vtanh.f32 %v5362_v37  ;;  %v5367_v58 = vadd.f32 %v9809_v7, %v5348_v19  ;;  %v5364_v44 = vadd.f32 %v10843_v53, %v5336_v20 }
0x3ade   :  { %8046 = vtanh.f32 %v5363_v45  ;;  %v5352_v39 = vrot.slane %v5320_v25, %v8481_v11  ;;  %v5366_v51 = vadd.f32 %v10844_v57, %v5344_v61  ;;  %v10848_v57 = vld [vmem:[#allocation6_spill] sm:$0xff] }
0x3adf   :  { %8048 = vtanh.f32 %v5365_v46 }
0x3ae0   :  { %8050 = vtanh.f32 %v5367_v58  ;;  %v5368_v12 = vadd.f32 %v10846_v40, %v5352_v39 }
0x3ae1   :  { %8052 = vtanh.f32 %v5364_v44  ;;  %v10847_v44 = vld [vmem:[#allocation5_spill] sm:$0xff] }
0x3ae2   :  { %8054 = vtanh.f32 %v5366_v51 }
0x3ae3   :  { %8056 = vtanh.f32 %v5368_v12 }
0x3ae6   :  { %v8043_v59 = vpop.eup %8042 }
0x3ae7   :  { %v5377_v23 = vmul.f32 %v10845_v29, %v8043_v59  ;;  %v8045_v4 = vpop.eup %8044  ;;  %v10849_v59 = vld [vmem:[#allocation8_spill] sm:$0xff] }
0x3ae8   :  { %v5378_v7 = vmul.f32 %v10845_v29, %v8045_v4  ;;  %v8047_v38 = vpop.eup %8046 }
0x3ae9   :  { %5385 = vadd.xlane.f32.xlu1 %v5377_v23  ;;  %v8049_v21 = vpop.eup %8048  ;;  %v5379_v27 = vmul.f32 %v10845_v29, %v8047_v38  ;;  %v10850_v23 = vld [vmem:[#allocation10_spill] sm:$0xff] }
0x3aea   :  { %5387 = vadd.xlane.f32.xlu0 %v5378_v7  ;;  %v5381_v47 = vmul.f32 %v10845_v29, %v8049_v21  ;;  %v8051_v10 = vpop.eup %8050  ;;  %v10851_v7 = vld [vmem:[#allocation7_spill] sm:$0xff] }
0x3aeb   :  { %v8053_v56 = vpop.eup %8052  ;;  %v5383_v18 = vmul.f32 %v10845_v29, %v8051_v10 }
0x3aec   :  { %v5380_v6 = vmul.f32 %v10845_v29, %v8053_v56  ;;  %v8055_v49 = vpop.eup %8054 }
0x3aed   :  { %5393 = vadd.xlane.f32.xlu1 %v5381_v47  ;;  %v5382_v1 = vmul.f32 %v10845_v29, %v8055_v49  ;;  %v8057_v62 = vpop.eup %8056 }
0x3aee   :  { %5389 = vadd.xlane.f32.xlu0 %v5379_v27  ;;  %v5384_v54 = vmul.f32 %v10845_v29, %v8057_v62 }
0x3af1   :  { %5397 = vadd.xlane.f32.xlu1 %v5383_v18 }
0x3af2   :  { %5391 = vadd.xlane.f32.xlu0 %v5380_v6  ;;  %v10852_v6 = vld [vmem:[#allocation9_spill] sm:$0xff] }
0x3af6   :  { %5395 = vadd.xlane.f32.xlu0 %v5382_v1 }
0x3afa   :  { %5399 = vadd.xlane.f32.xlu0 %v5384_v54 }
0x3b76   :  { %v5386_v35 = vpop.xlane.xlu1 %5385 }
0x3b77   :  { %v5388_v3 = vpop.xlane.xlu0 %5387  ;;  %v5412_v50 = vrot.slane %v5386_v35, %v10782_v30 }
0x3b78   :  { %v5416_v48 = vrot.slane %v5388_v3, %v10782_v30 }
0x3b7a   :  { %v5394_v28 = vpop.xlane.xlu1 %5393  ;;  %v5441_v17 = vsel %vm523_vm4, %v5416_v48, %v5412_v50  ;;  %v10853_v48 = vld [vmem:[#allocation11_spill] sm:$0xff] }
0x3b7b   :  { %v5390_v36 = vpop.xlane.xlu0 %5389  ;;  %v5428_v33 = vrot.slane %v5394_v28, %v10782_v30 }
0x3b7c   :  { %v5420_v63 = vrot.slane %v5390_v36, %v10782_v30 }
0x3b7e   :  { %v5442_v31 = vsel %vm525_vm5, %v5420_v63, %v5441_v17  ;;  %v5398_v14 = vpop.xlane.xlu1 %5397 }
0x3b7f   :  { %v5392_v41 = vpop.xlane.xlu0 %5391  ;;  %v5436_v20 = vrot.slane %v5398_v14, %v10782_v30 }
0x3b80   :  { %v5424_v43 = vrot.slane %v5392_v41, %v10782_v30 }
0x3b82   :  { %v5443_v2 = vsel %vm527_vm6, %v5424_v43, %v5442_v31 }
0x3b83   :  { %v5396_v34 = vpop.xlane.xlu0 %5395  ;;  %v5444_v42 = vsel %vm529_vm7, %v5428_v33, %v5443_v2 }
0x3b84   :  { %v5432_v52 = vrot.slane %v5396_v34, %v10782_v30 }
0x3b86   :  { %v5445_v19 = vsel %vm531_vm8, %v5432_v52, %v5444_v42 }
0x3b87   :  { %v5400_v37 = vpop.xlane.xlu0 %5399  ;;  %v5446_v46 = vsel %vm533_vm9, %v5436_v20, %v5445_v19 }
0x3b88   :  { %v5440_v45 = vrot.slane %v5400_v37, %v10782_v30 }
0x3b8a   :  { %v5447_v58 = vsel %vm535_vm10, %v5440_v45, %v5446_v46 }
0x3b8b   :  { %v5449_v25 = vsel %vm538_vm11, %v5447_v58, -inf }
0x3b8c   :  { %5450 = vmax.xlane.f32.xlu1 %v5449_v25 }
0x3c19   :  { %v5451_v61 = vpop.xlane.xlu1 %5450 }
0x3c1a   :  { %v5456_v53 = vrot.slane %v5451_v61, %v8481_v11  ;;  %v5460_v39 = vrot.slane %v5451_v61, %v10847_v44  ;;  %v5464_v51 = vrot.slane %v5451_v61, %v10848_v57  ;;  %v5472_v29 = vrot.slane %v5451_v61, %v10849_v59 }
0x3c1b   :  { %v5480_v4 = vrot.slane %v5451_v61, %v10850_v23  ;;  %v5468_v38 = vrot.slane %v5451_v61, %v10851_v7  ;;  %v5476_v49 = vrot.slane %v5451_v61, %v10852_v6  ;;  %v5484_v63 = vrot.slane %v5451_v61, %v10853_v48 }
0x3c1c   :  { %v5493_v40 = vsub.f32 %v5386_v35, %v5456_v53  ;;  %v5494_v12 = vsub.f32 %v5388_v3, %v5460_v39  ;;  %v5495_v21 = vsub.f32 %v5390_v36, %v5464_v51  ;;  %v5497_v47 = vsub.f32 %v5394_v28, %v5472_v29 }
0x3c1d   :  { %v5499_v56 = vsub.f32 %v5398_v14, %v5480_v4  ;;  %v5496_v1 = vsub.f32 %v5392_v41, %v5468_v38  ;;  %v5498_v35 = vsub.f32 %v5396_v34, %v5476_v49  ;;  %v5500_v36 = vsub.f32 %v5400_v37, %v5484_v63 }
0x3c1e   :  { %v5501_v10 = vmul.f32 1.442695, %v5493_v40  ;;  %v5503_v27 = vmul.f32 1.442695, %v5494_v12  ;;  %v5509_v18 = vmul.f32 1.442695, %v5497_v47 }
0x3c1f   :  { %v5505_v62 = vmul.f32 1.442695, %v5495_v21  ;;  %v5513_v54 = vmul.f32 1.442695, %v5499_v56  ;;  %v5507_v3 = vmul.f32 1.442695, %v5496_v1 }
0x3c20   :  { %8058 = vpow2.f32 %v5501_v10  ;;  %v5511_v50 = vmul.f32 1.442695, %v5498_v35  ;;  %v5515_v41 = vmul.f32 1.442695, %v5500_v36 }
0x3c21   :  { %8060 = vpow2.f32 %v5503_v27 }
0x3c22   :  { %8062 = vpow2.f32 %v5509_v18 }
0x3c23   :  { %8064 = vpow2.f32 %v5505_v62 }
0x3c24   :  { %8066 = vpow2.f32 %v5513_v54 }
0x3c25   :  { %8068 = vpow2.f32 %v5507_v3 }
0x3c26   :  { %8070 = vpow2.f32 %v5511_v50 }
0x3c27   :  { %8072 = vpow2.f32 %v5515_v41 }
0x3c2a   :  { %v8059_v28 = vpop.eup %8058 }
0x3c2b   :  { %v10150_v17 = vpop.eup %8060  ;;  %5526 = vperm.xlu0 %7695, %v8059_v28  }
0x3c2c   :  { %5529 = vperm.xlu1 %7696, %v10150_v17   ;;  %v10153_v43 = vpop.eup %8062 }
0x3c2d   :  { %v10155_v31 = vpop.eup %8064 }
0x3c2e   :  { %v10159_v2 = vpop.eup %8066 }
0x3c2f   :  { %5538 = vperm.xlu0 %7695, %v10153_v43   ;;  %v8069_v33 = vpop.eup %8068 }
0x3c30   :  { %5532 = vperm.xlu1 %7696, %v10155_v31   ;;  %v10162_v34 = vpop.eup %8070 }
0x3c31   :  { %v8073_v14 = vpop.eup %8072 }
0x3c33   :  { %5544 = vperm.xlu0 %7695, %v10159_v2  }
0x3c34   :  { %5535 = vperm.xlu1 %7696, %v8069_v33  }
0x3c38   :  { %5541 = vperm.xlu1 %7696, %v10162_v34  }
0x3c3c   :  { %5547 = vperm.xlu1 %7696, %v8073_v14  }
0x3caa   :  { %v5527_v42 = vpop.permute.xlu0 %5526 }
0x3cab   :  { %v5530_v52 = vpop.permute.xlu1 %5529  ;;  %v5552_v37 = vrot.slane %v5527_v42, %v10782_v30 }
0x3cac   :  { %v5556_v20 = vrot.slane %v5530_v52, %v10782_v30 }
0x3cae   :  { %v5539_v46 = vpop.permute.xlu0 %5538  ;;  %v5581_v25 = vsel %vm523_vm4, %v5556_v20, %v5552_v37 }
0x3caf   :  { %v5533_v19 = vpop.permute.xlu1 %5532  ;;  %v5568_v51 = vrot.slane %v5539_v46, %v10782_v30 }
0x3cb0   :  { %v5560_v45 = vrot.slane %v5533_v19, %v10782_v30 }
0x3cb2   :  { %v5582_v53 = vsel %vm525_vm5, %v5560_v45, %v5581_v25  ;;  %v5545_v4 = vpop.permute.xlu0 %5544 }
0x3cb3   :  { %v5536_v58 = vpop.permute.xlu1 %5535  ;;  %v5576_v21 = vrot.slane %v5545_v4, %v10782_v30 }
0x3cb4   :  { %v5564_v61 = vrot.slane %v5536_v58, %v10782_v30 }
0x3cb6   :  { %v5583_v39 = vsel %vm527_vm6, %v5564_v61, %v5582_v53 }
0x3cb7   :  { %v5542_v29 = vpop.permute.xlu1 %5541  ;;  %v5584_v12 = vsel %vm529_vm7, %v5568_v51, %v5583_v39 }
0x3cb8   :  { %v5572_v40 = vrot.slane %v5542_v29, %v10782_v30  ;;  %v10854_v29 = vld [vmem:[#allocation16_spill] sm:$0xff] }
0x3cba   :  { %v5585_v38 = vsel %vm531_vm8, %v5572_v40, %v5584_v12 }
0x3cbb   :  { %v5548_v47 = vpop.permute.xlu1 %5547  ;;  %v5586_v27 = vsel %vm533_vm9, %v5576_v21, %v5585_v38  ;;  %v10856_v21 = vld [vmem:[#allocation17_spill] sm:$0xff] }
0x3cbc   :  { %v5580_v10 = vrot.slane %v5548_v47, %v10782_v30 }
0x3cbe   :  { %v5587_v56 = vsel %vm535_vm10, %v5580_v10, %v5586_v27 }
0x3cbf   :  { %v5589_v18 = vsel %vm538_vm11, %v5587_v56, 0.0  ;;  %v10857_v56 = vld [vmem:[#allocation26_spill] sm:$0xff] }
0x3cc0   :  { %5590 = vadd.xlane.f32.xlu0 %v5589_v18 }
0x3d4d   :  { %v5591_v49 = vpop.xlane.xlu0 %5590 }
0x3d4e   :  { %v5624_v1 = vrot.slane %v5591_v49, %v10853_v48  ;;  %v5596_v62 = vrot.slane %v5591_v49, %v8481_v11  ;;  %v5600_v54 = vrot.slane %v5591_v49, %v10847_v44  ;;  %v5604_v63 = vrot.slane %v5591_v49, %v10848_v57 }
0x3d4f   :  { %v5608_v35 = vrot.slane %v5591_v49, %v10851_v7  ;;  %v5612_v41 = vrot.slane %v5591_v49, %v10849_v59  ;;  %v5616_v19 = vrot.slane %v5591_v49, %v10852_v6  ;;  %v5620_v45 = vrot.slane %v5591_v49, %v10850_v23 }
0x3d50   :  { %8074 = vrcp.f32 %v5624_v1 }
0x3d51   :  { %8076 = vrcp.f32 %v5596_v62 }
0x3d52   :  { %8078 = vrcp.f32 %v5600_v54  ;;  %v10858_v54 = vld [vmem:[#allocation18_spill] sm:$0xff] }
0x3d53   :  { %8080 = vrcp.f32 %v5604_v63 }
0x3d54   :  { %8082 = vrcp.f32 %v5608_v35 }
0x3d55   :  { %8084 = vrcp.f32 %v5612_v41 }
0x3d56   :  { %8086 = vrcp.f32 %v5616_v19  ;;  %v10859_v19 = vld [vmem:[#allocation21_spill] sm:$0xff] }
0x3d57   :  { %8088 = vrcp.f32 %v5620_v45 }
0x3d5a   :  { %v8075_v3 = vpop.eup %8074 }
0x3d5b   :  { %v8077_v36 = vpop.eup %8076  ;;  %v5648_v50 = vmul.f32 %v8075_v3, %v8073_v14 }
0x3d5c   :  { %v5634_v52 = vmul.f32 %v8077_v36, %v8059_v28  ;;  %v8079_v42 = vpop.eup %8078 }
0x3d5d   :  { %5686 = vperm.xlu0 %7695, %v5648_v50   ;;  %v5636_v20 = vmul.f32 %v8079_v42, %v10150_v17  ;;  %v8081_v37 = vpop.eup %8080 }
0x3d5e   :  { %5651 = vperm.xlu1 %7696, %v5634_v52   ;;  %v5638_v46 = vmul.f32 %v8081_v37, %v10155_v31  ;;  %v8083_v14 = vpop.eup %8082  ;;  %v7295_v31 = vld [vmem:[%s10677_s3 + $0x28] sm:$0xff] }
0x3d5f   :  { %v5640_v58 = vmul.f32 %v8083_v14, %v8069_v33  ;;  %v8085_v28 = vpop.eup %8084 }
0x3d60   :  { %v5642_v25 = vmul.f32 %v8085_v28, %v10153_v43  ;;  %v8087_v61 = vpop.eup %8086  ;;  %v10855_v43 = vld [vmem:[#allocation23_spill] sm:$0xff] }
0x3d61   :  { %v5644_v53 = vmul.f32 %v8087_v61, %v10162_v34  ;;  %v8089_v17 = vpop.eup %8088 }
0x3d62   :  { %5656 = vperm.xlu1 %7696, %v5636_v20   ;;  %v5646_v39 = vmul.f32 %v8089_v17, %v10159_v2  ;;  %v10860_v17 = vld [vmem:[#allocation22_spill] sm:$0xff] }
0x3d66   :  { %5661 = vperm.xlu1 %7696, %v5638_v46  }
0x3d6a   :  { %5666 = vperm.xlu1 %7696, %v5640_v58  }
0x3d6e   :  { %5671 = vperm.xlu1 %7696, %v5642_v25  }
0x3d72   :  { %5676 = vperm.xlu1 %7696, %v5644_v53  }
0x3d76   :  { %5681 = vperm.xlu1 %7696, %v5646_v39  }
0x3d7a   :  { %5857 = vrot.lane.b32.xlu1 %v7295_v31, %s8242_s26 }
0x3ddc   :  { %v5687_v38 = vpop.permute.xlu0 %5686 }
0x3ddd   :  { %v5652_v33 = vpop.permute.xlu1 %5651  ;;  %v5696_v18 = vmul.f32 %v10857_v56, %v5687_v38 }
0x3dde   :  { %v5689_v40 = vmul.f32 %v10855_v43, %v5652_v33 }
0x3ddf   :  { %v5746_v36 = vsel %vm81_vm3, %v5696_v18, 0.0 }
0x3de0   :  { %v5697_v2 = vsel %vm81_vm3, %v5689_v40, 0.0  ;;  %v5747_v45 = vrot.slane %v5746_v36, 4 }
0x3de1   :  { %v5657_v51 = vpop.permute.xlu1 %5656  ;;  %v5698_v62 = vrot.slane %v5697_v2, 4 }
0x3de2   :  { %v5690_v4 = vmul.f32 %v10854_v29, %v5657_v51  ;;  %v5748_v33 = vadd.f32 %v5747_v45, %v5746_v36 }
0x3de3   :  { %v5699_v42 = vadd.f32 %v5698_v62, %v5697_v2 }
0x3de4   :  { %v5704_v12 = vsel %vm81_vm3, %v5690_v4, 0.0 }
0x3de5   :  { %v5662_v34 = vpop.permute.xlu1 %5661  ;;  %v5705_v10 = vrot.slane %v5704_v12, 4  ;;  %v5700_v61 = vrot.slane %v5699_v42, 2 }
0x3de6   :  { %v5691_v47 = vmul.f32 %v10856_v21, %v5662_v34  ;;  %v10861_v21 = vld [vmem:[#allocation25_spill] sm:$0xff] }
0x3de7   :  { %v5706_v35 = vadd.f32 %v5705_v10, %v5704_v12  ;;  %v5701_v34 = vadd.f32 %v5700_v61, %v5699_v42 }
0x3de8   :  { %v5711_v27 = vsel %vm81_vm3, %v5691_v47, 0.0 }
0x3de9   :  { %v5712_v49 = vrot.slane %v5711_v27, 4  ;;  %v5667_v1 = vpop.permute.xlu1 %5666  ;;  %v5707_v46 = vrot.slane %v5706_v35, 2 }
0x3dea   :  { %v5692_v63 = vmul.f32 %v10858_v54, %v5667_v1  ;;  %v5702_v54 = vrot.slane %v5701_v34, 1 }
0x3deb   :  { %v5713_v50 = vadd.f32 %v5712_v49, %v5711_v27  ;;  %v5708_v51 = vadd.f32 %v5707_v46, %v5706_v35  ;;  %v5749_v27 = vrot.slane %v5748_v33, 2 }
0x3dec   :  { %v5718_v3 = vsel %vm81_vm3, %v5692_v63, 0.0 }
0x3ded   :  { %v5719_v41 = vrot.slane %v5718_v3, 4  ;;  %v5672_v52 = vpop.permute.xlu1 %5671  ;;  %v5714_v58 = vrot.slane %v5713_v50, 2  ;;  %v5709_v56 = vrot.slane %v5708_v51, 1 }
0x3dee   :  { %v5693_v20 = vmul.f32 %v10859_v19, %v5672_v52 }
0x3def   :  { %v5720_v37 = vadd.f32 %v5719_v41, %v5718_v3  ;;  %v5715_v4 = vadd.f32 %v5714_v58, %v5713_v50  ;;  %v5750_v50 = vadd.f32 %v5749_v27, %v5748_v33  ;;  %v5710_v41 = vadd.f32 %v5709_v56, %v5708_v51 }
0x3df0   :  { %v5725_v14 = vsel %vm81_vm3, %v5693_v20, 0.0  ;;  %v5703_v20 = vadd.f32 %v5702_v54, %v5701_v34 }
0x3df1   :  { %v5726_v28 = vrot.slane %v5725_v14, 4  ;;  %v5677_v25 = vpop.permute.xlu1 %5676  ;;  %v5721_v53 = vrot.slane %v5720_v37, 2  ;;  %v5716_v49 = vrot.slane %v5715_v4, 1 }
0x3df2   :  { %v5694_v39 = vmul.f32 %v10860_v17, %v5677_v25  ;;  %v5769_v58 = vsel %vm523_vm4, %v5710_v41, %v5703_v20 }
0x3df3   :  { %v5727_v31 = vadd.f32 %v5726_v28, %v5725_v14  ;;  %v5722_v38 = vadd.f32 %v5721_v53, %v5720_v37  ;;  %v5717_v52 = vadd.f32 %v5716_v49, %v5715_v4  ;;  %v5751_v14 = vrot.slane %v5750_v50, 1 }
0x3df4   :  { %v5732_v29 = vsel %vm81_vm3, %v5694_v39, 0.0 }
0x3df5   :  { %v5728_v43 = vrot.slane %v5727_v31, 2  ;;  %v5733_v40 = vrot.slane %v5732_v29, 4  ;;  %v5682_v12 = vpop.permute.xlu1 %5681  ;;  %v5723_v63 = vrot.slane %v5722_v38, 1  ;;  %v5770_v25 = vsel %vm525_vm5, %v5717_v52, %v5769_v58  ;;  %v5979_v52 = vld [vmem:[%s10671_s5 + $0x8] sm:$0xff]  ;;  %v5982_v58 = vld [vmem:[%s10671_s5 + $0x20] sm:$0xff] }
0x3df6   :  { %v5695_v47 = vmul.f32 %v10861_v21, %v5682_v12 }
0x3df7   :  { %v5729_v2 = vadd.f32 %v5728_v43, %v5727_v31  ;;  %v5734_v10 = vadd.f32 %v5733_v40, %v5732_v29  ;;  %v5724_v37 = vadd.f32 %v5723_v63, %v5722_v38  ;;  %v5752_v31 = vadd.f32 %v5751_v14, %v5750_v50 }
0x3df8   :  { %v5739_v18 = vsel %vm81_vm3, %v5695_v47, 0.0 }
0x3df9   :  { %v5735_v1 = vrot.slane %v5734_v10, 2  ;;  %v5740_v62 = vrot.slane %v5739_v18, 4  ;;  %v5730_v35 = vrot.slane %v5729_v2, 1  ;;  %v5771_v53 = vsel %vm527_vm6, %v5724_v37, %v5770_v25  ;;  %v5983_v37 = vld [vmem:[%s10671_s5 + $0x28] sm:$0xff] }
0x3dfb   :  { %v5736_v3 = vadd.f32 %v5735_v1, %v5734_v10  ;;  %v5741_v36 = vadd.f32 %v5740_v62, %v5739_v18  ;;  %v5731_v45 = vadd.f32 %v5730_v35, %v5729_v2  ;;  %v5858_v2 = vpop.permute.xlu1 %5857 }
0x3dfd   :  { %v5737_v42 = vrot.slane %v5736_v3, 1  ;;  %v5742_v19 = vrot.slane %v5741_v36, 2  ;;  %v5772_v17 = vsel %vm529_vm7, %v5731_v45, %v5771_v53  ;;  %v5985_v45 = vld [vmem:[%s10671_s5 + $0x38] sm:$0xff] }
0x3dfe   :  { %v7639_v14 = vpack.c.bf16 %v5985_v45, %v5983_v37  ;;  %v6102_v45 = vld [vmem:[%s10673_s6 + $0x70] sm:$0xff] }
0x3dff   :  { %v5743_v46 = vadd.f32 %v5742_v19, %v5741_v36  ;;  %v5738_v28 = vadd.f32 %v5737_v42, %v5736_v3  ;;  %v5981_v42 = vld [vmem:[%s10671_s5 + $0x18] sm:$0xff]  ;;  %v5978_v19 = vld [vmem:[%s10671_s5] sm:$0xff] }
0x3e00   :  { %v7635_v20 = vpack.c.bf16 %v5981_v42, %v5979_v52 }
0x3e01   :  { %v5744_v61 = vrot.slane %v5743_v46, 1  ;;  %v5773_v33 = vsel %vm531_vm8, %v5738_v28, %v5772_v17  ;;  %v5984_v28 = vld [vmem:[%s10671_s5 + $0x30] sm:$0xff] }
0x3e02   :  { %7636 = vmatprep.subr.bf16.mxu0 %v7635_v20  ;;  %v7641_v25 = vpack.c.bf16 %v5984_v28, %v5982_v58  ;;  %v6100_v20 = vld [vmem:[%s10673_s6 + $0x60] sm:$0xff] }
0x3e03   :  { %v5745_v39 = vadd.f32 %v5744_v61, %v5743_v46 }
0x3e05   :  { %v5774_v51 = vsel %vm533_vm9, %v5745_v39, %v5773_v33 }
0x3e06   :  { %v5775_v29 = vsel %vm535_vm10, %v5752_v31, %v5774_v51  ;;  %v7299_v31 = vld [vmem:[%s10672_s1 + $0x30] sm:$0xff] }
0x3e07   :  { %7294 = vmatmul.mubr.msk.f32.vlgmr.msra.gmra.mrb[28].mxu0 %vm81_vm3, %v5775_v29 }
0x3e08   :  { %6052 = vmatprep.mubr.f32.mxu0 %v10780_v22 }
0x3eda   :  { %v5844_v4 = vpop.f32.mrb[28].mxu0 }
0x3edb   :  { %v5866_v43 = vadd.f32 %v5844_v4, %v10090_v55  ;;  %v5846_v40 = vpop.f32.mrb[29].mxu0 }
0x3edc   :  { %v5849_v12 = vadd.f32 %v5846_v40, %v10095_v5 }
0x3edd   :  { %v5867_v34 = vadd.f32 %v5866_v43, %v10068_v60 }
0x3ede   :  { %v10227_v38 = vadd.f32 %v10028_v13, %v5849_v12 }
0x3ee0   :  { %v5851_v21 = vmul.f32 0.5, %v10227_v38 }
0x3ee2   :  { %v5852_v47 = vmul.f32 1.442695, %v5851_v21 }
0x3ee4   :  { %8090 = vpow2.f32 %v5852_v47 }
0x3eee   :  { %v8091_v10 = vpop.eup %8090 }
0x3eef   :  { %v5860_v27 = vmul.f32 %v8091_v10, %v5858_v2 }
0x3ef1   :  { %5862 = vrot.lane.b32.xlu1 %v5860_v27, %s8245_s24 }
0x3f63   :  { %v5863_v56 = vpop.permute.xlu1 %5862 }
0x3f64   :  { %v5865_v55 = vadd.f32 %v5863_v56, %v10227_v38 }
0x3f66   :  { %7387 = vmatmul.mubr.msk.f32.vlgmr.msra.gmra.mrb[28].mxu1 %vm965_vm13, %v5865_v55  ;;  %v6089_v55 = vld [vmem:[%s10673_s6 + $0x8] sm:$0xff] }
0x3f67   :  { %6173 = vmatprep.mubr.f32.mxu1 %v10780_v22 }
0x4039   :  { %v5939_v60 = vpop.f32.mrb[28].mxu1 }
0x403a   :  { %v5943_v5 = vadd.f32 %v5939_v60, %v5867_v34  ;;  %v7388_v13 = vpop.f32.mrb[29].mxu1  ;;  %v6093_v60 = vld [vmem:[%s10673_s6 + $0x28] sm:$0xff] }
0x403b   :  { %v7643_v13 = vpack.c.bf16 %v6093_v60, %v6089_v55  ;;  %v8218_v60 = vld [vmem:[%s10674_s2] sm:$0xff] }
0x403c   :  { %v5944_v18 = vadd.f32 %v10045_v9, %v5943_v5  ;;  %v6091_v5 = vld [vmem:[%s10673_s6 + $0x18] sm:$0xff] }
0x403d   :  { %7644 = vmatprep.subr.bf16.mxu1 %v7643_v13 }
0x403e   :  { %v7297_v49 = vmul.f32 -1.442695, %v5944_v18 }
0x4040   :  { %8092 = vpow2.f32 %v7297_v49  ;;  %v6092_v49 = vld [vmem:[%s10673_s6 + $0x20] sm:$0xff] }
0x4041   :  { %8094 = vtanh.f32 %v5944_v18  ;;  %v6088_v18 = vld [vmem:[%s10673_s6] sm:$0xff] }
0x404a   :  { %v8093_v1 = vpop.eup %8092 }
0x404b   :  { %v5949_v62 = vadd.f32 1.0, %v8093_v1  ;;  %v8095_v54 = vpop.eup %8094 }
0x404d   :  { %8096 = vrcp.f32 %v5949_v62  ;;  %v7645_v62 = vpack.c.bf16 %v6092_v49, %v6088_v18  ;;  %v8219_v18 = vld [vmem:[%s10674_s2 + $0x8] sm:$0xff] }
0x404f   :  { %7646 = vmatpush1.bf16.msra.mxu1 %v7645_v62  ;;  %v8221_v62 = vld [vmem:[%s10674_s2 + $0x20] sm:$0xff] }
0x4057   :  { %v8097_v63 = vpop.eup %8096 }
0x4058   :  { %v5952_v35 = vsel %vm8382_vm2, %v8095_v54, %v8097_v63  ;;  %v6090_v54 = vld [vmem:[%s10673_s6 + $0x10] sm:$0xff] }
0x4059   :  { %5955 = vrot.lane.b32.xlu1 %v5952_v35, %s8238_s21  ;;  %v5953_v50 = vmul.f32 %v5952_v35, %v10053_v15  ;;  %v5980_v15 = vld [vmem:[%s10671_s5 + $0x10] sm:$0xff] }
0x405a   :  { %v7637_v46 = vpack.c.bf16 %v5980_v15, %v5978_v19  ;;  %v6094_v63 = vld [vmem:[%s10673_s6 + $0x30] sm:$0xff]  ;;  %v6096_v19 = vld [vmem:[%s10673_s6 + $0x40] sm:$0xff] }
0x405b   :  { %v6098_v15 = vld [vmem:[%s10673_s6 + $0x50] sm:$0xff]  ;;  %v7649_v37 = vpack.c.bf16 %v6100_v20, %v6096_v19 }
0x405c   :  { %7638 = vmatpush1.bf16.msra.mxu0 %v7637_v46  ;;  %v7657_v46 = vpack.c.bf16 %v6102_v45, %v6098_v15  ;;  %v8225_v15 = vld [vmem:[%s10674_s2 + $0x38] sm:$0xff]  ;;  %v8226_v45 = vld [vmem:[%s10675_s9] ss:$0 sm:$0xff] }
0x405d   :  { %7640 = vmatprep.subr.bf16.mxu0 %v7639_v14 }
0x4060   :  { %7642 = vmatpush1.bf16.msra.mxu0 %v7641_v25 }
0x40cb   :  { %v5956_v3 = vpop.permute.xlu1 %5955 }
0x40cc   :  { %v5958_v36 = vmul.f32 %v5956_v3, %v5952_v35  ;;  %v7653_v3 = vpack.c.bf16 %v6094_v63, %v6090_v54 }
0x40ce   :  { %5960 = vrot.lane.b32.xlu1 %v5958_v36, %s8239_s22  ;;  %v6101_v36 = vld [vmem:[%s10673_s6 + $0x68] sm:$0xff] }
0x4140   :  { %v5961_v9 = vpop.permute.xlu1 %5960 }
0x4141   :  { %v10240_v41 = vadd.f32 %v5961_v9, %v5953_v50  ;;  %v6099_v50 = vld [vmem:[%s10673_s6 + $0x58] sm:$0xff] }
0x4142   :  { %v6103_v9 = vld [vmem:[%s10673_s6 + $0x78] sm:$0xff] }
0x4143   :  { %8098 = vtanh.f32 %v10240_v41  ;;  %v7655_v42 = vpack.c.bf16 %v6103_v9, %v6099_v50  ;;  %v8223_v50 = vld [vmem:[%s10674_s2 + $0x30] sm:$0xff] }
0x414d   :  { %v8099_v61 = vpop.eup %8098 }
0x414e   :  { %5966 = vrot.lane.b32.xlu1 %v8099_v61, %s8238_s21 }
0x41c0   :  { %v5967_v53 = vpop.permute.xlu1 %5966 }
0x41c1   :  { %v5969_v17 = vmul.f32 %v5967_v53, %v5952_v35  ;;  %v6097_v35 = vld [vmem:[%s10673_s6 + $0x48] sm:$0xff] }
0x41c2   :  { %v7647_v52 = vpack.c.bf16 %v6101_v36, %v6097_v35 }
0x41c3   :  { %5971 = vrot.lane.b32.xlu1 %v5969_v17, %s8239_s22 }
0x41c4   :  { %7648 = vmatprep.subr.bf16.mxu1 %v7647_v52 }
0x41c5   :  { %7650 = vmatpush1.bf16.msra.mxu1 %v7649_v37 }
0x4235   :  { %v5972_v39 = vpop.permute.xlu1 %5971 }
0x4236   :  { %5975 = vst.msk [vmem:[#allocation2 + $0x28] sm:$0xff] %vm81_vm3, %v5972_v39  ;;  %7298 = vmatmul.mubr.msk.f32.vlgmr.msra.gmra.mrb[30].mxu0 %vm81_vm3, %v5972_v39 }
0x4237   :  { %6243 = vmatprep.mubr.f32.mxu0 %v10780_v22 }
0x4309   :  { %v6054_v33 = vpop.f32.mrb[30].mxu0 }
0x430a   :  { %v6061_v51 = vadd.f32 %v7299_v31, %v6054_v33  ;;  %v10275_v29 = vpop.f32.mrb[31].mxu0 }
0x430c   :  { %v6062_v4 = vadd.f32 %v6061_v51, %v10093_v16 }
0x430e   :  { %v7300_v43 = vmul.f32 -1.442695, %v6062_v4 }
0x4310   :  { %8100 = vpow2.f32 %v7300_v43 }
0x4311   :  { %8102 = vtanh.f32 %v6062_v4 }
0x431a   :  { %v8101_v40 = vpop.eup %8100 }
0x431b   :  { %v6067_v12 = vadd.f32 1.0, %v8101_v40  ;;  %v8103_v34 = vpop.eup %8102 }
0x431d   :  { %8104 = vrcp.f32 %v6067_v12 }
0x4327   :  { %v8105_v21 = vpop.eup %8104 }
0x4328   :  { %v6070_v47 = vsel %vm8382_vm2, %v8103_v34, %v8105_v21 }
0x4329   :  { %6073 = vrot.lane.b32.xlu0 %v6070_v47, %s8238_s21  ;;  %v6071_v27 = vmul.f32 %v6070_v47, %v10076_v26  ;;  %v6095_v26 = vld [vmem:[%s10673_s6 + $0x38] sm:$0xff] }
0x432a   :  { %v7651_v1 = vpack.c.bf16 %v6095_v26, %v6091_v5 }
0x432c   :  { %7652 = vmatprep.subr.bf16.mxu0 %v7651_v1 }
0x432d   :  { %7654 = vmatpush1.bf16.msra.mxu0 %v7653_v3  ;;  %v8222_v3 = vld [vmem:[%s10674_s2 + $0x18] sm:$0xff] }
0x432e   :  { %7656 = vmatprep.subr.bf16.mxu0 %v7655_v42  ;;  %v8224_v42 = vld [vmem:[%s10674_s2 + $0x28] sm:$0xff] }
0x4331   :  { %7658 = vmatpush1.bf16.msra.mxu0 %v7657_v46 }
0x4332   :  { %7667 = vmatprep.subr.bf16.mxu0 %v10811_v8 }
0x439b   :  { %v6074_v2 = vpop.permute.xlu0 %6073 }
0x439c   :  { %v6076_v10 = vmul.f32 %v6074_v2, %v6070_v47 }
0x439e   :  { %6078 = vrot.lane.b32.xlu1 %v6076_v10, %s8239_s22 }
0x4410   :  { %v6079_v16 = vpop.permute.xlu1 %6078 }
0x4411   :  { %v6081_v56 = vadd.f32 %v6079_v16, %v6071_v27 }
0x4413   :  { %8106 = vtanh.f32 %v6081_v56 }
0x441d   :  { %v8107_v14 = vpop.eup %8106 }
0x441e   :  { %6084 = vrot.lane.b32.xlu0 %v8107_v14, %s8238_s21 }
0x4490   :  { %v6085_v58 = vpop.permute.xlu0 %6084 }
0x4491   :  { %v6087_v28 = vmul.f32 %v6085_v58, %v6070_v47 }
0x4493   :  { %6105 = vrot.lane.b32.xlu1 %v6087_v28, %s8239_s22 }
0x4505   :  { %v6106_v25 = vpop.permute.xlu1 %6105 }
0x4506   :  { %7301 = vmatmul.mubr.msk.f32.vlgmr.msra.gmra.mrb[30].mxu1 %vm81_vm3, %v6106_v25  ;;  %7302 = vmatmul.mubr.msk.f32.vlgmr.msra.gmra.mrb[32].mxu0 %vm81_vm3, %v6106_v25 }
0x4507   :  { %6821 = vmatprep.mubr.f32.mxu1 %v10780_v22  ;;  %7393 = vmatprep.mubr.msk.f32.mxu0 %vm8244_vm12, %v10780_v22 }
0x45d9   :  { %v10339_v61 = vpop.f32.mrb[30].mxu1  ;;  %v6245_v53 = vpop.f32.mrb[32].mxu0 }
0x45da   :  { %v6251_v17 = vcombine.high %v6245_v53, %v6245_v53  ;;  %v6258_v39 = vrot.slane %v6245_v53, %v8471_v0  ;;  %v6177_v31 = vpop.f32.mrb[31].mxu1  ;;  %v10342_v33 = vpop.f32.mrb[33].mxu0 }
0x45dc   :  { %v6265_v51 = vrot.slane %v6251_v17, %v8471_v0  ;;  %v6266_v4 = vcombine.high %v6258_v39, %v6258_v39  ;;  %v6274_v43 = vrot.slane %v6258_v39, %v8471_v0 }
0x45de   :  { %v6267_v40 = vcombine.high %v6265_v51, %v6265_v51  ;;  %v6281_v12 = vrot.slane %v6265_v51, %v8471_v0  ;;  %v6288_v34 = vrot.slane %v6266_v4, %v8471_v0  ;;  %v6296_v21 = vcombine.high %v6274_v43, %v6274_v43 }
0x45df   :  { %v6303_v47 = vrot.slane %v6274_v43, %v8481_v11 }
0x45e0   :  { %v6297_v2 = vcombine.high %v6281_v12, %v6281_v12  ;;  %v6298_v10 = vcombine.high %v6288_v34, %v6288_v34  ;;  %v6307_v27 = vrot.slane %v6288_v34, %v8481_v11  ;;  %v6295_v16 = vrot.slane %v6267_v40, %v8471_v0  ;;  %v8220_v0 = vld [vmem:[%s10674_s2 + $0x10] sm:$0xff] }
0x45e1   :  { %v6311_v56 = vrot.slane %v6296_v21, %v8481_v11  ;;  %v6319_v55 = vrot.slane %v6281_v12, %v8481_v11  ;;  %v6340_v5 = vadd.f32 %v8218_v60, %v6303_v47 }
0x45e2   :  { %v6315_v13 = vrot.slane %v6298_v10, %v8481_v11  ;;  %v6327_v26 = vrot.slane %v6297_v2, %v8481_v11  ;;  %v6341_v49 = vadd.f32 %v8219_v18, %v6307_v27  ;;  %v6299_v63 = vcombine.high %v6295_v16, %v6295_v16 }
0x45e3   :  { %v6342_v1 = vadd.f32 %v8220_v0, %v6311_v56  ;;  %8108 = vtanh.f32 %v6340_v5  ;;  %v6344_v54 = vadd.f32 %v8221_v62, %v6319_v55  ;;  %v6323_v35 = vrot.slane %v6295_v16, %v8481_v11 }
0x45e4   :  { %v6343_v36 = vadd.f32 %v8222_v3, %v6315_v13  ;;  %8110 = vtanh.f32 %v6341_v49  ;;  %v6346_v9 = vadd.f32 %v8223_v50, %v6327_v26  ;;  %v6331_v52 = vrot.slane %v6299_v63, %v8481_v11 }
0x45e5   :  { %8112 = vtanh.f32 %v6342_v1  ;;  %v6345_v19 = vadd.f32 %v8224_v42, %v6323_v35 }
0x45e6   :  { %8114 = vtanh.f32 %v6344_v54  ;;  %v6347_v37 = vadd.f32 %v8225_v15, %v6331_v52 }
0x45e7   :  { %8116 = vtanh.f32 %v6343_v36 }
0x45e8   :  { %8118 = vtanh.f32 %v6346_v9 }
0x45e9   :  { %8120 = vtanh.f32 %v6345_v19 }
0x45ea   :  { %8122 = vtanh.f32 %v6347_v37 }
0x45ed   :  { %v8109_v20 = vpop.eup %8108 }
0x45ee   :  { %v6356_v46 = vmul.f32 %v8226_v45, %v8109_v20  ;;  %v8111_v14 = vpop.eup %8110 }
0x45ef   :  { %v8113_v58 = vpop.eup %8112  ;;  %v6357_v28 = vmul.f32 %v8226_v45, %v8111_v14 }
0x45f0   :  { %6364 = vadd.xlane.f32.xlu0 %v6356_v46  ;;  %v8115_v25 = vpop.eup %8114  ;;  %v6358_v53 = vmul.f32 %v8226_v45, %v8113_v58 }
0x45f1   :  { %6366 = vadd.xlane.f32.xlu1 %v6357_v28  ;;  %v8117_v17 = vpop.eup %8116  ;;  %v6360_v39 = vmul.f32 %v8226_v45, %v8115_v25 }
0x45f2   :  { %v8119_v31 = vpop.eup %8118  ;;  %v6359_v51 = vmul.f32 %v8226_v45, %v8117_v17 }
0x45f3   :  { %v8121_v4 = vpop.eup %8120  ;;  %v6362_v43 = vmul.f32 %v8226_v45, %v8119_v31 }
0x45f4   :  { %6368 = vadd.xlane.f32.xlu0 %v6358_v53  ;;  %v6361_v40 = vmul.f32 %v8226_v45, %v8121_v4  ;;  %v8123_v12 = vpop.eup %8122 }
0x45f5   :  { %6372 = vadd.xlane.f32.xlu1 %v6360_v39  ;;  %v6363_v34 = vmul.f32 %v8226_v45, %v8123_v12 }
0x45f8   :  { %6370 = vadd.xlane.f32.xlu0 %v6359_v51 }
0x45f9   :  { %6376 = vadd.xlane.f32.xlu1 %v6362_v43 }
0x45fc   :  { %6374 = vadd.xlane.f32.xlu0 %v6361_v40 }
0x4600   :  { %6378 = vadd.xlane.f32.xlu0 %v6363_v34 }
0x467d   :  { %v6365_v21 = vpop.xlane.xlu0 %6364 }
0x467e   :  { %v6367_v47 = vpop.xlane.xlu1 %6366  ;;  %v6391_v27 = vrot.slane %v6365_v21, %v10782_v30 }
0x467f   :  { %v6395_v2 = vrot.slane %v6367_v47, %v10782_v30 }
0x4681   :  { %v6369_v10 = vpop.xlane.xlu0 %6368  ;;  %v6420_v56 = vsel %vm523_vm4, %v6395_v2, %v6391_v27 }
0x4682   :  { %v6399_v16 = vrot.slane %v6369_v10, %v10782_v30  ;;  %v6373_v55 = vpop.xlane.xlu1 %6372 }
0x4683   :  { %v6407_v18 = vrot.slane %v6373_v55, %v10782_v30 }
0x4684   :  { %v6421_v13 = vsel %vm525_vm5, %v6399_v16, %v6420_v56 }
0x4685   :  { %v6371_v60 = vpop.xlane.xlu0 %6370 }
0x4686   :  { %v6403_v5 = vrot.slane %v6371_v60, %v10782_v30  ;;  %v6377_v0 = vpop.xlane.xlu1 %6376 }
0x4687   :  { %v6415_v63 = vrot.slane %v6377_v0, %v10782_v30 }
0x4688   :  { %v6422_v26 = vsel %vm527_vm6, %v6403_v5, %v6421_v13 }
0x4689   :  { %v6375_v49 = vpop.xlane.xlu0 %6374  ;;  %v6423_v62 = vsel %vm529_vm7, %v6407_v18, %v6422_v26 }
0x468a   :  { %v6411_v1 = vrot.slane %v6375_v49, %v10782_v30 }
0x468c   :  { %v6424_v54 = vsel %vm531_vm8, %v6411_v1, %v6423_v62 }
0x468d   :  { %v6379_v35 = vpop.xlane.xlu0 %6378  ;;  %v6425_v36 = vsel %vm533_vm9, %v6415_v63, %v6424_v54 }
0x468e   :  { %v6419_v3 = vrot.slane %v6379_v35, %v10782_v30 }
0x4690   :  { %v6426_v50 = vsel %vm535_vm10, %v6419_v3, %v6425_v36 }
0x4691   :  { %v6428_v9 = vsel %vm538_vm11, %v6426_v50, -inf }
0x4692   :  { %6429 = vmax.xlane.f32.xlu1 %v6428_v9 }
0x471f   :  { %v6430_v52 = vpop.xlane.xlu1 %6429 }
0x4720   :  { %v6435_v42 = vrot.slane %v6430_v52, %v8481_v11  ;;  %v6439_v19 = vrot.slane %v6430_v52, %v10847_v44  ;;  %v6443_v20 = vrot.slane %v6430_v52, %v10848_v57  ;;  %v6447_v15 = vrot.slane %v6430_v52, %v10851_v7 }
0x4721   :  { %v6455_v37 = vrot.slane %v6430_v52, %v10852_v6  ;;  %v6451_v58 = vrot.slane %v6430_v52, %v10849_v59  ;;  %v6463_v17 = vrot.slane %v6430_v52, %v10853_v48  ;;  %v6459_v51 = vrot.slane %v6430_v52, %v10850_v23 }
0x4722   :  { %v6472_v45 = vsub.f32 %v6365_v21, %v6435_v42  ;;  %v6473_v46 = vsub.f32 %v6367_v47, %v6439_v19  ;;  %v6475_v14 = vsub.f32 %v6371_v60, %v6447_v15  ;;  %v6474_v28 = vsub.f32 %v6369_v10, %v6443_v20 }
0x4723   :  { %v6477_v39 = vsub.f32 %v6375_v49, %v6455_v37  ;;  %v6476_v4 = vsub.f32 %v6373_v55, %v6451_v58  ;;  %v6479_v40 = vsub.f32 %v6379_v35, %v6463_v17  ;;  %v6478_v34 = vsub.f32 %v6377_v0, %v6459_v51 }
0x4724   :  { %v6480_v25 = vmul.f32 1.442695, %v6472_v45  ;;  %v6482_v53 = vmul.f32 1.442695, %v6473_v46  ;;  %v6486_v31 = vmul.f32 1.442695, %v6475_v14 }
0x4725   :  { %v6484_v43 = vmul.f32 1.442695, %v6474_v28  ;;  %v6490_v12 = vmul.f32 1.442695, %v6477_v39  ;;  %v6488_v21 = vmul.f32 1.442695, %v6476_v4 }
0x4726   :  { %8124 = vpow2.f32 %v6480_v25  ;;  %v6494_v47 = vmul.f32 1.442695, %v6479_v40  ;;  %v6492_v2 = vmul.f32 1.442695, %v6478_v34 }
0x4727   :  { %8126 = vpow2.f32 %v6482_v53 }
0x4728   :  { %8128 = vpow2.f32 %v6486_v31 }
0x4729   :  { %8130 = vpow2.f32 %v6484_v43 }
0x472a   :  { %8132 = vpow2.f32 %v6490_v12 }
0x472b   :  { %8134 = vpow2.f32 %v6488_v21 }
0x472c   :  { %8136 = vpow2.f32 %v6494_v47 }
0x472d   :  { %8138 = vpow2.f32 %v6492_v2 }
0x4730   :  { %v8125_v10 = vpop.eup %8124 }
0x4731   :  { %v8127_v27 = vpop.eup %8126  ;;  %6505 = vperm.xlu0 %7695, %v8125_v10  }
0x4732   :  { %6508 = vperm.xlu1 %7696, %v8127_v27   ;;  %v10408_v16 = vpop.eup %8128 }
0x4733   :  { %v8131_v56 = vpop.eup %8130 }
0x4734   :  { %v10411_v55 = vpop.eup %8132 }
0x4735   :  { %6514 = vperm.xlu0 %7695, %v10408_v16   ;;  %v8135_v60 = vpop.eup %8134 }
0x4736   :  { %6511 = vperm.xlu1 %7696, %v8131_v56   ;;  %v10414_v5 = vpop.eup %8136 }
0x4737   :  { %v10416_v13 = vpop.eup %8138 }
0x4739   :  { %6520 = vperm.xlu0 %7695, %v10411_v55  }
0x473a   :  { %6517 = vperm.xlu1 %7696, %v8135_v60  }
0x473d   :  { %6526 = vperm.xlu0 %7695, %v10414_v5  }
0x473e   :  { %6523 = vperm.xlu1 %7696, %v10416_v13  }
0x47b0   :  { %v6506_v26 = vpop.permute.xlu0 %6505 }
0x47b1   :  { %v6509_v18 = vpop.permute.xlu1 %6508  ;;  %v6531_v0 = vrot.slane %v6506_v26, %v10782_v30 }
0x47b2   :  { %v6535_v49 = vrot.slane %v6509_v18, %v10782_v30  ;;  %v6739_v18 = vld [vmem:[%s10676_s7 + $0x38] sm:$0xff] }
0x47b4   :  { %v6515_v1 = vpop.permute.xlu0 %6514  ;;  %v6560_v63 = vsel %vm523_vm4, %v6535_v49, %v6531_v0  ;;  %v6736_v49 = vld [vmem:[%s10676_s7 + $0x20] sm:$0xff] }
0x47b5   :  { %v6512_v62 = vpop.permute.xlu1 %6511  ;;  %v6543_v35 = vrot.slane %v6515_v1, %v10782_v30  ;;  %v6738_v1 = vld [vmem:[%s10676_s7 + $0x30] sm:$0xff] }
0x47b6   :  { %v6539_v54 = vrot.slane %v6512_v62, %v10782_v30  ;;  %v7665_v62 = vpack.c.bf16 %v6738_v1, %v6736_v49 }
0x47b8   :  { %v6561_v3 = vsel %vm525_vm5, %v6539_v54, %v6560_v63  ;;  %v6521_v36 = vpop.permute.xlu0 %6520  ;;  %v7304_v54 = vld [vmem:[%s10677_s3 + $0x30] sm:$0xff] }
0x47b9   :  { %v6518_v50 = vpop.permute.xlu1 %6517  ;;  %v6562_v52 = vsel %vm527_vm6, %v6543_v35, %v6561_v3  ;;  %v6551_v42 = vrot.slane %v6521_v36, %v10782_v30  ;;  %v8227_v3 = vld [vmem:[%s10678_s0 + $0x8] sm:$0xff] }
0x47ba   :  { %v6547_v9 = vrot.slane %v6518_v50, %v10782_v30 }
0x47bc   :  { %v6563_v19 = vsel %vm529_vm7, %v6547_v9, %v6562_v52  ;;  %v6527_v20 = vpop.permute.xlu0 %6526  ;;  %v8228_v9 = vld [vmem:[%s10678_s0] sm:$0xff] }
0x47bd   :  { %v6524_v15 = vpop.permute.xlu1 %6523  ;;  %v6559_v37 = vrot.slane %v6527_v20, %v10782_v30  ;;  %v6564_v46 = vsel %vm531_vm8, %v6551_v42, %v6563_v19  ;;  %v8229_v42 = vld [vmem:[%s10678_s0 + $0x10] sm:$0xff] }
0x47be   :  { %v6555_v45 = vrot.slane %v6524_v15, %v10782_v30 }
0x47c0   :  { %v6565_v14 = vsel %vm533_vm9, %v6555_v45, %v6564_v46  ;;  %v8230_v46 = vld [vmem:[%s10678_s0 + $0x18] sm:$0xff] }
0x47c1   :  { %v6566_v58 = vsel %vm535_vm10, %v6559_v37, %v6565_v14 }
0x47c2   :  { %v6568_v28 = vsel %vm538_vm11, %v6566_v58, 0.0 }
0x47c3   :  { %6569 = vadd.xlane.f32.xlu1 %v6568_v28 }
0x4850   :  { %v6570_v25 = vpop.xlane.xlu1 %6569 }
0x4851   :  { %v6575_v53 = vrot.slane %v6570_v25, %v8481_v11  ;;  %v6579_v17 = vrot.slane %v6570_v25, %v10847_v44  ;;  %v6583_v39 = vrot.slane %v6570_v25, %v10848_v57  ;;  %v6587_v30 = vrot.slane %v6570_v25, %v10851_v7 }
0x4852   :  { %v6591_v51 = vrot.slane %v6570_v25, %v10849_v59  ;;  %v6595_v40 = vrot.slane %v6570_v25, %v10852_v6  ;;  %v6599_v44 = vrot.slane %v6570_v25, %v10850_v23  ;;  %v6603_v7 = vrot.slane %v6570_v25, %v10853_v48  ;;  %v6733_v48 = vld [vmem:[%s10676_s7 + $0x8] sm:$0xff] }
0x4853   :  { %8140 = vrcp.f32 %v6575_v53 }
0x4854   :  { %8142 = vrcp.f32 %v6579_v17 }
0x4855   :  { %8144 = vrcp.f32 %v6583_v39 }
0x4856   :  { %8146 = vrcp.f32 %v6587_v30  ;;  %v8231_v30 = vld [vmem:[%s10678_s0 + $0x20] sm:$0xff] }
0x4857   :  { %8148 = vrcp.f32 %v6591_v51 }
0x4858   :  { %8150 = vrcp.f32 %v6595_v40 }
0x4859   :  { %8152 = vrcp.f32 %v6599_v44 }
0x485a   :  { %8154 = vrcp.f32 %v6603_v7 }
0x485d   :  { %v8141_v31 = vpop.eup %8140 }
0x485e   :  { %v6613_v4 = vmul.f32 %v8141_v31, %v8125_v10  ;;  %v8143_v43 = vpop.eup %8142 }
0x485f   :  { %v6615_v11 = vmul.f32 %v8143_v43, %v8127_v27  ;;  %v8145_v12 = vpop.eup %8144 }
0x4860   :  { %6630 = vperm.xlu0 %7695, %v6613_v4   ;;  %v6617_v57 = vmul.f32 %v8145_v12, %v8131_v56  ;;  %v8147_v34 = vpop.eup %8146 }
0x4861   :  { %v6619_v59 = vmul.f32 %v8147_v34, %v10408_v16  ;;  %v8149_v21 = vpop.eup %8148  ;;  %v6735_v16 = vld [vmem:[%s10676_s7 + $0x18] sm:$0xff] }
0x4862   :  { %v6621_v47 = vmul.f32 %v8149_v21, %v8135_v60  ;;  %v8151_v2 = vpop.eup %8150  ;;  %v7659_v60 = vpack.c.bf16 %v6735_v16, %v6733_v48 }
0x4863   :  { %v6623_v6 = vmul.f32 %v8151_v2, %v10411_v55  ;;  %v8153_v10 = vpop.eup %8152  ;;  %v6732_v55 = vld [vmem:[%s10676_s7] sm:$0xff] }
0x4864   :  { %6635 = vperm.xlu0 %7695, %v6615_v11   ;;  %v6625_v23 = vmul.f32 %v8153_v10, %v10416_v13  ;;  %v8155_v27 = vpop.eup %8154  ;;  %v6734_v13 = vld [vmem:[%s10676_s7 + $0x10] sm:$0xff]  ;;  %7660 = vmatprep.subr.bf16.mxu1 %v7659_v60 }
0x4865   :  { %v6627_v56 = vmul.f32 %v8155_v27, %v10414_v5  ;;  %v7661_v26 = vpack.c.bf16 %v6734_v13, %v6732_v55  ;;  %v6737_v5 = vld [vmem:[%s10676_s7 + $0x28] sm:$0xff] }
0x4866   :  { %v7663_v0 = vpack.c.bf16 %v6739_v18, %v6737_v5 }
0x4867   :  { %7662 = vmatpush1.bf16.msra.mxu1 %v7661_v26 }
0x4868   :  { %6640 = vperm.xlu0 %7695, %v6617_v57   ;;  %7664 = vmatprep.subr.bf16.mxu1 %v7663_v0  ;;  %v8232_v57 = vld [vmem:[%s10678_s0 + $0x28] sm:$0xff] }
0x486b   :  { %7666 = vmatpush1.bf16.msra.mxu1 %v7665_v62  ;;  %v8234_v62 = vld [vmem:[%s10678_s0 + $0x38] sm:$0xff] }
0x486c   :  { %6645 = vperm.xlu0 %7695, %v6619_v59   ;;  %7676 = vmatprep.subr.bf16.mxu1 %v10811_v8 }
0x4870   :  { %6650 = vperm.xlu0 %7695, %v6621_v47  }
0x4874   :  { %6655 = vperm.xlu0 %7695, %v6623_v6  }
0x4878   :  { %6660 = vperm.xlu0 %7695, %v6625_v23  }
0x487c   :  { %6665 = vperm.xlu0 %7695, %v6627_v56   ;;  %v8233_v56 = vld [vmem:[%s10678_s0 + $0x30] sm:$0xff] }
0x4880   :  { %6836 = vrot.lane.b32.xlu0 %v7304_v54, %s8242_s26 }
0x48df   :  { %v6631_v63 = vpop.permute.xlu0 %6630 }
0x48e0   :  { %v6668_v52 = vmul.f32 %v8228_v9, %v6631_v63 }
0x48e2   :  { %v6676_v45 = vsel %vm81_vm3, %v6668_v52, 0.0 }
0x48e3   :  { %v6636_v35 = vpop.permute.xlu0 %6635  ;;  %v6677_v53 = vrot.slane %v6676_v45, 4 }
0x48e4   :  { %v6669_v36 = vmul.f32 %v8227_v3, %v6636_v35 }
0x48e5   :  { %v6678_v40 = vadd.f32 %v6677_v53, %v6676_v45 }
0x48e6   :  { %v6683_v20 = vsel %vm81_vm3, %v6669_v36, 0.0 }
0x48e7   :  { %v6641_v50 = vpop.permute.xlu0 %6640  ;;  %v6684_v58 = vrot.slane %v6683_v20, 4  ;;  %v6679_v2 = vrot.slane %v6678_v40, 2 }
0x48e8   :  { %v6670_v19 = vmul.f32 %v8229_v42, %v6641_v50 }
0x48e9   :  { %v6685_v51 = vadd.f32 %v6684_v58, %v6683_v20  ;;  %v6680_v26 = vadd.f32 %v6679_v2, %v6678_v40  ;;  %v6965_v40 = vld [vmem:[%s10682_s12 + $0x8] sm:$0xff] }
0x48ea   :  { %v6690_v15 = vsel %vm81_vm3, %v6670_v19, 0.0 }
0x48eb   :  { %v6646_v37 = vpop.permute.xlu0 %6645  ;;  %v6691_v28 = vrot.slane %v6690_v15, 4  ;;  %v6686_v7 = vrot.slane %v6685_v51, 2  ;;  %v6681_v9 = vrot.slane %v6680_v26, 1 }
0x48ec   :  { %v6671_v14 = vmul.f32 %v8230_v46, %v6646_v37 }
0x48ed   :  { %v6692_v4 = vadd.f32 %v6691_v28, %v6690_v15  ;;  %v6687_v16 = vadd.f32 %v6686_v7, %v6685_v51  ;;  %v6682_v58 = vadd.f32 %v6681_v9, %v6680_v26 }
0x48ee   :  { %v6697_v25 = vsel %vm81_vm3, %v6671_v14, 0.0 }
0x48ef   :  { %v6698_v17 = vrot.slane %v6697_v25, 4  ;;  %v6651_v39 = vpop.permute.xlu0 %6650  ;;  %v6693_v21 = vrot.slane %v6692_v4, 2  ;;  %v6688_v63 = vrot.slane %v6687_v16, 1 }
0x48f0   :  { %v6672_v31 = vmul.f32 %v8231_v30, %v6651_v39 }
0x48f1   :  { %v6699_v11 = vadd.f32 %v6698_v17, %v6697_v25  ;;  %v6694_v55 = vadd.f32 %v6693_v21, %v6692_v4  ;;  %v6689_v15 = vadd.f32 %v6688_v63, %v6687_v16  ;;  %v6966_v21 = vld [vmem:[%s10682_s12 + $0x10] sm:$0xff] }
0x48f2   :  { %v6704_v43 = vsel %vm81_vm3, %v6672_v31, 0.0 }
0x48f3   :  { %v6705_v12 = vrot.slane %v6704_v43, 4  ;;  %v6656_v44 = vpop.permute.xlu0 %6655  ;;  %v6700_v6 = vrot.slane %v6699_v11, 2  ;;  %v6695_v36 = vrot.slane %v6694_v55, 1  ;;  %v6748_v39 = vsel %vm523_vm4, %v6689_v15, %v6682_v58 }
0x48f4   :  { %v6673_v34 = vmul.f32 %v8232_v57, %v6656_v44 }
0x48f5   :  { %v6706_v59 = vadd.f32 %v6705_v12, %v6704_v43  ;;  %v6701_v5 = vadd.f32 %v6700_v6, %v6699_v11  ;;  %v6696_v14 = vadd.f32 %v6695_v36, %v6694_v55  ;;  %v6964_v43 = vld [vmem:[%s10682_s12] sm:$0xff] }
0x48f6   :  { %v6711_v47 = vsel %vm81_vm3, %v6673_v34, 0.0  ;;  %v10520_v7 = vpack.c.bf16 %v6965_v40, %v6964_v43 }
0x48f7   :  { %v6712_v10 = vrot.slane %v6711_v47, 4  ;;  %v6661_v23 = vpop.permute.xlu0 %6660  ;;  %v6707_v27 = vrot.slane %v6706_v59, 2  ;;  %v6702_v52 = vrot.slane %v6701_v5, 1  ;;  %v6749_v51 = vsel %vm525_vm5, %v6696_v14, %v6748_v39 }
0x48f8   :  { %v6674_v48 = vmul.f32 %v8233_v56, %v6661_v23  ;;  %v6961_v23 = vld [vmem:[#allocation2 + $0x20] sm:$0xff] }
0x48f9   :  { %v6713_v60 = vadd.f32 %v6712_v10, %v6711_v47  ;;  %v6708_v1 = vadd.f32 %v6707_v27, %v6706_v59  ;;  %v6703_v28 = vadd.f32 %v6702_v52, %v6701_v5  ;;  %v6967_v47 = vld [vmem:[%s10682_s12 + $0x18] sm:$0xff]  ;;  %v6962_v27 = vld [vmem:[#allocation2 + $0x28] sm:$0xff]  ;;  %v6847_v56 = vld [vmem:[%s10679_s8] sm:$0xff] }
0x48fa   :  { %v6718_v13 = vsel %vm81_vm3, %v6674_v48, 0.0  ;;  %v7674_v6 = vpack.c.bf16 %v6967_v47, %v6966_v21  ;;  %v6960_v10 = vld [vmem:[#allocation2 + $0x18] sm:$0xff]  ;;  %v6848_v48 = vld [vmem:[%s10679_s8 + $0x8] sm:$0xff] }
0x48fb   :  { %v6714_v18 = vrot.slane %v6713_v60, 2  ;;  %v6719_v49 = vrot.slane %v6718_v13, 4  ;;  %v6666_v0 = vpop.permute.xlu0 %6665  ;;  %v6709_v20 = vrot.slane %v6708_v1, 1  ;;  %v6750_v11 = vsel %vm527_vm6, %v6703_v28, %v6749_v51 }
0x48fc   :  { %v6675_v54 = vmul.f32 %v8234_v62, %v6666_v0  ;;  %v7668_v16 = vpack.c.bf16 %v6848_v48, %v6847_v56  ;;  %v10562_v0 = vld [vmem:[%s10683_s13] ss:$0 sm:$0xff] }
0x48fd   :  { %v6715_v35 = vadd.f32 %v6714_v18, %v6713_v60  ;;  %v6720_v3 = vadd.f32 %v6719_v49, %v6718_v13  ;;  %v6710_v17 = vadd.f32 %v6709_v20, %v6708_v1  ;;  %v8235_v18 = vld [vmem:[%s10680_s11] ss:$0 sm:$0xff]  ;;  %v10862_v20 = vld [vmem:[#allocation20_spill] sm:$0xff] }
0x48fe   :  { %v6725_v50 = vsel %vm81_vm3, %v6675_v54, 0.0  ;;  %7669 = vmatpush3.bf16.msra.mxu0 %v7668_v16  ;;  %v7117_v15 = vmul.f32 %v10862_v20, %v10862_v20  ;;  %v8246_v16 = vmov 1  }
0x48ff   :  { %v6721_v42 = vrot.slane %v6720_v3, 2  ;;  %v6726_v19 = vrot.slane %v6725_v50, 4  ;;  %v6716_v37 = vrot.slane %v6715_v35, 1  ;;  %v6751_v44 = vsel %vm529_vm7, %v6710_v17, %v6750_v11  ;;  %7670 = vmatprep.subr.bf16.mxu0 %v10811_v8  ;;  %v6837_v9 = vpop.permute.xlu0 %6836  ;;  %v6959_v17 = vld [vmem:[#allocation2 + $0x10] sm:$0xff]  ;;  %7697 = vset.pattern.permute.xlu0 %v8246_v16 }
0x4901   :  { %v6722_v45 = vadd.f32 %v6721_v42, %v6720_v3  ;;  %v6727_v46 = vadd.f32 %v6726_v19, %v6725_v50  ;;  %v6717_v30 = vadd.f32 %v6716_v37, %v6715_v35  ;;  %v10581_v19 = vld [vmem:[%s10685_s4] sm:$0xff]  ;;  %v10863_v37 = vld [vmem:[#allocation4_spill] sm:$0xff] }
0x4903   :  { %v6723_v25 = vrot.slane %v6722_v45, 1  ;;  %v6728_v53 = vrot.slane %v6727_v46, 2  ;;  %v6752_v34 = vsel %vm531_vm8, %v6717_v30, %v6751_v44 }
0x4905   :  { %v6729_v31 = vadd.f32 %v6728_v53, %v6727_v46  ;;  %v6724_v4 = vadd.f32 %v6723_v25, %v6722_v45  ;;  %v7118_v45 = vmul.f32 %v10863_v37, %v10863_v37  ;;  %v10864_v46 = vld [vmem:[#allocation24_spill] sm:$0xff]  ;;  %v6957_v25 = vld [vmem:[#allocation2] sm:$0xff]  ;;  %v6958_v53 = vld [vmem:[#allocation2 + $0x8] sm:$0xff] }
0x4906   :  { %v7119_v14 = vmul.f32 %v10864_v46, %v10864_v46 }
0x4907   :  { %v6730_v12 = vrot.slane %v6729_v31, 1  ;;  %v6753_v59 = vsel %vm533_vm9, %v6724_v4, %v6752_v34 }
0x4909   :  { %v6731_v57 = vadd.f32 %v6730_v12, %v6729_v31 }
0x490b   :  { %v6754_v2 = vsel %vm535_vm10, %v6731_v57, %v6753_v59 }
0x490c   :  { %7303 = vmatmul.mubr.msk.f32.vlgmr.msra.gmra.mrb[32].mxu1 %vm81_vm3, %v6754_v2 }
0x490d   :  { %7678 = vmatpush3.bf16.msra.mxu1 %v10520_v7  ;;  %7413 = vmatprep.mubr.msk.f32.mxu1 %vm8244_vm12, %v10780_v22 }
0x490e   :  { %7677 = vmatprep.subr.bf16.mxu1 %v10811_v8 }
0x4911   :  { %7679 = vmatpush3.bf16.msra.mxu1 %v7674_v6 }
0x4914   :  { %7414 = vmatmul.mubr.msk.f32.vlgmr.msra.gmra.mrb[34].mxu1 %vm81_vm3, %v6960_v10 }
0x4915   :  { %7416 = vmatprep.mubr.msk.f32.mxu1 %vm8244_vm12, %v10780_v22 }
0x4918   :  { %7417 = vmatmul.mubr.msk.f32.gmra.mrb[36].mxu1 %vm81_vm3, %v6961_v23 }
0x4919   :  { %7419 = vmatprep.mubr.msk.f32.mxu1 %vm8244_vm12, %v10780_v22 }
0x491c   :  { %7420 = vmatmul.mubr.msk.f32.gmra.mrb[38].mxu1 %vm81_vm3, %v6962_v27 }
0x491d   :  { %7422 = vmatprep.mubr.msk.f32.mxu1 %vm8244_vm12, %v10780_v22 }
0x49df   :  { %v6823_v60 = vpop.f32.mrb[32].mxu1 }
0x49e0   :  { %v6845_v55 = vadd.f32 %v6823_v60, %v10339_v61  ;;  %v6825_v13 = vpop.f32.mrb[33].mxu1 }
0x49e1   :  { %v6828_v26 = vadd.f32 %v6825_v13, %v10342_v33  ;;  %v8249_v13 = vmov 5  }
0x49e2   :  { %v6846_v5 = vadd.f32 %v6845_v55, %v10275_v29  ;;  %v8247_v55 = vmov 3  }
0x49e3   :  { %v10557_v49 = vadd.f32 %v8235_v18, %v6828_v26  ;;  %v8251_v18 = vmov 2  }
0x49e5   :  { %v6830_v1 = vmul.f32 0.5, %v10557_v49 }
0x49e7   :  { %v7077_v62 = vpop.f32.mrb[34].mxu1  ;;  %v6831_v61 = vmul.f32 1.442695, %v6830_v1  ;;  %v10865_v1 = vld [vmem:[#allocation12_spill] sm:$0xff] }
0x49e8   :  { %v7078_v54 = vadd.f32 %v10562_v0, %v7077_v62  ;;  %v7415_v33 = vpop.f32.mrb[35].mxu1  ;;  %v7120_v62 = vmul.f32 %v10865_v1, %v10865_v1 }
0x49e9   :  { %8156 = vpow2.f32 %v6831_v61  ;;  %v7121_v61 = vmul.f32 %v10031_v32, %v10031_v32  ;;  %v7123_v33 = vmul.f32 %v10557_v49, %v10557_v49 }
0x49ea   :  { %7099 = vst [vmem:[%s10684_s14 + $0x18] sm:$0xff] %v7078_v54  ;;  %v7122_v54 = vmul.f32 %v10227_v38, %v10227_v38 }
0x49eb   :  { %v7082_v29 = vpop.f32.mrb[36].mxu1 }
0x49ec   :  { %v7083_v63 = vadd.f32 %v10562_v0, %v7082_v29  ;;  %v7418_v35 = vpop.f32.mrb[37].mxu1 }
0x49ee   :  { %7100 = vst [vmem:[%s10684_s14 + $0x20] sm:$0xff] %v7083_v63 }
0x49ef   :  { %v7087_v3 = vpop.f32.mrb[38].mxu1 }
0x49f0   :  { %v7088_v36 = vadd.f32 %v10562_v0, %v7087_v3  ;;  %v7421_v50 = vpop.f32.mrb[39].mxu1 }
0x49f1   :  { %v7161_v50 = vmul.f32 1.442695, %v10863_v37 }
0x49f2   :  { %7101 = vst [vmem:[%s10684_s14 + $0x28] sm:$0xff] %v7088_v36  ;;  %v7159_v36 = vmul.f32 1.442695, %v10862_v20 }
0x49f3   :  { %v8157_v52 = vpop.eup %8156 }
0x49f4   :  { %v6839_v42 = vmul.f32 %v8157_v52, %v6837_v9  ;;  %v7163_v9 = vmul.f32 1.442695, %v10864_v46 }
0x49f6   :  { %6841 = vrot.lane.b32.xlu1 %v6839_v42, %s8245_s24  ;;  %v7165_v42 = vmul.f32 1.442695, %v10865_v1 }
0x49fa   :  { %7190 = vperm.xlu1 %7696, %v10581_v19  }
0x49fe   :  { %7131 = vrot.lane.b32.xlu1 %v7117_v15, %s8242_s26  ;;  %v7167_v15 = vmul.f32 1.442695, %v10031_v32 }
0x49ff   :  { %7699 = vset.pattern.permute.xlu1 %v8247_v55 }
0x4a02   :  { %7133 = vrot.lane.b32.xlu1 %v7118_v45, %s8242_s26 }
0x4a06   :  { %7135 = vrot.lane.b32.xlu1 %v7119_v14, %s8242_s26  ;;  %v7110_v14 = vadd.f32 1.0, %v10862_v20  ;;  %v7171_v20 = vmul.f32 1.442695, %v10557_v49 }
0x4a0a   :  { %7208 = vperm.xlu1 %7699, %v10581_v19  }
0x4a0e   :  { %7700 = vset.pattern.permute.xlu1 %v8248_v24 }
0x4a0f   :  { %7214 = vperm.xlu1 %7700, %v10581_v19  }
0x4a13   :  { %7701 = vset.pattern.permute.xlu1 %v8249_v13 }
0x4a14   :  { %7220 = vperm.xlu1 %7701, %v10581_v19  }
0x4a68   :  { %v6842_v58 = vpop.permute.xlu1 %6841 }
0x4a69   :  { %v6844_v28 = vadd.f32 %v6842_v58, %v10557_v49  ;;  %v7111_v58 = vadd.f32 1.0, %v10863_v37 }
0x4a6b   :  { %7394 = vmatmul.mubr.msk.f32.vlgmr.msra.gmra.mrb[34].mxu0 %vm965_vm13, %v6844_v28 }
0x4a6c   :  { %7672 = vmatpush3.bf16.msra.mxu0 %v10520_v7  ;;  %7404 = vmatprep.mubr.msk.f32.mxu0 %vm8244_vm12, %v10780_v22 }
0x4a6d   :  { %7673 = vmatprep.subr.bf16.mxu0 %v10811_v8  ;;  %v8236_v8 = vld [vmem:[%s10681_s10] ss:$0 sm:$0xff] }
0x4a70   :  { %7675 = vmatpush3.bf16.msra.mxu0 %v7674_v6 }
0x4a73   :  { %7405 = vmatmul.mubr.msk.f32.vlgmr.msra.gmra.mrb[36].mxu0 %vm81_vm3, %v6957_v25  ;;  %v7169_v25 = vmul.f32 1.442695, %v10227_v38 }
0x4a74   :  { %7407 = vmatprep.mubr.msk.f32.mxu0 %vm8244_vm12, %v10780_v22 }
0x4a77   :  { %7408 = vmatmul.mubr.msk.f32.gmra.mrb[38].mxu0 %vm81_vm3, %v6958_v53 }
0x4a78   :  { %7410 = vmatprep.mubr.msk.f32.mxu0 %vm8244_vm12, %v10780_v22 }
0x4a79   :  { %v7191_v63 = vpop.permute.xlu1 %7190 }
0x4a7b   :  { %7411 = vmatmul.mubr.msk.f32.gmra.mrb[40].mxu0 %vm81_vm3, %v6959_v17 }
0x4a7d   :  { %v7132_v35 = vpop.permute.xlu1 %7131 }
0x4a7e   :  { %v7152_v53 = vsub.f32 %v7110_v14, %v7132_v35 }
0x4a81   :  { %v7134_v52 = vpop.permute.xlu1 %7133 }
0x4a82   :  { %v7153_v17 = vsub.f32 %v7111_v58, %v7134_v52 }
0x4a85   :  { %v7136_v45 = vpop.permute.xlu1 %7135 }
0x4b3e   :  { %v6918_v39 = vpop.f32.mrb[34].mxu0 }
0x4b3f   :  { %v6922_v30 = vadd.f32 %v6918_v39, %v6846_v5  ;;  %v7395_v31 = vpop.f32.mrb[35].mxu0  ;;  %v7112_v39 = vadd.f32 1.0, %v10864_v46 }
0x4b41   :  { %v6923_v51 = vadd.f32 %v8236_v8, %v6922_v30  ;;  %v7209_v30 = vpop.permute.xlu1 %7208  ;;  %v7154_v8 = vsub.f32 %v7112_v39, %v7136_v45 }
0x4b43   :  { %v7306_v4 = vmul.f32 -1.442695, %v6923_v51 }
0x4b45   :  { %8158 = vpow2.f32 %v7306_v4 }
0x4b46   :  { %v7062_v43 = vpop.f32.mrb[36].mxu0  ;;  %8160 = vtanh.f32 %v6923_v51  ;;  %v7113_v51 = vadd.f32 1.0, %v10865_v1 }
0x4b47   :  { %v7063_v40 = vadd.f32 %v10562_v0, %v7062_v43  ;;  %v7406_v11 = vpop.f32.mrb[37].mxu0 }
0x4b49   :  { %7096 = vst [vmem:[%s10684_s14] sm:$0xff] %v7063_v40 }
0x4b4a   :  { %v7067_v22 = vpop.f32.mrb[38].mxu0 }
0x4b4b   :  { %v7068_v12 = vadd.f32 %v10562_v0, %v7067_v22  ;;  %v7409_v44 = vpop.f32.mrb[39].mxu0 }
0x4b4d   :  { %7097 = vst [vmem:[%s10684_s14 + $0x8] sm:$0xff] %v7068_v12 }
0x4b4e   :  { %v7072_v57 = vpop.f32.mrb[40].mxu0 }
0x4b4f   :  { %v8159_v34 = vpop.eup %8158  ;;  %v7073_v7 = vadd.f32 %v10562_v0, %v7072_v57  ;;  %v7412_v59 = vpop.f32.mrb[41].mxu0 }
0x4b50   :  { %v6928_v21 = vadd.f32 1.0, %v8159_v34  ;;  %v8161_v47 = vpop.eup %8160  ;;  %v7114_v34 = vadd.f32 1.0, %v10031_v32 }
0x4b51   :  { %7098 = vst [vmem:[%s10684_s14 + $0x10] sm:$0xff] %v7073_v7  ;;  %v7215_v7 = vpop.permute.xlu1 %7214 }
0x4b52   :  { %8162 = vrcp.f32 %v6928_v21 }
0x4b55   :  { %v7221_v32 = vpop.permute.xlu1 %7220 }
0x4b5c   :  { %v8163_v2 = vpop.eup %8162 }
0x4b5d   :  { %v6931_v6 = vsel %vm8382_vm2, %v8161_v47, %v8163_v2 }
0x4b5e   :  { %6934 = vrot.lane.b32.xlu0 %v6931_v6, %s8238_s21  ;;  %v6932_v27 = vmul.f32 %v6931_v6, %v10240_v41  ;;  %v8250_v41 = vmov 6  }
0x4b5f   :  { %7702 = vset.pattern.permute.xlu1 %v8250_v41 }
0x4b60   :  { %7226 = vperm.xlu1 %7702, %v10581_v19  }
0x4bd0   :  { %v6935_v10 = vpop.permute.xlu0 %6934 }
0x4bd1   :  { %v6937_v23 = vmul.f32 %v6935_v10, %v6931_v6 }
0x4bd3   :  { %6939 = vrot.lane.b32.xlu0 %v6937_v23, %s8239_s22 }
0x4c45   :  { %v6940_v56 = vpop.permute.xlu0 %6939 }
0x4c46   :  { %v6942_v48 = vadd.f32 %v6940_v56, %v6932_v27 }
0x4c48   :  { %8164 = vtanh.f32 %v6942_v48 }
0x4c49   :  { %8166 = vpow2.f32 %v7159_v36 }
0x4c4a   :  { %8168 = vpow2.f32 %v7161_v50 }
0x4c4b   :  { %8170 = vpow2.f32 %v7163_v9 }
0x4c4c   :  { %8172 = vpow2.f32 %v7165_v42 }
0x4c4d   :  { %8174 = vpow2.f32 %v7167_v15 }
0x4c4e   :  { %8176 = vpow2.f32 %v7169_v25 }
0x4c4f   :  { %8178 = vpow2.f32 %v7171_v20 }
0x4c52   :  { %v8165_v60 = vpop.eup %8164 }
0x4c53   :  { %6945 = vrot.lane.b32.xlu0 %v8165_v60, %s8238_s21  ;;  %v8167_v31 = vpop.eup %8166 }
0x4c54   :  { %v8169_v4 = vpop.eup %8168  ;;  %v7173_v37 = vsub.f32 %v7152_v53, %v8167_v31 }
0x4c55   :  { %v8171_v40 = vpop.eup %8170  ;;  %v7174_v11 = vsub.f32 %v7153_v17, %v8169_v4 }
0x4c56   :  { %v8173_v12 = vpop.eup %8172  ;;  %v7175_v44 = vsub.f32 %v7154_v8, %v8171_v40  ;;  %v7180_v59 = vmul.f32 -0.5, %v7173_v37 }
0x4c57   :  { %v7181_v21 = vmul.f32 -0.5, %v7174_v11  ;;  %v8175_v2 = vpop.eup %8174 }
0x4c58   :  { %v7182_v23 = vmul.f32 -0.5, %v7175_v44  ;;  %v7193_v16 = vmul.f32 %v7191_v63, %v7180_v59  ;;  %v8177_v13 = vpop.eup %8176  ;;  %v7227_v63 = vpop.permute.xlu1 %7226 }
0x4cc5   :  { %v6946_v26 = vpop.permute.xlu0 %6945 }
0x4cc6   :  { %v6948_v5 = vmul.f32 %v6946_v26, %v6931_v6  ;;  %v7115_v6 = vadd.f32 1.0, %v10227_v38 }
0x4cc8   :  { %6950 = vrot.lane.b32.xlu0 %v6948_v5, %s8239_s22 }
0x4ccc   :  { %7196 = vperm.xlu0 %7697, %v10581_v19  }
0x4cd0   :  { %7698 = vset.pattern.permute.xlu0 %v8251_v18  ;;  %v7116_v18 = vadd.f32 1.0, %v10557_v49 }
0x4cd1   :  { %7202 = vperm.xlu0 %7698, %v10581_v19  }
0x4cd5   :  { %7137 = vrot.lane.b32.xlu0 %v7120_v62, %s8242_s26 }
0x4cd6   :  { %7703 = vset.pattern.permute.xlu0 %v8250_v41 }
0x4cd9   :  { %7139 = vrot.lane.b32.xlu0 %v7121_v61, %s8242_s26 }
0x4cdd   :  { %7141 = vrot.lane.b32.xlu0 %v7122_v54, %s8242_s26 }
0x4ce1   :  { %7143 = vrot.lane.b32.xlu0 %v7123_v33, %s8242_s26  ;;  %v8179_v33 = vpop.eup %8178 }
0x4d3a   :  { %v6951_v29 = vpop.permute.xlu0 %6950 }
0x4d3b   :  { %6954 = vst.msk [vmem:[#allocation2 + $0x30] sm:$0xff] %vm81_vm3, %v6951_v29 }
0x4d42   :  { %v6963_v3 = vld [vmem:[#allocation2 + $0x30] sm:$0xff] }
0x4d43   :  { %7423 = vmatmul.mubr.msk.f32.gmra.mrb[40].mxu1 %vm81_vm3, %v6963_v3 }
0x4d4b   :  { %v7197_v19 = vpop.permute.xlu0 %7196 }
0x4d4c   :  { %v7199_v10 = vmul.f32 %v7197_v19, %v7181_v21 }
0x4d4e   :  { %v7200_v41 = vadd.f32 %v7199_v10, %v7193_v16 }
0x4d50   :  { %v7203_v28 = vpop.permute.xlu0 %7202 }
0x4d51   :  { %v7205_v60 = vmul.f32 %v7203_v28, %v7182_v23 }
0x4d53   :  { %v7206_v62 = vadd.f32 %v7205_v60, %v7200_v41 }
0x4d54   :  { %v7138_v43 = vpop.permute.xlu0 %7137 }
0x4d55   :  { %v7155_v22 = vsub.f32 %v7113_v51, %v7138_v43 }
0x4d57   :  { %v7176_v57 = vsub.f32 %v7155_v22, %v8173_v12 }
0x4d58   :  { %v7140_v46 = vpop.permute.xlu0 %7139 }
0x4d59   :  { %v7156_v47 = vsub.f32 %v7114_v34, %v7140_v46  ;;  %v7183_v56 = vmul.f32 -0.5, %v7176_v57 }
0x4d5b   :  { %v7177_v27 = vsub.f32 %v7156_v47, %v8175_v2  ;;  %v7211_v26 = vmul.f32 %v7209_v30, %v7183_v56 }
0x4d5c   :  { %v7142_v48 = vpop.permute.xlu0 %7141 }
0x4d5d   :  { %v7157_v55 = vsub.f32 %v7115_v6, %v7142_v48  ;;  %v7184_v24 = vmul.f32 -0.5, %v7177_v27  ;;  %v7212_v29 = vadd.f32 %v7211_v26, %v7206_v62 }
0x4d5f   :  { %v7178_v5 = vsub.f32 %v7157_v55, %v8177_v13  ;;  %v7217_v61 = vmul.f32 %v7215_v7, %v7184_v24 }
0x4d60   :  { %v7144_v1 = vpop.permute.xlu0 %7143 }
0x4d61   :  { %v7158_v38 = vsub.f32 %v7116_v18, %v7144_v1  ;;  %v7185_v54 = vmul.f32 -0.5, %v7178_v5  ;;  %v7218_v36 = vadd.f32 %v7217_v61, %v7212_v29 }
0x4d63   :  { %v7179_v35 = vsub.f32 %v7158_v38, %v8179_v33  ;;  %v7223_v3 = vmul.f32 %v7221_v32, %v7185_v54 }
0x4d65   :  { %v7186_v50 = vmul.f32 -0.5, %v7179_v35  ;;  %v7224_v9 = vadd.f32 %v7223_v3, %v7218_v36 }
0x4d67   :  { %v7229_v52 = vmul.f32 %v7227_v63, %v7186_v50 }
0x4d69   :  { %v7230_v42 = vadd.f32 %v7229_v52, %v7224_v9 }
0x4d6b   :  { %7232 = vrot.lane.b32.xlu1 %v7230_v42, %s8245_s24 }
0x4ddd   :  { %v7233_v19 = vpop.permute.xlu1 %7232 }
0x4dde   :  { %7235 = vst.msk [vmem:[%s10686_s15] sm:$0xff] %vm965_vm13, %v7233_v19 }
0x4e16   :  { %v7092_v49 = vpop.f32.mrb[40].mxu1 }
0x4e17   :  { %v7093_v15 = vadd.f32 %v10562_v0, %v7092_v49  ;;  %v7424_v45 = vpop.f32.mrb[41].mxu1 }
0x4e19   :  { %7102 = vst [vmem:[%s10684_s14 + $0x30] sm:$0xff] %v7093_v15 }

</bundles_post_ra>
